<compile_context>
chip_gen: v6e
topology: v6e:2x2x1
jax: 0.10.0
libtpu: 0.0.40
codegen_flags: <defaults>
</compile_context>

<pallas_src>
import functools

import jax
import jax.numpy as jnp
from jax.experimental import pallas as pl
from jax.experimental.pallas import tpu as pltpu


# -----------------------------------------------------------------------------
# Kernel 1: per-point MLP (conv1..conv4 with folded eval-mode BN) computed
# channel-major, writing x_local (NCW, bf16) and a per-(batch, split) partial
# channel-max.  Grid = (n_split, B, n_tiles); the point axis is "arbitrary"
# (the xg output block is resident/accumulated across it).
# -----------------------------------------------------------------------------
def mlp_kernel(x_ref,
               w1_ref, b1_ref, w2_ref, b2_ref, w3_ref, b3_ref, w4_ref, b4_ref,
               xlocal_ref, xg_ref):
    n = pl.program_id(2)
    bf = jnp.bfloat16

    x = x_ref[0]                       # (Cin, TN) f32
    w1 = w1_ref[...]                   # (128, Cin) f32
    cin = x.shape[0]

    # conv1 + bn1: K = Cin (tiny) contraction done as VPU broadcast FMAs
    # instead of a nearly-empty MXU pass.
    h = b1_ref[...] + w1[:, 0:1] * x[0:1, :]
    for c in range(1, cin):
        h = h + w1[:, c:c + 1] * x[c:c + 1, :]
    h = jnp.maximum(h, 0.0)            # (128, TN)

    # conv2..conv4 (+ folded BN, relu except the last) channel-major on the
    # bf16 MXU with f32 accumulation: W (Cout, Cin) @ h (Cin, TN).
    h = jnp.maximum(
        jnp.dot(w2_ref[...], h.astype(bf),
                preferred_element_type=jnp.float32) + b2_ref[...], 0.0)
    h = jnp.maximum(
        jnp.dot(w3_ref[...], h.astype(bf),
                preferred_element_type=jnp.float32) + b3_ref[...], 0.0)
    h4 = (jnp.dot(w4_ref[...], h.astype(bf),
                  preferred_element_type=jnp.float32)
          + b4_ref[...])               # (512, TN) f32

    # Already NCW: straight (lane-dense) store, no transpose, bf16 output.
    xlocal_ref[0] = h4.astype(xlocal_ref.dtype)

    # Running per-channel max over this (b, s) slice of points.  The output
    # block index is constant along the n axis, so it stays VMEM-resident.
    @pl.when(n == 0)
    def _():
        xg_ref[...] = jnp.full(xg_ref.shape, -jnp.inf, dtype=xg_ref.dtype)

    xg_ref[0, 0] = jnp.maximum(xg_ref[0, 0],
                               jnp.max(h4, axis=1, keepdims=True))


# -----------------------------------------------------------------------------
# Kernel 2 (trivially cheap epilogue): final max over the split partials and
# the two FC heads.  Grid = (B,).
# -----------------------------------------------------------------------------
def heads_kernel(xgp_ref,
                 wm1_ref, bm1_ref, wm2_ref, bm2_ref, wm3_ref, bm3_ref,
                 wv1_ref, bv1_ref, wv2_ref, bv2_ref, wv3_ref, bv3_ref,
                 m_ref, v_ref):
    bf = jnp.bfloat16
    xg = jnp.max(xgp_ref[0], axis=0, keepdims=True)      # (1, 512) f32
    xg = xg.astype(bf)

    def head(wa, ba, wb, bb, wc, bc):
        t = jnp.maximum(
            jnp.dot(xg, wa[...],
                    preferred_element_type=jnp.float32) + ba[...], 0.0)
        t = jnp.maximum(
            jnp.dot(t.astype(bf), wb[...],
                    preferred_element_type=jnp.float32) + bb[...], 0.0)
        return jnp.dot(t.astype(bf), wc[...],
                       preferred_element_type=jnp.float32) + bc[...]

    m_ref[0] = head(wm1_ref, bm1_ref, wm2_ref, bm2_ref, wm3_ref, bm3_ref)
    v_ref[0] = head(wv1_ref, bv1_ref, wv2_ref, bv2_ref, wv3_ref, bv3_ref)


def _heads_call(xgp, m_params, v_params, zdim):
    """xgp: (B, n_split, 512) f32 partial maxima.  Returns (m, v)."""
    B, n_split, C = xgp.shape
    bf = jnp.bfloat16
    (wm1, bm1), (wm2, bm2), (wm3, bm3) = m_params
    (wv1, bv1), (wv2, bv2), (wv3, bv3) = v_params
    wm1, wm2, wm3 = wm1.astype(bf), wm2.astype(bf), wm3.astype(bf)
    wv1, wv2, wv3 = wv1.astype(bf), wv2.astype(bf), wv3.astype(bf)

    operands = (xgp,
                wm1, bm1, wm2, bm2, wm3, bm3,
                wv1, bv1, wv2, bv2, wv3, bv3)

    def const_spec(a):
        return pl.BlockSpec(a.shape, lambda b: (0,) * a.ndim)

    grid_spec = pltpu.PrefetchScalarGridSpec(
        num_scalar_prefetch=0,
        grid=(B,),
        in_specs=[pl.BlockSpec((1, n_split, C), lambda b: (b, 0, 0))]
                 + [const_spec(a) for a in operands[1:]],
        out_specs=[pl.BlockSpec((1, 1, zdim), lambda b: (b, 0, 0)),
                   pl.BlockSpec((1, 1, zdim), lambda b: (b, 0, 0))],
    )

    m, v = pl.pallas_call(
        heads_kernel,
        grid_spec=grid_spec,
        out_shape=(jax.ShapeDtypeStruct((B, 1, zdim), jnp.float32),
                   jax.ShapeDtypeStruct((B, 1, zdim), jnp.float32)),
        compiler_params=pltpu.CompilerParams(
            dimension_semantics=("parallel",)),
    )(*operands)
    return m.reshape(B, zdim), v.reshape(B, zdim)


def encoder_forward(x, conv_params, m_params, v_params, zdim, *,
                    tn=1024, n_split=2, xlocal_dtype=jnp.bfloat16):
    """x: (B, N, input_dim) f32.  Returns (m, v, x_local) with x_local NCW."""
    B, N, Cin = x.shape

    if N % n_split != 0:
        n_split = 1                       # fall back: no point-axis split
    tn = min(tn, N // n_split)
    assert (N // n_split) % tn == 0, "N / n_split must be a multiple of tn"
    assert tn % 128 == 0 or tn == N // n_split, "tn should be lane-aligned"
    n_tiles = (N // n_split) // tn

    (w1, b1), (w2, b2), (w3, b3), (w4, b4) = conv_params
    bf = jnp.bfloat16
    w2b, w3b, w4b = w2.astype(bf), w3.astype(bf), w4.astype(bf)

    # NCW input (this is exactly the module's x.transpose(1, 2)); gives a
    # lane-dense (Cin, tn) block and contiguous row DMAs.
    x_ncw = jnp.transpose(x, (0, 2, 1))            # (B, Cin, N)

    operands = (x_ncw, w1, b1, w2b, b2, w3b, b3, w4b, b4)

    def const_spec(a):
        return pl.BlockSpec(a.shape, lambda s, b, n: (0,) * a.ndim)

    grid_spec = pltpu.PrefetchScalarGridSpec(
        num_scalar_prefetch=0,
        grid=(n_split, B, n_tiles),
        in_specs=[pl.BlockSpec((1, Cin, tn),
                               lambda s, b, n: (b, 0, s * n_tiles + n))]
                 + [const_spec(a) for a in operands[1:]],
        out_specs=[
            # x_local in NCW, lane-dense tn-wide tiles.
            pl.BlockSpec((1, 512, tn),
                         lambda s, b, n: (b, 0, s * n_tiles + n)),
            # per-(b, s) partial channel max (resident across the n axis).
            pl.BlockSpec((1, 1, 512, 1), lambda s, b, n: (b, s, 0, 0)),
        ],
    )

    x_local, xg_partial = pl.pallas_call(
        mlp_kernel,
        grid_spec=grid_spec,
        out_shape=(
            jax.ShapeDtypeStruct((B, 512, N), xlocal_dtype),
            jax.ShapeDtypeStruct((B, n_split, 512, 1), jnp.float32),
        ),
        compiler_params=pltpu.CompilerParams(
            dimension_semantics=("parallel", "parallel", "arbitrary"),
            # <= 48 MiB: valid on v7x (64 MiB physical); headroom for larger
            # tn on the 128 MiB parts.
            vmem_limit_bytes=48 * 1024 * 1024,
        ),
    )(*operands)

    m, v = _heads_call(xg_partial.reshape(B, n_split, 512),
                       m_params, v_params, zdim)
    return m, v, x_local


# -----------------------------------------------------------------------------
# Parameter construction (deterministic) + eval-mode BN folding.
# Conv weights are channel-major (Cout, Cin) -- PyTorch Conv1d's native layout;
# head weights are (in, out) with (1, out) biases.
# -----------------------------------------------------------------------------
EPS = 1e-5  # PyTorch BatchNorm default


def _make_bn(key, c):
    k1, k2, k3, k4 = jax.random.split(key, 4)
    gamma = 1.0 + 0.05 * jax.random.normal(k1, (c,), jnp.float32)
    beta = 0.05 * jax.random.normal(k2, (c,), jnp.float32)
    rm = 0.05 * jax.random.normal(k3, (c,), jnp.float32)
    rv = 1.0 + 0.1 * jnp.abs(jax.random.normal(k4, (c,), jnp.float32))
    return gamma, beta, rm, rv


def _make_linear_cm(key, cin, cout, scale=0.05):     # channel-major: W @ x
    kw, kb = jax.random.split(key)
    w = scale * jax.random.normal(kw, (cout, cin), jnp.float32)
    b = scale * jax.random.normal(kb, (cout,), jnp.float32)
    return w, b


def _make_linear_rm(key, cin, cout, scale=0.05):     # row-major: x @ W
    kw, kb = jax.random.split(key)
    w = scale * jax.random.normal(kw, (cin, cout), jnp.float32)
    b = scale * jax.random.normal(kb, (cout,), jnp.float32)
    return w, b


def fold_bn_cm(linear, bn):
    w, b = linear
    gamma, beta, rm, rv = bn
    s = gamma / jnp.sqrt(rv + EPS)
    return w * s[:, None], ((b - rm) * s + beta).reshape(-1, 1)


def fold_bn_rm(linear, bn):
    w, b = linear
    gamma, beta, rm, rv = bn
    s = gamma / jnp.sqrt(rv + EPS)
    return w * s[None, :], ((b - rm) * s + beta).reshape(1, -1)


def build_params(key, input_dim, zdim):
    keys = jax.random.split(key, 18)
    conv_dims = [(input_dim, 128), (128, 128), (128, 256), (256, 512)]
    conv = []
    for i, (ci, co) in enumerate(conv_dims):
        conv.append(fold_bn_cm(_make_linear_cm(keys[i], ci, co),
                               _make_bn(keys[4 + i], co)))
    m1 = fold_bn_rm(_make_linear_rm(keys[8], 512, 256), _make_bn(keys[9], 256))
    m2 = fold_bn_rm(_make_linear_rm(keys[10], 256, 128), _make_bn(keys[11], 128))
    w3m, b3m = _make_linear_rm(keys[12], 128, zdim)
    m3 = (w3m, b3m.reshape(1, -1))
    v1 = fold_bn_rm(_make_linear_rm(keys[13], 512, 256), _make_bn(keys[14], 256))
    v2 = fold_bn_rm(_make_linear_rm(keys[15], 256, 128), _make_bn(keys[16], 128))
    w3v, b3v = _make_linear_rm(keys[17], 128, zdim)
    v3 = (w3v, b3v.reshape(1, -1))
    return conv, (m1, m2, m3), (v1, v2, v3)


# -----------------------------------------------------------------------------
# Pure-JAX reference (mirrors kernel numerics: exact f32 layer 1, bf16 MXU
# with f32 accumulation for everything else).
# -----------------------------------------------------------------------------
def encoder_ref(x, conv_params, m_params, v_params):
    (w1, b1), (w2, b2), (w3, b3), (w4, b4) = conv_params
    bf = jnp.bfloat16

    def mm_cm(a, w):     # a: (..., Cin), w: (Cout, Cin)
        return jnp.dot(a.astype(bf), w.T.astype(bf),
                       preferred_element_type=jnp.float32)

    def mm_rm(a, w):     # a: (..., Cin), w: (Cin, Cout)
        return jnp.dot(a.astype(bf), w.astype(bf),
                       preferred_element_type=jnp.float32)

    # layer 1 (K = input_dim) in exact f32, matching the kernel's VPU path.
    h = jnp.sum(x[..., :, None] * w1.T[None, None, :, :], axis=2) + b1[:, 0]
    h = jnp.maximum(h, 0.0)
    h = jnp.maximum(mm_cm(h, w2) + b2[:, 0], 0.0)
    h = jnp.maximum(mm_cm(h, w3) + b3[:, 0], 0.0)
    x_local = mm_cm(h, w4) + b4[:, 0]             # (B, N, 512) f32
    xg = jnp.max(x_local, axis=1)                 # (B, 512)

    def head(params):
        (wa, ba), (wb, bb), (wc, bc) = params
        t = jnp.maximum(mm_rm(xg, wa) + ba, 0.0)
        t = jnp.maximum(mm_rm(t, wb) + bb, 0.0)
        return mm_rm(t, wc) + bc

    return head(m_params), head(v_params), jnp.transpose(x_local, (0, 2, 1))


if __name__ == "__main__":
    B, N, INPUT_DIM, ZDIM = 2, 2048, 3, 16
    key = jax.random.PRNGKey(0)
    kx, kp = jax.random.split(key)

    x = jax.random.normal(kx, (B, N, INPUT_DIM), jnp.float32)
    conv_params, m_params, v_params = build_params(kp, INPUT_DIM, ZDIM)

    # tn=512 with n_split=2 -> 2 point-tiles per (batch, split): exercises the
    # running-max accumulation as well as the split/epilogue path.
    fwd = jax.jit(functools.partial(encoder_forward, zdim=ZDIM,
                                    tn=512, n_split=2))
    m, v, x_local = fwd(x, conv_params, m_params, v_params)
    jax.block_until_ready((m, v, x_local))

    m_r, v_r, xl_r = encoder_ref(x, conv_params, m_params, v_params)
    assert m.shape == (B, ZDIM) and v.shape == (B, ZDIM)
    assert x_local.shape == (B, 512, N) and x_local.dtype == jnp.bfloat16

    assert jnp.allclose(m, m_r, atol=1e-2, rtol=1e-2), \
        float(jnp.max(jnp.abs(m - m_r)))
    assert jnp.allclose(v, v_r, atol=1e-2, rtol=1e-2), \
        float(jnp.max(jnp.abs(v - v_r)))
    assert jnp.allclose(x_local.astype(jnp.float32), xl_r,
                        atol=1e-2, rtol=1e-2), \
        float(jnp.max(jnp.abs(x_local.astype(jnp.float32) - xl_r)))

    print("KERNEL_OK")
</pallas_src>

<mosaic_0001>
module attributes {stable_mosaic.version = 11 : i64} {
  func.func @mlp_kernel(%arg0: i32, %arg1: i32, %arg2: i32, %arg3: memref<1x3x512xf32, #tpu.memory_space<vmem>>, %arg4: memref<128x3xf32, #tpu.memory_space<vmem>>, %arg5: memref<128x1xf32, #tpu.memory_space<vmem>>, %arg6: memref<128x128xbf16, #tpu.memory_space<vmem>>, %arg7: memref<128x1xf32, #tpu.memory_space<vmem>>, %arg8: memref<256x128xbf16, #tpu.memory_space<vmem>>, %arg9: memref<256x1xf32, #tpu.memory_space<vmem>>, %arg10: memref<512x256xbf16, #tpu.memory_space<vmem>>, %arg11: memref<512x1xf32, #tpu.memory_space<vmem>>, %arg12: memref<1x512x512xbf16, #tpu.memory_space<vmem>>, %arg13: memref<1x1x512x1xf32, #tpu.memory_space<vmem>>) attributes {dimension_semantics = [#tpu.dimension_semantics<parallel>, #tpu.dimension_semantics<parallel>, #tpu.dimension_semantics<arbitrary>], iteration_bounds = array<i64: 2, 2, 2>, scalar_prefetch = 0 : i64, scratch_operands = 0 : i64, tpu.core_type = #tpu.core_type<tc>, window_params = [{transform_indices = @transform_0, window_bounds = array<i64: 1, 3, 512>}, {pipeline_mode = #tpu.pipeline_mode<synchronous>, transform_indices = @transform_1, window_bounds = array<i64: 128, 3>}, {pipeline_mode = #tpu.pipeline_mode<synchronous>, transform_indices = @transform_2, window_bounds = array<i64: 128, 1>}, {pipeline_mode = #tpu.pipeline_mode<synchronous>, transform_indices = @transform_3, window_bounds = array<i64: 128, 128>}, {pipeline_mode = #tpu.pipeline_mode<synchronous>, transform_indices = @transform_4, window_bounds = array<i64: 128, 1>}, {pipeline_mode = #tpu.pipeline_mode<synchronous>, transform_indices = @transform_5, window_bounds = array<i64: 256, 128>}, {pipeline_mode = #tpu.pipeline_mode<synchronous>, transform_indices = @transform_6, window_bounds = array<i64: 256, 1>}, {pipeline_mode = #tpu.pipeline_mode<synchronous>, transform_indices = @transform_7, window_bounds = array<i64: 512, 256>}, {pipeline_mode = #tpu.pipeline_mode<synchronous>, transform_indices = @transform_8, window_bounds = array<i64: 512, 1>}, {transform_indices = @transform_9, window_bounds = array<i64: 1, 512, 512>}, {transform_indices = @transform_10, window_bounds = array<i64: 1, 1, 512, 1>}]} {
    %c0 = arith.constant 0 : index
    %c0_0 = arith.constant 0 : index
    %c0_1 = arith.constant 0 : index
    %0 = vector.load %arg3[%c0, %c0_0, %c0_1] : memref<1x3x512xf32, #tpu.memory_space<vmem>>, vector<1x3x512xf32>
    %1 = vector.shape_cast %0 : vector<1x3x512xf32> to vector<3x512xf32>
    %c0_2 = arith.constant 0 : index
    %c0_3 = arith.constant 0 : index
    %2 = vector.load %arg4[%c0_2, %c0_3] : memref<128x3xf32, #tpu.memory_space<vmem>>, vector<128x3xf32>
    %c0_4 = arith.constant 0 : index
    %c0_5 = arith.constant 0 : index
    %3 = vector.load %arg5[%c0_4, %c0_5] : memref<128x1xf32, #tpu.memory_space<vmem>>, vector<128x1xf32>
    %4 = vector.extract_strided_slice %2 {offsets = [0, 0], sizes = [128, 1], strides = [1, 1]} : vector<128x3xf32> to vector<128x1xf32>
    %5 = vector.extract_strided_slice %1 {offsets = [0, 0], sizes = [1, 512], strides = [1, 1]} : vector<3x512xf32> to vector<1x512xf32>
    %6 = vector.broadcast %4 : vector<128x1xf32> to vector<128x512xf32>
    %7 = vector.broadcast %5 : vector<1x512xf32> to vector<128x512xf32>
    %8 = arith.mulf %6, %7 : vector<128x512xf32>
    %9 = vector.broadcast %3 : vector<128x1xf32> to vector<128x512xf32>
    %10 = arith.addf %9, %8 : vector<128x512xf32>
    %11 = vector.extract_strided_slice %2 {offsets = [0, 1], sizes = [128, 1], strides = [1, 1]} : vector<128x3xf32> to vector<128x1xf32>
    %12 = vector.extract_strided_slice %1 {offsets = [1, 0], sizes = [1, 512], strides = [1, 1]} : vector<3x512xf32> to vector<1x512xf32>
    %13 = vector.broadcast %11 : vector<128x1xf32> to vector<128x512xf32>
    %14 = vector.broadcast %12 : vector<1x512xf32> to vector<128x512xf32>
    %15 = arith.mulf %13, %14 : vector<128x512xf32>
    %16 = arith.addf %10, %15 : vector<128x512xf32>
    %17 = vector.extract_strided_slice %2 {offsets = [0, 2], sizes = [128, 1], strides = [1, 1]} : vector<128x3xf32> to vector<128x1xf32>
    %18 = vector.extract_strided_slice %1 {offsets = [2, 0], sizes = [1, 512], strides = [1, 1]} : vector<3x512xf32> to vector<1x512xf32>
    %19 = vector.broadcast %17 : vector<128x1xf32> to vector<128x512xf32>
    %20 = vector.broadcast %18 : vector<1x512xf32> to vector<128x512xf32>
    %21 = arith.mulf %19, %20 : vector<128x512xf32>
    %22 = arith.addf %16, %21 : vector<128x512xf32>
    %cst = arith.constant 0.000000e+00 : f32
    %23 = vector.broadcast %cst : f32 to vector<128x512xf32>
    %24 = arith.maximumf %22, %23 : vector<128x512xf32>
    %c0_6 = arith.constant 0 : index
    %c0_7 = arith.constant 0 : index
    %25 = vector.load %arg6[%c0_6, %c0_7] : memref<128x128xbf16, #tpu.memory_space<vmem>>, vector<128x128xbf16>
    %26 = arith.truncf %24 : vector<128x512xf32> to vector<128x512xbf16>
    %cst_8 = arith.constant dense<0.000000e+00> : vector<128x512xf32>
    %27 = tpu.matmul %25, %26, %cst_8 {dimension_numbers = #tpu.dot_dimension_numbers<[1], [0], [0], [1], [0, 0, 1, 1], [], []>} : vector<128x128xbf16>, vector<128x512xbf16>, vector<128x512xf32> -> vector<128x512xf32>
    %c0_9 = arith.constant 0 : index
    %c0_10 = arith.constant 0 : index
    %28 = vector.load %arg7[%c0_9, %c0_10] : memref<128x1xf32, #tpu.memory_space<vmem>>, vector<128x1xf32>
    %29 = vector.broadcast %28 : vector<128x1xf32> to vector<128x512xf32>
    %30 = arith.addf %27, %29 : vector<128x512xf32>
    %cst_11 = arith.constant 0.000000e+00 : f32
    %31 = vector.broadcast %cst_11 : f32 to vector<128x512xf32>
    %32 = arith.maximumf %30, %31 : vector<128x512xf32>
    %c0_12 = arith.constant 0 : index
    %c0_13 = arith.constant 0 : index
    %33 = vector.load %arg8[%c0_12, %c0_13] : memref<256x128xbf16, #tpu.memory_space<vmem>>, vector<256x128xbf16>
    %34 = arith.truncf %32 : vector<128x512xf32> to vector<128x512xbf16>
    %cst_14 = arith.constant dense<0.000000e+00> : vector<256x512xf32>
    %35 = tpu.matmul %33, %34, %cst_14 {dimension_numbers = #tpu.dot_dimension_numbers<[1], [0], [0], [1], [0, 0, 1, 1], [], []>} : vector<256x128xbf16>, vector<128x512xbf16>, vector<256x512xf32> -> vector<256x512xf32>
    %c0_15 = arith.constant 0 : index
    %c0_16 = arith.constant 0 : index
    %36 = vector.load %arg9[%c0_15, %c0_16] : memref<256x1xf32, #tpu.memory_space<vmem>>, vector<256x1xf32>
    %37 = vector.broadcast %36 : vector<256x1xf32> to vector<256x512xf32>
    %38 = arith.addf %35, %37 : vector<256x512xf32>
    %cst_17 = arith.constant 0.000000e+00 : f32
    %39 = vector.broadcast %cst_17 : f32 to vector<256x512xf32>
    %40 = arith.maximumf %38, %39 : vector<256x512xf32>
    %c0_18 = arith.constant 0 : index
    %c0_19 = arith.constant 0 : index
    %41 = vector.load %arg10[%c0_18, %c0_19] : memref<512x256xbf16, #tpu.memory_space<vmem>>, vector<512x256xbf16>
    %42 = arith.truncf %40 : vector<256x512xf32> to vector<256x512xbf16>
    %cst_20 = arith.constant dense<0.000000e+00> : vector<512x512xf32>
    %43 = tpu.matmul %41, %42, %cst_20 {dimension_numbers = #tpu.dot_dimension_numbers<[1], [0], [0], [1], [0, 0, 1, 1], [], []>} : vector<512x256xbf16>, vector<256x512xbf16>, vector<512x512xf32> -> vector<512x512xf32>
    %c0_21 = arith.constant 0 : index
    %c0_22 = arith.constant 0 : index
    %44 = vector.load %arg11[%c0_21, %c0_22] : memref<512x1xf32, #tpu.memory_space<vmem>>, vector<512x1xf32>
    %45 = vector.broadcast %44 : vector<512x1xf32> to vector<512x512xf32>
    %46 = arith.addf %43, %45 : vector<512x512xf32>
    %47 = arith.truncf %46 : vector<512x512xf32> to vector<512x512xbf16>
    %c0_23 = arith.constant 0 : index
    %c0_24 = arith.constant 0 : index
    %c0_25 = arith.constant 0 : index
    %48 = vector.load %arg12[%c0_23, %c0_24, %c0_25] : memref<1x512x512xbf16, #tpu.memory_space<vmem>>, vector<1x512x512xbf16>
    %49 = vector.shape_cast %48 : vector<1x512x512xbf16> to vector<512x512xbf16>
    %50 = vector.shape_cast %47 : vector<512x512xbf16> to vector<1x512x512xbf16>
    tpu.vector_store %arg12[%c0_23, %c0_24, %c0_25], %50 {strides = array<i32>} : memref<1x512x512xbf16, #tpu.memory_space<vmem>>, vector<1x512x512xbf16>,
    %c0_i32 = arith.constant 0 : i32
    %51 = arith.cmpi eq, %arg2, %c0_i32 : i32
    %52 = arith.extui %51 : i1 to i32
    %c0_i32_26 = arith.constant 0 : i32
    %53 = arith.cmpi ne, %52, %c0_i32_26 : i32
    scf.if %53 {
      %cst_36 = arith.constant 0xFF800000 : f32
      %62 = vector.broadcast %cst_36 : f32 to vector<1x1x512x1xf32>
      %c0_37 = arith.constant 0 : index
      %c0_38 = arith.constant 0 : index
      %c0_39 = arith.constant 0 : index
      %c0_40 = arith.constant 0 : index
      %63 = vector.load %arg13[%c0_37, %c0_38, %c0_39, %c0_40] : memref<1x1x512x1xf32, #tpu.memory_space<vmem>>, vector<1x1x512x1xf32>
      tpu.vector_store %arg13[%c0_37, %c0_38, %c0_39, %c0_40], %62 {strides = array<i32>} : memref<1x1x512x1xf32, #tpu.memory_space<vmem>>, vector<1x1x512x1xf32>,
    } else {
    }
    %c0_27 = arith.constant 0 : index
    %c0_28 = arith.constant 0 : index
    %c0_29 = arith.constant 0 : index
    %c0_30 = arith.constant 0 : index
    %54 = vector.load %arg13[%c0_27, %c0_28, %c0_29, %c0_30] : memref<1x1x512x1xf32, #tpu.memory_space<vmem>>, vector<1x1x512x1xf32>
    %55 = vector.shape_cast %54 : vector<1x1x512x1xf32> to vector<512x1xf32>
    %cst_31 = arith.constant dense<0xFF800000> : vector<512xf32>
    %56 = vector.multi_reduction <maximumf>, %46, %cst_31 [1] : vector<512x512xf32> to vector<512xf32>
    %57 = vector.shape_cast %56 : vector<512xf32> to vector<512x1xf32>
    %58 = arith.maximumf %55, %57 : vector<512x1xf32>
    %c0_32 = arith.constant 0 : index
    %c0_33 = arith.constant 0 : index
    %c0_34 = arith.constant 0 : index
    %c0_35 = arith.constant 0 : index
    %59 = vector.load %arg13[%c0_32, %c0_33, %c0_34, %c0_35] : memref<1x1x512x1xf32, #tpu.memory_space<vmem>>, vector<1x1x512x1xf32>
    %60 = vector.shape_cast %59 : vector<1x1x512x1xf32> to vector<512x1xf32>
    %61 = vector.shape_cast %58 : vector<512x1xf32> to vector<1x1x512x1xf32>
    tpu.vector_store %arg13[%c0_32, %c0_33, %c0_34, %c0_35], %61 {strides = array<i32>} : memref<1x1x512x1xf32, #tpu.memory_space<vmem>>, vector<1x1x512x1xf32>,
    return
  }
  func.func @transform_0(%arg0: i32, %arg1: i32, %arg2: i32) -> (i32, i32, i32) {
    %c2_i32 = arith.constant 2 : i32
    %0 = arith.muli %arg0, %c2_i32 : i32
    %1 = arith.addi %0, %arg2 : i32
    %c0_i32 = arith.constant 0 : i32
    %c0_i32_0 = arith.constant 0 : i32
    return %arg1, %c0_i32, %1 : i32, i32, i32
  }
  func.func @transform_1(%arg0: i32, %arg1: i32, %arg2: i32) -> (i32, i32) {
    %c0_i32 = arith.constant 0 : i32
    %c0_i32_0 = arith.constant 0 : i32
    %c0_i32_1 = arith.constant 0 : i32
    return %c0_i32, %c0_i32_0 : i32, i32
  }
  func.func @transform_2(%arg0: i32, %arg1: i32, %arg2: i32) -> (i32, i32) {
    %c0_i32 = arith.constant 0 : i32
    %c0_i32_0 = arith.constant 0 : i32
    %c0_i32_1 = arith.constant 0 : i32
    return %c0_i32, %c0_i32_0 : i32, i32
  }
  func.func @transform_3(%arg0: i32, %arg1: i32, %arg2: i32) -> (i32, i32) {
    %c0_i32 = arith.constant 0 : i32
    %c0_i32_0 = arith.constant 0 : i32
    %c0_i32_1 = arith.constant 0 : i32
    return %c0_i32, %c0_i32_0 : i32, i32
  }
  func.func @transform_4(%arg0: i32, %arg1: i32, %arg2: i32) -> (i32, i32) {
    %c0_i32 = arith.constant 0 : i32
    %c0_i32_0 = arith.constant 0 : i32
    %c0_i32_1 = arith.constant 0 : i32
    return %c0_i32, %c0_i32_0 : i32, i32
  }
  func.func @transform_5(%arg0: i32, %arg1: i32, %arg2: i32) -> (i32, i32) {
    %c0_i32 = arith.constant 0 : i32
    %c0_i32_0 = arith.constant 0 : i32
    %c0_i32_1 = arith.constant 0 : i32
    return %c0_i32, %c0_i32_0 : i32, i32
  }
  func.func @transform_6(%arg0: i32, %arg1: i32, %arg2: i32) -> (i32, i32) {
    %c0_i32 = arith.constant 0 : i32
    %c0_i32_0 = arith.constant 0 : i32
    %c0_i32_1 = arith.constant 0 : i32
    return %c0_i32, %c0_i32_0 : i32, i32
  }
  func.func @transform_7(%arg0: i32, %arg1: i32, %arg2: i32) -> (i32, i32) {
    %c0_i32 = arith.constant 0 : i32
    %c0_i32_0 = arith.constant 0 : i32
    %c0_i32_1 = arith.constant 0 : i32
    return %c0_i32, %c0_i32_0 : i32, i32
  }
  func.func @transform_8(%arg0: i32, %arg1: i32, %arg2: i32) -> (i32, i32) {
    %c0_i32 = arith.constant 0 : i32
    %c0_i32_0 = arith.constant 0 : i32
    %c0_i32_1 = arith.constant 0 : i32
    return %c0_i32, %c0_i32_0 : i32, i32
  }
  func.func @transform_9(%arg0: i32, %arg1: i32, %arg2: i32) -> (i32, i32, i32) {
    %c2_i32 = arith.constant 2 : i32
    %0 = arith.muli %arg0, %c2_i32 : i32
    %1 = arith.addi %0, %arg2 : i32
    %c0_i32 = arith.constant 0 : i32
    %c0_i32_0 = arith.constant 0 : i32
    return %arg1, %c0_i32, %1 : i32, i32, i32
  }
  func.func @transform_10(%arg0: i32, %arg1: i32, %arg2: i32) -> (i32, i32, i32, i32) {
    %c0_i32 = arith.constant 0 : i32
    %c0_i32_0 = arith.constant 0 : i32
    %c0_i32_1 = arith.constant 0 : i32
    return %arg1, %arg0, %c0_i32, %c0_i32_0 : i32, i32, i32, i32
  }
}

module attributes {stable_mosaic.version = 11 : i64} {
  func.func @heads_kernel(%arg0: i32, %arg1: memref<1x2x512xf32, #tpu.memory_space<vmem>>, %arg2: memref<512x256xbf16, #tpu.memory_space<vmem>>, %arg3: memref<1x256xf32, #tpu.memory_space<vmem>>, %arg4: memref<256x128xbf16, #tpu.memory_space<vmem>>, %arg5: memref<1x128xf32, #tpu.memory_space<vmem>>, %arg6: memref<128x16xbf16, #tpu.memory_space<vmem>>, %arg7: memref<1x16xf32, #tpu.memory_space<vmem>>, %arg8: memref<512x256xbf16, #tpu.memory_space<vmem>>, %arg9: memref<1x256xf32, #tpu.memory_space<vmem>>, %arg10: memref<256x128xbf16, #tpu.memory_space<vmem>>, %arg11: memref<1x128xf32, #tpu.memory_space<vmem>>, %arg12: memref<128x16xbf16, #tpu.memory_space<vmem>>, %arg13: memref<1x16xf32, #tpu.memory_space<vmem>>, %arg14: memref<1x1x16xf32, #tpu.memory_space<vmem>>, %arg15: memref<1x1x16xf32, #tpu.memory_space<vmem>>) attributes {dimension_semantics = [#tpu.dimension_semantics<parallel>], iteration_bounds = array<i64: 2>, scalar_prefetch = 0 : i64, scratch_operands = 0 : i64, tpu.core_type = #tpu.core_type<tc>, window_params = [{transform_indices = @transform_0, window_bounds = array<i64: 1, 2, 512>}, {pipeline_mode = #tpu.pipeline_mode<synchronous>, transform_indices = @transform_1, window_bounds = array<i64: 512, 256>}, {pipeline_mode = #tpu.pipeline_mode<synchronous>, transform_indices = @transform_2, window_bounds = array<i64: 1, 256>}, {pipeline_mode = #tpu.pipeline_mode<synchronous>, transform_indices = @transform_3, window_bounds = array<i64: 256, 128>}, {pipeline_mode = #tpu.pipeline_mode<synchronous>, transform_indices = @transform_4, window_bounds = array<i64: 1, 128>}, {pipeline_mode = #tpu.pipeline_mode<synchronous>, transform_indices = @transform_5, window_bounds = array<i64: 128, 16>}, {pipeline_mode = #tpu.pipeline_mode<synchronous>, transform_indices = @transform_6, window_bounds = array<i64: 1, 16>}, {pipeline_mode = #tpu.pipeline_mode<synchronous>, transform_indices = @transform_7, window_bounds = array<i64: 512, 256>}, {pipeline_mode = #tpu.pipeline_mode<synchronous>, transform_indices = @transform_8, window_bounds = array<i64: 1, 256>}, {pipeline_mode = #tpu.pipeline_mode<synchronous>, transform_indices = @transform_9, window_bounds = array<i64: 256, 128>}, {pipeline_mode = #tpu.pipeline_mode<synchronous>, transform_indices = @transform_10, window_bounds = array<i64: 1, 128>}, {pipeline_mode = #tpu.pipeline_mode<synchronous>, transform_indices = @transform_11, window_bounds = array<i64: 128, 16>}, {pipeline_mode = #tpu.pipeline_mode<synchronous>, transform_indices = @transform_12, window_bounds = array<i64: 1, 16>}, {transform_indices = @transform_13, window_bounds = array<i64: 1, 1, 16>}, {transform_indices = @transform_14, window_bounds = array<i64: 1, 1, 16>}]} {
    %c0 = arith.constant 0 : index
    %c0_0 = arith.constant 0 : index
    %c0_1 = arith.constant 0 : index
    %0 = vector.load %arg1[%c0, %c0_0, %c0_1] : memref<1x2x512xf32, #tpu.memory_space<vmem>>, vector<1x2x512xf32>
    %1 = vector.shape_cast %0 : vector<1x2x512xf32> to vector<2x512xf32>
    %cst = arith.constant dense<0xFF800000> : vector<512xf32>
    %2 = vector.multi_reduction <maximumf>, %1, %cst [0] : vector<2x512xf32> to vector<512xf32>
    %3 = vector.shape_cast %2 : vector<512xf32> to vector<1x512xf32>
    %4 = arith.truncf %3 : vector<1x512xf32> to vector<1x512xbf16>
    %c0_2 = arith.constant 0 : index
    %c0_3 = arith.constant 0 : index
    %5 = vector.load %arg2[%c0_2, %c0_3] : memref<512x256xbf16, #tpu.memory_space<vmem>>, vector<512x256xbf16>
    %cst_4 = arith.constant dense<0.000000e+00> : vector<1x256xf32>
    %6 = tpu.matmul %4, %5, %cst_4 {dimension_numbers = #tpu.dot_dimension_numbers<[1], [0], [0], [1], [0, 0, 1, 1], [], []>} : vector<1x512xbf16>, vector<512x256xbf16>, vector<1x256xf32> -> vector<1x256xf32>
    %c0_5 = arith.constant 0 : index
    %c0_6 = arith.constant 0 : index
    %7 = vector.load %arg3[%c0_5, %c0_6] : memref<1x256xf32, #tpu.memory_space<vmem>>, vector<1x256xf32>
    %8 = arith.addf %6, %7 : vector<1x256xf32>
    %cst_7 = arith.constant 0.000000e+00 : f32
    %9 = vector.broadcast %cst_7 : f32 to vector<1x256xf32>
    %10 = arith.maximumf %8, %9 : vector<1x256xf32>
    %11 = arith.truncf %10 : vector<1x256xf32> to vector<1x256xbf16>
    %c0_8 = arith.constant 0 : index
    %c0_9 = arith.constant 0 : index
    %12 = vector.load %arg4[%c0_8, %c0_9] : memref<256x128xbf16, #tpu.memory_space<vmem>>, vector<256x128xbf16>
    %cst_10 = arith.constant dense<0.000000e+00> : vector<1x128xf32>
    %13 = tpu.matmul %11, %12, %cst_10 {dimension_numbers = #tpu.dot_dimension_numbers<[1], [0], [0], [1], [0, 0, 1, 1], [], []>} : vector<1x256xbf16>, vector<256x128xbf16>, vector<1x128xf32> -> vector<1x128xf32>
    %c0_11 = arith.constant 0 : index
    %c0_12 = arith.constant 0 : index
    %14 = vector.load %arg5[%c0_11, %c0_12] : memref<1x128xf32, #tpu.memory_space<vmem>>, vector<1x128xf32>
    %15 = arith.addf %13, %14 : vector<1x128xf32>
    %cst_13 = arith.constant 0.000000e+00 : f32
    %16 = vector.broadcast %cst_13 : f32 to vector<1x128xf32>
    %17 = arith.maximumf %15, %16 : vector<1x128xf32>
    %18 = arith.truncf %17 : vector<1x128xf32> to vector<1x128xbf16>
    %c0_14 = arith.constant 0 : index
    %c0_15 = arith.constant 0 : index
    %19 = vector.load %arg6[%c0_14, %c0_15] : memref<128x16xbf16, #tpu.memory_space<vmem>>, vector<128x16xbf16>
    %cst_16 = arith.constant dense<0.000000e+00> : vector<1x16xf32>
    %20 = tpu.matmul %18, %19, %cst_16 {dimension_numbers = #tpu.dot_dimension_numbers<[1], [0], [0], [1], [0, 0, 1, 1], [], []>} : vector<1x128xbf16>, vector<128x16xbf16>, vector<1x16xf32> -> vector<1x16xf32>
    %c0_17 = arith.constant 0 : index
    %c0_18 = arith.constant 0 : index
    %21 = vector.load %arg7[%c0_17, %c0_18] : memref<1x16xf32, #tpu.memory_space<vmem>>, vector<1x16xf32>
    %22 = arith.addf %20, %21 : vector<1x16xf32>
    %c0_19 = arith.constant 0 : index
    %c0_20 = arith.constant 0 : index
    %c0_21 = arith.constant 0 : index
    %23 = vector.load %arg14[%c0_19, %c0_20, %c0_21] : memref<1x1x16xf32, #tpu.memory_space<vmem>>, vector<1x1x16xf32>
    %24 = vector.shape_cast %23 : vector<1x1x16xf32> to vector<1x16xf32>
    %25 = vector.shape_cast %22 : vector<1x16xf32> to vector<1x1x16xf32>
    tpu.vector_store %arg14[%c0_19, %c0_20, %c0_21], %25 {strides = array<i32>} : memref<1x1x16xf32, #tpu.memory_space<vmem>>, vector<1x1x16xf32>,
    %c0_22 = arith.constant 0 : index
    %c0_23 = arith.constant 0 : index
    %26 = vector.load %arg8[%c0_22, %c0_23] : memref<512x256xbf16, #tpu.memory_space<vmem>>, vector<512x256xbf16>
    %cst_24 = arith.constant dense<0.000000e+00> : vector<1x256xf32>
    %27 = tpu.matmul %4, %26, %cst_24 {dimension_numbers = #tpu.dot_dimension_numbers<[1], [0], [0], [1], [0, 0, 1, 1], [], []>} : vector<1x512xbf16>, vector<512x256xbf16>, vector<1x256xf32> -> vector<1x256xf32>
    %c0_25 = arith.constant 0 : index
    %c0_26 = arith.constant 0 : index
    %28 = vector.load %arg9[%c0_25, %c0_26] : memref<1x256xf32, #tpu.memory_space<vmem>>, vector<1x256xf32>
    %29 = arith.addf %27, %28 : vector<1x256xf32>
    %cst_27 = arith.constant 0.000000e+00 : f32
    %30 = vector.broadcast %cst_27 : f32 to vector<1x256xf32>
    %31 = arith.maximumf %29, %30 : vector<1x256xf32>
    %32 = arith.truncf %31 : vector<1x256xf32> to vector<1x256xbf16>
    %c0_28 = arith.constant 0 : index
    %c0_29 = arith.constant 0 : index
    %33 = vector.load %arg10[%c0_28, %c0_29] : memref<256x128xbf16, #tpu.memory_space<vmem>>, vector<256x128xbf16>
    %cst_30 = arith.constant dense<0.000000e+00> : vector<1x128xf32>
    %34 = tpu.matmul %32, %33, %cst_30 {dimension_numbers = #tpu.dot_dimension_numbers<[1], [0], [0], [1], [0, 0, 1, 1], [], []>} : vector<1x256xbf16>, vector<256x128xbf16>, vector<1x128xf32> -> vector<1x128xf32>
    %c0_31 = arith.constant 0 : index
    %c0_32 = arith.constant 0 : index
    %35 = vector.load %arg11[%c0_31, %c0_32] : memref<1x128xf32, #tpu.memory_space<vmem>>, vector<1x128xf32>
    %36 = arith.addf %34, %35 : vector<1x128xf32>
    %cst_33 = arith.constant 0.000000e+00 : f32
    %37 = vector.broadcast %cst_33 : f32 to vector<1x128xf32>
    %38 = arith.maximumf %36, %37 : vector<1x128xf32>
    %39 = arith.truncf %38 : vector<1x128xf32> to vector<1x128xbf16>
    %c0_34 = arith.constant 0 : index
    %c0_35 = arith.constant 0 : index
    %40 = vector.load %arg12[%c0_34, %c0_35] : memref<128x16xbf16, #tpu.memory_space<vmem>>, vector<128x16xbf16>
    %cst_36 = arith.constant dense<0.000000e+00> : vector<1x16xf32>
    %41 = tpu.matmul %39, %40, %cst_36 {dimension_numbers = #tpu.dot_dimension_numbers<[1], [0], [0], [1], [0, 0, 1, 1], [], []>} : vector<1x128xbf16>, vector<128x16xbf16>, vector<1x16xf32> -> vector<1x16xf32>
    %c0_37 = arith.constant 0 : index
    %c0_38 = arith.constant 0 : index
    %42 = vector.load %arg13[%c0_37, %c0_38] : memref<1x16xf32, #tpu.memory_space<vmem>>, vector<1x16xf32>
    %43 = arith.addf %41, %42 : vector<1x16xf32>
    %c0_39 = arith.constant 0 : index
    %c0_40 = arith.constant 0 : index
    %c0_41 = arith.constant 0 : index
    %44 = vector.load %arg15[%c0_39, %c0_40, %c0_41] : memref<1x1x16xf32, #tpu.memory_space<vmem>>, vector<1x1x16xf32>
    %45 = vector.shape_cast %44 : vector<1x1x16xf32> to vector<1x16xf32>
    %46 = vector.shape_cast %43 : vector<1x16xf32> to vector<1x1x16xf32>
    tpu.vector_store %arg15[%c0_39, %c0_40, %c0_41], %46 {strides = array<i32>} : memref<1x1x16xf32, #tpu.memory_space<vmem>>, vector<1x1x16xf32>,
    return
  }
  func.func @transform_0(%arg0: i32) -> (i32, i32, i32) {
    %c0_i32 = arith.constant 0 : i32
    %c0_i32_0 = arith.constant 0 : i32
    %c0_i32_1 = arith.constant 0 : i32
    return %arg0, %c0_i32, %c0_i32_0 : i32, i32, i32
  }
  func.func @transform_1(%arg0: i32) -> (i32, i32) {
    %c0_i32 = arith.constant 0 : i32
    %c0_i32_0 = arith.constant 0 : i32
    %c0_i32_1 = arith.constant 0 : i32
    return %c0_i32, %c0_i32_0 : i32, i32
  }
  func.func @transform_2(%arg0: i32) -> (i32, i32) {
    %c0_i32 = arith.constant 0 : i32
    %c0_i32_0 = arith.constant 0 : i32
    %c0_i32_1 = arith.constant 0 : i32
    return %c0_i32, %c0_i32_0 : i32, i32
  }
  func.func @transform_3(%arg0: i32) -> (i32, i32) {
    %c0_i32 = arith.constant 0 : i32
    %c0_i32_0 = arith.constant 0 : i32
    %c0_i32_1 = arith.constant 0 : i32
    return %c0_i32, %c0_i32_0 : i32, i32
  }
  func.func @transform_4(%arg0: i32) -> (i32, i32) {
    %c0_i32 = arith.constant 0 : i32
    %c0_i32_0 = arith.constant 0 : i32
    %c0_i32_1 = arith.constant 0 : i32
    return %c0_i32, %c0_i32_0 : i32, i32
  }
  func.func @transform_5(%arg0: i32) -> (i32, i32) {
    %c0_i32 = arith.constant 0 : i32
    %c0_i32_0 = arith.constant 0 : i32
    %c0_i32_1 = arith.constant 0 : i32
    return %c0_i32, %c0_i32_0 : i32, i32
  }
  func.func @transform_6(%arg0: i32) -> (i32, i32) {
    %c0_i32 = arith.constant 0 : i32
    %c0_i32_0 = arith.constant 0 : i32
    %c0_i32_1 = arith.constant 0 : i32
    return %c0_i32, %c0_i32_0 : i32, i32
  }
  func.func @transform_7(%arg0: i32) -> (i32, i32) {
    %c0_i32 = arith.constant 0 : i32
    %c0_i32_0 = arith.constant 0 : i32
    %c0_i32_1 = arith.constant 0 : i32
    return %c0_i32, %c0_i32_0 : i32, i32
  }
  func.func @transform_8(%arg0: i32) -> (i32, i32) {
    %c0_i32 = arith.constant 0 : i32
    %c0_i32_0 = arith.constant 0 : i32
    %c0_i32_1 = arith.constant 0 : i32
    return %c0_i32, %c0_i32_0 : i32, i32
  }
  func.func @transform_9(%arg0: i32) -> (i32, i32) {
    %c0_i32 = arith.constant 0 : i32
    %c0_i32_0 = arith.constant 0 : i32
    %c0_i32_1 = arith.constant 0 : i32
    return %c0_i32, %c0_i32_0 : i32, i32
  }
  func.func @transform_10(%arg0: i32) -> (i32, i32) {
    %c0_i32 = arith.constant 0 : i32
    %c0_i32_0 = arith.constant 0 : i32
    %c0_i32_1 = arith.constant 0 : i32
    return %c0_i32, %c0_i32_0 : i32, i32
  }
  func.func @transform_11(%arg0: i32) -> (i32, i32) {
    %c0_i32 = arith.constant 0 : i32
    %c0_i32_0 = arith.constant 0 : i32
    %c0_i32_1 = arith.constant 0 : i32
    return %c0_i32, %c0_i32_0 : i32, i32
  }
  func.func @transform_12(%arg0: i32) -> (i32, i32) {
    %c0_i32 = arith.constant 0 : i32
    %c0_i32_0 = arith.constant 0 : i32
    %c0_i32_1 = arith.constant 0 : i32
    return %c0_i32, %c0_i32_0 : i32, i32
  }
  func.func @transform_13(%arg0: i32) -> (i32, i32, i32) {
    %c0_i32 = arith.constant 0 : i32
    %c0_i32_0 = arith.constant 0 : i32
    %c0_i32_1 = arith.constant 0 : i32
    return %arg0, %c0_i32, %c0_i32_0 : i32, i32, i32
  }
  func.func @transform_14(%arg0: i32) -> (i32, i32, i32) {
    %c0_i32 = arith.constant 0 : i32
    %c0_i32_0 = arith.constant 0 : i32
    %c0_i32_1 = arith.constant 0 : i32
    return %arg0, %c0_i32, %c0_i32_0 : i32, i32, i32
  }
}

</mosaic_0001>

<bundles_post_ra>
// kernel: encoder_forward.3
= control target key start
LH: loop header
LB: loop body
LE: loop exit
PB: predicated region body
PF: predicated region fallthrough
CT: control target
= control target key end

     0   :  { %s3642_s0 = inlined_call_operand.vmem [shape: f32[2,2,512], index: 0, kind: input, shape index: {}]   ;;  %s3643_s1 = inlined_call_operand.vmem [shape: bf16[512,256], index: 1, kind: input, shape index: {}]   ;;  %s3644_s2 = inlined_call_operand.vmem [shape: f32[1,256], index: 2, kind: input, shape index: {}]   ;;  %s3645_s3 = inlined_call_operand.vmem [shape: bf16[256,128], index: 3, kind: input, shape index: {}]   ;;  %s3646_s4 = inlined_call_operand.vmem [shape: f32[1,128], index: 4, kind: input, shape index: {}]   ;;  %s3647_s5 = inlined_call_operand.vmem [shape: bf16[128,16], index: 5, kind: input, shape index: {}]   ;;  %s3648_s6 = inlined_call_operand.vmem [shape: f32[1,16], index: 6, kind: input, shape index: {}]   ;;  %s3649_s7 = inlined_call_operand.vmem [shape: bf16[512,256], index: 7, kind: input, shape index: {}]   ;;  %s3650_s8 = inlined_call_operand.vmem [shape: f32[1,256], index: 8, kind: input, shape index: {}]   ;;  %s3651_s9 = inlined_call_operand.vmem [shape: bf16[256,128], index: 9, kind: input, shape index: {}]   ;;  %s3652_s10 = inlined_call_operand.vmem [shape: f32[1,128], index: 10, kind: input, shape index: {}]   ;;  %s3653_s11 = inlined_call_operand.vmem [shape: bf16[128,16], index: 11, kind: input, shape index: {}]   ;;  %s3654_s12 = inlined_call_operand.vmem [shape: f32[1,16], index: 12, kind: input, shape index: {}]   ;;  %s3655_s13 = inlined_call_operand.hbm [shape: f32[2,1,16], index: 13, kind: output, shape index: {0}]   ;;  %s3656_s14 = inlined_call_operand.hbm [shape: f32[2,1,16], index: 14, kind: output, shape index: {1}]  }
   0x1   :  { %3663 = sst [smem:[#allocation13_spill]] %s3642_s0 }
   0x2   :  { %3664 = sst [smem:[#allocation14_spill]] %s3643_s1 }
   0x3   :  { %20 = vsyncpa [#allocation3], 0 }
   0x4   :  { %22 = vsyncpa [#allocation3 + $0x1], 0 }
   0x5   :  { %23 = vsyncpa [#allocation5], 0 }
   0x6   :  { %25 = vsyncpa [#allocation5 + $0x1], 0  ;;  %s2913_s29 = smov 0   ;;  %s2915_s30 = smov 0  }
   0x7   :  { %s2917_s15 = smov 0   ;;  %s2919_s16 = smov 0  }
   0x8 LB: > { %3665 = sst [smem:[#allocation8_spill]] %s2819_s29  ;;  %s2934_s17 = sadd.s32 4294967295, %s2831_s16   ;;  %s2831_s16 = sphi %s2919_s16, %s3677_s16   ;;  %s2827_s15 = sphi %s2917_s15, %s3679_s15   ;;  %s2823_s30 = sphi %s2915_s30, %s3681_s30   ;;  %s2819_s29 = sphi %s2913_s29, %s3680_s29  }
   0x9   : > { %3666 = sst [smem:[#allocation9_spill]] %s2827_s15  ;;  %s2164_s18 = sadd.s32 4294967294, %s2831_s16  }
   0xa   : > { %s2938_s19 = sadd.s32 1, %s2831_s16   ;;  %s316_s20 = sadd.s32 1, %s2827_s15 }
   0xb   : > { %3667 = sst [smem:[#allocation10_spill]] %s2938_s19  ;;  %s313_s21 = ssub.s32 %s2831_s16, %s2938_s19 }
   0xc   : > { %p326_p0 = scmp.ne.s32.totalorder %s2827_s15, %s2823_s30  ;;  %p314_p1 = scmp.eq.s32.totalorder %s313_s21, 0 }
   0xd   : > { %p327_p2 = scmp.eq.s32.totalorder %s2934_s17, 1  ;;  %p332_p3 = scmp.ne.s32.totalorder %s2823_s30, %s2819_s29 }
   0xe   : > { %p333_p4 = scmp.eq.s32.totalorder %s2164_s18, 1  ;;  %p2167_p7 = scmp.ge.s32.totalorder %s2831_s16, 1 }
   0xf   : > { %s2949_s22 = scalar_select %p314_p1, %s2827_s15, %s316_s20  }
  0x10   : > { %p2951_p5 = por %p327_p2, %p326_p0  ;;  %p2955_p6 = por %p333_p4, %p332_p3 }
  0x11   : > { %3668 = sst [smem:[#allocation11_spill]] %s2949_s22  ;;  %p421_p8 = scmp.lt.s32.totalorder %s2831_s16, 3 }
  0x12   : > { %s3670_s24 = scalar_select %p2955_p6, 1, 0 }
  0x13   : > { %p422_p9 = pnand %p2167_p7, %p421_p8 }
  0x14   : > { %3671 = sst [smem:[#allocation12_spill]] %s3670_s24  ;;  %p470_p10 = scmp.lt.s32.totalorder (!%p422_p9), %s2934_s17, 1 }
  0x15   : > { %425 = sbr.rel (%p422_p9) target bundleno = 1177 (0x499), region = 72  ;;  %s3672_s1 = sld [smem:[#allocation14_spill]] (!%p422_p9) }
  0x16   : > { %s3673_s0 = sld [smem:[#allocation13_spill]] (!%p422_p9)  ;;  %s3539_s25 = sand.u32 (!%p422_p9), 1, %s2823_s30  }
  0x17   : > { %s463_s27 = scalar_lea.vmem (!%p422_p9), [#allocation2], %s3539_s25  ;;  %s3662_s20 = sshll.u32 (!%p422_p9), %s2934_s17, 4 }
  0x18   : > { %s2068_s22 = sshll.u32 (!%p422_p9), %s463_s27, 4  ;;  %s2066_s21 = scalar_lea.hbm (!%p422_p9), %s3655_s13, %s3662_s20  ;;  %s2069_s22 = int_to_ptr.vmem [resolvable:$true] %s2068_s22 }
  0x19   : > { %s2741_s15 = scalar_lea.vmem (!%p422_p9), %s2069_s22, 16  ;;  %s2836_s19 = smov (!%p422_p9), [#allocation2]  }
  0x1a   : > { %v2833_v36 = vmov 1983009808   ;;  %v482_v38 = vlaneseq  ;;  %s471_s18 = scalar_select %p470_p10, %s2934_s17, 1  ;;  %vm499_vm0 = vcmask 1041408   ;;  %vm2835_vm1 = vmmov 0  }
  0x1b   : > { %v2500_v0 = vld [vmem:[%s3672_s1 + $0x74] ss:$8 sps:$4 sm:$0xff]   ;;  %v2504_v2 = vld [vmem:[%s3672_s1 + $0x70] ss:$8 sps:$4 sm:$0xff]   ;;  %v2506_v4 = vld [vmem:[%s3672_s1 + $0x64] ss:$8 sps:$4 sm:$0xff]   ;;  %v480_v37 = vunpack.c.l.s4 %v2833_v36  ;;  %p2742_p11 = scmp.ne.s32.totalorder %s2069_s22, %s2741_s15 }
  0x1c   : > { %v2502_v1 = vld [vmem:[%s3672_s1 + $0x174] ss:$8 sps:$4 sm:$0xff]   ;;  %928 = vmatprep.subr.bf16.mxu0 %v2500_v0  ;;  %v2505_v3 = vld [vmem:[%s3672_s1 + $0x170] ss:$8 sps:$4 sm:$0xff]   ;;  %v2508_v5 = vld [vmem:[%s3672_s1 + $0x164] ss:$8 sps:$4 sm:$0xff]  }
  0x1d   : > { %969 = vmatprep.subr.bf16.mxu1 %v2502_v1  ;;  %929 = vmatpush1.bf16.msra.mxu0 %v2504_v2  ;;  %v2510_v6 = vld [vmem:[%s3672_s1 + $0x60] ss:$8 sps:$4 sm:$0xff]   ;;  %v2512_v8 = vld [vmem:[%s3672_s1 + $0x54] ss:$8 sps:$4 sm:$0xff]   ;;  %v2516_v10 = vld [vmem:[%s3672_s1 + $0x50] ss:$8 sps:$4 sm:$0xff]   ;;  %v481_v42 = vunpack.c.0.s8 %v480_v37  ;;  %p2743_p12 = pnand %p2742_p11, %p2951_p5 }
  0x1e   : > { %970 = vmatpush1.bf16.msra.mxu1 %v2505_v3  ;;  %930 = vmatprep.subr.bf16.mxu0 %v2506_v4  ;;  %v2511_v7 = vld [vmem:[%s3672_s1 + $0x160] ss:$8 sps:$4 sm:$0xff]   ;;  %v2514_v9 = vld [vmem:[%s3672_s1 + $0x154] ss:$8 sps:$4 sm:$0xff]   ;;  %v2517_v11 = vld [vmem:[%s3672_s1 + $0x150] ss:$8 sps:$4 sm:$0xff]  }
  0x1f   : > { %971 = vmatprep.subr.bf16.mxu1 %v2508_v5  ;;  %v2518_v12 = vld [vmem:[%s3672_s1 + $0x44] ss:$8 sps:$4 sm:$0xff]   ;;  %v2522_v14 = vld [vmem:[%s3672_s1 + $0x40] ss:$8 sps:$4 sm:$0xff]   ;;  %v2524_v16 = vld [vmem:[%s3672_s1 + $0x34] ss:$8 sps:$4 sm:$0xff]   ;;  %p2744_p13 = pneg %p2743_p12 }
  0x20   : > { %v2520_v13 = vld [vmem:[%s3672_s1 + $0x144] ss:$8 sps:$4 sm:$0xff]   ;;  %v2523_v15 = vld [vmem:[%s3672_s1 + $0x140] ss:$8 sps:$4 sm:$0xff]   ;;  %v2526_v17 = vld [vmem:[%s3672_s1 + $0x134] ss:$8 sps:$4 sm:$0xff]  }
  0x21   : > { %931 = vmatpush1.bf16.msra.mxu0 %v2510_v6  ;;  %v2528_v18 = vld [vmem:[%s3672_s1 + $0x30] ss:$8 sps:$4 sm:$0xff]   ;;  %v2530_v20 = vld [vmem:[%s3672_s1 + $0x24] ss:$8 sps:$4 sm:$0xff]   ;;  %v2534_v22 = vld [vmem:[%s3672_s1 + $0x20] ss:$8 sps:$4 sm:$0xff]  }
  0x22   : > { %972 = vmatpush1.bf16.msra.mxu1 %v2511_v7  ;;  %932 = vmatprep.subr.bf16.mxu0 %v2512_v8  ;;  %v2529_v19 = vld [vmem:[%s3672_s1 + $0x130] ss:$8 sps:$4 sm:$0xff]   ;;  %v2532_v21 = vld [vmem:[%s3672_s1 + $0x124] ss:$8 sps:$4 sm:$0xff]   ;;  %v2535_v23 = vld [vmem:[%s3672_s1 + $0x120] ss:$8 sps:$4 sm:$0xff]  }
  0x23   : > { %973 = vmatprep.subr.bf16.mxu1 %v2514_v9  ;;  %v2536_v24 = vld [vmem:[%s3672_s1 + $0x14] ss:$8 sps:$4 sm:$0xff]   ;;  %v2540_v26 = vld [vmem:[%s3672_s1 + $0x10] ss:$8 sps:$4 sm:$0xff]   ;;  %v2542_v28 = vld [vmem:[%s3672_s1 + $0x4] ss:$8 sps:$4 sm:$0xff]  }
  0x24   : > { %v2538_v25 = vld [vmem:[%s3672_s1 + $0x114] ss:$8 sps:$4 sm:$0xff]   ;;  %v2541_v27 = vld [vmem:[%s3672_s1 + $0x110] ss:$8 sps:$4 sm:$0xff]   ;;  %v2544_v29 = vld [vmem:[%s3672_s1 + $0x104] ss:$8 sps:$4 sm:$0xff]  }
  0x25   : > { %933 = vmatpush1.bf16.msra.mxu0 %v2516_v10  ;;  %v2546_v30 = vld [vmem:[%s3672_s1] ss:$8 sps:$4 sm:$0xff]   ;;  %v2548_v32 = vld [vmem:[%s3672_s1 + $0xf4] ss:$8 sps:$4 sm:$0xff]   ;;  %v2552_v34 = vld [vmem:[%s3672_s1 + $0xf0] ss:$8 sps:$4 sm:$0xff]  }
  0x26   : > { %974 = vmatpush1.bf16.msra.mxu1 %v2517_v11  ;;  %934 = vmatprep.subr.bf16.mxu0 %v2518_v12  ;;  %v2547_v31 = vld [vmem:[%s3672_s1 + $0x100] ss:$8 sps:$4 sm:$0xff]   ;;  %v2550_v33 = vld [vmem:[%s3672_s1 + $0x1f4] ss:$8 sps:$4 sm:$0xff]   ;;  %v2553_v35 = vld [vmem:[%s3672_s1 + $0x1f0] ss:$8 sps:$4 sm:$0xff]  }
  0x27   : > { %975 = vmatprep.subr.bf16.mxu1 %v2520_v13  ;;  %v2554_v39 = vld [vmem:[%s3672_s1 + $0xe4] ss:$8 sps:$4 sm:$0xff]   ;;  %v2558_v41 = vld [vmem:[%s3672_s1 + $0xe0] ss:$8 sps:$4 sm:$0xff]   ;;  %v3080_v43 = vshrl.u32 %v482_v38, 7  ;;  %s2350_s28 = sshll.u32 %s471_s18, 3 }
  0x28   : > { %v2556_v40 = vld [vmem:[%s3672_s1 + $0x1e4] ss:$8 sps:$4 sm:$0xff]   ;;  %v2559_v44 = vld [vmem:[%s3672_s1 + $0x1e0] ss:$8 sps:$4 sm:$0xff]   ;;  %v2560_v45 = vld [vmem:[%s3672_s1 + $0xd4] ss:$8 sps:$4 sm:$0xff]   ;;  %s474_s26 = scalar_lea.vmem %s3673_s0, %s2350_s28 }
  0x29   : > { %935 = vmatpush1.bf16.msra.mxu0 %v2522_v14  ;;  %v2562_v46 = vld [vmem:[%s3672_s1 + $0x1d4] ss:$8 sps:$4 sm:$0xff]   ;;  %v2564_v47 = vld [vmem:[%s3672_s1 + $0xd0] ss:$8 sps:$4 sm:$0xff]   ;;  %v484_v49 = vsub.s32 %v481_v42, %v3080_v43  ;;  %v2566_v50 = vld [vmem:[%s3672_s1 + $0xc4] ss:$8 sps:$4 sm:$0xff]  }
  0x2a   : > { %976 = vmatpush1.bf16.msra.mxu1 %v2523_v15  ;;  %936 = vmatprep.subr.bf16.mxu0 %v2524_v16  ;;  %v2565_v48 = vld [vmem:[%s3672_s1 + $0x1d0] ss:$8 sps:$4 sm:$0xff]   ;;  %v2568_v51 = vld [vmem:[%s3672_s1 + $0x1c4] ss:$8 sps:$4 sm:$0xff]   ;;  %v2570_v52 = vld [vmem:[%s3672_s1 + $0xc0] ss:$8 sps:$4 sm:$0xff]  }
  0x2b   : > { %977 = vmatprep.subr.bf16.mxu1 %v2526_v17  ;;  %v2571_v53 = vld [vmem:[%s3672_s1 + $0x1c0] ss:$8 sps:$4 sm:$0xff]   ;;  %v2572_v55 = vld [vmem:[%s3672_s1 + $0xb4] ss:$8 sps:$4 sm:$0xff]   ;;  %v2576_v62 = vld [vmem:[%s3672_s1 + $0xb0] ss:$8 sps:$4 sm:$0xff]  }
  0x2c   : > { %v476_v54 = vld [vmem:[%s474_s26] sm:$0xff]  ;;  %v2574_v58 = vld [vmem:[%s3672_s1 + $0x1b4] ss:$8 sps:$4 sm:$0xff]   ;;  %v2577_v63 = vld [vmem:[%s3672_s1 + $0x1b0] ss:$8 sps:$4 sm:$0xff]   ;;  %vm1290_vm2 = vcmask 122880  }
  0x2d   : > { %937 = vmatpush1.bf16.msra.mxu0 %v2528_v18  ;;  %v485_v56 = vrot.slane %v476_v54, %v484_v49  ;;  %v478_v57 = vcombine.high %v476_v54, %v476_v54  ;;  %v2578_v1 = vld [vmem:[%s3672_s1 + $0xa4] ss:$8 sps:$4 sm:$0xff]   ;;  %v2582_v10 = vld [vmem:[%s3672_s1 + $0xa0] ss:$8 sps:$4 sm:$0xff]   ;;  %v2584_v16 = vld [vmem:[%s3672_s1 + $0x94] ss:$8 sps:$4 sm:$0xff]  }
  0x2e   : > { %978 = vmatpush1.bf16.msra.mxu1 %v2529_v19  ;;  %938 = vmatprep.subr.bf16.mxu0 %v2530_v20  ;;  %v2580_v5 = vld [vmem:[%s3672_s1 + $0x1a4] ss:$8 sps:$4 sm:$0xff]   ;;  %v2583_v15 = vld [vmem:[%s3672_s1 + $0x1a0] ss:$8 sps:$4 sm:$0xff]   ;;  %v2606_v54 = vld [vmem:[%s3645_s3 + $0x18] sm:$0xff]   ;;  %s2052_s28 = scalar_lea.sflag [#allocation3], %s3539_s25 }
  0x2f   : > { %979 = vmatprep.subr.bf16.mxu1 %v2532_v21  ;;  %v493_v59 = vcombine.high %v485_v56, %v485_v56  ;;  %v492_v60 = vrot.slane %v478_v57, %v484_v49  ;;  %v500_v61 = vsel %vm499_vm0, %v485_v56, -inf  ;;  %v2586_v21 = vld [vmem:[%s3672_s1 + $0x194] ss:$8 sps:$4 sm:$0xff]   ;;  %v2601_v49 = vld [vmem:[%s3645_s3 + $0x68] sm:$0xff]   ;;  %s2745_s18 = sshll.u32 %s2836_s19, 4  ;;  %s2746_s18 = int_to_ptr.vmem [resolvable:$false] %s2745_s18 }
  0x30   : > { %v501_v0 = vrot.slane %v500_v61, 4  ;;  %v2608_v56 = vld [vmem:[%s3645_s3 + $0x10] sm:$0xff]   ;;  %v2609_v57 = vld [vmem:[%s3645_s3 + $0x48] sm:$0xff]   ;;  %s2747_s26 = scalar_lea.vmem %s2746_s18, 32  ;;  %p2748_p0 = scmp.lt.s32.totalorder %s2069_s22, %s2746_s18 }
  0x31   : > { %939 = vmatpush1.bf16.msra.mxu0 %v2534_v22  ;;  %v507_v2 = vsel %vm499_vm0, %v493_v59, -inf  ;;  %v494_v3 = vcombine.high %v492_v60, %v492_v60  ;;  %v514_v4 = vsel %vm499_vm0, %v492_v60, -inf  ;;  %v2588_v22 = vld [vmem:[%s3672_s1 + $0x90] ss:$8 sps:$4 sm:$0xff]   ;;  %v2611_v59 = vld [vmem:[%s3645_s3 + $0x40] sm:$0xff]   ;;  %p2749_p1 = scmp.lt.s32.totalorder %s2747_s26, %s2741_s15 }
  0x32   : > { %980 = vmatpush1.bf16.msra.mxu1 %v2535_v23  ;;  %940 = vmatprep.subr.bf16.mxu0 %v2536_v24  ;;  %v508_v6 = vrot.slane %v507_v2, 4  ;;  %v502_v7 = vmax.f32 %v500_v61, %v501_v0  ;;  %v515_v8 = vrot.slane %v514_v4, 4  ;;  %v2589_v23 = vld [vmem:[%s3672_s1 + $0x190] ss:$8 sps:$4 sm:$0xff]   ;;  %v2612_v60 = vld [vmem:[%s3645_s3] sm:$0xff]   ;;  %v2615_v0 = vld [vmem:[%s3647_s5 + $0x28] sm:$0xff]  }
  0x33   : > { %981 = vmatprep.subr.bf16.mxu1 %v2538_v25  ;;  %v521_v9 = vsel %vm499_vm0, %v494_v3, -inf  ;;  %v2613_v61 = vld [vmem:[%s3647_s5 + $0x38] sm:$0xff]   ;;  %v2618_v3 = vld [vmem:[%s3647_s5 + $0x10] sm:$0xff]   ;;  %p2750_p2 = por %p2749_p1, %p2748_p0 }
  0x34   : > { %v509_v11 = vmax.f32 %v507_v2, %v508_v6  ;;  %v522_v12 = vrot.slane %v521_v9, 4  ;;  %v503_v13 = vrot.slane %v502_v7, 2  ;;  %v516_v14 = vmax.f32 %v514_v4, %v515_v8  ;;  %v2617_v2 = vld [vmem:[%s3647_s5 + $0x18] sm:$0xff]  }
  0x35   : > { %941 = vmatpush1.bf16.msra.mxu0 %v2540_v26  ;;  %v920_v4 = vsub.s32 0, %v3080_v43  ;;  %v924_v6 = vsub.s32 1, %v3080_v43  ;;  %v2739_v43 = vld [vmem:[%s3653_s11 + $0x8] sm:$0xff]   ;;  %p2751_p3 = pnand %p2750_p2, %p2744_p13 }
  0x36   : > { %982 = vmatpush1.bf16.msra.mxu1 %v2541_v27  ;;  %942 = vmatprep.subr.bf16.mxu0 %v2542_v28  ;;  %v510_v17 = vrot.slane %v509_v11, 2  ;;  %v523_v18 = vmax.f32 %v521_v9, %v522_v12  ;;  %v504_v19 = vmax.f32 %v502_v7, %v503_v13  ;;  %v517_v20 = vrot.slane %v516_v14, 2  ;;  %v2590_v28 = vld [vmem:[%s3672_s1 + $0x84] ss:$8 sps:$4 sm:$0xff]  }
  0x37   : > { %983 = vmatprep.subr.bf16.mxu1 %v2544_v29  ;;  %v2592_v29 = vld [vmem:[%s3672_s1 + $0x184] ss:$8 sps:$4 sm:$0xff]  }
  0x38   : > { %v511_v24 = vmax.f32 %v509_v11, %v510_v17  ;;  %v524_v25 = vrot.slane %v523_v18, 2  ;;  %v505_v26 = vrot.slane %v504_v19, 1  ;;  %v518_v27 = vmax.f32 %v516_v14, %v517_v20 }
  0x39   : > { %943 = vmatpush1.bf16.msra.mxu0 %v2546_v30 }
  0x3a   : > { %984 = vmatpush1.bf16.msra.mxu1 %v2547_v31  ;;  %944 = vmatprep.subr.bf16.mxu0 %v2548_v32  ;;  %v512_v30 = vrot.slane %v511_v24, 1  ;;  %v525_v31 = vmax.f32 %v523_v18, %v524_v25  ;;  %v519_v32 = vrot.slane %v518_v27, 1  ;;  %v506_v37 = vmax.f32 %v504_v19, %v505_v26  ;;  %v2621_v25 = vld [vmem:[%s3649_s7 + $0x74] ss:$8 sps:$4 sm:$0xff]   ;;  %v2619_v26 = vld [vmem:[%s3649_s7 + $0x70] ss:$8 sps:$4 sm:$0xff]  }
  0x3b   : > { %985 = vmatprep.subr.bf16.mxu1 %v2550_v33  ;;  %v2594_v33 = vld [vmem:[%s3672_s1 + $0x80] ss:$8 sps:$4 sm:$0xff]  }
  0x3c   : > { %v526_v36 = vrot.slane %v525_v31, 1  ;;  %v520_v38 = vmax.f32 %v518_v27, %v519_v32  ;;  %v2622_v27 = vld [vmem:[%s3647_s5 + $0x8] sm:$0xff]   ;;  %v2632_v32 = vld [vmem:[%s3649_s7 + $0x174] ss:$8 sps:$4 sm:$0xff]  }
  0x3d   : > { %945 = vmatpush2.bf16.msra.mxu0 %v2552_v34  ;;  %v2595_v34 = vld [vmem:[%s3672_s1 + $0x180] ss:$8 sps:$4 sm:$0xff]  }
  0x3e   : > { %986 = vmatpush2.bf16.msra.mxu1 %v2553_v35  ;;  %946 = vmatprep.subr.bf16.mxu0 %v2554_v39  ;;  %v513_v35 = vmax.f32 %v511_v24, %v512_v30  ;;  %v2597_v39 = vld [vmem:[%s3645_s3 + $0x78] sm:$0xff]   ;;  %v2626_v30 = vld [vmem:[%s3647_s5] sm:$0xff]  }
  0x3f   : > { %987 = vmatprep.subr.bf16.mxu1 %v2556_v40 }
  0x40   : > { %v3168_v40 = vpack.c.bf16 %v513_v35, %v513_v35  ;;  %v2635_v35 = vld [vmem:[%s3649_s7 + $0x44] ss:$8 sps:$4 sm:$0xff]  }
  0x41   : > { %947 = vmatpush2.bf16.msra.mxu0 %v2558_v41  ;;  %v527_v41 = vmax.f32 %v525_v31, %v526_v36  ;;  %v2629_v31 = vld [vmem:[%s3649_s7 + $0x54] ss:$8 sps:$4 sm:$0xff]   ;;  %v2639_v36 = vld [vmem:[%s3649_s7 + $0x30] ss:$8 sps:$4 sm:$0xff]  }
  0x42   : > { %988 = vmatpush2.bf16.msra.mxu1 %v2559_v44  ;;  %948 = vmatprep.subr.bf16.mxu0 %v2560_v45  ;;  %v2598_v44 = vld [vmem:[%s3645_s3 + $0x38] sm:$0xff]   ;;  %v3176_v45 = vpack.c.bf16 %v506_v37, %v506_v37 }
  0x43   : > { %989 = vmatprep.subr.bf16.mxu1 %v2562_v46  ;;  %960 = vmatprep.mubr.bf16.mxu0 %v3168_v40  ;;  %v3171_v42 = vpack.c.bf16 %v527_v41, %v527_v41  ;;  %v3178_v46 = vpack.c.bf16 %v520_v38, %v520_v38  ;;  %v2641_v37 = vld [vmem:[%s3649_s7 + $0x34] ss:$8 sps:$4 sm:$0xff]   ;;  %v2645_v38 = vld [vmem:[%s3649_s7 + $0x20] ss:$8 sps:$4 sm:$0xff]  }
  0x44   : > { %v2653_v41 = vld [vmem:[%s3649_s7 + $0x14] ss:$8 sps:$4 sm:$0xff]  }
  0x45   : > { %949 = vmatpush2.bf16.msra.mxu0 %v2564_v47  ;;  %v2599_v47 = vld [vmem:[%s3645_s3 + $0x70] sm:$0xff]   ;;  %1001 = vmatprep.mubr.bf16.mxu1 %v3171_v42 }
  0x46   : > { %990 = vmatpush2.bf16.msra.mxu1 %v2565_v48  ;;  %950 = vmatprep.subr.bf16.mxu0 %v2566_v50  ;;  %v2600_v48 = vld [vmem:[%s3645_s3 + $0x30] sm:$0xff]   ;;  %v2602_v50 = vld [vmem:[%s3645_s3 + $0x28] sm:$0xff]  }
  0x47   : > { %991 = vmatprep.subr.bf16.mxu1 %v2568_v51  ;;  %v2603_v51 = vld [vmem:[%s3645_s3 + $0x60] sm:$0xff]  }
  0x49   : > { %951 = vmatpush2.bf16.msra.mxu0 %v2570_v52  ;;  %v2604_v52 = vld [vmem:[%s3645_s3 + $0x20] sm:$0xff]  }
  0x4a   : > { %992 = vmatpush2.bf16.msra.mxu1 %v2571_v53  ;;  %952 = vmatprep.subr.bf16.mxu0 %v2572_v55  ;;  %v2605_v53 = vld [vmem:[%s3645_s3 + $0x58] sm:$0xff]   ;;  %v2607_v55 = vld [vmem:[%s3645_s3 + $0x50] sm:$0xff]  }
  0x4b   : > { %993 = vmatprep.subr.bf16.mxu1 %v2574_v58  ;;  %v2610_v58 = vld [vmem:[%s3645_s3 + $0x8] sm:$0xff]  }
  0x4d   : > { %953 = vmatpush2.bf16.msra.mxu0 %v2576_v62  ;;  %v2834_v62 = vmov 0.0  }
  0x4e   : > { %994 = vmatpush2.bf16.msra.mxu1 %v2577_v63  ;;  %954 = vmatprep.subr.bf16.mxu0 %v2578_v1  ;;  %v2614_v63 = vld [vmem:[%s3647_s5 + $0x30] sm:$0xff]   ;;  %v2616_v1 = vld [vmem:[%s3647_s5 + $0x20] sm:$0xff]  }
  0x4f   : > { %995 = vmatprep.subr.bf16.mxu1 %v2580_v5  ;;  %v596_v5 = vld [vmem:[%s3644_s2] sm:$0x3] }
  0x50   : > { %v921_v7 = vrot.slane %v596_v5, %v920_v4  ;;  %v925_v8 = vrot.slane %v596_v5, %v924_v6 }
  0x51   : > { %955 = vmatpush2.bf16.msra.mxu0 %v2582_v10 }
  0x52   : > { %996 = vmatpush2.bf16.msra.mxu1 %v2583_v15  ;;  %956 = vmatprep.subr.bf16.mxu0 %v2584_v16 }
  0x53   : > { %997 = vmatprep.subr.bf16.mxu1 %v2586_v21 }
  0x55   : > { %957 = vmatpush2.bf16.msra.mxu0 %v2588_v22 }
  0x56   : > { %998 = vmatpush2.bf16.msra.mxu1 %v2589_v23  ;;  %958 = vmatprep.subr.bf16.mxu0 %v2590_v28  ;;  %v2625_v28 = vld [vmem:[%s3649_s7 + $0x64] ss:$8 sps:$4 sm:$0xff]  }
  0x57   : > { %999 = vmatprep.subr.bf16.mxu1 %v2592_v29  ;;  %v2623_v29 = vld [vmem:[%s3649_s7 + $0x60] ss:$8 sps:$4 sm:$0xff]  }
  0x59   : > { %959 = vmatpush2.bf16.msra.mxu0 %v2594_v33  ;;  %v2627_v33 = vld [vmem:[%s3649_s7 + $0x50] ss:$8 sps:$4 sm:$0xff]  }
  0x5a   : > { %1000 = vmatpush2.bf16.msra.mxu1 %v2595_v34  ;;  %2351 = vmatprep.subr.bf16.mxu0 %v2597_v39  ;;  %v2633_v34 = vld [vmem:[%s3649_s7 + $0x40] ss:$8 sps:$4 sm:$0xff]   ;;  %v2647_v39 = vld [vmem:[%s3649_s7 + $0x24] ss:$8 sps:$4 sm:$0xff]  }
  0x5b   : > { %2413 = vmatprep.subr.bf16.mxu1 %v2834_v62 }
  0x5c   : > { %961 = vmatmul.mubr.bf16.vlgmr.msra.gmra.mxu0 %v3176_v45 }
  0x5d   : > { %1002 = vmatmul.mubr.bf16.vlgmr.msra.gmra.mxu1 %v3178_v46  ;;  %2352 = vmatpush3.bf16.msra.mxu0 %v2598_v44  ;;  %v2657_v44 = vld [vmem:[%s3649_s7] ss:$8 sps:$4 sm:$0xff]  }
  0x5e   : > { %2353 = vmatprep.subr.bf16.mxu0 %v2599_v47  ;;  %2414 = vmatpush3.bf16.msra.mxu1 %v2613_v61  ;;  %v2659_v47 = vld [vmem:[%s3649_s7 + $0x4] ss:$8 sps:$4 sm:$0xff]   ;;  %v2701_v61 = vld [vmem:[%s3649_s7 + $0x94] ss:$8 sps:$4 sm:$0xff]  }
  0x5f   : > { %2415 = vmatprep.subr.bf16.mxu1 %v2834_v62  ;;  %2429 = vmatprep.mubr.msk.bf16.mxu1 %vm2835_vm1, %v2834_v62 }
  0x61   : > { %2354 = vmatpush3.bf16.msra.mxu0 %v2600_v48  ;;  %v2663_v48 = vld [vmem:[%s3649_s7 + $0xf0] ss:$8 sps:$4 sm:$0xff]  }
  0x62   : > { %2355 = vmatprep.subr.bf16.mxu0 %v2601_v49  ;;  %2416 = vmatpush3.bf16.msra.mxu1 %v2614_v63  ;;  %v2665_v49 = vld [vmem:[%s3649_s7 + $0xf4] ss:$8 sps:$4 sm:$0xff]   ;;  %v2705_v63 = vld [vmem:[%s3649_s7 + $0x80] ss:$8 sps:$4 sm:$0xff]  }
  0x63   : > { %2417 = vmatprep.subr.bf16.mxu1 %v2834_v62 }
  0x65   : > { %2356 = vmatpush3.bf16.msra.mxu0 %v2602_v50  ;;  %v2669_v50 = vld [vmem:[%s3649_s7 + $0xe0] ss:$8 sps:$4 sm:$0xff]  }
  0x66   : > { %2357 = vmatprep.subr.bf16.mxu0 %v2603_v51  ;;  %2418 = vmatpush3.bf16.msra.mxu1 %v2615_v0  ;;  %v2671_v51 = vld [vmem:[%s3649_s7 + $0xe4] ss:$8 sps:$4 sm:$0xff]  }
  0x67   : > { %2419 = vmatprep.subr.bf16.mxu1 %v2834_v62  ;;  %v2707_v0 = vld [vmem:[%s3649_s7 + $0x84] ss:$8 sps:$4 sm:$0xff]  }
  0x69   : > { %2358 = vmatpush3.bf16.msra.mxu0 %v2604_v52  ;;  %v2675_v52 = vld [vmem:[%s3649_s7 + $0xd0] ss:$8 sps:$4 sm:$0xff]  }
  0x6a   : > { %2359 = vmatprep.subr.bf16.mxu0 %v2605_v53  ;;  %2420 = vmatpush3.bf16.msra.mxu1 %v2616_v1  ;;  %v2677_v53 = vld [vmem:[%s3649_s7 + $0xd4] ss:$8 sps:$4 sm:$0xff]  }
  0x6b   : > { %2421 = vmatprep.subr.bf16.mxu1 %v2834_v62 }
  0x6d   : > { %2360 = vmatpush3.bf16.msra.mxu0 %v2606_v54  ;;  %v2681_v54 = vld [vmem:[%s3649_s7 + $0xc0] ss:$8 sps:$4 sm:$0xff]  }
  0x6e   : > { %2361 = vmatprep.subr.bf16.mxu0 %v2607_v55  ;;  %2422 = vmatpush3.bf16.msra.mxu1 %v2617_v2  ;;  %v2683_v55 = vld [vmem:[%s3649_s7 + $0xc4] ss:$8 sps:$4 sm:$0xff]   ;;  %v1046_v2 = vld [vmem:[%s3646_s4] sm:$0x1] }
  0x6f   : > { %2423 = vmatprep.subr.bf16.mxu1 %v2834_v62 }
  0x71   : > { %2362 = vmatpush3.bf16.msra.mxu0 %v2608_v56  ;;  %v2687_v56 = vld [vmem:[%s3649_s7 + $0xb0] ss:$8 sps:$4 sm:$0xff]  }
  0x72   : > { %2363 = vmatprep.subr.bf16.mxu0 %v2609_v57  ;;  %2424 = vmatpush3.bf16.msra.mxu1 %v2618_v3  ;;  %v2689_v57 = vld [vmem:[%s3649_s7 + $0xb4] ss:$8 sps:$4 sm:$0xff]  }
  0x73   : > { %2425 = vmatprep.subr.bf16.mxu1 %v2834_v62 }
  0x75   : > { %2364 = vmatpush3.bf16.msra.mxu0 %v2610_v58  ;;  %v2693_v58 = vld [vmem:[%s3649_s7 + $0xa0] ss:$8 sps:$4 sm:$0xff]  }
  0x76   : > { %2365 = vmatprep.subr.bf16.mxu0 %v2611_v59  ;;  %2426 = vmatpush3.bf16.msra.mxu1 %v2622_v27  ;;  %v2695_v59 = vld [vmem:[%s3649_s7 + $0xa4] ss:$8 sps:$4 sm:$0xff]  }
  0x77   : > { %2427 = vmatprep.subr.bf16.mxu1 %v2834_v62  ;;  %v2686_v27 = vld [vmem:[%s3649_s7 + $0x1e4] ss:$8 sps:$4 sm:$0xff]  }
  0x79   : > { %2366 = vmatpush3.bf16.msra.mxu0 %v2612_v60  ;;  %v2699_v60 = vld [vmem:[%s3649_s7 + $0x90] ss:$8 sps:$4 sm:$0xff]  }
  0x7a   : > { %1688 = vmatprep.subr.bf16.mxu0 %v2621_v25  ;;  %2428 = vmatpush3.bf16.msra.mxu1 %v2626_v30  ;;  %v2680_v25 = vld [vmem:[%s3649_s7 + $0x1f4] ss:$8 sps:$4 sm:$0xff]   ;;  %v2690_v30 = vld [vmem:[%s3649_s7 + $0x1d0] ss:$8 sps:$4 sm:$0xff]  }
  0x7b   : > { %1729 = vmatprep.subr.bf16.mxu1 %v2632_v32  ;;  %v2696_v32 = vld [vmem:[%s3649_s7 + $0x1c0] ss:$8 sps:$4 sm:$0xff]  }
 0x11c   : > { %v962_v9 = vpop.f32.mrf.mxu0 }
 0x11d   : > { %v1003_v10 = vpop.f32.mrf.mxu1  ;;  %v963_v11 = vadd.f32 %v962_v9, %v921_v7 }
 0x11e   : > { %v964_v12 = vpop.f32.mrf.mxu0 }
 0x11f   : > { %v1005_v13 = vpop.f32.mrf.mxu1  ;;  %v1004_v14 = vadd.f32 %v1003_v10, %v963_v11  ;;  %v965_v15 = vadd.f32 %v964_v12, %v925_v8  ;;  %v2630_v11 = vld [vmem:[%s3649_s7 + $0x170] ss:$8 sps:$4 sm:$0xff]  }
 0x120   : > { %v966_v16 = vpop.f32.mrf.mxu0 }
 0x121   : > { %v1007_v17 = vpop.f32.mrf.mxu1  ;;  %v1006_v18 = vadd.f32 %v1005_v13, %v965_v15  ;;  %v1010_v19 = vmax.f32 %v1004_v14, 0.0  ;;  %v2636_v13 = vld [vmem:[%s3649_s7 + $0x160] ss:$8 sps:$4 sm:$0xff]   ;;  %v2644_v14 = vld [vmem:[%s3649_s7 + $0x154] ss:$8 sps:$4 sm:$0xff]  }
 0x122   : > { %v967_v20 = vpop.f32.mrf.mxu0  ;;  %v2642_v15 = vld [vmem:[%s3649_s7 + $0x150] ss:$8 sps:$4 sm:$0xff]   ;;  %v2650_v16 = vld [vmem:[%s3649_s7 + $0x144] ss:$8 sps:$4 sm:$0xff]   ;;  %v2656_v17 = vld [vmem:[%s3649_s7 + $0x134] ss:$8 sps:$4 sm:$0xff]  }
 0x123   : > { %v1008_v21 = vpop.f32.mrf.mxu1  ;;  %v1011_v22 = vmax.f32 %v1006_v18, 0.0  ;;  %v1012_v24 = vpack.c.bf16 %v1010_v19, %v1010_v19  ;;  %v2654_v18 = vld [vmem:[%s3649_s7 + $0x130] ss:$8 sps:$4 sm:$0xff]   ;;  %v2662_v19 = vld [vmem:[%s3649_s7 + $0x124] ss:$8 sps:$4 sm:$0xff]  }
 0x124   : > { %v2660_v20 = vld [vmem:[%s3649_s7 + $0x120] ss:$8 sps:$4 sm:$0xff]   ;;  %v2668_v21 = vld [vmem:[%s3649_s7 + $0x114] ss:$8 sps:$4 sm:$0xff]  }
 0x125   : > { %v1013_v23 = vpack.c.bf16 %v1011_v22, %v1011_v22  ;;  %v2666_v22 = vld [vmem:[%s3649_s7 + $0x110] ss:$8 sps:$4 sm:$0xff]  }
 0x127   : > { %1175 = vmatprep.mubr.bf16.mxu0 %v1013_v23  ;;  %v2674_v23 = vld [vmem:[%s3649_s7 + $0x104] ss:$8 sps:$4 sm:$0xff]  }
 0x128   : > { %1176 = vmatmul.mubr.bf16.vlgmr.msra.gmra.mxu0 %v1012_v24  ;;  %v2672_v24 = vld [vmem:[%s3649_s7 + $0x100] ss:$8 sps:$4 sm:$0xff]  }
 0x129   : > { %1720 = vmatprep.mubr.bf16.mxu0 %v3168_v40  ;;  %1689 = vmatpush1.bf16.msra.mxu0 %v2619_v26  ;;  %v2651_v40 = vld [vmem:[%s3649_s7 + $0x10] ss:$8 sps:$4 sm:$0xff]  }
 0x12a   : > { %1690 = vmatprep.subr.bf16.mxu0 %v2625_v28  ;;  %v2678_v26 = vld [vmem:[%s3649_s7 + $0x1f0] ss:$8 sps:$4 sm:$0xff]   ;;  %v2684_v28 = vld [vmem:[%s3649_s7 + $0x1e0] ss:$8 sps:$4 sm:$0xff]  }
 0x12d   : > { %1691 = vmatpush1.bf16.msra.mxu0 %v2623_v29  ;;  %v2692_v29 = vld [vmem:[%s3649_s7 + $0x1d4] ss:$8 sps:$4 sm:$0xff]  }
 0x12e   : > { %1692 = vmatprep.subr.bf16.mxu0 %v2629_v31  ;;  %v2698_v31 = vld [vmem:[%s3649_s7 + $0x1c4] ss:$8 sps:$4 sm:$0xff]  }
 0x131   : > { %1693 = vmatpush1.bf16.msra.mxu0 %v2627_v33  ;;  %v2704_v33 = vld [vmem:[%s3649_s7 + $0x1b4] ss:$8 sps:$4 sm:$0xff]  }
 0x132   : > { %1694 = vmatprep.subr.bf16.mxu0 %v2635_v35  ;;  %v2710_v35 = vld [vmem:[%s3649_s7 + $0x1a4] ss:$8 sps:$4 sm:$0xff]  }
 0x135   : > { %1695 = vmatpush1.bf16.msra.mxu0 %v2633_v34  ;;  %v2702_v34 = vld [vmem:[%s3649_s7 + $0x1b0] ss:$8 sps:$4 sm:$0xff]  }
 0x136   : > { %1696 = vmatprep.subr.bf16.mxu0 %v2641_v37  ;;  %v2713_v37 = vld [vmem:[%s3649_s7 + $0x194] ss:$8 sps:$4 sm:$0xff]  }
 0x139   : > { %1697 = vmatpush1.bf16.msra.mxu0 %v2639_v36  ;;  %v2708_v36 = vld [vmem:[%s3649_s7 + $0x1a0] ss:$8 sps:$4 sm:$0xff]  }
 0x13a   : > { %1698 = vmatprep.subr.bf16.mxu0 %v2647_v39  ;;  %v2716_v39 = vld [vmem:[%s3649_s7 + $0x184] ss:$8 sps:$4 sm:$0xff]  }
 0x13d   : > { %1699 = vmatpush1.bf16.msra.mxu0 %v2645_v38  ;;  %v2711_v38 = vld [vmem:[%s3649_s7 + $0x190] ss:$8 sps:$4 sm:$0xff]  }
 0x13e   : > { %1700 = vmatprep.subr.bf16.mxu0 %v2653_v41  ;;  %v2717_v41 = vld [vmem:[%s3651_s9 + $0x78] sm:$0xff]  }
 0x141   : > { %1701 = vmatpush1.bf16.msra.mxu0 %v2651_v40  ;;  %v2714_v40 = vld [vmem:[%s3649_s7 + $0x180] ss:$8 sps:$4 sm:$0xff]  }
 0x142   : > { %1702 = vmatprep.subr.bf16.mxu0 %v2659_v47  ;;  %v2719_v47 = vld [vmem:[%s3651_s9 + $0x70] sm:$0xff]  }
 0x145   : > { %1703 = vmatpush1.bf16.msra.mxu0 %v2657_v44  ;;  %v2718_v44 = vld [vmem:[%s3651_s9 + $0x38] sm:$0xff]  }
 0x146   : > { %1704 = vmatprep.subr.bf16.mxu0 %v2665_v49  ;;  %v2722_v49 = vld [vmem:[%s3651_s9 + $0x28] sm:$0xff]  }
 0x149   : > { %1705 = vmatpush2.bf16.msra.mxu0 %v2663_v48  ;;  %v2721_v48 = vld [vmem:[%s3651_s9 + $0x68] sm:$0xff]  }
 0x14a   : > { %1706 = vmatprep.subr.bf16.mxu0 %v2671_v51  ;;  %v2724_v51 = vld [vmem:[%s3651_s9 + $0x20] sm:$0xff]  }
 0x14d   : > { %1707 = vmatpush2.bf16.msra.mxu0 %v2669_v50  ;;  %v2723_v50 = vld [vmem:[%s3651_s9 + $0x60] sm:$0xff]  }
 0x14e   : > { %1708 = vmatprep.subr.bf16.mxu0 %v2677_v53  ;;  %v2726_v53 = vld [vmem:[%s3651_s9 + $0x18] sm:$0xff]  }
 0x151   : > { %1709 = vmatpush2.bf16.msra.mxu0 %v2675_v52  ;;  %v2725_v52 = vld [vmem:[%s3651_s9 + $0x58] sm:$0xff]  }
 0x152   : > { %1710 = vmatprep.subr.bf16.mxu0 %v2683_v55  ;;  %v2728_v55 = vld [vmem:[%s3651_s9 + $0x10] sm:$0xff]  }
 0x155   : > { %1711 = vmatpush2.bf16.msra.mxu0 %v2681_v54  ;;  %v2727_v54 = vld [vmem:[%s3651_s9 + $0x50] sm:$0xff]  }
 0x156   : > { %1712 = vmatprep.subr.bf16.mxu0 %v2689_v57 }
 0x159   : > { %1713 = vmatpush2.bf16.msra.mxu0 %v2687_v56 }
 0x15a   : > { %1714 = vmatprep.subr.bf16.mxu0 %v2695_v59 }
 0x15d   : > { %1715 = vmatpush2.bf16.msra.mxu0 %v2693_v58 }
 0x15e   : > { %1716 = vmatprep.subr.bf16.mxu0 %v2701_v61  ;;  %v2730_v61 = vld [vmem:[%s3651_s9 + $0x8] sm:$0xff]  }
 0x161   : > { %1717 = vmatpush2.bf16.msra.mxu0 %v2699_v60  ;;  %v2729_v60 = vld [vmem:[%s3651_s9 + $0x48] sm:$0xff]  }
 0x162   : > { %1718 = vmatprep.subr.bf16.mxu0 %v2707_v0  ;;  %v2732_v0 = vld [vmem:[%s3651_s9] sm:$0xff]  }
 0x165   : > { %1719 = vmatpush2.bf16.msra.mxu0 %v2705_v63  ;;  %v2731_v63 = vld [vmem:[%s3651_s9 + $0x40] sm:$0xff]  }
 0x166   : > { %2382 = vmatprep.subr.bf16.mxu0 %v2717_v41 }
 0x168   : > { %1721 = vmatmul.mubr.bf16.vlgmr.msra.gmra.mxu0 %v3176_v45  ;;  %v2638_v45 = vld [vmem:[%s3649_s7 + $0x164] ss:$8 sps:$4 sm:$0xff]  }
 0x169   : > { %2383 = vmatpush3.bf16.msra.mxu0 %v2718_v44 }
 0x16a   : > { %2384 = vmatprep.subr.bf16.mxu0 %v2719_v47 }
 0x1e8   : > { %v2367_v1 = vpop.f32.mrf.mxu0 }
 0x1ea   : > { %v2368_v3 = vpop.f32.mrf.mxu0 }
 0x1eb   : > { %v2369_v5 = vadd.f32 %v2368_v3, %v2367_v1  ;;  %v2733_v1 = vld [vmem:[%s3653_s11 + $0x38] sm:$0xff]   ;;  %v2735_v3 = vld [vmem:[%s3653_s11 + $0x28] sm:$0xff]  }
 0x1ec   : > { %v2370_v7 = vpop.f32.mrf.mxu0 }
 0x1ed   : > { %v1178_v8 = vadd.f32 %v2369_v5, %v1046_v2  ;;  %v2734_v2 = vld [vmem:[%s3653_s11 + $0x30] sm:$0xff]   ;;  %v2736_v5 = vld [vmem:[%s3653_s11 + $0x20] sm:$0xff]   ;;  %v2737_v7 = vld [vmem:[%s3653_s11 + $0x18] sm:$0xff]  }
 0x1ee   : > { %v2371_v9 = vpop.f32.mrf.mxu0 }
 0x1ef   : > { %v1183_v10 = vmax.f32 %v1178_v8, 0.0  ;;  %v1201_v8 = vld [vmem:[%s3648_s6] sm:$0x1] }
 0x1f1   : > { %v1184_v12 = vpack.c.bf16 %v1183_v10, %v1183_v10 }
 0x1f3   : > { %2430 = vmatmul.mubr.bf16.vlgmr.msra.gmra.mxu1 %v1184_v12 }
 0x1f4   : > { %1730 = vmatpush1.bf16.msra.mxu1 %v2630_v11  ;;  %1761 = vmatprep.mubr.bf16.mxu1 %v3171_v42  ;;  %v2648_v42 = vld [vmem:[%s3649_s7 + $0x140] ss:$8 sps:$4 sm:$0xff]  }
 0x1f5   : > { %1731 = vmatprep.subr.bf16.mxu1 %v2638_v45 }
 0x1f8   : > { %1732 = vmatpush1.bf16.msra.mxu1 %v2636_v13  ;;  %v1356_v13 = vld [vmem:[%s3650_s8] sm:$0x3] }
 0x1f9   : > { %1733 = vmatprep.subr.bf16.mxu1 %v2644_v14  ;;  %v1681_v14 = vrot.slane %v1356_v13, %v920_v4  ;;  %v2738_v4 = vld [vmem:[%s3653_s11 + $0x10] sm:$0xff]  }
 0x1fc   : > { %1734 = vmatpush1.bf16.msra.mxu1 %v2642_v15 }
 0x1fd   : > { %1735 = vmatprep.subr.bf16.mxu1 %v2650_v16  ;;  %v1685_v16 = vrot.slane %v1356_v13, %v924_v6  ;;  %v2740_v6 = vld [vmem:[%s3653_s11] sm:$0xff]  }
 0x200   : > { %1736 = vmatpush1.bf16.msra.mxu1 %v2648_v42 }
 0x201   : > { %1737 = vmatprep.subr.bf16.mxu1 %v2656_v17 }
 0x204   : > { %1738 = vmatpush1.bf16.msra.mxu1 %v2654_v18 }
 0x205   : > { %1739 = vmatprep.subr.bf16.mxu1 %v2662_v19 }
 0x208   : > { %1740 = vmatpush1.bf16.msra.mxu1 %v2660_v20 }
 0x209   : > { %1741 = vmatprep.subr.bf16.mxu1 %v2668_v21 }
 0x20c   : > { %1742 = vmatpush1.bf16.msra.mxu1 %v2666_v22 }
 0x20d   : > { %1743 = vmatprep.subr.bf16.mxu1 %v2674_v23 }
 0x210   : > { %1744 = vmatpush1.bf16.msra.mxu1 %v2672_v24 }
 0x211   : > { %1745 = vmatprep.subr.bf16.mxu1 %v2680_v25 }
 0x214   : > { %1746 = vmatpush2.bf16.msra.mxu1 %v2678_v26 }
 0x215   : > { %1747 = vmatprep.subr.bf16.mxu1 %v2686_v27 }
 0x218   : > { %1748 = vmatpush2.bf16.msra.mxu1 %v2684_v28  ;;  %v1806_v28 = vld [vmem:[%s3652_s10] sm:$0x1] }
 0x219   : > { %1749 = vmatprep.subr.bf16.mxu1 %v2692_v29 }
 0x21c   : > { %1750 = vmatpush2.bf16.msra.mxu1 %v2690_v30 }
 0x21d   : > { %1751 = vmatprep.subr.bf16.mxu1 %v2698_v31 }
 0x220   : > { %1752 = vmatpush2.bf16.msra.mxu1 %v2696_v32 }
 0x221   : > { %1753 = vmatprep.subr.bf16.mxu1 %v2704_v33 }
 0x224   : > { %1754 = vmatpush2.bf16.msra.mxu1 %v2702_v34 }
 0x225   : > { %1755 = vmatprep.subr.bf16.mxu1 %v2710_v35 }
 0x228   : > { %1756 = vmatpush2.bf16.msra.mxu1 %v2708_v36  ;;  %v1722_v56 = vpop.f32.mrf.mxu0 }
 0x229   : > { %1757 = vmatprep.subr.bf16.mxu1 %v2713_v37  ;;  %v1723_v15 = vadd.f32 %v1722_v56, %v1681_v14 }
 0x22a   : > { %v1724_v57 = vpop.f32.mrf.mxu0 }
 0x22b   : > { %v1725_v17 = vadd.f32 %v1724_v57, %v1685_v16 }
 0x22c   : > { %1758 = vmatpush2.bf16.msra.mxu1 %v2711_v38  ;;  %v1726_v58 = vpop.f32.mrf.mxu0 }
 0x22d   : > { %1759 = vmatprep.subr.bf16.mxu1 %v2716_v39 }
 0x22e   : > { %v1727_v59 = vpop.f32.mrf.mxu0 }
 0x230   : > { %1760 = vmatpush2.bf16.msra.mxu1 %v2714_v40 }
 0x231   : > { %2433 = vmatprep.subr.bf16.mxu1 %v2834_v62 }
 0x233   : > { %1762 = vmatmul.mubr.bf16.vlgmr.msra.gmra.mxu1 %v3178_v46  ;;  %v2720_v46 = vld [vmem:[%s3651_s9 + $0x30] sm:$0xff]  }
 0x234   : > { %2449 = vmatprep.mubr.msk.bf16.mxu1 %vm2835_vm1, %v2834_v62  ;;  %2385 = vmatpush3.bf16.msra.mxu0 %v2720_v46 }
 0x235   : > { %2386 = vmatprep.subr.bf16.mxu0 %v2721_v48  ;;  %2434 = vmatpush3.bf16.msra.mxu1 %v2733_v1 }
 0x236   : > { %2435 = vmatprep.subr.bf16.mxu1 %v2834_v62 }
 0x238   : > { %2387 = vmatpush3.bf16.msra.mxu0 %v2722_v49 }
 0x239   : > { %2388 = vmatprep.subr.bf16.mxu0 %v2723_v50  ;;  %2436 = vmatpush3.bf16.msra.mxu1 %v2734_v2 }
 0x23a   : > { %2437 = vmatprep.subr.bf16.mxu1 %v2834_v62 }
 0x23c   : > { %2389 = vmatpush3.bf16.msra.mxu0 %v2724_v51 }
 0x23d   : > { %2390 = vmatprep.subr.bf16.mxu0 %v2725_v52  ;;  %2438 = vmatpush3.bf16.msra.mxu1 %v2735_v3 }
 0x23e   : > { %2439 = vmatprep.subr.bf16.mxu1 %v2834_v62 }
 0x240   : > { %2391 = vmatpush3.bf16.msra.mxu0 %v2726_v53 }
 0x241   : > { %2392 = vmatprep.subr.bf16.mxu0 %v2727_v54  ;;  %2440 = vmatpush3.bf16.msra.mxu1 %v2736_v5 }
 0x242   : > { %2441 = vmatprep.subr.bf16.mxu1 %v2834_v62 }
 0x244   : > { %2393 = vmatpush3.bf16.msra.mxu0 %v2728_v55 }
 0x245   : > { %2394 = vmatprep.subr.bf16.mxu0 %v2729_v60  ;;  %2442 = vmatpush3.bf16.msra.mxu1 %v2737_v7 }
 0x246   : > { %2443 = vmatprep.subr.bf16.mxu1 %v2834_v62 }
 0x248   : > { %2395 = vmatpush3.bf16.msra.mxu0 %v2730_v61 }
 0x249   : > { %2396 = vmatprep.subr.bf16.mxu0 %v2731_v63  ;;  %2444 = vmatpush3.bf16.msra.mxu1 %v2738_v4 }
 0x24a   : > { %2445 = vmatprep.subr.bf16.mxu1 %v2834_v62 }
 0x24c   : > { %2397 = vmatpush3.bf16.msra.mxu0 %v2732_v0 }
 0x24d   : > { %2446 = vmatpush3.bf16.msra.mxu1 %v2739_v43 }
 0x24e   : > { %2447 = vmatprep.subr.bf16.mxu1 %v2834_v62 }
 0x251   : > { %2448 = vmatpush3.bf16.msra.mxu1 %v2740_v6 }
 0x2b3   : > { %v1284_v9 = vpop.f32.mrf.mxu1 }
 0x2b4   : > { %v1285_v10 = vadd.f32 %v1284_v9, %v1201_v8 }
 0x2b5   : > { %v2431_v11 = vpop.f32.mrf.mxu1 }
 0x2b6   : > { %1291 = vst.msk [vmem:[%s463_s27] sm:$0x1] %vm1290_vm2, %v1285_v10 }
 0x2b7   : > { %v1287_v12 = vpop.f32.mrf.mxu1 }
 0x2b9   : > { %v2432_v45 = vpop.f32.mrf.mxu1 }
 0x2f3   : > { %v1763_v42 = vpop.f32.mrf.mxu1 }
 0x2f4   : > { %v1764_v18 = vadd.f32 %v1763_v42, %v1723_v15 }
 0x2f5   : > { %v1765_v19 = vpop.f32.mrf.mxu1 }
 0x2f6   : > { %v1766_v20 = vadd.f32 %v1765_v19, %v1725_v17  ;;  %v1770_v21 = vmax.f32 %v1764_v18, 0.0 }
 0x2f7   : > { %v1767_v22 = vpop.f32.mrf.mxu1 }
 0x2f8   : > { %v1771_v23 = vmax.f32 %v1766_v20, 0.0  ;;  %v1772_v26 = vpack.c.bf16 %v1770_v21, %v1770_v21 }
 0x2f9   : > { %v1768_v24 = vpop.f32.mrf.mxu1 }
 0x2fa   : > { %v1773_v25 = vpack.c.bf16 %v1771_v23, %v1771_v23 }
 0x2fc   : > { %1935 = vmatprep.mubr.bf16.mxu0 %v1773_v25 }
 0x2fd   : > { %1936 = vmatmul.mubr.bf16.vlgmr.msra.gmra.mxu0 %v1772_v26 }
 0x3bd   : > { %v2398_v27 = vpop.f32.mrf.mxu0 }
 0x3bf   : > { %v2399_v29 = vpop.f32.mrf.mxu0 }
 0x3c0   : > { %v2400_v30 = vadd.f32 %v2399_v29, %v2398_v27 }
 0x3c1   : > { %v2401_v31 = vpop.f32.mrf.mxu0 }
 0x3c2   : > { %v1938_v32 = vadd.f32 %v2400_v30, %v1806_v28 }
 0x3c3   : > { %v2402_v33 = vpop.f32.mrf.mxu0 }
 0x3c4   : > { %v1943_v34 = vmax.f32 %v1938_v32, 0.0 }
 0x3c6   : > { %v1944_v35 = vpack.c.bf16 %v1943_v34, %v1943_v34 }
 0x3c8   : > { %2450 = vmatmul.mubr.bf16.vlgmr.msra.gmra.mxu1 %v1944_v35 }
 0x3c9   : > { %2754 = shalt.err (!%p2751_p3)
}
 0x3ca   : > { %s2755_s27 = scalar_lea.hbm %s2066_s21, 16  ;;  %s2759_s20 = scalar_lea.hbm %s3655_s13, 32 }
 0x3cb   : > { %p2756_p4 = scmp.ne.s32.totalorder %s2066_s21, %s2755_s27  ;;  %p2760_p9 = scmp.lt.s32.totalorder %s2066_s21, %s3655_s13 }
 0x3cc   : > { %p2761_p10 = scmp.lt.s32.totalorder %s2759_s20, %s2755_s27 }
 0x3cd   : > { %p2757_p7 = pnand %p2756_p4, %p2951_p5 }
 0x3ce   : > { %p2762_p11 = por %p2761_p10, %p2760_p9 }
 0x3cf   : > { %p2758_p8 = pneg %p2757_p7 }
 0x3d1   : > { %p2763_p12 = pnand %p2762_p11, %p2758_p8 }
 0x3d3   : > { %2766 = shalt.err (!%p2763_p12)
}
 0x3d4   : > { %2453 = dma.vmem_to_hbm [thread:$0]  (%p2951_p5), %s2069_s22, 16, %s2066_s21, %s2052_s28   ;;  %v1961_v62 = vld [vmem:[%s3654_s12] sm:$0x1] }
 0x3d5   : > { %s469_s18 = scalar_lea.vmem [#allocation4], %s3539_s25  ;;  %s3674_s0 = sshll.u32 %s2934_s17, 4 }
 0x3d6   : > { %s2081_s26 = sshll.u32 %s469_s18, 4  ;;  %s3599_s27 = scalar_lea.hbm %s3656_s14, %s3674_s0  ;;  %s3601_s26 = int_to_ptr.vmem [resolvable:$true] %s2081_s26 }
 0x3d7   : > { %s2056_s22 = scalar_lea.sflag [#allocation5], %s3539_s25  ;;  %s2767_s21 = scalar_lea.vmem %s3601_s26, 16 }
 0x3d8   : > { %p2768_p13 = scmp.ne.s32.totalorder %s3601_s26, %s2767_s21  ;;  %s2837_s17 = smov [#allocation4]  }
 0x3d9   : > { %s2771_s28 = sshll.u32 %s2837_s17, 4  ;;  %s2772_s28 = int_to_ptr.vmem [resolvable:$false] %s2771_s28 }
 0x3da   : > { %p2769_p0 = pnand %p2768_p13, %p2951_p5  ;;  %s2773_s29 = scalar_lea.vmem %s2772_s28, 32 }
 0x3db   : > { %p2774_p2 = scmp.lt.s32.totalorder %s3601_s26, %s2772_s28  ;;  %p2775_p3 = scmp.lt.s32.totalorder %s2773_s29, %s2767_s21 }
 0x3dc   : > { %p2770_p1 = pneg %p2769_p0 }
 0x3dd   : > { %p2776_p4 = por %p2775_p3, %p2774_p2 }
 0x3df   : > { %p2777_p7 = pnand %p2776_p4, %p2770_p1 }
 0x488   : > { %v2044_v36 = vpop.f32.mrf.mxu1 }
 0x489   : > { %v2045_v37 = vadd.f32 %v2044_v36, %v1961_v62 }
 0x48a   : > { %v2451_v38 = vpop.f32.mrf.mxu1 }
 0x48b   : > { %2050 = vst.msk [vmem:[%s469_s18] sm:$0x1] %vm1290_vm2, %v2045_v37 }
 0x48c   : > { %v2047_v39 = vpop.f32.mrf.mxu1 }
 0x48d   : > { %2780 = shalt.err (!%p2777_p7)
}
 0x48e   : > { %s2781_s24 = scalar_lea.hbm %s3599_s27, 16  ;;  %s2785_s19 = scalar_lea.hbm %s3656_s14, 32 }
 0x48f   : > { %p2782_p8 = scmp.ne.s32.totalorder %s3599_s27, %s2781_s24  ;;  %p2786_p11 = scmp.lt.s32.totalorder %s3599_s27, %s3656_s14 }
 0x490   : > { %p2787_p12 = scmp.lt.s32.totalorder %s2785_s19, %s2781_s24 }
 0x491   : > { %p2783_p9 = pnand %p2782_p8, %p2951_p5 }
 0x492   : > { %p2788_p13 = por %p2787_p12, %p2786_p11 }
 0x493   : > { %p2784_p10 = pneg %p2783_p9 }
 0x495   : > { %p2789_p0 = pnand %p2788_p13, %p2784_p10 }
 0x497   : > { %2792 = shalt.err (!%p2789_p0)
}
 0x498   : > { %2454 = dma.vmem_to_hbm [thread:$0]  (%p2951_p5), %s3601_s26, 16, %s3599_s27, %s2056_s22   ;;  %v2452_v40 = vpop.f32.mrf.mxu1 }
 0x499 PF: > { %s3675_s1 = sld [smem:[#allocation8_spill]]  ;;  %p2464_p1 = scmp.ge.s32.totalorder %s2831_s16, 2 }
 0x49b   : > { %p2458_p2 = pnand %p2464_p1, %p2955_p6 }
 0x49d   : > { %p2459_p3 = pneg %p2458_p2 }
 0x49f   : > { %s2093_s21 = sand.u32 1, %s3675_s1  }
 0x4a0   : > { %s2094_s17 = scalar_lea.sflag [#allocation3], %s2093_s21 }
 0x4a1   : > { %2810 = dma.done.wait (%p2459_p3), %s2094_s17, 16  }
 0x4a2   : > { %2812 = vsyncadd (%p2459_p3), %s2094_s17, 4294967280  ;;  %s2102_s28 = scalar_lea.sflag [#allocation5], %s2093_s21 }
 0x4a3   : > { %2814 = dma.done.wait (%p2459_p3), %s2102_s28, 16  }
 0x4a4   : > { %2816 = vsyncadd (%p2459_p3), %s2102_s28, 4294967280  ;;  %s3677_s16 = sld [smem:[#allocation10_spill]]  ;;  %s3680_s29 = smov %s2823_s30 }
 0x4a5   : > { %s3678_s23 = sld [smem:[#allocation9_spill]] }
 0x4a6   : > { %s3679_s15 = sld [smem:[#allocation11_spill]] }
 0x4aa   : > { %p28_p5 = scmp.ge.s32.totalorder %s3677_s16, 4  }
 0x4ab   : > { %s3681_s30 = smov %s3678_s23 }
 0x4ac   :  { %30 = sbr.rel (!%p28_p5) target bundleno = 8 (0x8), region = 124 }
 0x4b1   :  { %2106 = vsyncpa [#allocation3], 1 }
 0x4b2   :  { %2108 = vsyncpa [#allocation3 + $0x1], 1 }
 0x4b3   :  { %2109 = vsyncpa [#allocation5], 1 }
 0x4b4   :  { %2111 = vsyncpa [#allocation5 + $0x1], 1 }

// kernel: encoder_forward.2
= control target key start
LH: loop header
LB: loop body
LE: loop exit
PB: predicated region body
PF: predicated region fallthrough
CT: control target
= control target key end

     0   :  { %s10524_s0 = inlined_call_operand.vmem [shape: f32[2,3,2048], index: 0, kind: input, shape index: {}]   ;;  %s10525_s1 = inlined_call_operand.vmem [shape: f32[128,3], index: 1, kind: input, shape index: {}]   ;;  %s10526_s2 = inlined_call_operand.vmem [shape: f32[128,1], index: 2, kind: input, shape index: {}]   ;;  %s10527_s3 = inlined_call_operand.vmem [shape: bf16[128,128], index: 3, kind: input, shape index: {}]   ;;  %s10528_s4 = inlined_call_operand.vmem [shape: f32[128,1], index: 4, kind: input, shape index: {}]   ;;  %s10529_s5 = inlined_call_operand.vmem [shape: bf16[256,128], index: 5, kind: input, shape index: {}]   ;;  %s10530_s6 = inlined_call_operand.vmem [shape: f32[256,1], index: 6, kind: input, shape index: {}]   ;;  %s10531_s7 = inlined_call_operand.vmem [shape: bf16[512,256], index: 7, kind: input, shape index: {}]   ;;  %s10532_s8 = inlined_call_operand.vmem [shape: f32[512,1], index: 8, kind: input, shape index: {}]   ;;  %s10533_s9 = inlined_call_operand.hbm [shape: bf16[2,512,2048], index: 9, kind: output, shape index: {0}]   ;;  %s10534_s10 = inlined_call_operand.vmem [shape: f32[2,2,512,1], index: 10, kind: output, shape index: {1}]  }
   0x1   :  { %10790 = sst [smem:[#allocation215_spill]] %s10531_s7 }
   0x2   :  { %10791 = sst [smem:[#allocation216_spill]] %s10533_s9 }
   0x3   :  { %16 = vsyncpa [#allocation3], 0 }
   0x4   :  { %18 = vsyncpa [#allocation3 + $0x1], 0  ;;  %s6637_s13 = smov 0   ;;  %s6639_s14 = smov 0  }
   0x5   :  { %s6641_s15 = smov 0   ;;  %s6643_s16 = smov 0  }
   0x6   :  { %s6645_s17 = smov 0   ;;  %s6647_s18 = smov 0  }
   0x7   :  { %s6649_s19 = smov 0   ;;  %s6651_s20 = smov 0  }
   0x8   :  { %s6653_s21 = smov 0   ;;  %s6655_s22 = smov 0  }
   0x9 LB: > { %10792 = sst [smem:[#allocation5_spill]] %s6536_s13  ;;  %s36_s23 = sadd.s32 1, %s6560_s19  ;;  %s6572_s22 = sphi %s6655_s22, %s24_s22   ;;  %s6568_s21 = sphi %s6653_s21, %s11439_s21   ;;  %s6564_s20 = sphi %s6651_s20, %s11438_s20   ;;  %s6560_s19 = sphi %s6649_s19, %s11437_s19   ;;  %s6556_s18 = sphi %s6647_s18, %s11430_s18   ;;  %s6552_s17 = sphi %s6645_s17, %s11429_s17   ;;  %s6548_s16 = sphi %s6643_s16, %s11436_s16   ;;  %s6544_s15 = sphi %s6641_s15, %s11435_s15   ;;  %s6540_s14 = sphi %s6639_s14, %s11434_s14   ;;  %s6536_s13 = sphi %s6637_s13, %s11428_s13  }
   0xa   : > { %10793 = sst [smem:[#allocation6_spill]] %s6540_s14  ;;  %p37_p0 = scmp.ge.s32.totalorder %s36_s23, 2 }
   0xb   : > { %10794 = sst [smem:[#allocation7_spill]] %s6564_s20  ;;  %s39_s24 = sadd.s32 1, %s6564_s20 }
   0xc   : > { %10795 = sst [smem:[#allocation8_spill]] %s6568_s21  ;;  %s5845_s25 = sadd.s32 4294967295, %s6572_s22  }
   0xd   : > { %s5846_s26 = sadd.s32 4294967294, %s6572_s22   ;;  %s11441_s23 = smov (%p37_p0, %s36_s23), 0 }
   0xe   : > { %10796 = sst [smem:[#allocation9_spill]] %s11441_s23  ;;  %s11443_s24 = smov (!%p37_p0, %s39_s24), %s6564_s20 }
   0xf   : > { %s43_s27 = sadd.s32 1, %s6568_s21  ;;  %p266_p1 = scmp.ne.s32.totalorder %s6544_s15, %s6540_s14 }
  0x10   : > { %p41_p2 = scmp.ge.s32.totalorder %s11443_s24, 2  ;;  %p267_p3 = scmp.eq.s32.totalorder %s5845_s25, 7 }
  0x11   : > { %p272_p4 = scmp.ne.s32.totalorder %s6540_s14, %s6536_s13  ;;  %p273_p5 = scmp.eq.s32.totalorder %s5846_s26, 7 }
  0x12   : > { %s11445_s24 = smov (%p41_p2, %s11443_s24), 0  ;;  %s11447_s27 = smov (!%p41_p2, %s43_s27), %s6568_s21 }
  0x13   : > { %10797 = sst [smem:[#allocation10_spill]] %s11445_s24  ;;  %s5849_s28 = sshll.u32 %s6568_s21, 1 }
  0x14   : > { %p6703_p6 = por %p267_p3, %p266_p1  ;;  %p45_p7 = scmp.ge.s32.totalorder %s11447_s27, 2 }
  0x15   : > { %p6707_p8 = por %p273_p5, %p272_p4  ;;  %p5853_p9 = scmp.ge.s32.totalorder %s6572_s22, 1 }
  0x16   : > { %s10798_s29 = scalar_select %p6703_p6, 1, 0 }
  0x17   : > { %s10800_s30 = scalar_select %p6707_p8, 1, 0 }
  0x18   : > { %10799 = sst [smem:[#allocation11_spill]] %s10798_s29  ;;  %p360_p10 = scmp.lt.s32.totalorder %s6572_s22, 9 }
  0x19   : > { %10801 = sst [smem:[#allocation12_spill]] %s10800_s30  ;;  %s11449_s27 = smov (%p45_p7, %s11447_s27), 0 }
  0x1a   : > { %10802 = sst [smem:[#allocation13_spill]] %s11449_s27  ;;  %s248_s11 = sadd.s32 %s6560_s19, %s5849_s28 }
  0x1b   : > { %p361_p11 = pnand %p5853_p9, %p360_p10  ;;  %s5850_s12 = sshll.u32 %s11449_s27, 1 }
  0x1c   : > { %s251_s25 = ssub.s32 %s6564_s20, %s11445_s24  ;;  %s250_s26 = sadd.s32 %s5850_s12, %s11441_s23 }
  0x1d   : > { %s252_s21 = ssub.s32 %s248_s11, %s250_s26  ;;  %s256_s9 = sadd.s32 1, %s6544_s15 }
  0x1e   : > { %s253_s13 = sor.u32 %s252_s21, %s251_s25  ;;  %364 = sbr.rel (%p361_p11) target bundleno = 1770 (0x6ea), region = 56 }
  0x1f   : > { %p254_p12 = scmp.eq.s32.totalorder %s253_s13, 0 }
  0x21   : > { %s6722_s29 = scalar_select %p254_p12, %s6544_s15, %s256_s9  }
  0x23   : > { %v472_v0 = vld [vmem:[%s10526_s2 + $0x70] sm:$0xff]  ;;  %v10548_v2 = vmov 0   ;;  %p416_p13 = scmp.lt.s32.totalorder %s6552_s17, 1  ;;  %v473_v3 = vld [vmem:[%s10526_s2 + $0x78] sm:$0xff]  ;;  %p432_p0 = scmp.lt.s32.totalorder %s6556_s18, 1  ;;  %v455_v5 = vld [vmem:[%s10525_s1 + $0x68] sm:$0xff]  ;;  %v556_v50 = vlaneseq }
  0x24   : > { %v6730_v1 = vld [vmem:[%s10525_s1 + $0x70] sm:$0xff]  ;;  %6309 = vset.pattern.permute.xlu1 %v10548_v2  ;;  %6308 = vset.pattern.permute.xlu0 %v10548_v2  ;;  %v457_v4 = vld [vmem:[%s10525_s1 + $0x78] sm:$0xff]  ;;  %v6575_v6 = vmov 1   ;;  %v470_v7 = vld [vmem:[%s10526_s2 + $0x60] sm:$0xff]  ;;  %v10550_v11 = vmov 2   ;;  %p6078_p2 = scmp.ne.s32.totalorder %s6548_s16, 0 }
  0x25   : > { %728 = vperm.xlu1 %6309, %v472_v0   ;;  %546 = vperm.xlu0 %6308, %v6730_v1   ;;  %s6746_s21 = scalar_select %p416_p13, %s6552_s17, 1  ;;  %v454_v8 = vld [vmem:[%s10525_s1 + $0x60] sm:$0xff]  ;;  %v453_v9 = vld [vmem:[%s10525_s1 + $0x58] sm:$0xff]  ;;  %v468_v10 = vld [vmem:[%s10526_s2 + $0x50] sm:$0xff]  ;;  %v557_v54 = vshrl.u32 %v556_v50, 7 }
  0x26   : > { %1544 = vmatprep.mubr.bf16.mxu0 %v10548_v2  ;;  %1657 = vmatprep.mubr.bf16.mxu1 %v10548_v2  ;;  %s433_s25 = scalar_select %p432_p0, %s6556_s18, 1  ;;  %v6777_v12 = vld [vmem:[%s10525_s1 + $0x48] sm:$0xff]  ;;  %v466_v14 = vld [vmem:[%s10526_s2 + $0x40] sm:$0xff]  ;;  %v6790_v15 = vld [vmem:[%s10525_s1 + $0x38] sm:$0xff] }
  0x27   : > { %s5860_s12 = sshll.u32 %s6746_s21, 7  ;;  %v471_v13 = vld [vmem:[%s10526_s2 + $0x68] sm:$0xff]  ;;  %v464_v16 = vld [vmem:[%s10526_s2 + $0x30] sm:$0xff]  ;;  %v462_v19 = vld [vmem:[%s10526_s2 + $0x20] sm:$0xff]  ;;  %s5857_s30 = sshll.u32 %s6746_s21, 4  ;;  %v558_v59 = vsub.s32 0, %v557_v54 }
  0x28   : > { %s5859_s26 = sshll.u32 %s433_s25, 6  ;;  %v452_v17 = vld [vmem:[%s10525_s1 + $0x50] sm:$0xff]  ;;  %v6803_v18 = vld [vmem:[%s10525_s1 + $0x28] sm:$0xff]  ;;  %v6814_v20 = vld [vmem:[%s10525_s1 + $0x18] sm:$0xff]  ;;  %s5855_s25 = sshll.u32 %s6556_s18, 1  ;;  %v562_v61 = vsub.s32 4, %v557_v54 }
  0x29   : > { %733 = vperm.xlu1 %6309, %v473_v3   ;;  %551 = vperm.xlu0 %6308, %v457_v4   ;;  %s436_s9 = sadd.s32 %s5860_s12, %s5859_s26  ;;  %v469_v21 = vld [vmem:[%s10526_s2 + $0x58] sm:$0xff]  ;;  %v460_v22 = vld [vmem:[%s10526_s2 + $0x10] sm:$0xff]  ;;  %v6827_v23 = vld [vmem:[%s10525_s1 + $0x8] sm:$0xff]  ;;  %s414_s28 = sadd.s32 %s6548_s16, %s5855_s25  ;;  %v866_v3 = vsub.s32 1, %v557_v54 }
  0x2a   : > { %s5861_s27 = sshll.u32 %s436_s9, 3  ;;  %v458_v24 = vld [vmem:[%s10526_s2] sm:$0xff]  ;;  %v467_v26 = vld [vmem:[%s10526_s2 + $0x48] sm:$0xff]  ;;  %v448_v27 = vld [vmem:[%s10525_s1 + $0x30] sm:$0xff]  ;;  %s6911_s23 = sshll.u32 %s414_s28, 2 }
  0x2b   : > { %s6766_s20 = scalar_lea.vmem %s10534_s10, %s5861_s27  ;;  %v450_v25 = vld [vmem:[%s10525_s1 + $0x40] sm:$0xff]  ;;  %v6857_v29 = vld [vmem:[%s10525_s1 + $0x10] sm:$0xff]  ;;  %v465_v31 = vld [vmem:[%s10526_s2 + $0x38] sm:$0xff]  ;;  %p418_p1 = scmp.lt.s32.totalorder %s6911_s23, 15 }
  0x2c   : > { %v446_v28 = vld [vmem:[%s10525_s1 + $0x20] sm:$0xff]  ;;  %v1379_v33 = vld [vmem:[%s10528_s4 + $0x58] sm:$0xff]  ;;  %v1377_v34 = vld [vmem:[%s10528_s4 + $0x48] sm:$0xff]  ;;  %s10911_s25 = sld [smem:[#allocation215_spill]] }
  0x2d   : > { %6310 = vset.pattern.permute.xlu1 %v6575_v6  ;;  %541 = vperm.xlu0 %6308, %v455_v5   ;;  %v6864_v30 = vld [vmem:[%s10525_s1] sm:$0xff]  ;;  %v1375_v35 = vld [vmem:[%s10528_s4 + $0x38] sm:$0xff]  ;;  %v463_v36 = vld [vmem:[%s10526_s2 + $0x28] sm:$0xff]  ;;  %s419_s14 = scalar_select %p418_p1, %s6911_s23, 15 }
  0x2e   : > { %861 = vperm.xlu1 %6310, %v457_v4   ;;  %v1380_v32 = vld [vmem:[%s10528_s4 + $0x60] sm:$0xff]  ;;  %v1373_v39 = vld [vmem:[%s10528_s4 + $0x28] sm:$0xff]  ;;  %v1371_v42 = vld [vmem:[%s10528_s4 + $0x18] sm:$0xff] }
  0x2f   : > { %v1369_v45 = vld [vmem:[%s10528_s4 + $0x8] sm:$0xff]  ;;  %v1881_v47 = vld [vmem:[%s10530_s6 + $0x78] sm:$0xff]  ;;  %s421_s11 = sadd.s32 %s5857_s30, %s419_s14  ;;  %s11020_s14 = sld [smem:[#allocation6_spill]] }
  0x30   : > { %v1879_v51 = vld [vmem:[%s10530_s6 + $0x68] sm:$0xff]  ;;  %s5858_s26 = sshll.u32 %s421_s11, 2  ;;  %v461_v55 = vld [vmem:[%s10526_s2 + $0x18] sm:$0xff] }
  0x31   : > { %718 = vperm.xlu0 %6308, %v470_v7   ;;  %v1877_v57 = vld [vmem:[%s10530_s6 + $0x58] sm:$0xff]  ;;  %s423_s9 = scalar_lea.vmem %s10524_s0, %s5858_s26  ;;  %v1875_v62 = vld [vmem:[%s10530_s6 + $0x48] sm:$0xff] }
  0x32   : > { %6311 = vset.pattern.permute.xlu1 %v10548_v2  ;;  %v440_v60 = vld [vmem:[%s423_s9] sm:$0x77]  ;;  %v441_v63 = vld [vmem:[%s423_s9 + $0x8] sm:$0x77] }
  0x33   : > { %536 = vperm.xlu1 %6311, %v454_v8   ;;  %v563_v7 = vrot.slane %v440_v60, %v562_v61 }
  0x35   : > { %531 = vperm.xlu0 %6308, %v453_v9   ;;  %s399_s30 = sand.u32 1, %s11020_s14  }
  0x36   : > { %s5854_s11 = sshll.u32 %s399_s30, 10 }
  0x37   : > { %6312 = vset.pattern.permute.xlu1 %v10550_v11  ;;  %s8895_s28 = scalar_lea.vmem [#allocation2], %s5854_s11 }
  0x38   : > { %1085 = vperm.xlu1 %6312, %v6730_v1  }
  0x39   : > { %708 = vperm.xlu0 %6308, %v468_v10  }
  0x3c   : > { %1089 = vperm.xlu1 %6312, %v457_v4   ;;  %v559_v4 = vrot.slane %v440_v60, %v558_v59 }
  0x3d   : > { %521 = vperm.xlu0 %6308, %v6777_v12  }
  0x40   : > { %6313 = vset.pattern.permute.xlu1 %v10548_v2 }
  0x41   : > { %723 = vperm.xlu1 %6313, %v471_v13   ;;  %698 = vperm.xlu0 %6308, %v466_v14   ;;  %v867_v14 = vrot.slane %v440_v60, %v866_v3 }
  0x45   : > { %6314 = vset.pattern.permute.xlu1 %v6575_v6  ;;  %511 = vperm.xlu0 %6308, %v6790_v15  }
  0x46   : > { %853 = vperm.xlu1 %6314, %v455_v5  }
  0x49   : > { %688 = vperm.xlu0 %6308, %v464_v16   ;;  %v1094_v16 = vsub.s32 2, %v557_v54 }
  0x4a   : > { %6315 = vset.pattern.permute.xlu1 %v10548_v2 }
  0x4b   : > { %526 = vperm.xlu1 %6315, %v452_v17  }
  0x4d   : > { %501 = vperm.xlu0 %6308, %v6803_v18  }
  0x4f   : > { %6316 = vset.pattern.permute.xlu1 %v10550_v11 }
  0x50   : > { %1077 = vperm.xlu1 %6316, %v454_v8  }
  0x51   : > { %678 = vperm.xlu0 %6308, %v462_v19   ;;  %v6981_v19 = vrot.slane %v563_v7, %v558_v59 }
  0x54   : > { %1081 = vperm.xlu1 %6316, %v455_v5   ;;  %v567_v5 = vrot.slane %v441_v63, %v558_v59 }
  0x55   : > { %491 = vperm.xlu0 %6308, %v6814_v20  }
  0x58   : > { %6317 = vset.pattern.permute.xlu1 %v10548_v2 }
  0x59   : > { %713 = vperm.xlu1 %6317, %v469_v21   ;;  %668 = vperm.xlu0 %6308, %v460_v22  }
  0x5d   : > { %6318 = vset.pattern.permute.xlu1 %v6575_v6  ;;  %481 = vperm.xlu0 %6308, %v6827_v23  }
  0x5e   : > { %845 = vperm.xlu1 %6318, %v453_v9  }
  0x61   : > { %658 = vperm.xlu0 %6308, %v458_v24   ;;  %v875_v24 = vrot.slane %v441_v63, %v866_v3 }
  0x62   : > { %6319 = vset.pattern.permute.xlu1 %v10548_v2 }
  0x63   : > { %516 = vperm.xlu1 %6319, %v450_v25   ;;  %v7006_v50 = vrot.slane %v875_v24, %v866_v3 }
  0x65   : > { %6337 = vset.pattern.permute.xlu0 %v6575_v6 }
  0x66   : > { %857 = vperm.xlu0 %6337, %v6730_v1  }
  0x67   : > { %6320 = vset.pattern.permute.xlu1 %v10550_v11 }
  0x68   : > { %1069 = vperm.xlu1 %6320, %v452_v17  }
  0x6a   : > { %849 = vperm.xlu0 %6337, %v454_v8   ;;  %v571_v8 = vrot.slane %v441_v63, %v562_v61 }
  0x6c   : > { %1073 = vperm.xlu1 %6320, %v453_v9   ;;  %v870_v9 = vsub.s32 5, %v557_v54  ;;  %v6983_v21 = vrot.slane %v571_v8, %v558_v59 }
  0x6e   : > { %841 = vperm.xlu0 %6337, %v452_v17   ;;  %v1098_v17 = vsub.s32 6, %v557_v54  ;;  %v871_v22 = vrot.slane %v440_v60, %v870_v9 }
  0x70   : > { %6321 = vset.pattern.permute.xlu1 %v10548_v2 }
  0x71   : > { %703 = vperm.xlu1 %6321, %v467_v26  }
  0x72   : > { %833 = vperm.xlu0 %6337, %v450_v25  }
  0x75   : > { %6322 = vset.pattern.permute.xlu1 %v6575_v6 }
  0x76   : > { %837 = vperm.xlu1 %6322, %v6777_v12   ;;  %825 = vperm.xlu0 %6337, %v448_v27  }
  0x7a   : > { %6323 = vset.pattern.permute.xlu1 %v10548_v2  ;;  %817 = vperm.xlu0 %6337, %v446_v28  }
  0x7b   : > { %506 = vperm.xlu1 %6323, %v448_v27  }
  0x7e   : > { %809 = vperm.xlu0 %6337, %v6857_v29  }
  0x7f   : > { %6324 = vset.pattern.permute.xlu1 %v10550_v11 }
  0x80   : > { %1061 = vperm.xlu1 %6324, %v450_v25   ;;  %v879_v25 = vrot.slane %v441_v63, %v870_v9 }
  0x82   : > { %801 = vperm.xlu0 %6337, %v6864_v30  }
  0x84   : > { %1065 = vperm.xlu1 %6324, %v6777_v12   ;;  %v1873_v12 = vld [vmem:[%s10530_s6 + $0x38] sm:$0xff] }
  0x86   : > { %6341 = vset.pattern.permute.xlu0 %v10550_v11 }
  0x87   : > { %1033 = vperm.xlu0 %6341, %v6827_v23  }
  0x88   : > { %6325 = vset.pattern.permute.xlu1 %v10548_v2 }
  0x89   : > { %693 = vperm.xlu1 %6325, %v465_v31  }
  0x8b   : > { %6343 = vset.pattern.permute.xlu0 %v10548_v2 }
  0x8c   : > { %1446 = vperm.xlu0 %6343, %v1380_v32   ;;  %v1099_v32 = vrot.slane %v440_v60, %v1098_v17 }
  0x8d   : > { %6326 = vset.pattern.permute.xlu1 %v6575_v6 }
  0x8e   : > { %829 = vperm.xlu1 %6326, %v6790_v15  }
  0x90   : > { %1441 = vperm.xlu0 %6343, %v1379_v33   ;;  %v1107_v33 = vrot.slane %v441_v63, %v1098_v17 }
  0x92   : > { %6327 = vset.pattern.permute.xlu1 %v10548_v2  ;;  %v7023_v61 = vrot.slane %v1107_v33, %v1094_v16 }
  0x93   : > { %496 = vperm.xlu1 %6327, %v446_v28  }
  0x94   : > { %1431 = vperm.xlu0 %6343, %v1377_v34   ;;  %v1095_v34 = vrot.slane %v440_v60, %v1094_v16  ;;  %v7021_v60 = vrot.slane %v1099_v32, %v1094_v16  ;;  %v459_v32 = vld [vmem:[%s10526_s2 + $0x8] sm:$0xff] }
  0x97   : > { %6328 = vset.pattern.permute.xlu1 %v10550_v11 }
  0x98   : > { %1053 = vperm.xlu1 %6328, %v448_v27   ;;  %1421 = vperm.xlu0 %6343, %v1375_v35   ;;  %v6988_v27 = vrot.slane %v867_v14, %v866_v3  ;;  %v1103_v35 = vrot.slane %v441_v63, %v1094_v16  ;;  %v1869_v63 = vld [vmem:[%s10530_s6 + $0x18] sm:$0xff] }
  0x9c   : > { %1057 = vperm.xlu1 %6328, %v6790_v15   ;;  %1411 = vperm.xlu0 %6343, %v1373_v39   ;;  %v6976_v15 = vrot.slane %v559_v4, %v558_v59 }
  0xa0   : > { %v6895_v37 = vpop.permute.xlu1 %728  ;;  %v6897_v38 = vpop.permute.xlu0 %546  ;;  %6329 = vset.pattern.permute.xlu1 %v10548_v2  ;;  %1401 = vperm.xlu0 %6343, %v1371_v42  }
  0xa1   : > { %683 = vperm.xlu1 %6329, %v463_v36   ;;  %v648_v36 = vmul.f32 %v6976_v15, %v6897_v38  ;;  %v649_v42 = vmul.f32 %v6981_v19, %v6897_v38 }
  0xa3   : > { %v7035_v4 = vadd.f32 %v6895_v37, %v649_v42 }
  0xa4   : > { %v6905_v40 = vpop.permute.xlu1 %733  ;;  %v6907_v41 = vpop.permute.xlu0 %551  ;;  %1391 = vperm.xlu0 %6343, %v1369_v45   ;;  %v651_v45 = vmul.f32 %v6983_v21, %v6897_v38 }
  0xa5   : > { %6330 = vset.pattern.permute.xlu1 %v6575_v6 }
  0xa6   : > { %821 = vperm.xlu1 %6330, %v6803_v18  }
  0xa8   : > { %v6916_v43 = vpop.permute.xlu0 %541  ;;  %1975 = vperm.xlu0 %6343, %v1881_v47   ;;  %v7004_v47 = vrot.slane %v871_v22, %v866_v3 }
  0xa9   : > { %v6918_v44 = vpop.permute.xlu1 %861  ;;  %v644_v24 = vmul.f32 %v6976_v15, %v6916_v43  ;;  %v647_v33 = vmul.f32 %v6983_v21, %v6916_v43 }
  0xaa   : > { %6331 = vset.pattern.permute.xlu1 %v10548_v2  ;;  %v961_v9 = vmul.f32 %v7004_v47, %v6918_v44  ;;  %v960_v14 = vmul.f32 %v6988_v27, %v6918_v44 }
  0xab   : > { %486 = vperm.xlu1 %6331, %v6857_v29  }
  0xac   : > { %v6926_v46 = vpop.permute.xlu0 %718  ;;  %1965 = vperm.xlu0 %6343, %v1879_v51   ;;  %v7008_v51 = vrot.slane %v879_v25, %v866_v3  ;;  %v645_v25 = vmul.f32 %v6981_v19, %v6916_v43 }
  0xae   : > { %v6932_v48 = vpop.permute.xlu1 %536 }
  0xaf   : > { %6332 = vset.pattern.permute.xlu1 %v10550_v11 }
  0xb0   : > { %1045 = vperm.xlu1 %6332, %v446_v28   ;;  %v6936_v49 = vpop.permute.xlu0 %531  ;;  %1955 = vperm.xlu0 %6343, %v1877_v57   ;;  %v1871_v28 = vld [vmem:[%s10530_s6 + $0x28] sm:$0xff] }
  0xb3   : > { %v6941_v52 = vpop.permute.xlu1 %1085 }
  0xb4   : > { %1049 = vperm.xlu1 %6332, %v6803_v18   ;;  %v6944_v53 = vpop.permute.xlu0 %708  ;;  %1945 = vperm.xlu0 %6343, %v1875_v62   ;;  %v6979_v18 = vrot.slane %v567_v5, %v558_v59  ;;  %v655_v59 = vmul.f32 %v6983_v21, %v6907_v41  ;;  %v7027_v62 = vrot.slane %v1103_v35, %v1094_v16 }
  0xb5   : > { %v7038_v5 = vadd.f32 %v6895_v37, %v651_v45 }
  0xb6   : > { %v650_v39 = vmul.f32 %v6979_v18, %v6897_v38  ;;  %v654_v57 = vmul.f32 %v6979_v18, %v6907_v41  ;;  %v653_v38 = vmul.f32 %v6981_v19, %v6907_v41  ;;  %v642_v35 = vmul.f32 %v6979_v18, %v6932_v48 }
  0xb7   : > { %v6949_v56 = vpop.permute.xlu1 %1089 }
  0xb8   : > { %6333 = vset.pattern.permute.xlu1 %v10548_v2  ;;  %v6958_v58 = vpop.permute.xlu0 %521  ;;  %1935 = vperm.xlu0 %6343, %v1873_v12   ;;  %v7044_v7 = vadd.f32 %v6895_v37, %v650_v39  ;;  %v963_v12 = vmul.f32 %v7008_v51, %v6918_v44  ;;  %v797_v17 = vadd.f32 %v6905_v40, %v653_v38  ;;  %v1867_v39 = vld [vmem:[%s10530_s6 + $0x8] sm:$0xff] }
  0xb9   : > { %673 = vperm.xlu1 %6333, %v461_v55   ;;  %v652_v55 = vmul.f32 %v6976_v15, %v6907_v41  ;;  %v7041_v41 = vadd.f32 %v6895_v37, %v648_v36  ;;  %v799_v37 = vadd.f32 %v6905_v40, %v655_v59  ;;  %v798_v22 = vadd.f32 %v6905_v40, %v654_v57 }
  0xba   : > { %v1025_v45 = vadd.f32 %v961_v9, %v797_v17  ;;  %v7096_v59 = vmul.f32 %v6979_v18, %v6936_v49  ;;  %v7102_v9 = vmul.f32 %v6983_v21, %v6936_v49 }
  0xbc   : > { %v6963_v0 = vpop.permute.xlu1 %723  ;;  %v6965_v1 = vpop.permute.xlu0 %698  ;;  %1925 = vperm.xlu0 %6343, %v1871_v28   ;;  %v641_v28 = vmul.f32 %v6981_v19, %v6932_v48 }
  0xbd   : > { %6334 = vset.pattern.permute.xlu1 %v6575_v6 }
  0xbe   : > { %813 = vperm.xlu1 %6334, %v6814_v20  }
  0xc0   : > { %v6969_v10 = vpop.permute.xlu0 %511  ;;  %1915 = vperm.xlu0 %6343, %v1869_v63   ;;  %v1189_v63 = vmul.f32 %v7021_v60, %v6949_v56 }
  0xc1   : > { %10803 = vst [vmem:[#allocation14_spill] sm:$0xff] %v6969_v10  ;;  %v6974_v13 = vpop.permute.xlu1 %853 }
  0xc2   : > { %6335 = vset.pattern.permute.xlu1 %v10548_v2 }
  0xc3   : > { %476 = vperm.xlu1 %6335, %v6864_v30  }
  0xc4   : > { %v6986_v26 = vpop.permute.xlu0 %688  ;;  %1905 = vperm.xlu0 %6343, %v1867_v39   ;;  %v7151_v39 = vmul.f32 %v6981_v19, %v6958_v58 }
  0xc5   : > { %10804 = vst [vmem:[#allocation15_spill] sm:$0xff] %v6986_v26 }
  0xc6   : > { %v6993_v31 = vpop.permute.xlu1 %526  ;;  %10810 = vst [vmem:[#allocation21_spill] sm:$0xff] %v7151_v39 }
  0xc7   : > { %6336 = vset.pattern.permute.xlu1 %v10550_v11  ;;  %v7156_v11 = vadd.f32 %v1189_v63, %v1025_v45  ;;  %v788_v45 = vadd.f32 %v6963_v0, %v644_v24  ;;  %v791_v63 = vadd.f32 %v6963_v0, %v647_v33  ;;  %v633_v33 = vmul.f32 %v6981_v19, %v6993_v31 }
  0xc8   : > { %1037 = vperm.xlu1 %6336, %v6857_v29   ;;  %v7011_v54 = vpop.permute.xlu0 %501  ;;  %v7025_v29 = vrot.slane %v1095_v34, %v1094_v16  ;;  %v962_v16 = vmul.f32 %v7006_v50, %v6918_v44  ;;  %v643_v44 = vmul.f32 %v6983_v21, %v6932_v48  ;;  %v640_v34 = vmul.f32 %v6976_v15, %v6932_v48 }
  0xc9   : > { %10805 = vst [vmem:[#allocation16_spill] sm:$0xff] %v7011_v54  ;;  %v7092_v48 = vmul.f32 %v6981_v19, %v6936_v49  ;;  %v954_v54 = vmul.f32 %v7006_v50, %v6974_v13 }
  0xca   : > { %v1026_v38 = vadd.f32 %v962_v16, %v798_v22  ;;  %v7110_v16 = vadd.f32 %v6926_v46, %v643_v44  ;;  %v1188_v17 = vmul.f32 %v7025_v29, %v6949_v56  ;;  %v1897_v22 = vld [vmem:[%s10530_s6 + $0xf8] sm:$0xff] }
  0xcb   : > { %v7032_v3 = vpop.permute.xlu1 %1077  ;;  %2055 = vperm.xlu0 %6343, %v1897_v22  }
  0xcc   : > { %1041 = vperm.xlu1 %6336, %v6814_v20   ;;  %v7047_v8 = vpop.permute.xlu0 %678  ;;  %v796_v20 = vadd.f32 %v6905_v40, %v652_v55  ;;  %v646_v40 = vmul.f32 %v6979_v18, %v6916_v43  ;;  %v1027_v55 = vadd.f32 %v963_v12, %v799_v37  ;;  %v7088_v43 = vmul.f32 %v6976_v15, %v6936_v49 }
  0xcd   : > { %10806 = vst [vmem:[#allocation17_spill] sm:$0xff] %v7047_v8  ;;  %v1191_v12 = vmul.f32 %v7023_v61, %v6949_v56  ;;  %v1190_v37 = vmul.f32 %v7027_v62, %v6949_v56  ;;  %v7120_v49 = vadd.f32 %v6926_v46, %v642_v35  ;;  %v7135_v56 = vmul.f32 %v7023_v61, %v6941_v52 }
  0xce   : > { %v1024_v57 = vadd.f32 %v960_v14, %v796_v20  ;;  %v7107_v14 = vadd.f32 %v6926_v46, %v641_v28  ;;  %v7117_v20 = vadd.f32 %v6926_v46, %v640_v34  ;;  %v7139_v46 = vmul.f32 %v7025_v29, %v6941_v52 }
  0xcf   : > { %v1082_v36 = vpop.permute.xlu1 %1081  ;;  %v7143_v34 = vmul.f32 %v7027_v62, %v6941_v52  ;;  %v7147_v35 = vmul.f32 %v6976_v15, %v6958_v58  ;;  %v789_v8 = vadd.f32 %v6963_v0, %v645_v25  ;;  %v1895_v25 = vld [vmem:[%s10530_s6 + $0xe8] sm:$0xff] }
  0xd0   : > { %6338 = vset.pattern.permute.xlu1 %v10548_v2  ;;  %v7084_v42 = vpop.permute.xlu0 %491  ;;  %v953_v2 = vmul.f32 %v7004_v47, %v6974_v13  ;;  %v7168_v26 = vadd.f32 %v1188_v17, %v1024_v57  ;;  %v1182_v24 = vmul.f32 %v7027_v62, %v1082_v36  ;;  %v635_v17 = vmul.f32 %v6983_v21, %v6993_v31 }
  0xd1   : > { %10807 = vst [vmem:[#allocation18_spill] sm:$0xff] %v7084_v42  ;;  %663 = vperm.xlu1 %6338, %v459_v32   ;;  %v7131_v32 = vmul.f32 %v7021_v60, %v6941_v52  ;;  %10809 = vst [vmem:[#allocation20_spill] sm:$0xff] %v7147_v35  ;;  %v955_v52 = vmul.f32 %v7008_v51, %v6974_v13  ;;  %v7163_v42 = vadd.f32 %v1191_v12, %v1027_v55 }
  0xd2   : > { %v1183_v55 = vmul.f32 %v7023_v61, %v1082_v36  ;;  %v1180_v12 = vmul.f32 %v7025_v29, %v1082_v36  ;;  %2045 = vperm.xlu0 %6343, %v1895_v25   ;;  %v1382_v25 = vld [vmem:[%s10528_s4 + $0x70] sm:$0xff] }
  0xd3   : > { %v1019_v22 = vadd.f32 %v955_v52, %v791_v63 }
  0xd4   : > { %v7125_v28 = vpop.permute.xlu1 %713  ;;  %v7127_v44 = vpop.permute.xlu0 %668 }
  0xd5   : > { %10808 = vst [vmem:[#allocation19_spill] sm:$0xff] %v7127_v44  ;;  %6339 = vset.pattern.permute.xlu1 %v6575_v6  ;;  %v952_v44 = vmul.f32 %v6988_v27, %v6974_v13  ;;  %v7170_v6 = vadd.f32 %v1190_v37, %v1026_v38  ;;  %v790_v13 = vadd.f32 %v6963_v0, %v646_v40  ;;  %v10812_v37 = vmov 2  }
  0xd6   : > { %805 = vperm.xlu1 %6339, %v6827_v23   ;;  %v1181_v23 = vmul.f32 %v7021_v60, %v1082_v36  ;;  %v1017_v38 = vadd.f32 %v953_v2, %v789_v8  ;;  %v632_v0 = vmul.f32 %v6976_v15, %v6993_v31  ;;  %v634_v2 = vmul.f32 %v6979_v18, %v6993_v31 }
  0xd7   : > { %v1018_v8 = vadd.f32 %v954_v54, %v790_v13  ;;  %v7198_v40 = vmul.f32 %v6979_v18, %v6958_v58  ;;  %v7202_v36 = vmul.f32 %v6983_v21, %v6958_v58  ;;  %v1893_v58 = vld [vmem:[%s10530_s6 + $0xd8] sm:$0xff]  ;;  %v7251_v13 = vmul.f32 %v7025_v29, %v7032_v3 }
  0xd8   : > { %v7174_v10 = vpop.permute.xlu0 %481  ;;  %2035 = vperm.xlu0 %6343, %v1893_v58  }
  0xd9   : > { %10811 = vst [vmem:[#allocation22_spill] sm:$0xff] %v7174_v10  ;;  %v7182_v57 = vpop.permute.xlu1 %845  ;;  %v1016_v10 = vadd.f32 %v952_v44, %v788_v45  ;;  %10813 = vst [vmem:[#allocation23_spill] sm:$0xff] %v7198_v40  ;;  %v7206_v44 = vadd.f32 %v1181_v23, %v1017_v38  ;;  %v7208_v45 = vadd.f32 %v1183_v55, %v1019_v22 }
  0xda   : > { %6340 = vset.pattern.permute.xlu1 %v10812_v37  ;;  %10814 = vst [vmem:[#allocation24_spill] sm:$0xff] %v7202_v36  ;;  %v7214_v63 = vadd.f32 %v1182_v24, %v1018_v8  ;;  %v7227_v38 = vadd.f32 %v6944_v53, %v633_v33  ;;  %v7238_v24 = vmul.f32 %v7023_v61, %v7032_v3  ;;  %v10818_v8 = vmov 0  }
  0xdb   : > { %1029 = vperm.xlu1 %6340, %v6864_v30   ;;  %v7212_v54 = vadd.f32 %v1180_v12, %v1016_v10  ;;  %v7230_v10 = vadd.f32 %v6944_v53, %v635_v17  ;;  %v7234_v12 = vmul.f32 %v7021_v60, %v7032_v3  ;;  %v7241_v37 = vadd.f32 %v6944_v53, %v632_v0  ;;  %v1383_v30 = vld [vmem:[%s10528_s4 + $0x78] sm:$0xff] }
  0xdc   : > { %v7204_v52 = vpop.permute.xlu0 %658  ;;  %v7244_v22 = vadd.f32 %v6944_v53, %v634_v2  ;;  %v7255_v55 = vmul.f32 %v7027_v62, %v7032_v3  ;;  %v945_v53 = vmul.f32 %v7004_v47, %v7182_v57  ;;  %v947_v0 = vmul.f32 %v7008_v51, %v7182_v57 }
  0xdd   : > { %10815 = vst [vmem:[#allocation25_spill] sm:$0xff] %v7204_v52  ;;  %10816 = vst [vmem:[#allocation26_spill] sm:$0xff] %v7241_v37  ;;  %v780_v33 = vadd.f32 %v7125_v28, %v7088_v43  ;;  %v781_v17 = vadd.f32 %v7125_v28, %v7092_v48  ;;  %v782_v52 = vadd.f32 %v7125_v28, %v7096_v59 }
  0xde   : > { %v7222_v23 = vpop.permute.xlu1 %516  ;;  %10817 = vst [vmem:[#allocation27_spill] sm:$0xff] %v7244_v22  ;;  %v783_v40 = vadd.f32 %v7125_v28, %v7102_v9  ;;  %v944_v43 = vmul.f32 %v6988_v27, %v7182_v57  ;;  %v946_v48 = vmul.f32 %v7006_v50, %v7182_v57  ;;  %v1889_v57 = vld [vmem:[%s10530_s6 + $0xb8] sm:$0xff] }
  0xdf   : > { %6342 = vset.pattern.permute.xlu1 %v10818_v8  ;;  %v1891_v8 = vld [vmem:[%s10530_s6 + $0xc8] sm:$0xff]  ;;  %v7291_v37 = vadd.f32 %v945_v53, %v781_v17 }
  0xe0   : > { %1456 = vperm.xlu1 %6342, %v1382_v25   ;;  %v7293_v9 = vadd.f32 %v947_v0, %v783_v40  ;;  %2025 = vperm.xlu0 %6343, %v1891_v8  }
  0xe1   : > { %v858_v2 = vpop.permute.xlu0 %857  ;;  %10819 = vst [vmem:[#allocation28_spill] sm:$0xff] %v7291_v37 }
  0xe2   : > { %v957_v3 = vmul.f32 %v7004_v47, %v858_v2  ;;  %v959_v25 = vmul.f32 %v7008_v51, %v858_v2  ;;  %v956_v58 = vmul.f32 %v6988_v27, %v858_v2  ;;  %v958_v31 = vmul.f32 %v7006_v50, %v858_v2  ;;  %10820 = vst [vmem:[#allocation29_spill] sm:$0xff] %v7293_v9 }
  0xe3   : > { %v7281_v35 = vpop.permute.xlu1 %1069 }
  0xe4   : > { %v1021_v2 = vadd.f32 %v957_v3, %v7035_v4  ;;  %v1023_v36 = vadd.f32 %v959_v25, %v7038_v5  ;;  %v1020_v39 = vadd.f32 %v956_v58, %v7041_v41  ;;  %v1022_v22 = vadd.f32 %v958_v31, %v7044_v7  ;;  %1461 = vperm.xlu1 %6342, %v1383_v30   ;;  %v1381_v4 = vld [vmem:[%s10528_s4 + $0x68] sm:$0xff] }
  0xe5   : > { %v850_v59 = vpop.permute.xlu0 %849  ;;  %2015 = vperm.xlu0 %6343, %v1889_v57  }
  0xe6   : > { %v948_v5 = vmul.f32 %v6988_v27, %v850_v59  ;;  %v949_v41 = vmul.f32 %v7004_v47, %v850_v59  ;;  %v950_v7 = vmul.f32 %v7006_v50, %v850_v59  ;;  %v951_v28 = vmul.f32 %v7008_v51, %v850_v59 }
  0xe7   : > { %v7305_v31 = vpop.permute.xlu1 %1073  ;;  %v1249_v40 = vadd.f32 %v7131_v32, %v1021_v2  ;;  %v1251_v30 = vadd.f32 %v7135_v56, %v1023_v36  ;;  %v1248_v8 = vadd.f32 %v7139_v46, %v1020_v39  ;;  %v1250_v17 = vadd.f32 %v7143_v34, %v1022_v22  ;;  %v1378_v56 = vld [vmem:[%s10528_s4 + $0x50] sm:$0xff] }
  0xe8   : > { %v1013_v53 = vadd.f32 %v949_v41, %v7107_v14  ;;  %v1015_v0 = vadd.f32 %v951_v28, %v7110_v16  ;;  %v1012_v3 = vadd.f32 %v948_v5, %v7117_v20  ;;  %v1014_v25 = vadd.f32 %v950_v7, %v7120_v49  ;;  %1451 = vperm.xlu1 %6342, %v1381_v4  }
  0xe9   : > { %v842_v58 = vpop.permute.xlu0 %841  ;;  %v1313_v59 = vmax.f32 %v1249_v40, 0.0  ;;  %v1315_v9 = vmax.f32 %v1251_v30, 0.0  ;;  %v1312_v37 = vmax.f32 %v1248_v8, 0.0  ;;  %v1314_v32 = vmax.f32 %v1250_v17, 0.0 }
  0xea   : > { %v941_v46 = vmul.f32 %v7004_v47, %v842_v58  ;;  %v943_v14 = vmul.f32 %v7008_v51, %v842_v58  ;;  %v7320_v16 = vadd.f32 %v944_v43, %v780_v33  ;;  %v7322_v20 = vadd.f32 %v946_v48, %v782_v52 }
  0xeb   : > { %v10821_v49 = vmax.f32 %v7156_v11, 0.0  ;;  %v10822_v39 = vmax.f32 %v7163_v42, 0.0  ;;  %v10823_v22 = vmax.f32 %v7168_v26, 0.0  ;;  %v10824_v4 = vmax.f32 %v7170_v6, 0.0 }
  0xec   : > { %v7332_v41 = vpop.permute.xlu1 %703  ;;  %v1241_v7 = vadd.f32 %v7234_v12, %v1013_v53  ;;  %v1243_v33 = vadd.f32 %v7238_v24, %v1015_v0  ;;  %v1240_v52 = vadd.f32 %v7251_v13, %v1012_v3  ;;  %v1242_v11 = vadd.f32 %v7255_v55, %v1014_v25  ;;  %1436 = vperm.xlu1 %6342, %v1378_v56   ;;  %v1376_v13 = vld [vmem:[%s10528_s4 + $0x40] sm:$0xff] }
  0xed   : > { %v1365_v34 = vpack.c.bf16 %v10821_v49, %v1313_v59  ;;  %v1367_v36 = vpack.c.bf16 %v10822_v39, %v1315_v9  ;;  %v1364_v2 = vpack.c.bf16 %v10823_v22, %v1312_v37  ;;  %v1366_v5 = vpack.c.bf16 %v10824_v4, %v1314_v32  ;;  %v10829_v49 = vld [vmem:[#allocation28_spill] sm:$0xff]  ;;  %v10831_v22 = vld [vmem:[#allocation26_spill] sm:$0xff] }
  0xee   : > { %v624_v42 = vmul.f32 %v6976_v15, %v7222_v23  ;;  %v625_v26 = vmul.f32 %v6981_v19, %v7222_v23  ;;  %v626_v6 = vmul.f32 %v6979_v18, %v7222_v23  ;;  %v627_v37 = vmul.f32 %v6983_v21, %v7222_v23  ;;  %v1887_v23 = vld [vmem:[%s10530_s6 + $0xa8] sm:$0xff] }
  0xef   : > { %1512 = vmatprep.subr.bf16.mxu0 %v1365_v34  ;;  %v940_v55 = vmul.f32 %v6988_v27, %v842_v58  ;;  %v942_v12 = vmul.f32 %v7006_v50, %v842_v58  ;;  %1625 = vmatprep.subr.bf16.mxu1 %v1367_v36  ;;  %v1169_v24 = vmul.f32 %v7021_v60, %v7281_v35  ;;  %v1305_v48 = vmax.f32 %v1241_v7, 0.0 }
  0xf0   : > { %v1171_v43 = vmul.f32 %v7023_v61, %v7281_v35  ;;  %1513 = vmatpush1.bf16.msra.mxu0 %v1364_v2  ;;  %1626 = vmatpush1.bf16.msra.mxu1 %v1366_v5  ;;  %v1307_v9 = vmax.f32 %v1243_v33, 0.0  ;;  %v1304_v28 = vmax.f32 %v1240_v52, 0.0  ;;  %v1306_v57 = vmax.f32 %v1242_v11, 0.0  ;;  %v10832_v52 = vld [vmem:[#allocation27_spill] sm:$0xff] }
  0xf1   : > { %v1005_v40 = vadd.f32 %v941_v46, %v7227_v38  ;;  %v1173_v30 = vmul.f32 %v7021_v60, %v7305_v31  ;;  %v1007_v8 = vadd.f32 %v943_v14, %v7230_v10  ;;  %v1175_v17 = vmul.f32 %v7023_v61, %v7305_v31  ;;  %1426 = vperm.xlu1 %6342, %v1376_v13   ;;  %v838_v58 = vpop.permute.xlu1 %837 }
  0xf2   : > { %v10825_v53 = vmax.f32 %v7206_v44, 0.0  ;;  %v10826_v3 = vmax.f32 %v7208_v45, 0.0  ;;  %v10827_v59 = vmax.f32 %v7212_v54, 0.0  ;;  %v10828_v38 = vmax.f32 %v7214_v63, 0.0  ;;  %2005 = vperm.xlu0 %6343, %v1887_v23   ;;  %v1374_v45 = vld [vmem:[%s10528_s4 + $0x30] sm:$0xff]  ;;  %v1885_v54 = vld [vmem:[%s10530_s6 + $0x98] sm:$0xff] }
  0xf3   : > { %v1168_v10 = vmul.f32 %v7025_v29, %v7281_v35  ;;  %v1170_v46 = vmul.f32 %v7027_v62, %v7281_v35  ;;  %v769_v44 = vadd.f32 %v6965_v1, %v625_v26  ;;  %v7378_v14 = vadd.f32 %v6965_v1, %v627_v37  ;;  %v10830_v35 = vld [vmem:[#allocation29_spill] sm:$0xff]  ;;  %v834_v26 = vpop.permute.xlu0 %833 }
  0xf4   : > { %v1361_v0 = vpack.c.bf16 %v10825_v53, %v1305_v48  ;;  %v1363_v25 = vpack.c.bf16 %v10826_v3, %v1307_v9  ;;  %v1360_v32 = vpack.c.bf16 %v10827_v59, %v1304_v28  ;;  %v1362_v56 = vpack.c.bf16 %v10828_v38, %v1306_v57  ;;  %v1883_v57 = vld [vmem:[%s10530_s6 + $0x88] sm:$0xff]  ;;  %v10834_v59 = vld [vmem:[#allocation24_spill] sm:$0xff] }
  0xf5   : > { %v1233_v63 = vadd.f32 %v1169_v24, %v1005_v40  ;;  %v1237_v34 = vadd.f32 %v1173_v30, %v10829_v49  ;;  %v1235_v39 = vadd.f32 %v1171_v43, %v1007_v8  ;;  %v1239_v36 = vadd.f32 %v1175_v17, %v10830_v35  ;;  %1416 = vperm.xlu1 %6342, %v1374_v45   ;;  %v10833_v8 = vld [vmem:[#allocation21_spill] sm:$0xff] }
  0xf6   : > { %1514 = vmatprep.subr.bf16.mxu0 %v1361_v0  ;;  %1627 = vmatprep.subr.bf16.mxu1 %v1363_v25  ;;  %v1004_v2 = vadd.f32 %v940_v55, %v10831_v22  ;;  %v1172_v4 = vmul.f32 %v7025_v29, %v7305_v31  ;;  %v1006_v11 = vadd.f32 %v942_v12, %v10832_v52  ;;  %v7395_v23 = vpop.permute.xlu1 %506  ;;  %v1372_v55 = vld [vmem:[%s10528_s4 + $0x20] sm:$0xff] }
  0xf7   : > { %1515 = vmatpush1.bf16.msra.mxu0 %v1360_v32  ;;  %1628 = vmatpush1.bf16.msra.mxu1 %v1362_v56  ;;  %v1297_v5 = vmax.f32 %v1233_v63, 0.0  ;;  %v1301_v7 = vmax.f32 %v1237_v34, 0.0  ;;  %v1299_v33 = vmax.f32 %v1235_v39, 0.0  ;;  %v1303_v37 = vmax.f32 %v1239_v36, 0.0  ;;  %v2797_v34 = vld [vmem:[%s10532_s8 + $0x8] sm:$0xff]  ;;  %v10835_v39 = vld [vmem:[#allocation20_spill] sm:$0xff] }
  0xf8   : > { %1995 = vperm.xlu0 %6343, %v1885_v54   ;;  %v1232_v13 = vadd.f32 %v1168_v10, %v1004_v2  ;;  %v1236_v24 = vadd.f32 %v1172_v4, %v7320_v16  ;;  %v1174_v43 = vmul.f32 %v7027_v62, %v7305_v31  ;;  %v1234_v9 = vadd.f32 %v1170_v46, %v1006_v11  ;;  %v10836_v36 = vld [vmem:[#allocation23_spill] sm:$0xff]  ;;  %v1368_v52 = vld [vmem:[%s10528_s4] sm:$0xff] }
  0xf9   : > { %v1357_v48 = vpack.c.bf16 %v1301_v7, %v1297_v5  ;;  %v768_v12 = vadd.f32 %v6965_v1, %v624_v42  ;;  %v770_v28 = vadd.f32 %v6965_v1, %v626_v6  ;;  %v1359_v16 = vpack.c.bf16 %v1303_v37, %v1299_v33  ;;  %1406 = vperm.xlu1 %6342, %v1372_v55  }
  0xfa   : > { %v1296_v40 = vmax.f32 %v1232_v13, 0.0  ;;  %v1300_v30 = vmax.f32 %v1236_v24, 0.0  ;;  %v1238_v31 = vadd.f32 %v1174_v43, %v7322_v20  ;;  %v773_v17 = vadd.f32 %v7332_v41, %v10833_v8  ;;  %v1370_v20 = vld [vmem:[%s10528_s4 + $0x10] sm:$0xff] }
  0xfb   : > { %v933_v53 = vmul.f32 %v7004_v47, %v834_v26  ;;  %v935_v0 = vmul.f32 %v7008_v51, %v834_v26  ;;  %1516 = vmatprep.subr.bf16.mxu0 %v1357_v48  ;;  %v1298_v42 = vmax.f32 %v1234_v9, 0.0  ;;  %v937_v1 = vmul.f32 %v7004_v47, %v838_v58  ;;  %1629 = vmatprep.subr.bf16.mxu1 %v1359_v16  ;;  %v1062_v46 = vpop.permute.xlu1 %1061 }
  0xfc   : > { %v939_v6 = vmul.f32 %v7008_v51, %v838_v58  ;;  %v1356_v3 = vpack.c.bf16 %v1300_v30, %v1296_v40  ;;  %v1302_v25 = vmax.f32 %v1238_v31, 0.0  ;;  %1985 = vperm.xlu0 %6343, %v1883_v57   ;;  %v775_v32 = vadd.f32 %v7332_v41, %v10834_v59  ;;  %v1880_v40 = vld [vmem:[%s10530_s6 + $0x70] sm:$0xff] }
  0xfd   : > { %v932_v38 = vmul.f32 %v6988_v27, %v834_v26  ;;  %v934_v56 = vmul.f32 %v7006_v50, %v834_v26  ;;  %v936_v10 = vmul.f32 %v6988_v27, %v838_v58  ;;  %v938_v45 = vmul.f32 %v7006_v50, %v838_v58  ;;  %1396 = vperm.xlu1 %6342, %v1370_v20  }
  0xfe   : > { %1517 = vmatpush1.bf16.msra.mxu0 %v1356_v3  ;;  %v1358_v54 = vpack.c.bf16 %v1302_v25, %v1298_v42  ;;  %v1161_v63 = vmul.f32 %v7021_v60, %v1062_v46  ;;  %v1163_v49 = vmul.f32 %v7023_v61, %v1062_v46  ;;  %v772_v35 = vadd.f32 %v7332_v41, %v10835_v39 }
  0xff   : > { %v774_v22 = vadd.f32 %v7332_v41, %v10836_v36  ;;  %v997_v2 = vadd.f32 %v933_v53, %v769_v44  ;;  %v1160_v4 = vmul.f32 %v7025_v29, %v1062_v46  ;;  %v1001_v58 = vadd.f32 %v937_v1, %v773_v17  ;;  %v1066_v11 = vpop.permute.xlu1 %1065  ;;  %v2801_v1 = vld [vmem:[%s10532_s8 + $0x28] sm:$0xff]  ;;  %v826_v36 = vpop.permute.xlu0 %825 }
 0x100   : > { %1630 = vmatpush1.bf16.msra.mxu1 %v1358_v54  ;;  %v999_v5 = vadd.f32 %v935_v0, %v7378_v14  ;;  %v1003_v7 = vadd.f32 %v939_v6, %v775_v32  ;;  %v1162_v33 = vmul.f32 %v7027_v62, %v1062_v46  ;;  %v996_v37 = vadd.f32 %v932_v38, %v768_v12  ;;  %v2799_v14 = vld [vmem:[%s10532_s8 + $0x18] sm:$0xff]  ;;  %v1878_v38 = vld [vmem:[%s10530_s6 + $0x60] sm:$0xff]  ;;  %v1876_v54 = vld [vmem:[%s10530_s6 + $0x50] sm:$0xff] }
 0x101   : > { %v1225_v26 = vadd.f32 %v1161_v63, %v997_v2  ;;  %v1000_v13 = vadd.f32 %v936_v10, %v772_v35  ;;  %v998_v41 = vadd.f32 %v934_v56, %v770_v28  ;;  %2867 = vperm.xlu0 %6343, %v2797_v34   ;;  %v1165_v44 = vmul.f32 %v7021_v60, %v1066_v11  ;;  %v2805_v63 = vld [vmem:[%s10532_s8 + $0x48] sm:$0xff]  ;;  %v1874_v2 = vld [vmem:[%s10530_s6 + $0x40] sm:$0xff] }
 0x102   : > { %v1167_v24 = vmul.f32 %v7023_v61, %v1066_v11  ;;  %v1227_v43 = vadd.f32 %v1163_v49, %v999_v5  ;;  %v1002_v55 = vadd.f32 %v938_v45, %v774_v22  ;;  %v1164_v48 = vmul.f32 %v7025_v29, %v1066_v11  ;;  %1386 = vperm.xlu1 %6342, %v1368_v52   ;;  %v2803_v45 = vld [vmem:[%s10532_s8 + $0x38] sm:$0xff] }
 0x103   : > { %v1224_v9 = vadd.f32 %v1160_v4, %v996_v37  ;;  %v1166_v57 = vmul.f32 %v7027_v62, %v1066_v11  ;;  %v1226_v16 = vadd.f32 %v1162_v33, %v998_v41  ;;  %v1229_v12 = vadd.f32 %v1165_v44, %v1001_v58  ;;  %v10837_v4 = vld [vmem:[#allocation14_spill] sm:$0xff]  ;;  %v2807_v37 = vld [vmem:[%s10532_s8 + $0x58] sm:$0xff] }
 0x104   : > { %v1231_v28 = vadd.f32 %v1167_v24, %v1003_v7  ;;  %v1228_v30 = vadd.f32 %v1164_v48, %v1000_v13  ;;  %v694_v8 = vpop.permute.xlu1 %693  ;;  %v1289_v17 = vmax.f32 %v1225_v26, 0.0  ;;  %v1291_v0 = vmax.f32 %v1227_v43, 0.0  ;;  %v10838_v13 = vld [vmem:[#allocation15_spill] sm:$0xff] }
 0x105   : > { %v1230_v31 = vadd.f32 %v1166_v57, %v1002_v55  ;;  %2877 = vperm.xlu0 %6343, %v2799_v14   ;;  %v1293_v53 = vmax.f32 %v1229_v12, 0.0  ;;  %v1288_v6 = vmax.f32 %v1224_v9, 0.0  ;;  %v1290_v3 = vmax.f32 %v1226_v16, 0.0  ;;  %v1872_v55 = vld [vmem:[%s10530_s6 + $0x30] sm:$0xff] }
 0x106   : > { %v1295_v42 = vmax.f32 %v1231_v28, 0.0  ;;  %1970 = vperm.xlu1 %6342, %v1880_v40   ;;  %v1292_v59 = vmax.f32 %v1228_v30, 0.0  ;;  %v616_v49 = vmul.f32 %v6976_v15, %v7395_v23  ;;  %v617_v34 = vmul.f32 %v6981_v19, %v7395_v23 }
 0x107   : > { %v1353_v25 = vpack.c.bf16 %v1293_v53, %v1289_v17  ;;  %v1294_v32 = vmax.f32 %v1230_v31, 0.0  ;;  %v618_v39 = vmul.f32 %v6979_v18, %v7395_v23  ;;  %v619_v35 = vmul.f32 %v6983_v21, %v7395_v23 }
 0x108   : > { %v1355_v20 = vpack.c.bf16 %v1295_v42, %v1291_v0  ;;  %v1352_v56 = vpack.c.bf16 %v1292_v59, %v1288_v6  ;;  %v620_v58 = vmul.f32 %v6976_v15, %v10837_v4  ;;  %v621_v5 = vmul.f32 %v6981_v19, %v10837_v4  ;;  %v2809_v42 = vld [vmem:[%s10532_s8 + $0x68] sm:$0xff] }
 0x109   : > { %2887 = vperm.xlu0 %6343, %v2801_v1   ;;  %1518 = vmatprep.subr.bf16.mxu0 %v1353_v25  ;;  %v1354_v10 = vpack.c.bf16 %v1294_v32, %v1290_v3  ;;  %v830_v46 = vpop.permute.xlu1 %829  ;;  %v622_v7 = vmul.f32 %v6979_v18, %v10837_v4  ;;  %v623_v33 = vmul.f32 %v6983_v21, %v10837_v4  ;;  %v1868_v4 = vld [vmem:[%s10530_s6 + $0x10] sm:$0xff] }
 0x10a   : > { %1631 = vmatprep.subr.bf16.mxu1 %v1355_v20  ;;  %1960 = vperm.xlu1 %6342, %v1878_v38   ;;  %v924_v23 = vmul.f32 %v6988_v27, %v826_v36  ;;  %v925_v52 = vmul.f32 %v7004_v47, %v826_v36  ;;  %v926_v11 = vmul.f32 %v7006_v50, %v826_v36  ;;  %v1870_v20 = vld [vmem:[%s10530_s6 + $0x20] sm:$0xff] }
 0x10b   : > { %1519 = vmatpush1.bf16.msra.mxu0 %v1352_v56  ;;  %1632 = vmatpush1.bf16.msra.mxu1 %v1354_v10  ;;  %v927_v26 = vmul.f32 %v7008_v51, %v826_v36  ;;  %v761_v41 = vadd.f32 %v10838_v13, %v617_v34  ;;  %v763_v44 = vadd.f32 %v10838_v13, %v619_v35  ;;  %v2811_v35 = vld [vmem:[%s10532_s8 + $0x78] sm:$0xff] }
 0x10c   : > { %v760_v24 = vadd.f32 %v10838_v13, %v616_v49  ;;  %v762_v43 = vadd.f32 %v10838_v13, %v618_v39  ;;  %v928_v14 = vmul.f32 %v6988_v27, %v830_v46  ;;  %v929_v48 = vmul.f32 %v7004_v47, %v830_v46 }
 0x10d   : > { %2897 = vperm.xlu0 %6343, %v2803_v45   ;;  %v930_v9 = vmul.f32 %v7006_v50, %v830_v46  ;;  %v931_v57 = vmul.f32 %v7008_v51, %v830_v46  ;;  %v764_v12 = vadd.f32 %v694_v8, %v620_v58  ;;  %v765_v28 = vadd.f32 %v694_v8, %v621_v5 }
 0x10e   : > { %1950 = vperm.xlu1 %6342, %v1876_v54   ;;  %v7469_v22 = vpop.permute.xlu1 %496  ;;  %v766_v31 = vadd.f32 %v694_v8, %v622_v7  ;;  %v767_v17 = vadd.f32 %v694_v8, %v623_v33  ;;  %v989_v1 = vadd.f32 %v925_v52, %v761_v41  ;;  %v991_v6 = vadd.f32 %v927_v26, %v763_v44 }
 0x10f   : > { %v988_v3 = vadd.f32 %v924_v23, %v760_v24  ;;  %v990_v25 = vadd.f32 %v926_v11, %v762_v43  ;;  %v993_v32 = vadd.f32 %v929_v48, %v765_v28  ;;  %v992_v38 = vadd.f32 %v928_v14, %v764_v12  ;;  %v1866_v43 = vld [vmem:[%s10530_s6] sm:$0xff] }
 0x110   : > { %v995_v8 = vadd.f32 %v931_v57, %v767_v17  ;;  %v994_v56 = vadd.f32 %v930_v9, %v766_v31  ;;  %v1896_v57 = vld [vmem:[%s10530_s6 + $0xf0] sm:$0xff]  ;;  %v608_v12 = vmul.f32 %v6976_v15, %v7469_v22  ;;  %v609_v28 = vmul.f32 %v6981_v19, %v7469_v22  ;;  %v818_v31 = vpop.permute.xlu0 %817 }
 0x111   : > { %2907 = vperm.xlu0 %6343, %v2805_v63  }
 0x112   : > { %1940 = vperm.xlu1 %6342, %v1874_v2  }
 0x113   : > { %v1054_v16 = vpop.permute.xlu1 %1053 }
 0x114   : > { %v1153_v40 = vmul.f32 %v7021_v60, %v1054_v16  ;;  %v1155_v30 = vmul.f32 %v7023_v61, %v1054_v16  ;;  %v1152_v53 = vmul.f32 %v7025_v29, %v1054_v16  ;;  %v1154_v0 = vmul.f32 %v7027_v62, %v1054_v16  ;;  %v2815_v16 = vld [vmem:[%s10532_s8 + $0x98] sm:$0xff] }
 0x115   : > { %2917 = vperm.xlu0 %6343, %v2807_v37  }
 0x116   : > { %1930 = vperm.xlu1 %6342, %v1872_v55   ;;  %v1217_v46 = vadd.f32 %v1153_v40, %v989_v1  ;;  %v1219_v54 = vadd.f32 %v1155_v30, %v991_v6  ;;  %v1216_v49 = vadd.f32 %v1152_v53, %v988_v3  ;;  %v1218_v39 = vadd.f32 %v1154_v0, %v990_v25  ;;  %v2813_v55 = vld [vmem:[%s10532_s8 + $0x88] sm:$0xff]  ;;  %v1894_v53 = vld [vmem:[%s10530_s6 + $0xe0] sm:$0xff] }
 0x117   : > { %v1058_v59 = vpop.permute.xlu1 %1057  ;;  %v610_v40 = vmul.f32 %v6979_v18, %v7469_v22  ;;  %v611_v30 = vmul.f32 %v6983_v21, %v7469_v22  ;;  %v2817_v0 = vld [vmem:[%s10532_s8 + $0xa8] sm:$0xff]  ;;  %v916_v25 = vmul.f32 %v6988_v27, %v818_v31 }
 0x118   : > { %v1157_v10 = vmul.f32 %v7021_v60, %v1058_v59  ;;  %v1159_v45 = vmul.f32 %v7023_v61, %v1058_v59  ;;  %v1156_v63 = vmul.f32 %v7025_v29, %v1058_v59  ;;  %v1158_v34 = vmul.f32 %v7027_v62, %v1058_v59 }
 0x119   : > { %2927 = vperm.xlu0 %6343, %v2809_v42   ;;  %v1281_v33 = vmax.f32 %v1217_v46, 0.0  ;;  %v1283_v52 = vmax.f32 %v1219_v54, 0.0  ;;  %v1280_v26 = vmax.f32 %v1216_v49, 0.0  ;;  %v1282_v37 = vmax.f32 %v1218_v39, 0.0  ;;  %v10839_v42 = vld [vmem:[#allocation16_spill] sm:$0xff] }
 0x11a   : > { %1920 = vperm.xlu1 %6342, %v1870_v20   ;;  %v1221_v36 = vadd.f32 %v1157_v10, %v993_v32  ;;  %v1223_v2 = vadd.f32 %v1159_v45, %v995_v8  ;;  %v1220_v58 = vadd.f32 %v1156_v63, %v992_v38  ;;  %v1222_v5 = vadd.f32 %v1158_v34, %v994_v56  ;;  %v10840_v8 = vld [vmem:[#allocation17_spill] sm:$0xff]  ;;  %v1892_v45 = vld [vmem:[%s10530_s6 + $0xd0] sm:$0xff] }
 0x11b   : > { %v612_v1 = vmul.f32 %v6976_v15, %v10839_v42  ;;  %v613_v6 = vmul.f32 %v6981_v19, %v10839_v42  ;;  %v614_v22 = vmul.f32 %v6979_v18, %v10839_v42  ;;  %v615_v3 = vmul.f32 %v6983_v21, %v10839_v42 }
 0x11c   : > { %v684_v7 = vpop.permute.xlu1 %683  ;;  %v1285_v23 = vmax.f32 %v1221_v36, 0.0  ;;  %v1287_v11 = vmax.f32 %v1223_v2, 0.0  ;;  %v1284_v44 = vmax.f32 %v1220_v58, 0.0  ;;  %v1286_v24 = vmax.f32 %v1222_v5, 0.0 }
 0x11d   : > { %2937 = vperm.xlu0 %6343, %v2811_v35   ;;  %v917_v20 = vmul.f32 %v7004_v47, %v818_v31  ;;  %v918_v59 = vmul.f32 %v7006_v50, %v818_v31  ;;  %v919_v32 = vmul.f32 %v7008_v51, %v818_v31  ;;  %v753_v38 = vadd.f32 %v10840_v8, %v609_v28  ;;  %v2819_v35 = vld [vmem:[%s10532_s8 + $0xb8] sm:$0xff] }
 0x11e   : > { %1910 = vperm.xlu1 %6342, %v1868_v4   ;;  %v1349_v13 = vpack.c.bf16 %v1285_v23, %v1281_v33  ;;  %v1351_v41 = vpack.c.bf16 %v1287_v11, %v1283_v52  ;;  %v1348_v14 = vpack.c.bf16 %v1284_v44, %v1280_v26  ;;  %v1350_v48 = vpack.c.bf16 %v1286_v24, %v1282_v37 }
 0x11f   : > { %v755_v56 = vadd.f32 %v10840_v8, %v611_v30  ;;  %v752_v10 = vadd.f32 %v10840_v8, %v608_v12  ;;  %v754_v46 = vadd.f32 %v10840_v8, %v610_v40  ;;  %v756_v36 = vadd.f32 %v684_v7, %v612_v1 }
 0x120   : > { %1520 = vmatprep.subr.bf16.mxu0 %v1349_v13  ;;  %1633 = vmatprep.subr.bf16.mxu1 %v1351_v41  ;;  %v757_v2 = vadd.f32 %v684_v7, %v613_v6  ;;  %v758_v5 = vadd.f32 %v684_v7, %v614_v22  ;;  %v759_v33 = vadd.f32 %v684_v7, %v615_v3  ;;  %v1890_v41 = vld [vmem:[%s10530_s6 + $0xc0] sm:$0xff]  ;;  %v2821_v7 = vld [vmem:[%s10532_s8 + $0xc8] sm:$0xff]  ;;  %v2823_v6 = vld [vmem:[%s10532_s8 + $0xd8] sm:$0xff] }
 0x121   : > { %v822_v9 = vpop.permute.xlu1 %821  ;;  %2947 = vperm.xlu0 %6343, %v2813_v55   ;;  %1521 = vmatpush1.bf16.msra.mxu0 %v1348_v14  ;;  %v981_v11 = vadd.f32 %v917_v20, %v753_v38  ;;  %v983_v26 = vadd.f32 %v919_v32, %v755_v56  ;;  %v980_v37 = vadd.f32 %v916_v25, %v752_v10  ;;  %v810_v38 = vpop.permute.xlu0 %809 }
 0x122   : > { %1900 = vperm.xlu1 %6342, %v1866_v43   ;;  %1634 = vmatpush1.bf16.msra.mxu1 %v1350_v48  ;;  %v920_v54 = vmul.f32 %v6988_v27, %v822_v9  ;;  %v921_v63 = vmul.f32 %v7004_v47, %v822_v9  ;;  %v922_v49 = vmul.f32 %v7006_v50, %v822_v9 }
 0x123   : > { %v923_v34 = vmul.f32 %v7008_v51, %v822_v9  ;;  %v982_v13 = vadd.f32 %v918_v59, %v754_v46 }
 0x124   : > { %v985_v24 = vadd.f32 %v921_v63, %v757_v2  ;;  %v984_v55 = vadd.f32 %v920_v54, %v756_v36  ;;  %v986_v14 = vadd.f32 %v922_v49, %v758_v5  ;;  %v1886_v54 = vld [vmem:[%s10530_s6 + $0xa0] sm:$0xff]  ;;  %v1884_v36 = vld [vmem:[%s10530_s6 + $0x90] sm:$0xff]  ;;  %v2827_v2 = vld [vmem:[%s10532_s8 + $0xf8] sm:$0xff] }
 0x125   : > { %2957 = vperm.xlu0 %6343, %v2815_v16   ;;  %v987_v43 = vadd.f32 %v923_v34, %v759_v33  ;;  %v2825_v34 = vld [vmem:[%s10532_s8 + $0xe8] sm:$0xff] }
 0x126   : > { %2050 = vperm.xlu1 %6342, %v1896_v57   ;;  %v7540_v17 = vpop.permute.xlu1 %486 }
 0x127   : > { %v600_v33 = vmul.f32 %v6976_v15, %v7540_v17 }
 0x129   : > { %2967 = vperm.xlu0 %6343, %v2817_v0   ;;  %v1888_v0 = vld [vmem:[%s10530_s6 + $0xb0] sm:$0xff] }
 0x12a   : > { %2040 = vperm.xlu1 %6342, %v1894_v53  }
 0x12b   : > { %v1046_v39 = vpop.permute.xlu1 %1045 }
 0x12c   : > { %v1145_v4 = vmul.f32 %v7021_v60, %v1046_v39  ;;  %v1147_v58 = vmul.f32 %v7023_v61, %v1046_v39  ;;  %v1144_v23 = vmul.f32 %v7025_v29, %v1046_v39  ;;  %v1146_v52 = vmul.f32 %v7027_v62, %v1046_v39 }
 0x12d   : > { %2977 = vperm.xlu0 %6343, %v2819_v35   ;;  %v7602_v35 = vpop.permute.xlu0 %801 }
 0x12e   : > { %2030 = vperm.xlu1 %6342, %v1892_v45   ;;  %v1209_v9 = vadd.f32 %v1145_v4, %v981_v11  ;;  %v1211_v16 = vadd.f32 %v1147_v58, %v983_v26  ;;  %v1208_v28 = vadd.f32 %v1144_v23, %v980_v37  ;;  %v1210_v30 = vadd.f32 %v1146_v52, %v982_v13  ;;  %v10841_v4 = vld [vmem:[#allocation18_spill] sm:$0xff] }
 0x12f   : > { %v1050_v44 = vpop.permute.xlu1 %1049  ;;  %v604_v58 = vmul.f32 %v6976_v15, %v10841_v4  ;;  %v605_v5 = vmul.f32 %v6981_v19, %v10841_v4  ;;  %v601_v23 = vmul.f32 %v6981_v19, %v7540_v17  ;;  %v602_v52 = vmul.f32 %v6979_v18, %v7540_v17  ;;  %v1882_v13 = vld [vmem:[%s10530_s6 + $0x80] sm:$0xff] }
 0x130   : > { %v1149_v48 = vmul.f32 %v7021_v60, %v1050_v44  ;;  %v1151_v57 = vmul.f32 %v7023_v61, %v1050_v44  ;;  %v1148_v12 = vmul.f32 %v7025_v29, %v1050_v44  ;;  %v1150_v40 = vmul.f32 %v7027_v62, %v1050_v44 }
 0x131   : > { %2987 = vperm.xlu0 %6343, %v2821_v7   ;;  %v1273_v3 = vmax.f32 %v1209_v9, 0.0  ;;  %v1275_v20 = vmax.f32 %v1211_v16, 0.0  ;;  %v1272_v32 = vmax.f32 %v1208_v28, 0.0  ;;  %v1274_v8 = vmax.f32 %v1210_v30, 0.0  ;;  %v7624_v37 = vpop.permute.xlu0 %1033  ;;  %v2829_v9 = vld [vmem:[%s10532_s8 + $0x108] sm:$0xff] }
 0x132   : > { %2020 = vperm.xlu1 %6342, %v1890_v41   ;;  %v1213_v31 = vadd.f32 %v1149_v48, %v985_v24  ;;  %v1215_v53 = vadd.f32 %v1151_v57, %v987_v43  ;;  %v1212_v42 = vadd.f32 %v1148_v12, %v984_v55  ;;  %v1214_v1 = vadd.f32 %v1150_v40, %v986_v14  ;;  %v10842_v24 = vld [vmem:[#allocation22_spill] sm:$0xff]  ;;  %v10843_v40 = vld [vmem:[#allocation19_spill] sm:$0xff] }
 0x133   : > { %v603_v11 = vmul.f32 %v6983_v21, %v7540_v17  ;;  %v606_v41 = vmul.f32 %v6979_v18, %v10841_v4  ;;  %v607_v44 = vmul.f32 %v6983_v21, %v10841_v4  ;;  %v7635_v43 = vmul.f32 %v6976_v15, %v10842_v24 }
 0x134   : > { %v7594_v22 = vpop.permute.xlu1 %673  ;;  %v1277_v25 = vmax.f32 %v1213_v31, 0.0  ;;  %v1279_v59 = vmax.f32 %v1215_v53, 0.0  ;;  %v1276_v46 = vmax.f32 %v1212_v42, 0.0  ;;  %v1278_v45 = vmax.f32 %v1214_v1, 0.0  ;;  %v2796_v42 = vld [vmem:[%s10532_s8] sm:$0xff] }
 0x135   : > { %2997 = vperm.xlu0 %6343, %v2823_v6   ;;  %v7639_v17 = vmul.f32 %v6981_v19, %v10842_v24  ;;  %v7643_v55 = vmul.f32 %v6979_v18, %v10842_v24  ;;  %v7647_v14 = vmul.f32 %v6983_v21, %v10842_v24  ;;  %v908_v7 = vmul.f32 %v6988_v27, %v810_v38 }
 0x136   : > { %2010 = vperm.xlu1 %6342, %v1888_v0   ;;  %v1345_v56 = vpack.c.bf16 %v1277_v25, %v1273_v3  ;;  %v1347_v10 = vpack.c.bf16 %v1279_v59, %v1275_v20  ;;  %v1344_v63 = vpack.c.bf16 %v1276_v46, %v1272_v32  ;;  %v1346_v49 = vpack.c.bf16 %v1278_v45, %v1274_v8 }
 0x137   : > { %v909_v48 = vmul.f32 %v7004_v47, %v810_v38  ;;  %v910_v57 = vmul.f32 %v7006_v50, %v810_v38  ;;  %v911_v16 = vmul.f32 %v7008_v51, %v810_v38  ;;  %v7658_v12 = vmul.f32 %v6988_v27, %v7602_v35 }
 0x138   : > { %1522 = vmatprep.subr.bf16.mxu0 %v1345_v56  ;;  %1635 = vmatprep.subr.bf16.mxu1 %v1347_v10  ;;  %v7662_v28 = vmul.f32 %v7021_v60, %v7624_v37  ;;  %v745_v30 = vadd.f32 %v10843_v40, %v601_v23  ;;  %v747_v31 = vadd.f32 %v10843_v40, %v603_v11  ;;  %v2831_v56 = vld [vmem:[%s10532_s8 + $0x118] sm:$0xff] }
 0x139   : > { %v814_v39 = vpop.permute.xlu1 %813  ;;  %1523 = vmatpush1.bf16.msra.mxu0 %v1344_v63  ;;  %1636 = vmatpush1.bf16.msra.mxu1 %v1346_v49  ;;  %v744_v53 = vadd.f32 %v10843_v40, %v600_v33  ;;  %v746_v0 = vadd.f32 %v10843_v40, %v602_v52  ;;  %v748_v59 = vadd.f32 %v7594_v22, %v604_v58  ;;  %v2800_v40 = vld [vmem:[%s10532_s8 + $0x20] sm:$0xff] }
 0x13a   : > { %2000 = vperm.xlu1 %6342, %v1886_v54   ;;  %3007 = vperm.xlu0 %6343, %v2825_v34   ;;  %v912_v1 = vmul.f32 %v6988_v27, %v814_v39  ;;  %v913_v6 = vmul.f32 %v7004_v47, %v814_v39  ;;  %v914_v3 = vmul.f32 %v7006_v50, %v814_v39 }
 0x13b   : > { %v915_v25 = vmul.f32 %v7008_v51, %v814_v39  ;;  %v749_v32 = vadd.f32 %v7594_v22, %v605_v5  ;;  %v750_v10 = vadd.f32 %v7594_v22, %v606_v41  ;;  %v751_v46 = vadd.f32 %v7594_v22, %v607_v44 }
 0x13c   : > { %v973_v63 = vadd.f32 %v909_v48, %v745_v30  ;;  %v975_v49 = vadd.f32 %v911_v16, %v747_v31  ;;  %v972_v34 = vadd.f32 %v908_v7, %v744_v53  ;;  %v974_v39 = vadd.f32 %v910_v57, %v746_v0 }
 0x13d   : > { %v977_v4 = vadd.f32 %v913_v6, %v749_v32  ;;  %v979_v58 = vadd.f32 %v915_v25, %v751_v46  ;;  %v976_v5 = vadd.f32 %v912_v1, %v748_v59  ;;  %v978_v33 = vadd.f32 %v914_v3, %v750_v10  ;;  %v2835_v3 = vld [vmem:[%s10532_s8 + $0x138] sm:$0xff] }
 0x13e   : > { %1990 = vperm.xlu1 %6342, %v1884_v36   ;;  %v7622_v26 = vpop.permute.xlu1 %476  ;;  %3017 = vperm.xlu0 %6343, %v2827_v2   ;;  %v2798_v36 = vld [vmem:[%s10532_s8 + $0x10] sm:$0xff] }
 0x13f   : > { %v592_v48 = vmul.f32 %v6976_v15, %v7622_v26  ;;  %v594_v30 = vmul.f32 %v6979_v18, %v7622_v26  ;;  %v595_v31 = vmul.f32 %v6983_v21, %v7622_v26  ;;  %v1135_v18 = vmul.f32 %v7023_v61, %v7624_v37 }
 0x140   : > { %v1132_v21 = vmul.f32 %v7025_v29, %v7624_v37 }
 0x142   : > { %1980 = vperm.xlu1 %6342, %v1882_v13   ;;  %3027 = vperm.xlu0 %6343, %v2829_v9   ;;  %v2833_v13 = vld [vmem:[%s10532_s8 + $0x128] sm:$0xff]  ;;  %v593_v9 = vmul.f32 %v6981_v19, %v7622_v26 }
 0x143   : > { %v1038_v20 = vpop.permute.xlu1 %1037 }
 0x144   : > { %v1137_v8 = vmul.f32 %v7021_v60, %v1038_v20  ;;  %v1139_v38 = vmul.f32 %v7023_v61, %v1038_v20  ;;  %v1136_v45 = vmul.f32 %v7025_v29, %v1038_v20  ;;  %v1138_v54 = vmul.f32 %v7027_v62, %v1038_v20 }
 0x146   : > { %2862 = vperm.xlu1 %6342, %v2796_v42   ;;  %3037 = vperm.xlu0 %6343, %v2831_v56   ;;  %v1201_v23 = vadd.f32 %v1137_v8, %v973_v63  ;;  %v1203_v11 = vadd.f32 %v1139_v38, %v975_v49  ;;  %v1200_v44 = vadd.f32 %v1136_v45, %v972_v34  ;;  %v2802_v38 = vld [vmem:[%s10532_s8 + $0x30] sm:$0xff]  ;;  %v10844_v56 = vld [vmem:[#allocation25_spill] sm:$0xff] }
 0x147   : > { %v1042_v2 = vpop.permute.xlu1 %1041  ;;  %v1202_v7 = vadd.f32 %v1138_v54, %v974_v39  ;;  %v737_v10 = vadd.f32 %v10844_v56, %v593_v9  ;;  %v739_v46 = vadd.f32 %v10844_v56, %v595_v31  ;;  %v736_v45 = vadd.f32 %v10844_v56, %v592_v48  ;;  %v2837_v39 = vld [vmem:[%s10532_s8 + $0x148] sm:$0xff] }
 0x148   : > { %v1141_v22 = vmul.f32 %v7021_v60, %v1042_v2  ;;  %v1143_v52 = vmul.f32 %v7023_v61, %v1042_v2  ;;  %v1140_v41 = vmul.f32 %v7025_v29, %v1042_v2  ;;  %v1142_v24 = vmul.f32 %v7027_v62, %v1042_v2 }
 0x149   : > { %v1265_v15 = vmax.f32 %v1201_v23, 0.0  ;;  %v1267_v6 = vmax.f32 %v1203_v11, 0.0  ;;  %v1264_v25 = vmax.f32 %v1200_v44, 0.0  ;;  %v1266_v20 = vmax.f32 %v1202_v7, 0.0 }
 0x14a   : > { %2872 = vperm.xlu1 %6342, %v2798_v36   ;;  %v1205_v57 = vadd.f32 %v1141_v22, %v977_v4  ;;  %v1207_v16 = vadd.f32 %v1143_v52, %v979_v58  ;;  %v1204_v53 = vadd.f32 %v1140_v41, %v976_v5  ;;  %v1206_v0 = vadd.f32 %v1142_v24, %v978_v33  ;;  %v2839_v41 = vld [vmem:[%s10532_s8 + $0x158] sm:$0xff] }
 0x14b   : > { %3047 = vperm.xlu0 %6343, %v2833_v13   ;;  %v1134_v54 = vmul.f32 %v7027_v62, %v7624_v37  ;;  %v738_v34 = vadd.f32 %v10844_v56, %v594_v30  ;;  %v7776_v56 = vpop.permute.xlu0 %1446 }
 0x14c   : > { %v664_v42 = vpop.permute.xlu1 %663  ;;  %v1269_v1 = vmax.f32 %v1205_v57, 0.0  ;;  %v1271_v19 = vmax.f32 %v1207_v16, 0.0  ;;  %v1268_v32 = vmax.f32 %v1204_v53, 0.0  ;;  %v1270_v8 = vmax.f32 %v1206_v0, 0.0  ;;  %v2806_v57 = vld [vmem:[%s10532_s8 + $0x50] sm:$0xff] }
 0x14d   : > { %v740_v36 = vadd.f32 %v664_v42, %v7635_v43  ;;  %v741_v2 = vadd.f32 %v664_v42, %v7639_v17  ;;  %v742_v4 = vadd.f32 %v664_v42, %v7643_v55  ;;  %v743_v58 = vadd.f32 %v664_v42, %v7647_v14  ;;  %v2804_v43 = vld [vmem:[%s10532_s8 + $0x40] sm:$0xff] }
 0x14e   : > { %2882 = vperm.xlu1 %6342, %v2800_v40   ;;  %v1341_v26 = vpack.c.bf16 %v1269_v1, %v1265_v15  ;;  %v1343_v59 = vpack.c.bf16 %v1271_v19, %v1267_v6  ;;  %v1340_v63 = vpack.c.bf16 %v1268_v32, %v1264_v25  ;;  %v1342_v49 = vpack.c.bf16 %v1270_v8, %v1266_v20  ;;  %v6344_v32 = vld [vmem:[%s10527_s3] sm:$0xff]  }
 0x14f   : > { %3057 = vperm.xlu0 %6343, %v2835_v3   ;;  %v901_v17 = vmul.f32 %v7004_v47, %v7602_v35  ;;  %v902_v55 = vmul.f32 %v7006_v50, %v7602_v35  ;;  %v2812_v8 = vld [vmem:[%s10532_s8 + $0x80] sm:$0xff] }
 0x150   : > { %1524 = vmatprep.subr.bf16.mxu0 %v1341_v26  ;;  %1637 = vmatprep.subr.bf16.mxu1 %v1343_v59  ;;  %v2810_v26 = vld [vmem:[%s10532_s8 + $0x70] sm:$0xff]  ;;  %v2843_v59 = vld [vmem:[%s10532_s8 + $0x178] sm:$0xff] }
 0x151   : > { %v806_v37 = vpop.permute.xlu1 %805  ;;  %1525 = vmatpush1.bf16.msra.mxu0 %v1340_v63  ;;  %1638 = vmatpush1.bf16.msra.mxu1 %v1342_v49  ;;  %v965_v44 = vadd.f32 %v901_v17, %v737_v10  ;;  %v966_v7 = vadd.f32 %v902_v55, %v738_v34  ;;  %v10845_v10 = vmov 0   ;;  %v7789_v63 = vpop.permute.xlu0 %1441  ;;  %v2816_v49 = vld [vmem:[%s10532_s8 + $0xa0] sm:$0xff]  ;;  %v2849_v34 = vld [vmem:[%s10532_s8 + $0x1a8] sm:$0xff] }
 0x152   : > { %2892 = vperm.xlu1 %6342, %v2802_v38   ;;  %v904_v5 = vmul.f32 %v6988_v27, %v806_v37  ;;  %v905_v33 = vmul.f32 %v7004_v47, %v806_v37  ;;  %v906_v22 = vmul.f32 %v7006_v50, %v806_v37  ;;  %v907_v23 = vmul.f32 %v7008_v51, %v806_v37  ;;  %v2845_v38 = vld [vmem:[%s10532_s8 + $0x188] sm:$0xff] }
 0x153   : > { %v903_v27 = vmul.f32 %v7008_v51, %v7602_v35  ;;  %3067 = vperm.xlu0 %6343, %v2837_v39   ;;  %v964_v47 = vadd.f32 %v7658_v12, %v736_v45  ;;  %v2847_v45 = vld [vmem:[%s10532_s8 + $0x198] sm:$0xff]  ;;  %v2818_v39 = vld [vmem:[%s10532_s8 + $0xb0] sm:$0xff]  ;;  %v2853_v37 = vld [vmem:[%s10532_s8 + $0x1c8] sm:$0xff] }
 0x154   : > { %v969_v14 = vadd.f32 %v905_v33, %v741_v2  ;;  %v971_v52 = vadd.f32 %v907_v23, %v743_v58  ;;  %v968_v11 = vadd.f32 %v904_v5, %v740_v36  ;;  %v970_v13 = vadd.f32 %v906_v22, %v742_v4  ;;  %v2851_v36 = vld [vmem:[%s10532_s8 + $0x1b8] sm:$0xff]  ;;  %v6346_v2 = vld [vmem:[%s10527_s3 + $0x10] sm:$0xff]   ;;  %v2820_v58 = vld [vmem:[%s10532_s8 + $0xc0] sm:$0xff] }
 0x155   : > { %v967_v24 = vadd.f32 %v903_v27, %v739_v46  ;;  %v2814_v46 = vld [vmem:[%s10532_s8 + $0x90] sm:$0xff]  ;;  %v7808_v4 = vpop.permute.xlu0 %1431  ;;  %v2855_v22 = vld [vmem:[%s10532_s8 + $0x1d8] sm:$0xff]  ;;  %v2857_v17 = vld [vmem:[%s10532_s8 + $0x1e8] sm:$0xff] }
 0x156   : > { %2902 = vperm.xlu1 %6342, %v2804_v43   ;;  %v1030_v50 = vpop.permute.xlu1 %1029  ;;  %v1197_v48 = vadd.f32 %v7662_v28, %v969_v14  ;;  %v1199_v51 = vadd.f32 %v1135_v18, %v971_v52  ;;  %v1196_v35 = vadd.f32 %v1132_v21, %v968_v11  ;;  %v1198_v9 = vadd.f32 %v1134_v54, %v970_v13  ;;  %v2841_v28 = vld [vmem:[%s10532_s8 + $0x168] sm:$0xff]  ;;  %v2822_v33 = vld [vmem:[%s10532_s8 + $0xd0] sm:$0xff]  ;;  %v6347_v23 = vld [vmem:[%s10527_s3 + $0x18] sm:$0xff]  }
 0x157   : > { %v1129_v16 = vmul.f32 %v7021_v60, %v1030_v50  ;;  %v1131_v40 = vmul.f32 %v7023_v61, %v1030_v50  ;;  %v1128_v30 = vmul.f32 %v7025_v29, %v1030_v50  ;;  %v1130_v12 = vmul.f32 %v7027_v62, %v1030_v50  ;;  %3077 = vperm.xlu0 %6343, %v2839_v41   ;;  %v2808_v61 = vld [vmem:[%s10532_s8 + $0x60] sm:$0xff]  ;;  %v6345_v54 = vld [vmem:[%s10527_s3 + $0x8] sm:$0xff]   ;;  %v2826_v27 = vld [vmem:[%s10532_s8 + $0xf0] sm:$0xff] }
 0x158   : > { %v1261_v15 = vmax.f32 %v1197_v48, 0.0  ;;  %v1263_v1 = vmax.f32 %v1199_v51, 0.0  ;;  %v1260_v6 = vmax.f32 %v1196_v35, 0.0  ;;  %v1262_v60 = vmax.f32 %v1198_v9, 0.0  ;;  %v2824_v43 = vld [vmem:[%s10532_s8 + $0xe0] sm:$0xff]  ;;  %v2859_v14 = vld [vmem:[%s10532_s8 + $0x1f8] sm:$0xff] }
 0x159   : > { %v1193_v31 = vadd.f32 %v1129_v16, %v965_v44  ;;  %v1195_v53 = vadd.f32 %v1131_v40, %v967_v24  ;;  %v1192_v0 = vadd.f32 %v1128_v30, %v964_v47  ;;  %v1194_v42 = vadd.f32 %v1130_v12, %v966_v7  ;;  %v7818_v5 = vpop.permute.xlu0 %1421  ;;  %v6348_v52 = vld [vmem:[%s10527_s3 + $0x20] sm:$0xff]   ;;  %v2830_v41 = vld [vmem:[%s10532_s8 + $0x110] sm:$0xff]  ;;  %v6349_v44 = vld [vmem:[%s10527_s3 + $0x28] sm:$0xff]  }
 0x15a   : > { %2912 = vperm.xlu1 %6342, %v2806_v57   ;;  %v2828_v13 = vld [vmem:[%s10532_s8 + $0x100] sm:$0xff]  ;;  %v2834_v47 = vld [vmem:[%s10532_s8 + $0x130] sm:$0xff]  ;;  %v6351_v35 = vld [vmem:[%s10527_s3 + $0x38] sm:$0xff]  }
 0x15b   : > { %v1257_v29 = vmax.f32 %v1193_v31, 0.0  ;;  %v1259_v62 = vmax.f32 %v1195_v53, 0.0  ;;  %v1256_v19 = vmax.f32 %v1192_v0, 0.0  ;;  %v1258_v3 = vmax.f32 %v1194_v42, 0.0  ;;  %3087 = vperm.xlu0 %6343, %v2841_v28   ;;  %v2832_v24 = vld [vmem:[%s10532_s8 + $0x120] sm:$0xff]  ;;  %v6350_v7 = vld [vmem:[%s10527_s3 + $0x30] sm:$0xff]   ;;  %v7880_v51 = vpop.permute.xlu1 %1456 }
 0x15c   : > { %v2836_v50 = vld [vmem:[%s10532_s8 + $0x140] sm:$0xff]  ;;  %v2838_v48 = vld [vmem:[%s10532_s8 + $0x150] sm:$0xff] }
 0x15d   : > { %v1337_v25 = vpack.c.bf16 %v1261_v15, %v1257_v29  ;;  %v1339_v20 = vpack.c.bf16 %v1263_v1, %v1259_v62  ;;  %v1336_v18 = vpack.c.bf16 %v1260_v6, %v1256_v19  ;;  %v1338_v21 = vpack.c.bf16 %v1262_v60, %v1258_v3  ;;  %v7835_v55 = vpop.permute.xlu0 %1411  ;;  %v2840_v9 = vld [vmem:[%s10532_s8 + $0x160] sm:$0xff]  ;;  %v2842_v16 = vld [vmem:[%s10532_s8 + $0x170] sm:$0xff] }
 0x15e   : > { %2922 = vperm.xlu1 %6342, %v2808_v61   ;;  %v2844_v40 = vld [vmem:[%s10532_s8 + $0x180] sm:$0xff]  ;;  %v2846_v12 = vld [vmem:[%s10532_s8 + $0x190] sm:$0xff] }
 0x15f   : > { %1526 = vmatprep.subr.bf16.mxu0 %v1337_v25  ;;  %1639 = vmatprep.subr.bf16.mxu1 %v1339_v20  ;;  %v7890_v57 = vpop.permute.xlu1 %1461  ;;  %v2848_v31 = vld [vmem:[%s10532_s8 + $0x1a0] sm:$0xff]  ;;  %v2850_v53 = vld [vmem:[%s10532_s8 + $0x1b0] sm:$0xff] }
 0x160   : > { %1527 = vmatpush1.bf16.msra.mxu0 %v1336_v18  ;;  %1640 = vmatpush1.bf16.msra.mxu1 %v1338_v21  ;;  %v2852_v42 = vld [vmem:[%s10532_s8 + $0x1c0] sm:$0xff]  ;;  %v2854_v1 = vld [vmem:[%s10532_s8 + $0x1d0] sm:$0xff] }
 0x161   : > { %3097 = vperm.xlu0 %6343, %v2843_v59   ;;  %v7848_v11 = vpop.permute.xlu0 %1401  ;;  %v2856_v6 = vld [vmem:[%s10532_s8 + $0x1e0] sm:$0xff]  ;;  %v2858_v61 = vld [vmem:[%s10532_s8 + $0x1f0] sm:$0xff] }
 0x162   : > { %2932 = vperm.xlu1 %6342, %v2810_v26  }
 0x163   : > { %1545 = vmatmul.mubr.bf16.vlgmr.msra.gmra.mxu0 %v6344_v32  ;;  %1658 = vmatmul.mubr.bf16.vlgmr.msra.gmra.mxu1 %v6344_v32  ;;  %v7898_v30 = vpop.permute.xlu1 %1451 }
 0x164   : > { %1554 = vmatprep.mubr.bf16.mxu0 %v10845_v10  ;;  %1667 = vmatprep.mubr.bf16.mxu1 %v10845_v10 }
 0x165   : > { %3107 = vperm.xlu0 %6343, %v2845_v38   ;;  %v7937_v18 = vpop.permute.xlu0 %1391 }
 0x166   : > { %2942 = vperm.xlu1 %6342, %v2812_v8  }
 0x167   : > { %v7903_v28 = vpop.permute.xlu1 %1436 }
 0x169   : > { %3117 = vperm.xlu0 %6343, %v2847_v45  }
 0x16a   : > { %2952 = vperm.xlu1 %6342, %v2814_v46  }
 0x16b   : > { %1555 = vmatmul.mubr.bf16.gmra.mxu0 %v6345_v54  ;;  %1668 = vmatmul.mubr.bf16.gmra.mxu1 %v6345_v54 }
 0x16c   : > { %1564 = vmatprep.mubr.bf16.mxu0 %v10845_v10  ;;  %1677 = vmatprep.mubr.bf16.mxu1 %v10845_v10  ;;  %v7911_v0 = vpop.permute.xlu1 %1426 }
 0x16d   : > { %3127 = vperm.xlu0 %6343, %v2849_v34  }
 0x16e   : > { %2962 = vperm.xlu1 %6342, %v2816_v49  }
 0x170   : > { %v7916_v15 = vpop.permute.xlu1 %1416 }
 0x171   : > { %3137 = vperm.xlu0 %6343, %v2851_v36  }
 0x172   : > { %2972 = vperm.xlu1 %6342, %v2818_v39  }
 0x173   : > { %1565 = vmatmul.mubr.bf16.gmra.mxu0 %v6346_v2  ;;  %1678 = vmatmul.mubr.bf16.gmra.mxu1 %v6346_v2 }
 0x174   : > { %1574 = vmatprep.mubr.bf16.mxu0 %v10845_v10  ;;  %1687 = vmatprep.mubr.bf16.mxu1 %v10845_v10  ;;  %v7924_v60 = vpop.permute.xlu1 %1406 }
 0x175   : > { %3147 = vperm.xlu0 %6343, %v2853_v37   ;;  %10846 = vst [vmem:[#allocation28_spill] sm:$0xff] %v7924_v60 }
 0x176   : > { %2982 = vperm.xlu1 %6342, %v2820_v58  }
 0x178   : > { %v7929_v29 = vpop.permute.xlu1 %1396 }
 0x179   : > { %3157 = vperm.xlu0 %6343, %v2855_v22   ;;  %10847 = vst [vmem:[#allocation29_spill] sm:$0xff] %v7929_v29 }
 0x17a   : > { %2992 = vperm.xlu1 %6342, %v2822_v33  }
 0x17b   : > { %1575 = vmatmul.mubr.bf16.gmra.mxu0 %v6347_v23  ;;  %1688 = vmatmul.mubr.bf16.gmra.mxu1 %v6347_v23 }
 0x17c   : > { %1584 = vmatprep.mubr.bf16.mxu0 %v10845_v10  ;;  %1697 = vmatprep.mubr.bf16.mxu1 %v10845_v10 }
 0x17d   : > { %3167 = vperm.xlu0 %6343, %v2857_v17   ;;  %v7931_v3 = vpop.permute.xlu1 %1386 }
 0x17e   : > { %3002 = vperm.xlu1 %6342, %v2824_v43   ;;  %10848 = vst [vmem:[#allocation26_spill] sm:$0xff] %v7931_v3 }
 0x181   : > { %3177 = vperm.xlu0 %6343, %v2859_v14  }
 0x182   : > { %3012 = vperm.xlu1 %6342, %v2826_v27  }
 0x183   : > { %1585 = vmatmul.mubr.bf16.gmra.mxu0 %v6348_v52  ;;  %1698 = vmatmul.mubr.bf16.gmra.mxu1 %v6348_v52 }
 0x184   : > { %1594 = vmatprep.mubr.bf16.mxu0 %v10845_v10  ;;  %1707 = vmatprep.mubr.bf16.mxu1 %v10845_v10 }
 0x186   : > { %3022 = vperm.xlu1 %6342, %v2828_v13  }
 0x18a   : > { %3032 = vperm.xlu1 %6342, %v2830_v41  }
 0x18b   : > { %1595 = vmatmul.mubr.bf16.gmra.mxu0 %v6349_v44  ;;  %1708 = vmatmul.mubr.bf16.gmra.mxu1 %v6349_v44 }
 0x18c   : > { %1604 = vmatprep.mubr.bf16.mxu0 %v10845_v10  ;;  %1717 = vmatprep.mubr.bf16.mxu1 %v10845_v10 }
 0x18e   : > { %3042 = vperm.xlu1 %6342, %v2832_v24  }
 0x192   : > { %3052 = vperm.xlu1 %6342, %v2834_v47  }
 0x193   : > { %1605 = vmatmul.mubr.bf16.gmra.mxu0 %v6350_v7  ;;  %1718 = vmatmul.mubr.bf16.gmra.mxu1 %v6350_v7 }
 0x194   : > { %1614 = vmatprep.mubr.bf16.mxu0 %v10845_v10  ;;  %1727 = vmatprep.mubr.bf16.mxu1 %v10845_v10 }
 0x196   : > { %3062 = vperm.xlu1 %6342, %v2836_v50  }
 0x19a   : > { %3072 = vperm.xlu1 %6342, %v2838_v48  }
 0x19b   : > { %1615 = vmatmul.mubr.bf16.gmra.mxu0 %v6351_v35  ;;  %1728 = vmatmul.mubr.bf16.gmra.mxu1 %v6351_v35 }
 0x19c   : > { %2186 = vmatprep.mubr.bf16.mxu0 %v10845_v10  ;;  %2379 = vmatprep.mubr.bf16.mxu1 %v10845_v10 }
 0x19e   : > { %3082 = vperm.xlu1 %6342, %v2840_v9  }
 0x1a2   : > { %3092 = vperm.xlu1 %6342, %v2842_v16  }
 0x1a6   : > { %3102 = vperm.xlu1 %6342, %v2844_v40  }
 0x1aa   : > { %3112 = vperm.xlu1 %6342, %v2846_v12  }
 0x1ae   : > { %3122 = vperm.xlu1 %6342, %v2848_v31  }
 0x1b2   : > { %3132 = vperm.xlu1 %6342, %v2850_v53  }
 0x1b6   : > { %3142 = vperm.xlu1 %6342, %v2852_v42  }
 0x1ba   : > { %3152 = vperm.xlu1 %6342, %v2854_v1  }
 0x1be   : > { %3162 = vperm.xlu1 %6342, %v2856_v6  }
 0x1c2   : > { %3172 = vperm.xlu1 %6342, %v2858_v61  }
 0x223   : > { %v1546_v62 = vpop.f32.mrf.mxu0  ;;  %v1659_v19 = vpop.f32.mrf.mxu1 }
 0x224   : > { %v1547_v21 = vadd.f32 %v1546_v62, %v7931_v3  ;;  %v1660_v26 = vadd.f32 %v1659_v19, %v7931_v3 }
 0x225   : > { %v7933_v25 = vpop.f32.mrf.mxu0  ;;  %v7935_v20 = vpop.f32.mrf.mxu1 }
 0x226   : > { %10849 = vst [vmem:[#allocation27_spill] sm:$0xff] %v7933_v25  ;;  %10850 = vst [vmem:[#allocation21_spill] sm:$0xff] %v7935_v20  ;;  %v1738_v54 = vmax.f32 %v1547_v21, 0.0  ;;  %v1740_v49 = vmax.f32 %v1660_v26, 0.0 }
 0x227   : > { %v1550_v59 = vpop.f32.mrf.mxu0  ;;  %v1663_v32 = vpop.f32.mrf.mxu1 }
 0x228   : > { %v1551_v8 = vadd.f32 %v1550_v59, %v7937_v18  ;;  %v1664_v38 = vadd.f32 %v1663_v32, %v7937_v18 }
 0x229   : > { %v7943_v46 = vpop.f32.mrf.mxu0  ;;  %v7945_v45 = vpop.f32.mrf.mxu1 }
 0x22a   : > { %v1742_v34 = vmax.f32 %v1551_v8, 0.0  ;;  %v1744_v39 = vmax.f32 %v1664_v38, 0.0  ;;  %v7993_v20 = vadd.f32 %v7943_v46, %v7937_v18  ;;  %v7997_v25 = vadd.f32 %v7945_v45, %v7937_v18 }
 0x22b   : > { %v1556_v36 = vpop.f32.mrf.mxu0  ;;  %v1669_v2 = vpop.f32.mrf.mxu1 }
 0x22c   : > { %v7947_v58 = vpack.c.bf16 %v1742_v34, %v1738_v54  ;;  %v7949_v37 = vpack.c.bf16 %v1744_v39, %v1740_v49  ;;  %v1557_v23 = vadd.f32 %v1556_v36, %v7929_v29  ;;  %v1670_v43 = vadd.f32 %v1669_v2, %v7929_v29  ;;  %10861 = vst [vmem:[#allocation25_spill] sm:$0xff] %v7993_v20 }
 0x22d   : > { %v7951_v33 = vpop.f32.mrf.mxu0  ;;  %v7953_v22 = vpop.f32.mrf.mxu1  ;;  %10862 = vst [vmem:[#allocation30_spill] sm:$0xff] %v7997_v25 }
 0x22e   : > { %10851 = vst [vmem:[#allocation24_spill] sm:$0xff] %v7947_v58  ;;  %10852 = vst [vmem:[#allocation20_spill] sm:$0xff] %v7949_v37  ;;  %v1746_v44 = vmax.f32 %v1557_v23, 0.0  ;;  %v1748_v24 = vmax.f32 %v1670_v43, 0.0 }
 0x22f   : > { %10853 = vst [vmem:[#allocation23_spill] sm:$0xff] %v7951_v33  ;;  %10854 = vst [vmem:[#allocation14_spill] sm:$0xff] %v7953_v22  ;;  %v1560_v17 = vpop.f32.mrf.mxu0  ;;  %v1673_v27 = vpop.f32.mrf.mxu1 }
 0x230   : > { %v1561_v14 = vadd.f32 %v1560_v17, %v7848_v11  ;;  %v1674_v52 = vadd.f32 %v1673_v27, %v7848_v11 }
 0x231   : > { %v1562_v13 = vpop.f32.mrf.mxu0  ;;  %v1675_v41 = vpop.f32.mrf.mxu1 }
 0x232   : > { %v1750_v47 = vmax.f32 %v1561_v14, 0.0  ;;  %v1752_v7 = vmax.f32 %v1674_v52, 0.0  ;;  %v8000_v3 = vadd.f32 %v1562_v13, %v7848_v11  ;;  %v8003_v22 = vadd.f32 %v1675_v41, %v7848_v11 }
 0x233   : > { %v7959_v50 = vpop.f32.mrf.mxu0  ;;  %v7961_v48 = vpop.f32.mrf.mxu1 }
 0x234   : > { %10855 = vst [vmem:[#allocation15_spill] sm:$0xff] %v7959_v50  ;;  %10856 = vst [vmem:[#allocation16_spill] sm:$0xff] %v7961_v48  ;;  %v7963_v35 = vpack.c.bf16 %v1750_v47, %v1746_v44  ;;  %v7965_v9 = vpack.c.bf16 %v1752_v7, %v1748_v24 }
 0x235   : > { %v1568_v16 = vpop.f32.mrf.mxu0  ;;  %v1681_v40 = vpop.f32.mrf.mxu1  ;;  %10863 = vst [vmem:[#allocation31_spill] sm:$0xff] %v8000_v3  ;;  %10864 = vst [vmem:[#allocation32_spill] sm:$0xff] %v8003_v22 }
 0x236   : > { %10857 = vst [vmem:[#allocation17_spill] sm:$0xff] %v7963_v35  ;;  %10858 = vst [vmem:[#allocation18_spill] sm:$0xff] %v7965_v9  ;;  %v8006_v33 = vadd.f32 %v1568_v16, %v7924_v60  ;;  %v8009_v29 = vadd.f32 %v1681_v40, %v7924_v60 }
 0x237   : > { %v7967_v12 = vpop.f32.mrf.mxu0  ;;  %v7969_v31 = vpop.f32.mrf.mxu1 }
 0x238   : > { %10859 = vst [vmem:[#allocation22_spill] sm:$0xff] %v7967_v12  ;;  %10860 = vst [vmem:[#allocation19_spill] sm:$0xff] %v7969_v31 }
 0x239   : > { %v1572_v53 = vpop.f32.mrf.mxu0  ;;  %v1685_v42 = vpop.f32.mrf.mxu1  ;;  %10865 = vst [vmem:[#allocation33_spill] sm:$0xff] %v8006_v33  ;;  %10866 = vst [vmem:[#allocation34_spill] sm:$0xff] %v8009_v29 }
 0x23a   : > { %v8012_v48 = vadd.f32 %v1572_v53, %v7835_v55  ;;  %v8015_v46 = vadd.f32 %v1685_v42, %v7835_v55 }
 0x23b   : > { %v7971_v1 = vpop.f32.mrf.mxu0  ;;  %v7973_v6 = vpop.f32.mrf.mxu1 }
 0x23c   : > { %10867 = vst [vmem:[#allocation35_spill] sm:$0xff] %v8012_v48  ;;  %10868 = vst [vmem:[#allocation36_spill] sm:$0xff] %v8015_v46 }
 0x23d   : > { %v1578_v61 = vpop.f32.mrf.mxu0  ;;  %v1691_v62 = vpop.f32.mrf.mxu1 }
 0x23e   : > { %v8018_v13 = vadd.f32 %v1578_v61, %v7916_v15  ;;  %v8021_v11 = vadd.f32 %v1691_v62, %v7916_v15 }
 0x23f   : > { %v7975_v19 = vpop.f32.mrf.mxu0  ;;  %v7977_v21 = vpop.f32.mrf.mxu1 }
 0x240   : > { %10869 = vst [vmem:[#allocation37_spill] sm:$0xff] %v8018_v13  ;;  %10870 = vst [vmem:[#allocation38_spill] sm:$0xff] %v8021_v11 }
 0x241   : > { %v1582_v26 = vpop.f32.mrf.mxu0  ;;  %v1695_v59 = vpop.f32.mrf.mxu1 }
 0x242   : > { %v8024_v41 = vadd.f32 %v1582_v26, %v7818_v5  ;;  %v8027_v16 = vadd.f32 %v1695_v59, %v7818_v5 }
 0x243   : > { %v7979_v32 = vpop.f32.mrf.mxu0  ;;  %v7981_v8 = vpop.f32.mrf.mxu1 }
 0x245   : > { %v1588_v38 = vpop.f32.mrf.mxu0  ;;  %v1701_v54 = vpop.f32.mrf.mxu1 }
 0x246   : > { %v8030_v40 = vadd.f32 %v1588_v38, %v7911_v0  ;;  %v8033_v53 = vadd.f32 %v1701_v54, %v7911_v0 }
 0x247   : > { %v7983_v49 = vpop.f32.mrf.mxu0  ;;  %v7985_v34 = vpop.f32.mrf.mxu1 }
 0x249   : > { %v1592_v39 = vpop.f32.mrf.mxu0  ;;  %v1705_v36 = vpop.f32.mrf.mxu1 }
 0x24a   : > { %v8036_v42 = vadd.f32 %v1592_v39, %v7808_v4  ;;  %v8039_v61 = vadd.f32 %v1705_v36, %v7808_v4 }
 0x24b   : > { %v7987_v2 = vpop.f32.mrf.mxu0  ;;  %v7989_v23 = vpop.f32.mrf.mxu1 }
 0x24d   : > { %v1598_v43 = vpop.f32.mrf.mxu0  ;;  %v1711_v17 = vpop.f32.mrf.mxu1 }
 0x24e   : > { %v8042_v26 = vadd.f32 %v1598_v43, %v7903_v28  ;;  %v8045_v59 = vadd.f32 %v1711_v17, %v7903_v28 }
 0x24f   : > { %v1600_v27 = vpop.f32.mrf.mxu0  ;;  %v1713_v14 = vpop.f32.mrf.mxu1 }
 0x250   : > { %v8048_v38 = vadd.f32 %v1600_v27, %v7789_v63  ;;  %v8051_v54 = vadd.f32 %v1713_v14, %v7789_v63 }
 0x251   : > { %v1602_v52 = vpop.f32.mrf.mxu0  ;;  %v1715_v44 = vpop.f32.mrf.mxu1 }
 0x252   : > { %v8054_v39 = vadd.f32 %v1602_v52, %v7789_v63  ;;  %v8057_v36 = vadd.f32 %v1715_v44, %v7789_v63 }
 0x253   : > { %v1606_v24 = vpop.f32.mrf.mxu0  ;;  %v1719_v47 = vpop.f32.mrf.mxu1 }
 0x255   : > { %v1608_v7 = vpop.f32.mrf.mxu0  ;;  %v1721_v10 = vpop.f32.mrf.mxu1 }
 0x256   : > { %v1609_v52 = vadd.f32 %v1608_v7, %v7776_v56  ;;  %v1722_v33 = vadd.f32 %v1721_v10, %v7776_v56 }
 0x257   : > { %v1610_v37 = vpop.f32.mrf.mxu0  ;;  %v1723_v58 = vpop.f32.mrf.mxu1 }
 0x258   : > { %v1611_v50 = vadd.f32 %v1610_v37, %v7898_v30  ;;  %v1787_v31 = vmax.f32 %v1609_v52, 0.0  ;;  %v1769_v52 = vmax.f32 %v8027_v16, 0.0 }
 0x259   : > { %v1612_v9 = vpop.f32.mrf.mxu0  ;;  %v1725_v35 = vpop.f32.mrf.mxu1 }
 0x25a   : > { %v1613_v20 = vadd.f32 %v1612_v9, %v7898_v30  ;;  %v1726_v43 = vadd.f32 %v1725_v35, %v7898_v30  ;;  %v1790_v12 = vmax.f32 %v1611_v50, 0.0  ;;  %v1591_v50 = vadd.f32 %v7983_v49, %v7808_v4 }
 0x25b   : > { %v1616_v18 = vpop.f32.mrf.mxu0  ;;  %v1729_v45 = vpop.f32.mrf.mxu1 }
 0x25c   : > { %v1617_v63 = vadd.f32 %v1616_v18, %v7880_v51  ;;  %v1730_v9 = vadd.f32 %v1729_v45, %v7880_v51  ;;  %v1791_v60 = vmax.f32 %v1613_v20, 0.0  ;;  %v1720_v45 = vadd.f32 %v1719_v47, %v7776_v56 }
 0x25d   : > { %v1618_v62 = vpop.f32.mrf.mxu0  ;;  %v1731_v25 = vpop.f32.mrf.mxu1 }
 0x25e   : > { %v1619_v17 = vadd.f32 %v1618_v62, %v7880_v51  ;;  %v1732_v27 = vadd.f32 %v1731_v25, %v7880_v51  ;;  %v1724_v62 = vadd.f32 %v1723_v58, %v7898_v30  ;;  %v1607_v51 = vadd.f32 %v1606_v24, %v7776_v56 }
 0x25f   : > { %v1620_v22 = vpop.f32.mrf.mxu0  ;;  %v1733_v3 = vpop.f32.mrf.mxu1  ;;  %v1794_v13 = vmax.f32 %v1617_v63, 0.0  ;;  %v1796_v37 = vmax.f32 %v1730_v9, 0.0  ;;  %v1789_v30 = vmax.f32 %v1722_v33, 0.0  ;;  %v1597_v56 = vadd.f32 %v7987_v2, %v7903_v28 }
 0x260   : > { %v1621_v29 = vadd.f32 %v1620_v22, %v7890_v57  ;;  %v1734_v14 = vadd.f32 %v1733_v3, %v7890_v57  ;;  %v1793_v3 = vmax.f32 %v1726_v43, 0.0  ;;  %v1795_v48 = vmax.f32 %v1619_v17, 0.0 }
 0x261   : > { %v1622_v44 = vpop.f32.mrf.mxu0  ;;  %v1735_v35 = vpop.f32.mrf.mxu1  ;;  %v1797_v10 = vmax.f32 %v1732_v27, 0.0  ;;  %v1785_v17 = vmax.f32 %v8057_v36, 0.0  ;;  %v1859_v27 = vpack.c.bf16 %v1791_v60, %v1787_v31  ;;  %v1710_v33 = vadd.f32 %v7989_v23, %v7903_v28 }
 0x262   : > { %v1623_v25 = vadd.f32 %v1622_v44, %v7890_v57  ;;  %v1736_v22 = vadd.f32 %v1735_v35, %v7890_v57  ;;  %v1798_v46 = vmax.f32 %v1621_v29, 0.0  ;;  %v1800_v7 = vmax.f32 %v1734_v14, 0.0 }
 0x263   : > { %v1792_v57 = vmax.f32 %v1724_v62, 0.0  ;;  %v1783_v29 = vmax.f32 %v8054_v39, 0.0  ;;  %v1861_v24 = vpack.c.bf16 %v1793_v3, %v1789_v30  ;;  %v1788_v47 = vmax.f32 %v1720_v45, 0.0  ;;  %v10872_v62 = vld [vmem:[#allocation19_spill] sm:$0xff] }
 0x264   : > { %v1799_v11 = vmax.f32 %v1623_v25, 0.0  ;;  %v1801_v18 = vmax.f32 %v1736_v22, 0.0  ;;  %v1862_v20 = vpack.c.bf16 %v1798_v46, %v1794_v13  ;;  %v1864_v43 = vpack.c.bf16 %v1800_v7, %v1796_v37  ;;  %v10873_v25 = vld [vmem:[#allocation37_spill] sm:$0xff]  ;;  %v10874_v22 = vld [vmem:[#allocation38_spill] sm:$0xff] }
 0x265   : > { %v1704_v46 = vadd.f32 %v7985_v34, %v7808_v4  ;;  %v1779_v13 = vmax.f32 %v8042_v26, 0.0  ;;  %v1781_v60 = vmax.f32 %v8045_v59, 0.0  ;;  %v1782_v31 = vmax.f32 %v8048_v38, 0.0 }
 0x266   : > { %v1863_v58 = vpack.c.bf16 %v1799_v11, %v1795_v48  ;;  %v1865_v44 = vpack.c.bf16 %v1801_v18, %v1797_v10  ;;  %v1786_v48 = vmax.f32 %v1607_v51, 0.0  ;;  %v1784_v28 = vmax.f32 %v8051_v54, 0.0  ;;  %v10876_v51 = vld [vmem:[#allocation36_spill] sm:$0xff] }
 0x267   : > { %v1860_v23 = vpack.c.bf16 %v1792_v57, %v1788_v47  ;;  %v1775_v11 = vmax.f32 %v8036_v42, 0.0  ;;  %v1777_v39 = vmax.f32 %v8039_v61, 0.0  ;;  %v1855_v49 = vpack.c.bf16 %v1783_v29, %v1779_v13 }
 0x268   : > { %2154 = vmatprep.subr.bf16.mxu0 %v1863_v58  ;;  %2347 = vmatprep.subr.bf16.mxu1 %v1865_v44  ;;  %v1858_v2 = vpack.c.bf16 %v1790_v12, %v1786_v48  ;;  %v1857_v36 = vpack.c.bf16 %v1785_v17, %v1781_v60  ;;  %v1587_v4 = vadd.f32 %v7979_v32, %v7911_v0  ;;  %v1778_v26 = vmax.f32 %v1597_v56, 0.0  ;;  %v10877_v58 = vld [vmem:[#allocation28_spill] sm:$0xff]  ;;  %v10878_v44 = vld [vmem:[#allocation15_spill] sm:$0xff]  ;;  %v10880_v17 = vld [vmem:[#allocation29_spill] sm:$0xff] }
 0x269   : > { %2155 = vmatpush1.bf16.msra.mxu0 %v1862_v20  ;;  %2348 = vmatpush1.bf16.msra.mxu1 %v1864_v43  ;;  %v1700_v34 = vadd.f32 %v7981_v8, %v7911_v0  ;;  %v1780_v59 = vmax.f32 %v1710_v33, 0.0  ;;  %v1581_v12 = vadd.f32 %v7975_v19, %v7818_v5  ;;  %v1694_v42 = vadd.f32 %v7977_v21, %v7818_v5  ;;  %v10882_v56 = vld [vmem:[#allocation14_spill] sm:$0xff]  ;;  %v10883_v48 = vld [vmem:[#allocation33_spill] sm:$0xff] }
 0x26a   : > { %2156 = vmatprep.subr.bf16.mxu0 %v1859_v27  ;;  %2349 = vmatprep.subr.bf16.mxu1 %v1861_v24  ;;  %v1771_v61 = vmax.f32 %v8030_v40, 0.0  ;;  %v1773_v38 = vmax.f32 %v8033_v53, 0.0  ;;  %v1774_v32 = vmax.f32 %v1591_v50, 0.0  ;;  %v1776_v54 = vmax.f32 %v1704_v46, 0.0  ;;  %v10871_v53 = vld [vmem:[#allocation22_spill] sm:$0xff]  ;;  %v10881_v27 = vld [vmem:[#allocation23_spill] sm:$0xff] }
 0x26b   : > { %v1854_v14 = vpack.c.bf16 %v1782_v31, %v1778_v26  ;;  %v1856_v0 = vpack.c.bf16 %v1784_v28, %v1780_v59  ;;  %v1767_v8 = vmax.f32 %v8024_v41, 0.0  ;;  %v1577_v19 = vadd.f32 %v7971_v1, %v7916_v15  ;;  %v10884_v50 = vld [vmem:[#allocation34_spill] sm:$0xff]  ;;  %v10888_v59 = vld [vmem:[#allocation27_spill] sm:$0xff] }
 0x26c   : > { %v1851_v63 = vpack.c.bf16 %v1775_v11, %v1771_v61  ;;  %v1853_v9 = vpack.c.bf16 %v1777_v39, %v1773_v38  ;;  %v1690_v5 = vadd.f32 %v7973_v6, %v7916_v15  ;;  %v1770_v21 = vmax.f32 %v1587_v4, 0.0  ;;  %v10875_v6 = vld [vmem:[#allocation35_spill] sm:$0xff]  ;;  %v10886_v11 = vld [vmem:[#allocation32_spill] sm:$0xff]  ;;  %v10887_v26 = vld [vmem:[#allocation26_spill] sm:$0xff] }
 0x26d   : > { %2157 = vmatpush1.bf16.msra.mxu0 %v1858_v2  ;;  %2350 = vmatpush1.bf16.msra.mxu1 %v1860_v23  ;;  %v1772_v40 = vmax.f32 %v1700_v34, 0.0  ;;  %v1571_v35 = vadd.f32 %v10871_v53, %v7835_v55  ;;  %v1684_v41 = vadd.f32 %v10872_v62, %v7835_v55  ;;  %v1763_v16 = vmax.f32 %v10873_v25, 0.0  ;;  %v10879_v55 = vld [vmem:[#allocation16_spill] sm:$0xff]  ;;  %v10885_v2 = vld [vmem:[#allocation31_spill] sm:$0xff]  ;;  %v10893_v62 = vld [vmem:[#allocation18_spill] sm:$0xff] }
 0x26e   : > { %2158 = vmatprep.subr.bf16.mxu0 %v1855_v49  ;;  %2351 = vmatprep.subr.bf16.mxu1 %v1857_v36  ;;  %v1765_v3 = vmax.f32 %v10874_v22, 0.0  ;;  %v1766_v1 = vmax.f32 %v1581_v12, 0.0  ;;  %v1768_v7 = vmax.f32 %v1694_v42, 0.0  ;;  %v1850_v10 = vpack.c.bf16 %v1774_v32, %v1770_v21  ;;  %v10889_v42 = vld [vmem:[#allocation21_spill] sm:$0xff]  ;;  %v10894_v25 = vld [vmem:[#allocation24_spill] sm:$0xff] }
 0x26f   : > { %v1852_v15 = vpack.c.bf16 %v1776_v54, %v1772_v40  ;;  %v1759_v18 = vmax.f32 %v10875_v6, 0.0  ;;  %v1761_v45 = vmax.f32 %v10876_v51, 0.0  ;;  %v1847_v37 = vpack.c.bf16 %v1767_v8, %v1763_v16  ;;  %v10895_v16 = vld [vmem:[#allocation20_spill] sm:$0xff]  ;;  %v6360_v51 = vld [vmem:[%s10529_s5 + $0x40] sm:$0xff]  }
 0x270   : > { %v1849_v30 = vpack.c.bf16 %v1769_v52, %v1765_v3  ;;  %v1567_v57 = vadd.f32 %v10878_v44, %v10877_v58  ;;  %v1680_v20 = vadd.f32 %v10879_v55, %v10877_v58  ;;  %v1762_v43 = vmax.f32 %v1577_v19, 0.0  ;;  %v10891_v52 = vld [vmem:[#allocation30_spill] sm:$0xff]  ;;  %v6353_v3 = vld [vmem:[%s10529_s5 + $0x8] sm:$0xff]   ;;  %v6358_v6 = vld [vmem:[%s10529_s5 + $0x30] sm:$0xff]  }
 0x271   : > { %2159 = vmatpush1.bf16.msra.mxu0 %v1854_v14  ;;  %2352 = vmatpush1.bf16.msra.mxu1 %v1856_v0  ;;  %v1764_v29 = vmax.f32 %v1690_v5, 0.0  ;;  %v1559_v24 = vadd.f32 %v10881_v27, %v10880_v17  ;;  %v1672_v33 = vadd.f32 %v10882_v56, %v10880_v17  ;;  %v1755_v47 = vmax.f32 %v10883_v48, 0.0  ;;  %v10890_v0 = vld [vmem:[#allocation25_spill] sm:$0xff]  ;;  %v6364_v58 = vld [vmem:[%s10529_s5 + $0x60] sm:$0xff]   ;;  %v6365_v44 = vld [vmem:[%s10529_s5 + $0x68] sm:$0xff]  }
 0x272   : > { %2160 = vmatprep.subr.bf16.mxu0 %v1851_v63  ;;  %2353 = vmatprep.subr.bf16.mxu1 %v1853_v9  ;;  %v1757_v46 = vmax.f32 %v10884_v50, 0.0  ;;  %v1758_v13 = vmax.f32 %v1571_v35, 0.0  ;;  %v1760_v60 = vmax.f32 %v1684_v41, 0.0  ;;  %v1846_v31 = vpack.c.bf16 %v1766_v1, %v1762_v43  ;;  %v10892_v35 = vld [vmem:[#allocation17_spill] sm:$0xff]  ;;  %v6352_v41 = vld [vmem:[%s10529_s5] sm:$0xff]   ;;  %v6354_v1 = vld [vmem:[%s10529_s5 + $0x10] sm:$0xff]   ;;  %v8217_v43 = vpop.permute.xlu0 %1975 }
 0x273   : > { %v1848_v28 = vpack.c.bf16 %v1768_v7, %v1764_v29  ;;  %v1751_v23 = vmax.f32 %v10885_v2, 0.0  ;;  %v1753_v39 = vmax.f32 %v10886_v11, 0.0  ;;  %v1843_v49 = vpack.c.bf16 %v1759_v18, %v1755_v47  ;;  %v6355_v7 = vld [vmem:[%s10529_s5 + $0x18] sm:$0xff]  }
 0x274   : > { %v1845_v36 = vpack.c.bf16 %v1761_v45, %v1757_v46  ;;  %v1754_v4 = vmax.f32 %v1567_v57, 0.0  ;;  %v1756_v34 = vmax.f32 %v1680_v20, 0.0  ;;  %v1549_v12 = vadd.f32 %v10888_v59, %v10887_v26  ;;  %v6359_v18 = vld [vmem:[%s10529_s5 + $0x38] sm:$0xff]   ;;  %v6361_v45 = vld [vmem:[%s10529_s5 + $0x48] sm:$0xff]   ;;  %v6366_v57 = vld [vmem:[%s10529_s5 + $0x70] sm:$0xff]   ;;  %v8215_v20 = vpop.permute.xlu1 %1970 }
 0x275   : > { %2161 = vmatpush1.bf16.msra.mxu0 %v1850_v10  ;;  %2354 = vmatpush1.bf16.msra.mxu1 %v1852_v15  ;;  %v1662_v61 = vadd.f32 %v10889_v42, %v10887_v26  ;;  %v1747_v38 = vmax.f32 %v1559_v24, 0.0  ;;  %v1749_v32 = vmax.f32 %v1672_v33, 0.0  ;;  %v1743_v8 = vmax.f32 %v10890_v0, 0.0  ;;  %v6356_v10 = vld [vmem:[%s10529_s5 + $0x20] sm:$0xff]   ;;  %v6357_v15 = vld [vmem:[%s10529_s5 + $0x28] sm:$0xff]   ;;  %v6367_v55 = vld [vmem:[%s10529_s5 + $0x78] sm:$0xff]  }
 0x276   : > { %2162 = vmatprep.subr.bf16.mxu0 %v1847_v37  ;;  %2355 = vmatprep.subr.bf16.mxu1 %v1849_v30  ;;  %v1842_v54 = vpack.c.bf16 %v1758_v13, %v1754_v4  ;;  %v1844_v14 = vpack.c.bf16 %v1760_v60, %v1756_v34  ;;  %v1745_v63 = vmax.f32 %v10891_v52, 0.0  ;;  %v1739_v5 = vmax.f32 %v1549_v12, 0.0  ;;  %v6362_v37 = vld [vmem:[%s10529_s5 + $0x50] sm:$0xff]   ;;  %v6363_v30 = vld [vmem:[%s10529_s5 + $0x58] sm:$0xff]   ;;  %v8221_v17 = vpop.permute.xlu0 %1965 }
 0x277   : > { %v1839_v9 = vpack.c.bf16 %v1751_v23, %v1747_v38  ;;  %v1841_v19 = vpack.c.bf16 %v1753_v39, %v1749_v32  ;;  %v1741_v21 = vmax.f32 %v1662_v61, 0.0  ;;  %v10896_v22 = vmov 0  }
 0x278   : > { %v1835_v40 = vpack.c.bf16 %v1743_v8, %v1739_v5  ;;  %v8219_v29 = vpop.permute.xlu1 %1960 }
 0x279   : > { %2163 = vmatpush1.bf16.msra.mxu0 %v1846_v31  ;;  %2356 = vmatpush1.bf16.msra.mxu1 %v1848_v28  ;;  %v1837_v53 = vpack.c.bf16 %v1745_v63, %v1741_v21 }
 0x27a   : > { %2164 = vmatprep.subr.bf16.mxu0 %v1843_v49  ;;  %2357 = vmatprep.subr.bf16.mxu1 %v1845_v36  ;;  %v8225_v24 = vpop.permute.xlu0 %1955 }
 0x27c   : > { %v8223_v27 = vpop.permute.xlu1 %1950 }
 0x27d   : > { %2165 = vmatpush1.bf16.msra.mxu0 %v1842_v54  ;;  %2358 = vmatpush1.bf16.msra.mxu1 %v1844_v14 }
 0x27e   : > { %2166 = vmatprep.subr.bf16.mxu0 %v1839_v9  ;;  %2359 = vmatprep.subr.bf16.mxu1 %v1841_v19  ;;  %v8229_v33 = vpop.permute.xlu0 %1945 }
 0x280   : > { %v8227_v56 = vpop.permute.xlu1 %1940 }
 0x281   : > { %2167 = vmatpush1.bf16.msra.mxu0 %v10892_v35  ;;  %2360 = vmatpush1.bf16.msra.mxu1 %v10893_v62 }
 0x282   : > { %2168 = vmatprep.subr.bf16.mxu0 %v1835_v40  ;;  %2361 = vmatprep.subr.bf16.mxu1 %v1837_v53  ;;  %v8233_v47 = vpop.permute.xlu0 %1935 }
 0x284   : > { %v8231_v48 = vpop.permute.xlu1 %1930 }
 0x285   : > { %2169 = vmatpush1.bf16.msra.mxu0 %v10894_v25  ;;  %2362 = vmatpush1.bf16.msra.mxu1 %v10895_v16 }
 0x286   : > { %v8237_v46 = vpop.permute.xlu0 %1925 }
 0x288   : > { %2187 = vmatmul.mubr.bf16.vlgmr.msra.gmra.mxu0 %v6352_v41  ;;  %2380 = vmatmul.mubr.bf16.vlgmr.msra.gmra.mxu1 %v6352_v41  ;;  %v8235_v50 = vpop.permute.xlu1 %1920 }
 0x289   : > { %2196 = vmatprep.mubr.bf16.mxu0 %v10896_v22  ;;  %2389 = vmatprep.mubr.bf16.mxu1 %v10896_v22 }
 0x28a   : > { %v8241_v60 = vpop.permute.xlu0 %1915 }
 0x28c   : > { %v8239_v13 = vpop.permute.xlu1 %1910 }
 0x28d   : > { %10897 = vst [vmem:[#allocation22_spill] sm:$0xff] %v8239_v13 }
 0x28e   : > { %v8249_v39 = vpop.permute.xlu0 %1905 }
 0x290   : > { %2197 = vmatmul.mubr.bf16.gmra.mxu0 %v6353_v3  ;;  %2390 = vmatmul.mubr.bf16.gmra.mxu1 %v6353_v3  ;;  %v8243_v2 = vpop.permute.xlu1 %1900 }
 0x291   : > { %2206 = vmatprep.mubr.bf16.mxu0 %v10896_v22  ;;  %2399 = vmatprep.mubr.bf16.mxu1 %v10896_v22  ;;  %10898 = vst [vmem:[#allocation19_spill] sm:$0xff] %v8243_v2 }
 0x298   : > { %2207 = vmatmul.mubr.bf16.gmra.mxu0 %v6354_v1  ;;  %2400 = vmatmul.mubr.bf16.gmra.mxu1 %v6354_v1 }
 0x299   : > { %2216 = vmatprep.mubr.bf16.mxu0 %v10896_v22  ;;  %2409 = vmatprep.mubr.bf16.mxu1 %v10896_v22 }
 0x2a0   : > { %2217 = vmatmul.mubr.bf16.gmra.mxu0 %v6355_v7  ;;  %2410 = vmatmul.mubr.bf16.gmra.mxu1 %v6355_v7 }
 0x2a1   : > { %2226 = vmatprep.mubr.bf16.mxu0 %v10896_v22  ;;  %2419 = vmatprep.mubr.bf16.mxu1 %v10896_v22 }
 0x2a8   : > { %2227 = vmatmul.mubr.bf16.gmra.mxu0 %v6356_v10  ;;  %2420 = vmatmul.mubr.bf16.gmra.mxu1 %v6356_v10 }
 0x2a9   : > { %2236 = vmatprep.mubr.bf16.mxu0 %v10896_v22  ;;  %2429 = vmatprep.mubr.bf16.mxu1 %v10896_v22 }
 0x2b0   : > { %2237 = vmatmul.mubr.bf16.gmra.mxu0 %v6357_v15  ;;  %2430 = vmatmul.mubr.bf16.gmra.mxu1 %v6357_v15 }
 0x2b1   : > { %2246 = vmatprep.mubr.bf16.mxu0 %v10896_v22  ;;  %2439 = vmatprep.mubr.bf16.mxu1 %v10896_v22 }
 0x2b8   : > { %2247 = vmatmul.mubr.bf16.gmra.mxu0 %v6358_v6  ;;  %2440 = vmatmul.mubr.bf16.gmra.mxu1 %v6358_v6 }
 0x2b9   : > { %2256 = vmatprep.mubr.bf16.mxu0 %v10896_v22  ;;  %2449 = vmatprep.mubr.bf16.mxu1 %v10896_v22 }
 0x2c0   : > { %2257 = vmatmul.mubr.bf16.gmra.mxu0 %v6359_v18  ;;  %2450 = vmatmul.mubr.bf16.gmra.mxu1 %v6359_v18 }
 0x2c1   : > { %2266 = vmatprep.mubr.bf16.mxu0 %v10896_v22  ;;  %2459 = vmatprep.mubr.bf16.mxu1 %v10896_v22 }
 0x2c8   : > { %2267 = vmatmul.mubr.bf16.gmra.mxu0 %v6360_v51  ;;  %2460 = vmatmul.mubr.bf16.gmra.mxu1 %v6360_v51 }
 0x2c9   : > { %2276 = vmatprep.mubr.bf16.mxu0 %v10896_v22  ;;  %2469 = vmatprep.mubr.bf16.mxu1 %v10896_v22 }
 0x2d0   : > { %2277 = vmatmul.mubr.bf16.gmra.mxu0 %v6361_v45  ;;  %2470 = vmatmul.mubr.bf16.gmra.mxu1 %v6361_v45 }
 0x2d1   : > { %2286 = vmatprep.mubr.bf16.mxu0 %v10896_v22  ;;  %2479 = vmatprep.mubr.bf16.mxu1 %v10896_v22 }
 0x2d8   : > { %2287 = vmatmul.mubr.bf16.gmra.mxu0 %v6362_v37  ;;  %2480 = vmatmul.mubr.bf16.gmra.mxu1 %v6362_v37 }
 0x2d9   : > { %2296 = vmatprep.mubr.bf16.mxu0 %v10896_v22  ;;  %2489 = vmatprep.mubr.bf16.mxu1 %v10896_v22 }
 0x2e0   : > { %2297 = vmatmul.mubr.bf16.gmra.mxu0 %v6363_v30  ;;  %2490 = vmatmul.mubr.bf16.gmra.mxu1 %v6363_v30 }
 0x2e1   : > { %2306 = vmatprep.mubr.bf16.mxu0 %v10896_v22  ;;  %2499 = vmatprep.mubr.bf16.mxu1 %v10896_v22 }
 0x2e8   : > { %2307 = vmatmul.mubr.bf16.gmra.mxu0 %v6364_v58  ;;  %2500 = vmatmul.mubr.bf16.gmra.mxu1 %v6364_v58  ;;  %v8279_v58 = vpop.permute.xlu1 %2050 }
 0x2e9   : > { %2316 = vmatprep.mubr.bf16.mxu0 %v10896_v22  ;;  %2509 = vmatprep.mubr.bf16.mxu1 %v10896_v22  ;;  %10907 = vst [vmem:[#allocation23_spill] sm:$0xff] %v8279_v58 }
 0x2f0   : > { %2317 = vmatmul.mubr.bf16.gmra.mxu0 %v6365_v44  ;;  %2510 = vmatmul.mubr.bf16.gmra.mxu1 %v6365_v44 }
 0x2f1   : > { %2326 = vmatprep.mubr.bf16.mxu0 %v10896_v22  ;;  %2519 = vmatprep.mubr.bf16.mxu1 %v10896_v22 }
 0x2f8   : > { %2327 = vmatmul.mubr.bf16.gmra.mxu0 %v6366_v57  ;;  %2520 = vmatmul.mubr.bf16.gmra.mxu1 %v6366_v57 }
 0x2f9   : > { %2336 = vmatprep.mubr.bf16.mxu0 %v10896_v22  ;;  %2529 = vmatprep.mubr.bf16.mxu1 %v10896_v22 }
 0x300   : > { %2337 = vmatmul.mubr.bf16.gmra.mxu0 %v6367_v55  ;;  %2530 = vmatmul.mubr.bf16.gmra.mxu1 %v6367_v55  ;;  %v8281_v55 = vpop.permute.xlu0 %2055 }
 0x301   : > { %10908 = vst [vmem:[#allocation14_spill] sm:$0xff] %v8281_v55 }
 0x348   : > { %v2188_v31 = vpop.f32.mrf.mxu0  ;;  %v2381_v28 = vpop.f32.mrf.mxu1 }
 0x349   : > { %v2189_v49 = vadd.f32 %v2188_v31, %v8243_v2  ;;  %v2382_v36 = vadd.f32 %v2381_v28, %v8243_v2 }
 0x34a   : > { %v8245_v23 = vpop.f32.mrf.mxu0  ;;  %v8247_v11 = vpop.f32.mrf.mxu1 }
 0x34b   : > { %10899 = vst [vmem:[#allocation37_spill] sm:$0xff] %v8245_v23  ;;  %10900 = vst [vmem:[#allocation38_spill] sm:$0xff] %v8247_v11  ;;  %v2540_v61 = vmax.f32 %v2189_v49, 0.0  ;;  %v2542_v38 = vmax.f32 %v2382_v36, 0.0 }
 0x34c   : > { %v2192_v4 = vpop.f32.mrf.mxu0  ;;  %v2385_v34 = vpop.f32.mrf.mxu1 }
 0x34d   : > { %v2193_v26 = vadd.f32 %v2192_v4, %v8249_v39  ;;  %v2386_v59 = vadd.f32 %v2385_v34, %v8249_v39  ;;  %v8283_v4 = vpop.permute.xlu1 %2040 }
 0x34e   : > { %v8255_v12 = vpop.f32.mrf.mxu0  ;;  %v8257_v42 = vpop.f32.mrf.mxu1  ;;  %10909 = vst [vmem:[#allocation33_spill] sm:$0xff] %v8283_v4 }
 0x34f   : > { %v2544_v32 = vmax.f32 %v2193_v26, 0.0  ;;  %v2546_v54 = vmax.f32 %v2386_v59, 0.0  ;;  %v8285_v59 = vpop.permute.xlu0 %2045 }
 0x350   : > { %v2198_v14 = vpop.f32.mrf.mxu0  ;;  %v2391_v0 = vpop.f32.mrf.mxu1  ;;  %10910 = vst [vmem:[#allocation34_spill] sm:$0xff] %v8285_v59 }
 0x351   : > { %v8259_v8 = vpack.c.bf16 %v2544_v32, %v2540_v61  ;;  %v8261_v52 = vpack.c.bf16 %v2546_v54, %v2542_v38  ;;  %v2199_v19 = vadd.f32 %v2198_v14, %v8239_v13  ;;  %v2392_v5 = vadd.f32 %v2391_v0, %v8239_v13  ;;  %v6370_v14 = vld [vmem:[%s10911_s25 + $0x4] ss:$8 sps:$4 sm:$0xff]   ;;  %v8294_v0 = vpop.permute.xlu1 %2030 }
 0x352   : > { %v8263_v63 = vpop.f32.mrf.mxu0  ;;  %v8265_v9 = vpop.f32.mrf.mxu1  ;;  %10912 = vst [vmem:[#allocation31_spill] sm:$0xff] %v8294_v0  ;;  %3532 = vmatprep.mubr.bf16.mxu0 %v6370_v14  ;;  %3885 = vmatprep.mubr.bf16.mxu1 %v6370_v14 }
 0x353   : > { %10901 = vst [vmem:[#allocation35_spill] sm:$0xff] %v8259_v8  ;;  %10902 = vst [vmem:[#allocation36_spill] sm:$0xff] %v8261_v52  ;;  %v2548_v25 = vmax.f32 %v2199_v19, 0.0  ;;  %v2550_v16 = vmax.f32 %v2392_v5, 0.0 }
 0x354   : > { %10903 = vst [vmem:[#allocation28_spill] sm:$0xff] %v8263_v63  ;;  %10904 = vst [vmem:[#allocation15_spill] sm:$0xff] %v8265_v9  ;;  %v2202_v21 = vpop.f32.mrf.mxu0  ;;  %v2395_v40 = vpop.f32.mrf.mxu1 }
 0x355   : > { %v2203_v53 = vadd.f32 %v2202_v21, %v8241_v60  ;;  %v2396_v35 = vadd.f32 %v2395_v40, %v8241_v60  ;;  %v8296_v21 = vpop.permute.xlu0 %2035 }
 0x356   : > { %v2204_v62 = vpop.f32.mrf.mxu0  ;;  %v2397_v41 = vpop.f32.mrf.mxu1  ;;  %10913 = vst [vmem:[#allocation32_spill] sm:$0xff] %v8296_v21 }
 0x357   : > { %v2552_v22 = vmax.f32 %v2203_v53, 0.0  ;;  %v2554_v3 = vmax.f32 %v2396_v35, 0.0  ;;  %v8321_v23 = vadd.f32 %v2204_v62, %v8241_v60 }
 0x358   : > { %v8271_v1 = vpop.f32.mrf.mxu0  ;;  %v8273_v7 = vpop.f32.mrf.mxu1 }
 0x359   : > { %v8275_v10 = vpack.c.bf16 %v2552_v22, %v2548_v25  ;;  %v8277_v15 = vpack.c.bf16 %v2554_v3, %v2550_v16  ;;  %v8298_v16 = vpop.permute.xlu1 %2020  ;;  %v8300_v4 = vpop.permute.xlu0 %2025  ;;  %10922 = vst [vmem:[#allocation20_spill] sm:$0xff] %v8321_v23 }
 0x35a   : > { %v2210_v6 = vpop.f32.mrf.mxu0  ;;  %v2403_v18 = vpop.f32.mrf.mxu1  ;;  %10914 = vst [vmem:[#allocation26_spill] sm:$0xff] %v8298_v16  ;;  %10915 = vst [vmem:[#allocation27_spill] sm:$0xff] %v8300_v4  ;;  %v8314_v16 = vadd.f32 %v8255_v12, %v8249_v39  ;;  %v8318_v4 = vadd.f32 %v8257_v42, %v8249_v39 }
 0x35b   : > { %10905 = vst [vmem:[#allocation16_spill] sm:$0xff] %v8275_v10  ;;  %10906 = vst [vmem:[#allocation29_spill] sm:$0xff] %v8277_v15  ;;  %v8333_v12 = vadd.f32 %v2403_v18, %v8235_v50 }
 0x35c   : > { %v2212_v51 = vpop.f32.mrf.mxu0  ;;  %v2405_v45 = vpop.f32.mrf.mxu1  ;;  %10920 = vst [vmem:[#allocation18_spill] sm:$0xff] %v8314_v16  ;;  %10921 = vst [vmem:[#allocation24_spill] sm:$0xff] %v8318_v4 }
 0x35d   : > { %v8302_v52 = vpop.permute.xlu1 %2010  ;;  %v8304_v15 = vpop.permute.xlu0 %2015  ;;  %10925 = vst [vmem:[#allocation41_spill] sm:$0xff] %v8333_v12  ;;  %v8336_v39 = vadd.f32 %v2212_v51, %v8237_v46  ;;  %v8339_v42 = vadd.f32 %v2405_v45, %v8237_v46 }
 0x35e   : > { %v2214_v37 = vpop.f32.mrf.mxu0  ;;  %v2407_v30 = vpop.f32.mrf.mxu1  ;;  %10916 = vst [vmem:[#allocation21_spill] sm:$0xff] %v8302_v52  ;;  %10917 = vst [vmem:[#allocation25_spill] sm:$0xff] %v8304_v15  ;;  %v8324_v15 = vadd.f32 %v2397_v41, %v8241_v60 }
 0x35f   : > { %v8307_v21 = vadd.f32 %v2214_v37, %v8237_v46  ;;  %v8310_v10 = vadd.f32 %v2407_v30, %v8237_v46  ;;  %v8327_v37 = vadd.f32 %v2210_v6, %v8235_v50  ;;  %10926 = vst [vmem:[#allocation42_spill] sm:$0xff] %v8336_v39  ;;  %10927 = vst [vmem:[#allocation43_spill] sm:$0xff] %v8339_v42 }
 0x360   : > { %v2218_v44 = vpop.f32.mrf.mxu0  ;;  %v2411_v57 = vpop.f32.mrf.mxu1  ;;  %10923 = vst [vmem:[#allocation39_spill] sm:$0xff] %v8324_v15 }
 0x361   : > { %10918 = vst [vmem:[#allocation30_spill] sm:$0xff] %v8307_v21  ;;  %10919 = vst [vmem:[#allocation17_spill] sm:$0xff] %v8310_v10  ;;  %v8344_v4 = vpop.permute.xlu1 %2000  ;;  %v8355_v46 = vadd.f32 %v2218_v44, %v8231_v48  ;;  %v8358_v45 = vadd.f32 %v2411_v57, %v8231_v48  ;;  %v8366_v16 = vpop.permute.xlu0 %2005 }
 0x362   : > { %v2220_v31 = vpop.f32.mrf.mxu0  ;;  %v2413_v28 = vpop.f32.mrf.mxu1  ;;  %10924 = vst [vmem:[#allocation40_spill] sm:$0xff] %v8327_v37  ;;  %10928 = vst [vmem:[#allocation44_spill] sm:$0xff] %v8344_v4 }
 0x363   : > { %10929 = vst [vmem:[#allocation45_spill] sm:$0xff] %v8358_v45  ;;  %v8364_v4 = vadd.f32 %v2413_v28, %v8231_v48  ;;  %10930 = vst [vmem:[#allocation46_spill] sm:$0xff] %v8366_v16 }
 0x364   : > { %v2222_v49 = vpop.f32.mrf.mxu0  ;;  %v2415_v36 = vpop.f32.mrf.mxu1 }
 0x365   : > { %v8426_v15 = vpop.permute.xlu0 %1995 }
 0x366   : > { %v2224_v34 = vpop.f32.mrf.mxu0  ;;  %v2417_v26 = vpop.f32.mrf.mxu1 }
 0x367   : > { %v8330_v30 = vadd.f32 %v2224_v34, %v8233_v47  ;;  %v8342_v62 = vadd.f32 %v2417_v26, %v8233_v47  ;;  %v8361_v26 = vadd.f32 %v2220_v31, %v8231_v48 }
 0x368   : > { %v8287_v61 = vpop.f32.mrf.mxu0  ;;  %v8289_v38 = vpop.f32.mrf.mxu1 }
 0x36a   : > { %v2230_v32 = vpop.f32.mrf.mxu0  ;;  %v2423_v54 = vpop.f32.mrf.mxu1 }
 0x36b   : > { %v8380_v48 = vadd.f32 %v2230_v32, %v8227_v56  ;;  %v8383_v28 = vadd.f32 %v2423_v54, %v8227_v56 }
 0x36c   : > { %v2232_v19 = vpop.f32.mrf.mxu0  ;;  %v2425_v5 = vpop.f32.mrf.mxu1 }
 0x36d   : > { %v8386_v16 = vadd.f32 %v2232_v19, %v8229_v33 }
 0x36e   : > { %v2234_v40 = vpop.f32.mrf.mxu0  ;;  %v2427_v53 = vpop.f32.mrf.mxu1 }
 0x36f   : > { %v8349_v18 = vadd.f32 %v2234_v40, %v8229_v33  ;;  %v8352_v51 = vadd.f32 %v2427_v53, %v8229_v33  ;;  %v8369_v40 = vadd.f32 %v2222_v49, %v8233_v47  ;;  %v8372_v53 = vadd.f32 %v2415_v36, %v8233_v47  ;;  %v8408_v36 = vpop.permute.xlu1 %1990 }
 0x370   : > { %v2238_v35 = vpop.f32.mrf.mxu0  ;;  %v2431_v25 = vpop.f32.mrf.mxu1  ;;  %v8389_v47 = vadd.f32 %v2425_v5, %v8229_v33  ;;  %10931 = vst [vmem:[#allocation47_spill] sm:$0xff] %v8408_v36 }
 0x371   : > { %v8394_v31 = vadd.f32 %v2238_v35, %v8223_v27  ;;  %v8397_v32 = vadd.f32 %v2431_v25, %v8223_v27 }
 0x372   : > { %v2240_v22 = vpop.f32.mrf.mxu0  ;;  %v2433_v3 = vpop.f32.mrf.mxu1 }
 0x373   : > { %v8400_v54 = vadd.f32 %v2240_v22, %v8223_v27  ;;  %v8403_v19 = vadd.f32 %v2433_v3, %v8223_v27 }
 0x374   : > { %v2242_v55 = vpop.f32.mrf.mxu0  ;;  %v2435_v58 = vpop.f32.mrf.mxu1 }
 0x375   : > { %v8406_v44 = vadd.f32 %v2242_v55, %v8225_v24 }
 0x376   : > { %v2244_v59 = vpop.f32.mrf.mxu0  ;;  %v2437_v0 = vpop.f32.mrf.mxu1 }
 0x377   : > { %v8376_v57 = vadd.f32 %v2244_v59, %v8225_v24  ;;  %v8411_v59 = vadd.f32 %v2435_v58, %v8225_v24  ;;  %v8415_v25 = vadd.f32 %v2437_v0, %v8225_v24 }
 0x378   : > { %v2248_v8 = vpop.f32.mrf.mxu0  ;;  %v2441_v14 = vpop.f32.mrf.mxu1 }
 0x379   : > { %v8419_v27 = vadd.f32 %v2248_v8, %v8219_v29  ;;  %v8422_v55 = vadd.f32 %v2441_v14, %v8219_v29 }
 0x37a   : > { %v2250_v11 = vpop.f32.mrf.mxu0  ;;  %v2443_v52 = vpop.f32.mrf.mxu1 }
 0x37b   : > { %v2251_v22 = vadd.f32 %v2250_v11, %v8219_v29  ;;  %v2444_v0 = vadd.f32 %v2443_v52, %v8219_v29 }
 0x37c   : > { %v2252_v60 = vpop.f32.mrf.mxu0  ;;  %v2445_v41 = vpop.f32.mrf.mxu1 }
 0x37d   : > { %v2253_v14 = vadd.f32 %v2252_v60, %v8221_v17  ;;  %v2589_v39 = vmax.f32 %v2251_v22, 0.0  ;;  %v2446_v12 = vadd.f32 %v2445_v41, %v8221_v17  ;;  %v8439_v60 = vpop.permute.xlu1 %1980  ;;  %v2591_v13 = vmax.f32 %v2444_v0, 0.0 }
 0x37e   : > { %v2254_v6 = vpop.f32.mrf.mxu0  ;;  %v2447_v34 = vpop.f32.mrf.mxu1  ;;  %10932 = vst [vmem:[#allocation48_spill] sm:$0xff] %v8439_v60 }
 0x37f   : > { %v2255_v3 = vadd.f32 %v2254_v6, %v8221_v17  ;;  %v2448_v10 = vadd.f32 %v2447_v34, %v8221_v17  ;;  %v2592_v22 = vmax.f32 %v2253_v14, 0.0 }
 0x380   : > { %v2258_v49 = vpop.f32.mrf.mxu0  ;;  %v2451_v2 = vpop.f32.mrf.mxu1 }
 0x381   : > { %v2259_v6 = vadd.f32 %v2258_v49, %v8215_v20  ;;  %v2452_v34 = vadd.f32 %v2451_v2, %v8215_v20  ;;  %v2595_v37 = vmax.f32 %v2448_v10, 0.0 }
 0x382   : > { %v2260_v33 = vpop.f32.mrf.mxu0  ;;  %v2453_v5 = vpop.f32.mrf.mxu1 }
 0x383   : > { %v2261_v35 = vadd.f32 %v2260_v33, %v8215_v20  ;;  %v2454_v24 = vadd.f32 %v2453_v5, %v8215_v20  ;;  %v2596_v45 = vmax.f32 %v2259_v6, 0.0  ;;  %v2598_v17 = vmax.f32 %v2452_v34, 0.0 }
 0x384   : > { %v2262_v21 = vpop.f32.mrf.mxu0  ;;  %v2455_v58 = vpop.f32.mrf.mxu1  ;;  %v2587_v6 = vmax.f32 %v8415_v25, 0.0 }
 0x385   : > { %v2263_v11 = vadd.f32 %v2262_v21, %v8217_v43  ;;  %v2456_v8 = vadd.f32 %v2455_v58, %v8217_v43  ;;  %v2593_v21 = vmax.f32 %v2255_v3, 0.0  ;;  %v2597_v49 = vmax.f32 %v2261_v35, 0.0 }
 0x386   : > { %v2264_v23 = vpop.f32.mrf.mxu0  ;;  %v2457_v42 = vpop.f32.mrf.mxu1  ;;  %v2599_v63 = vmax.f32 %v2454_v24, 0.0  ;;  %v2594_v35 = vmax.f32 %v2446_v12, 0.0 }
 0x387   : > { %v2265_v33 = vadd.f32 %v2264_v23, %v8217_v43  ;;  %v2458_v5 = vadd.f32 %v2457_v42, %v8217_v43  ;;  %v2600_v58 = vmax.f32 %v2263_v11, 0.0  ;;  %v2602_v9 = vmax.f32 %v2456_v8, 0.0  ;;  %v8445_v43 = vpop.permute.xlu0 %1985 }
 0x388   : > { %v2268_v29 = vpop.f32.mrf.mxu0  ;;  %v2461_v52 = vpop.f32.mrf.mxu1  ;;  %v2757_v14 = vpack.c.bf16 %v2593_v21, %v2589_v39 }
 0x389   : > { %v2601_v20 = vmax.f32 %v2265_v33, 0.0  ;;  %v2603_v2 = vmax.f32 %v2458_v5, 0.0  ;;  %v2269_v10 = vadd.f32 %v2268_v29, %v8439_v60  ;;  %v2462_v42 = vadd.f32 %v2461_v52, %v8439_v60  ;;  %v10991_v60 = vld [vmem:[#allocation34_spill] sm:$0xff] }
 0x38a   : > { %v8441_v41 = vpop.f32.mrf.mxu0  ;;  %v8443_v23 = vpop.f32.mrf.mxu1  ;;  %v2760_v24 = vpack.c.bf16 %v2600_v58, %v2596_v45  ;;  %v2762_v8 = vpack.c.bf16 %v2602_v9, %v2598_v17  ;;  %v2581_v29 = vmax.f32 %v8400_v54, 0.0  ;;  %v2583_v52 = vmax.f32 %v8403_v19, 0.0 }
 0x38b   : > { %10933 = vst [vmem:[#allocation49_spill] sm:$0xff] %v8441_v41  ;;  %10934 = vst [vmem:[#allocation50_spill] sm:$0xff] %v8443_v23  ;;  %v2761_v3 = vpack.c.bf16 %v2601_v20, %v2597_v49  ;;  %v2763_v11 = vpack.c.bf16 %v2603_v2, %v2599_v63  ;;  %v2759_v23 = vpack.c.bf16 %v2595_v37, %v2591_v13  ;;  %v2588_v63 = vmax.f32 %v8419_v27, 0.0  ;;  %v10990_v41 = vld [vmem:[#allocation32_spill] sm:$0xff] }
 0x38c   : > { %v2272_v33 = vpop.f32.mrf.mxu0  ;;  %v2465_v0 = vpop.f32.mrf.mxu1  ;;  %v2590_v9 = vmax.f32 %v8422_v55, 0.0  ;;  %v2604_v45 = vmax.f32 %v2269_v10, 0.0  ;;  %v2606_v25 = vmax.f32 %v2462_v42, 0.0  ;;  %v2584_v13 = vmax.f32 %v8406_v44, 0.0 }
 0x38d   : > { %v2273_v34 = vadd.f32 %v2272_v33, %v8445_v43  ;;  %v2466_v5 = vadd.f32 %v2465_v0, %v8445_v43  ;;  %3500 = vmatprep.subr.bf16.mxu0 %v2761_v3  ;;  %3853 = vmatprep.subr.bf16.mxu1 %v2763_v11  ;;  %v2586_v37 = vmax.f32 %v8411_v59, 0.0  ;;  %v2756_v54 = vpack.c.bf16 %v2592_v22, %v2588_v63 }
 0x38e   : > { %v8456_v12 = vpop.f32.mrf.mxu0  ;;  %v8458_v39 = vpop.f32.mrf.mxu1  ;;  %3501 = vmatpush1.bf16.msra.mxu0 %v2760_v24  ;;  %3854 = vmatpush1.bf16.msra.mxu1 %v2762_v8  ;;  %v2758_v19 = vpack.c.bf16 %v2594_v35, %v2590_v9  ;;  %v10937_v2 = vmax.f32 %v8376_v57, 0.0  ;;  %v2755_v10 = vpack.c.bf16 %v2587_v6, %v2583_v52  ;;  %v2229_v42 = vadd.f32 %v8287_v61, %v8227_v56 }
 0x38f   : > { %v2608_v21 = vmax.f32 %v2273_v34, 0.0  ;;  %v2610_v58 = vmax.f32 %v2466_v5, 0.0  ;;  %3502 = vmatprep.subr.bf16.mxu0 %v2757_v14  ;;  %3855 = vmatprep.subr.bf16.mxu1 %v2759_v23  ;;  %v2422_v44 = vadd.f32 %v8289_v38, %v8227_v56  ;;  %v2580_v59 = vmax.f32 %v8394_v31, 0.0 }
 0x390   : > { %v2278_v27 = vpop.f32.mrf.mxu0  ;;  %v2471_v55 = vpop.f32.mrf.mxu1  ;;  %v2753_v17 = vpack.c.bf16 %v10937_v2, %v2581_v29  ;;  %v2582_v22 = vmax.f32 %v8397_v32, 0.0  ;;  %v2573_v57 = vmax.f32 %v8380_v48, 0.0  ;;  %v2575_v11 = vmax.f32 %v8383_v28, 0.0 }
 0x391   : > { %v8462_v49 = vpack.c.bf16 %v2608_v21, %v2604_v45  ;;  %v8464_v20 = vpack.c.bf16 %v2610_v58, %v2606_v25  ;;  %v2279_v35 = vadd.f32 %v2278_v27, %v8408_v36  ;;  %v2472_v61 = vadd.f32 %v2471_v55, %v8408_v36  ;;  %v10994_v36 = vld [vmem:[#allocation33_spill] sm:$0xff] }
 0x392   : > { %v8474_v23 = vpop.f32.mrf.mxu0  ;;  %v8476_v3 = vpop.f32.mrf.mxu1  ;;  %3503 = vmatpush1.bf16.msra.mxu0 %v2756_v54  ;;  %3856 = vmatpush1.bf16.msra.mxu1 %v2758_v19  ;;  %v2576_v56 = vmax.f32 %v8386_v16, 0.0  ;;  %v2578_v38 = vmax.f32 %v8389_v47, 0.0  ;;  %v2752_v31 = vpack.c.bf16 %v2584_v13, %v2580_v59  ;;  %v2754_v32 = vpack.c.bf16 %v2586_v37, %v2582_v22  ;;  %v10950_v59 = vld [vmem:[#allocation28_spill] sm:$0xff]  ;;  %v10951_v22 = vld [vmem:[#allocation15_spill] sm:$0xff] }
 0x393   : > { %10935 = vst [vmem:[#allocation51_spill] sm:$0xff] %v8462_v49  ;;  %10936 = vst [vmem:[#allocation52_spill] sm:$0xff] %v8464_v20  ;;  %3504 = vmatprep.subr.bf16.mxu0 %v2753_v17  ;;  %3857 = vmatprep.subr.bf16.mxu1 %v2755_v10  ;;  %v10940_v28 = vmax.f32 %v8349_v18, 0.0  ;;  %v10941_v14 = vmax.f32 %v8352_v51, 0.0  ;;  %v2565_v34 = vmax.f32 %v8361_v26, 0.0  ;;  %v2567_v16 = vmax.f32 %v8364_v4, 0.0 }
 0x394   : > { %10938 = vst [vmem:[#allocation53_spill] sm:$0xff] %v8474_v23  ;;  %10939 = vst [vmem:[#allocation54_spill] sm:$0xff] %v8476_v3  ;;  %v2282_v24 = vpop.f32.mrf.mxu0  ;;  %v2475_v8 = vpop.f32.mrf.mxu1  ;;  %v2572_v5 = vmax.f32 %v2229_v42, 0.0  ;;  %v2574_v47 = vmax.f32 %v2422_v44, 0.0  ;;  %v2612_v63 = vmax.f32 %v2279_v35, 0.0  ;;  %v2614_v9 = vmax.f32 %v2472_v61, 0.0 }
 0x395   : > { %v2283_v33 = vadd.f32 %v2282_v24, %v8426_v15  ;;  %v2476_v48 = vadd.f32 %v2475_v8, %v8426_v15  ;;  %v2749_v0 = vpack.c.bf16 %v10940_v28, %v2573_v57  ;;  %v2751_v6 = vpack.c.bf16 %v10941_v14, %v2575_v11  ;;  %v10948_v17 = vld [vmem:[#allocation45_spill] sm:$0xff]  ;;  %v10955_v61 = vld [vmem:[#allocation43_spill] sm:$0xff]  ;;  %v10958_v8 = vld [vmem:[#allocation20_spill] sm:$0xff] }
 0x396   : > { %v8492_v29 = vpop.f32.mrf.mxu0  ;;  %v8494_v52 = vpop.f32.mrf.mxu1  ;;  %3505 = vmatpush1.bf16.msra.mxu0 %v2752_v31  ;;  %3858 = vmatpush1.bf16.msra.mxu1 %v2754_v32  ;;  %v2568_v51 = vmax.f32 %v8369_v40, 0.0  ;;  %v2570_v26 = vmax.f32 %v8372_v53, 0.0  ;;  %v2748_v25 = vpack.c.bf16 %v2576_v56, %v2572_v5  ;;  %v2750_v4 = vpack.c.bf16 %v2578_v38, %v2574_v47  ;;  %v10953_v35 = vld [vmem:[#allocation41_spill] sm:$0xff]  ;;  %v10993_v3 = vld [vmem:[#allocation14_spill] sm:$0xff] }
 0x397   : > { %v2616_v45 = vmax.f32 %v2283_v33, 0.0  ;;  %v2618_v18 = vmax.f32 %v2476_v48, 0.0  ;;  %3506 = vmatprep.subr.bf16.mxu0 %v2749_v0  ;;  %3859 = vmatprep.subr.bf16.mxu1 %v2751_v6  ;;  %v10946_v54 = vmax.f32 %v8330_v30, 0.0  ;;  %v10947_v27 = vmax.f32 %v8342_v62, 0.0  ;;  %v10949_v30 = vld [vmem:[#allocation22_spill] sm:$0xff]  ;;  %v10959_v48 = vld [vmem:[#allocation39_spill] sm:$0xff] }
 0x398   : > { %v8498_v21 = vpop.f32.mrf.mxu0  ;;  %v8500_v58 = vpop.f32.mrf.mxu1  ;;  %v2209_v40 = vadd.f32 %v8271_v1, %v8235_v50  ;;  %v2402_v53 = vadd.f32 %v8273_v7, %v8235_v50  ;;  %v2564_v2 = vmax.f32 %v8355_v46, 0.0  ;;  %v2566_v10 = vmax.f32 %v10948_v17, 0.0  ;;  %v10952_v1 = vld [vmem:[#allocation40_spill] sm:$0xff]  ;;  %v10954_v7 = vld [vmem:[#allocation42_spill] sm:$0xff] }
 0x399   : > { %10942 = vst [vmem:[#allocation55_spill] sm:$0xff] %v8498_v21  ;;  %10943 = vst [vmem:[#allocation56_spill] sm:$0xff] %v8500_v58  ;;  %v8502_v13 = vpack.c.bf16 %v2616_v45, %v2612_v63  ;;  %v8504_v37 = vpack.c.bf16 %v2618_v18, %v2614_v9  ;;  %v2745_v19 = vpack.c.bf16 %v10946_v54, %v2565_v34  ;;  %v2557_v11 = vmax.f32 %v10952_v1, 0.0  ;;  %v10960_v0 = vld [vmem:[#allocation30_spill] sm:$0xff]  ;;  %v10962_v34 = vld [vmem:[#allocation17_spill] sm:$0xff] }
 0x39a   : > { %v2747_v55 = vpack.c.bf16 %v10947_v27, %v2567_v16  ;;  %v8516_v42 = vpop.f32.mrf.mxu0  ;;  %v8518_v44 = vpop.f32.mrf.mxu1  ;;  %3507 = vmatpush1.bf16.msra.mxu0 %v2748_v25  ;;  %3860 = vmatpush1.bf16.msra.mxu1 %v2750_v4  ;;  %v2201_v62 = vadd.f32 %v10950_v59, %v10949_v30  ;;  %v2394_v57 = vadd.f32 %v10951_v22, %v10949_v30  ;;  %v2559_v50 = vmax.f32 %v10953_v35, 0.0  ;;  %v10964_v18 = vld [vmem:[#allocation19_spill] sm:$0xff]  ;;  %v10966_v25 = vld [vmem:[#allocation38_spill] sm:$0xff] }
 0x39b   : > { %10944 = vst [vmem:[#allocation57_spill] sm:$0xff] %v8502_v13  ;;  %10945 = vst [vmem:[#allocation58_spill] sm:$0xff] %v8504_v37  ;;  %3508 = vmatprep.subr.bf16.mxu0 %v2745_v19  ;;  %v2560_v46 = vmax.f32 %v10954_v7, 0.0  ;;  %v2562_v56 = vmax.f32 %v10955_v61, 0.0  ;;  %v2744_v38 = vpack.c.bf16 %v2568_v51, %v2564_v2  ;;  %v2746_v31 = vpack.c.bf16 %v2570_v26, %v2566_v10  ;;  %v10965_v51 = vld [vmem:[#allocation37_spill] sm:$0xff]  ;;  %v10967_v2 = vld [vmem:[#allocation18_spill] sm:$0xff] }
 0x39c   : > { %3861 = vmatprep.subr.bf16.mxu1 %v2747_v55  ;;  %v8528_v32 = vpop.f32.mrf.mxu0  ;;  %v8530_v24 = vpop.f32.mrf.mxu1  ;;  %v2553_v33 = vmax.f32 %v10958_v8, 0.0  ;;  %v2555_v28 = vmax.f32 %v10959_v48, 0.0  ;;  %v10961_v14 = vmax.f32 %v10960_v0, 0.0  ;;  %v10963_v16 = vmax.f32 %v10962_v34, 0.0  ;;  %v10968_v10 = vld [vmem:[#allocation24_spill] sm:$0xff]  ;;  %v10971_v0 = vld [vmem:[#allocation35_spill] sm:$0xff] }
 0x39d   : > { %10956 = vst [vmem:[#allocation45_spill] sm:$0xff] %v8528_v32  ;;  %10957 = vst [vmem:[#allocation22_spill] sm:$0xff] %v8530_v24  ;;  %v2556_v47 = vmax.f32 %v2209_v40, 0.0  ;;  %v2558_v63 = vmax.f32 %v2402_v53, 0.0  ;;  %v2191_v26 = vadd.f32 %v10965_v51, %v10964_v18  ;;  %v2384_v4 = vadd.f32 %v10966_v25, %v10964_v18  ;;  %v10988_v37 = vld [vmem:[#allocation27_spill] sm:$0xff] }
 0x39e   : > { %v2741_v6 = vpack.c.bf16 %v10961_v14, %v2557_v11  ;;  %v2743_v5 = vpack.c.bf16 %v10963_v16, %v2559_v50  ;;  %v8538_v9 = vpop.f32.mrf.mxu0  ;;  %v8540_v45 = vpop.f32.mrf.mxu1  ;;  %3509 = vmatpush1.bf16.msra.mxu0 %v2744_v38  ;;  %3862 = vmatpush1.bf16.msra.mxu1 %v2746_v31  ;;  %v2549_v54 = vmax.f32 %v2201_v62, 0.0  ;;  %v2551_v19 = vmax.f32 %v2394_v57, 0.0  ;;  %v10969_v38 = vld [vmem:[#allocation16_spill] sm:$0xff]  ;;  %v10970_v31 = vld [vmem:[#allocation29_spill] sm:$0xff] }
 0x39f   : > { %v2740_v27 = vpack.c.bf16 %v2560_v46, %v2556_v47  ;;  %v2742_v55 = vpack.c.bf16 %v2562_v56, %v2558_v63  ;;  %v2545_v17 = vmax.f32 %v10967_v2, 0.0  ;;  %v2547_v30 = vmax.f32 %v10968_v10, 0.0  ;;  %v10972_v14 = vld [vmem:[#allocation36_spill] sm:$0xff] }
 0x3a0   : > { %3510 = vmatprep.subr.bf16.mxu0 %v2741_v6  ;;  %3863 = vmatprep.subr.bf16.mxu1 %v2743_v5  ;;  %v8546_v40 = vpop.f32.mrf.mxu0  ;;  %v8548_v53 = vpop.f32.mrf.mxu1  ;;  %v2737_v59 = vpack.c.bf16 %v2553_v33, %v2549_v54  ;;  %v2739_v22 = vpack.c.bf16 %v2555_v28, %v2551_v19  ;;  %v2541_v62 = vmax.f32 %v2191_v26, 0.0  ;;  %v2543_v57 = vmax.f32 %v2384_v4, 0.0 }
 0x3a2   : > { %v2300_v1 = vpop.f32.mrf.mxu0  ;;  %v2493_v11 = vpop.f32.mrf.mxu1  ;;  %3511 = vmatpush1.bf16.msra.mxu0 %v2740_v27  ;;  %3864 = vmatpush1.bf16.msra.mxu1 %v2742_v55  ;;  %v2733_v7 = vpack.c.bf16 %v2545_v17, %v2541_v62  ;;  %v2735_v46 = vpack.c.bf16 %v2547_v30, %v2543_v57  ;;  %v8578_v62 = vadd.f32 %v8458_v39, %v8445_v43 }
 0x3a3   : > { %3512 = vmatprep.subr.bf16.mxu0 %v2737_v59  ;;  %3865 = vmatprep.subr.bf16.mxu1 %v2739_v22  ;;  %v8574_v22 = vadd.f32 %v8456_v12, %v8445_v43  ;;  %v8582_v57 = vadd.f32 %v8492_v29, %v8426_v15 }
 0x3a4   : > { %v8552_v35 = vpop.f32.mrf.mxu0  ;;  %v8554_v50 = vpop.f32.mrf.mxu1  ;;  %10974 = vst [vmem:[#allocation15_spill] sm:$0xff] %v8578_v62 }
 0x3a5   : > { %10973 = vst [vmem:[#allocation28_spill] sm:$0xff] %v8574_v22  ;;  %10975 = vst [vmem:[#allocation40_spill] sm:$0xff] %v8582_v57  ;;  %v10989_v22 = vld [vmem:[#allocation31_spill] sm:$0xff] }
 0x3a6   : > { %v2304_v61 = vpop.f32.mrf.mxu0  ;;  %v2497_v56 = vpop.f32.mrf.mxu1  ;;  %3513 = vmatpush1.bf16.msra.mxu0 %v10969_v38  ;;  %3866 = vmatpush1.bf16.msra.mxu1 %v10970_v31  ;;  %v10980_v31 = vld [vmem:[#allocation46_spill] sm:$0xff] }
 0x3a7   : > { %3514 = vmatprep.subr.bf16.mxu0 %v2733_v7  ;;  %3867 = vmatprep.subr.bf16.mxu1 %v2735_v46  ;;  %v8586_v7 = vadd.f32 %v8494_v52, %v8426_v15  ;;  %v10977_v46 = vld [vmem:[#allocation44_spill] sm:$0xff]  ;;  %v8598_v43 = vadd.f32 %v8538_v9, %v10980_v31  ;;  %v8602_v39 = vadd.f32 %v8540_v45, %v10980_v31  ;;  %v10983_v15 = vld [vmem:[#allocation21_spill] sm:$0xff]  ;;  %v10987_v9 = vld [vmem:[#allocation26_spill] sm:$0xff] }
 0x3a8   : > { %v8558_v8 = vpop.f32.mrf.mxu0  ;;  %v8560_v33 = vpop.f32.mrf.mxu1  ;;  %v8590_v38 = vadd.f32 %v8516_v42, %v10977_v46  ;;  %v8594_v12 = vadd.f32 %v8518_v44, %v10977_v46  ;;  %v8605_v52 = vadd.f32 %v2300_v1, %v10983_v15  ;;  %v8608_v42 = vadd.f32 %v2493_v11, %v10983_v15 }
 0x3a9   : > { %10976 = vst [vmem:[#allocation41_spill] sm:$0xff] %v8586_v7  ;;  %10981 = vst [vmem:[#allocation20_spill] sm:$0xff] %v8598_v43 }
 0x3aa   : > { %v2310_v48 = vpop.f32.mrf.mxu0  ;;  %v2503_v28 = vpop.f32.mrf.mxu1  ;;  %3515 = vmatpush1.bf16.msra.mxu0 %v10971_v0  ;;  %3868 = vmatpush1.bf16.msra.mxu1 %v10972_v14  ;;  %10978 = vst [vmem:[#allocation42_spill] sm:$0xff] %v8590_v38  ;;  %10979 = vst [vmem:[#allocation43_spill] sm:$0xff] %v8594_v12  ;;  %v10986_v14 = vld [vmem:[#allocation25_spill] sm:$0xff] }
 0x3ab   : > { %10982 = vst [vmem:[#allocation39_spill] sm:$0xff] %v8602_v39  ;;  %10984 = vst [vmem:[#allocation30_spill] sm:$0xff] %v8605_v52  ;;  %v8611_v20 = vadd.f32 %v2304_v61, %v10986_v14  ;;  %v8614_v44 = vadd.f32 %v2497_v56, %v10986_v14  ;;  %v8617_v49 = vadd.f32 %v2310_v48, %v10987_v9 }
 0x3ac   : > { %v8564_v6 = vpop.f32.mrf.mxu0  ;;  %v8566_v34 = vpop.f32.mrf.mxu1  ;;  %10985 = vst [vmem:[#allocation17_spill] sm:$0xff] %v8608_v42  ;;  %v8620_v45 = vadd.f32 %v2503_v28, %v10987_v9 }
 0x3ae   : > { %v2314_v16 = vpop.f32.mrf.mxu0  ;;  %v2507_v5 = vpop.f32.mrf.mxu1 }
 0x3af   : > { %v8623_v13 = vadd.f32 %v2314_v16, %v10988_v37  ;;  %v8626_v1 = vadd.f32 %v2507_v5, %v10988_v37 }
 0x3b0   : > { %v8568_v47 = vpop.f32.mrf.mxu0  ;;  %v8570_v63 = vpop.f32.mrf.mxu1 }
 0x3b2   : > { %v2320_v18 = vpop.f32.mrf.mxu0  ;;  %v2513_v51 = vpop.f32.mrf.mxu1 }
 0x3b3   : > { %v8629_v61 = vadd.f32 %v2320_v18, %v10989_v22  ;;  %v8632_v56 = vadd.f32 %v2513_v51, %v10989_v22  ;;  %v10992_v51 = vld [vmem:[#allocation23_spill] sm:$0xff] }
 0x3b4   : > { %v2322_v26 = vpop.f32.mrf.mxu0  ;;  %v2515_v25 = vpop.f32.mrf.mxu1 }
 0x3b5   : > { %v8635_v48 = vadd.f32 %v2322_v26, %v10990_v41  ;;  %v8638_v28 = vadd.f32 %v2515_v25, %v10990_v41 }
 0x3b6   : > { %v2324_v4 = vpop.f32.mrf.mxu0  ;;  %v2517_v54 = vpop.f32.mrf.mxu1 }
 0x3b7   : > { %v8641_v16 = vadd.f32 %v2324_v4, %v10990_v41  ;;  %v8644_v5 = vadd.f32 %v2517_v54, %v10990_v41 }
 0x3b8   : > { %v2328_v19 = vpop.f32.mrf.mxu0  ;;  %v2521_v27 = vpop.f32.mrf.mxu1 }
 0x3ba   : > { %v2330_v55 = vpop.f32.mrf.mxu0  ;;  %v2523_v2 = vpop.f32.mrf.mxu1 }
 0x3bb   : > { %v2331_v4 = vadd.f32 %v2330_v55, %v10994_v36  ;;  %v2524_v58 = vadd.f32 %v2523_v2, %v10994_v36 }
 0x3bc   : > { %v2332_v17 = vpop.f32.mrf.mxu0  ;;  %v2525_v10 = vpop.f32.mrf.mxu1 }
 0x3bd   : > { %v2333_v21 = vadd.f32 %v2332_v17, %v10991_v60  ;;  %v2653_v24 = vmax.f32 %v2331_v4, 0.0  ;;  %v2635_v4 = vmax.f32 %v8614_v44, 0.0 }
 0x3be   : > { %v2334_v30 = vpop.f32.mrf.mxu0  ;;  %v2527_v59 = vpop.f32.mrf.mxu1 }
 0x3bf   : > { %v2335_v7 = vadd.f32 %v2334_v30, %v10991_v60  ;;  %v2528_v18 = vadd.f32 %v2527_v59, %v10991_v60  ;;  %v2656_v32 = vmax.f32 %v2333_v21, 0.0  ;;  %v2313_v21 = vadd.f32 %v8564_v6, %v10988_v37 }
 0x3c0   : > { %v2338_v29 = vpop.f32.mrf.mxu0  ;;  %v2531_v0 = vpop.f32.mrf.mxu1 }
 0x3c1   : > { %v2339_v41 = vadd.f32 %v2338_v29, %v10992_v51  ;;  %v2532_v54 = vadd.f32 %v2531_v0, %v10992_v51  ;;  %v2657_v46 = vmax.f32 %v2335_v7, 0.0  ;;  %v2329_v0 = vadd.f32 %v2328_v19, %v10994_v36 }
 0x3c2   : > { %v2340_v11 = vpop.f32.mrf.mxu0  ;;  %v2533_v62 = vpop.f32.mrf.mxu1 }
 0x3c3   : > { %v2341_v38 = vadd.f32 %v2340_v11, %v10992_v51  ;;  %v2534_v26 = vadd.f32 %v2533_v62, %v10992_v51  ;;  %v2526_v11 = vadd.f32 %v2525_v10, %v10991_v60  ;;  %v2522_v51 = vadd.f32 %v2521_v27, %v10994_v36 }
 0x3c4   : > { %v2342_v57 = vpop.f32.mrf.mxu0  ;;  %v2535_v12 = vpop.f32.mrf.mxu1  ;;  %v2660_v52 = vmax.f32 %v2339_v41, 0.0  ;;  %v2662_v17 = vmax.f32 %v2532_v54, 0.0  ;;  %v2655_v60 = vmax.f32 %v2524_v58, 0.0  ;;  %v2319_v36 = vadd.f32 %v8568_v47, %v10989_v22 }
 0x3c5   : > { %v2343_v23 = vadd.f32 %v2342_v57, %v10993_v3  ;;  %v2536_v25 = vadd.f32 %v2535_v12, %v10993_v3  ;;  %v2659_v12 = vmax.f32 %v2528_v18, 0.0  ;;  %v2661_v43 = vmax.f32 %v2341_v38, 0.0 }
 0x3c6   : > { %v2344_v30 = vpop.f32.mrf.mxu0  ;;  %v2537_v59 = vpop.f32.mrf.mxu1  ;;  %v2663_v2 = vmax.f32 %v2534_v26, 0.0  ;;  %v2651_v38 = vmax.f32 %v8644_v5, 0.0  ;;  %v2789_v26 = vpack.c.bf16 %v2657_v46, %v2653_v24  ;;  %v2512_v58 = vadd.f32 %v8570_v63, %v10989_v22 }
 0x3c7   : > { %v2345_v62 = vadd.f32 %v2344_v30, %v10993_v3  ;;  %v2538_v57 = vadd.f32 %v2537_v59, %v10993_v3  ;;  %v2664_v39 = vmax.f32 %v2343_v23, 0.0  ;;  %v2666_v55 = vmax.f32 %v2536_v25, 0.0 }
 0x3c8   : > { %v2658_v3 = vmax.f32 %v2526_v11, 0.0  ;;  %v2649_v23 = vmax.f32 %v8641_v16, 0.0  ;;  %v2791_v19 = vpack.c.bf16 %v2659_v12, %v2655_v60  ;;  %v2652_v27 = vmax.f32 %v2329_v0, 0.0  ;;  %v10996_v11 = vld [vmem:[#allocation22_spill] sm:$0xff]  ;;  %v11000_v0 = vld [vmem:[#allocation39_spill] sm:$0xff] }
 0x3c9   : > { %v2665_v42 = vmax.f32 %v2345_v62, 0.0  ;;  %v2667_v29 = vmax.f32 %v2538_v57, 0.0  ;;  %v2792_v7 = vpack.c.bf16 %v2664_v39, %v2660_v52  ;;  %v2794_v18 = vpack.c.bf16 %v2666_v55, %v2662_v17  ;;  %v10997_v62 = vld [vmem:[#allocation30_spill] sm:$0xff]  ;;  %v10998_v57 = vld [vmem:[#allocation17_spill] sm:$0xff] }
 0x3ca   : > { %v2506_v39 = vadd.f32 %v8566_v34, %v10988_v37  ;;  %v2645_v52 = vmax.f32 %v8629_v61, 0.0  ;;  %v2647_v24 = vmax.f32 %v8632_v56, 0.0  ;;  %v2648_v47 = vmax.f32 %v8635_v48, 0.0 }
 0x3cb   : > { %v2793_v10 = vpack.c.bf16 %v2665_v42, %v2661_v43  ;;  %v2795_v30 = vpack.c.bf16 %v2667_v29, %v2663_v2  ;;  %v2654_v43 = vmax.f32 %v2522_v51, 0.0  ;;  %v2650_v63 = vmax.f32 %v8638_v28, 0.0 }
 0x3cc   : > { %v2788_v22 = vpack.c.bf16 %v2656_v32, %v2652_v27  ;;  %v2641_v42 = vmax.f32 %v8623_v13, 0.0  ;;  %v2643_v16 = vmax.f32 %v8626_v1, 0.0  ;;  %v2785_v6 = vpack.c.bf16 %v2649_v23, %v2645_v52  ;;  %v11007_v27 = vld [vmem:[#allocation42_spill] sm:$0xff] }
 0x3cd   : > { %3516 = vmatprep.subr.bf16.mxu0 %v2793_v10  ;;  %3869 = vmatprep.subr.bf16.mxu1 %v2795_v30  ;;  %v2790_v46 = vpack.c.bf16 %v2658_v3, %v2654_v43  ;;  %v2787_v5 = vpack.c.bf16 %v2651_v38, %v2647_v24  ;;  %v2309_v37 = vadd.f32 %v8558_v8, %v10987_v9  ;;  %v2644_v61 = vmax.f32 %v2319_v36, 0.0  ;;  %v11001_v10 = vld [vmem:[#allocation44_spill] sm:$0xff]  ;;  %v11002_v30 = vld [vmem:[#allocation55_spill] sm:$0xff]  ;;  %v11006_v36 = vld [vmem:[#allocation54_spill] sm:$0xff] }
 0x3ce   : > { %3517 = vmatpush2.bf16.msra.mxu0 %v2792_v7  ;;  %3870 = vmatpush2.bf16.msra.mxu1 %v2794_v18  ;;  %v2502_v34 = vadd.f32 %v8560_v33, %v10987_v9  ;;  %v2646_v56 = vmax.f32 %v2512_v58, 0.0  ;;  %v2303_v32 = vadd.f32 %v8552_v35, %v10986_v14  ;;  %v2496_v13 = vadd.f32 %v8554_v50, %v10986_v14  ;;  %v11004_v38 = vld [vmem:[#allocation47_spill] sm:$0xff] }
 0x3cf   : > { %3518 = vmatprep.subr.bf16.mxu0 %v2789_v26  ;;  %3871 = vmatprep.subr.bf16.mxu1 %v2791_v19  ;;  %v2637_v1 = vmax.f32 %v8617_v49, 0.0  ;;  %v2639_v48 = vmax.f32 %v8620_v45, 0.0  ;;  %v2640_v8 = vmax.f32 %v2313_v21, 0.0  ;;  %v2642_v28 = vmax.f32 %v2506_v39, 0.0  ;;  %v10995_v45 = vld [vmem:[#allocation45_spill] sm:$0xff]  ;;  %v11008_v21 = vld [vmem:[#allocation43_spill] sm:$0xff] }
 0x3d0   : > { %v2784_v25 = vpack.c.bf16 %v2648_v47, %v2644_v61  ;;  %v2786_v33 = vpack.c.bf16 %v2650_v63, %v2646_v56  ;;  %v2633_v9 = vmax.f32 %v8611_v20, 0.0  ;;  %v2299_v35 = vadd.f32 %v8546_v40, %v10983_v15  ;;  %v11005_v26 = vld [vmem:[#allocation53_spill] sm:$0xff]  ;;  %v11011_v61 = vld [vmem:[#allocation48_spill] sm:$0xff] }
 0x3d1   : > { %v2781_v41 = vpack.c.bf16 %v2641_v42, %v2637_v1  ;;  %v2783_v54 = vpack.c.bf16 %v2643_v16, %v2639_v48  ;;  %v2492_v49 = vadd.f32 %v8548_v53, %v10983_v15  ;;  %v2636_v50 = vmax.f32 %v2309_v37, 0.0  ;;  %v10999_v15 = vld [vmem:[#allocation20_spill] sm:$0xff]  ;;  %v11010_v42 = vld [vmem:[#allocation41_spill] sm:$0xff] }
 0x3d2   : > { %3519 = vmatpush2.bf16.msra.mxu0 %v2788_v22  ;;  %3872 = vmatpush2.bf16.msra.mxu1 %v2790_v46  ;;  %v2638_v14 = vmax.f32 %v2502_v34, 0.0  ;;  %v2293_v59 = vadd.f32 %v10995_v45, %v10980_v31  ;;  %v2486_v20 = vadd.f32 %v10996_v11, %v10980_v31  ;;  %v2629_v44 = vmax.f32 %v10997_v62, 0.0  ;;  %v11003_v31 = vld [vmem:[#allocation56_spill] sm:$0xff]  ;;  %v11012_v56 = vld [vmem:[#allocation49_spill] sm:$0xff]  ;;  %v11017_v11 = vld [vmem:[#allocation58_spill] sm:$0xff] }
 0x3d3   : > { %3520 = vmatprep.subr.bf16.mxu0 %v2785_v6  ;;  %3873 = vmatprep.subr.bf16.mxu1 %v2787_v5  ;;  %v2631_v12 = vmax.f32 %v10998_v57, 0.0  ;;  %v2632_v40 = vmax.f32 %v2303_v32, 0.0  ;;  %v2634_v55 = vmax.f32 %v2496_v13, 0.0  ;;  %v2780_v2 = vpack.c.bf16 %v2640_v8, %v2636_v50  ;;  %v11009_v22 = vld [vmem:[#allocation40_spill] sm:$0xff]  ;;  %v11013_v13 = vld [vmem:[#allocation50_spill] sm:$0xff]  ;;  %v11018_v62 = vld [vmem:[#allocation51_spill] sm:$0xff] }
 0x3d4   : > { %v2782_v53 = vpack.c.bf16 %v2642_v28, %v2638_v14  ;;  %v2625_v29 = vmax.f32 %v10999_v15, 0.0  ;;  %v2627_v51 = vmax.f32 %v11000_v0, 0.0  ;;  %v2777_v17 = vpack.c.bf16 %v2633_v9, %v2629_v44  ;;  %v11019_v44 = vld [vmem:[#allocation52_spill] sm:$0xff]  ;;  %v6382_v15 = vld [vmem:[%s10911_s25 + $0x44] ss:$8 sps:$4 sm:$0xff]  }
 0x3d5   : > { %v2779_v60 = vpack.c.bf16 %v2635_v4, %v2631_v12  ;;  %v2289_v3 = vadd.f32 %v11002_v30, %v11001_v10  ;;  %v2482_v7 = vadd.f32 %v11003_v31, %v11001_v10  ;;  %v2628_v18 = vmax.f32 %v2299_v35, 0.0  ;;  %v11015_v4 = vld [vmem:[#allocation15_spill] sm:$0xff]  ;;  %v6371_v57 = vld [vmem:[%s10911_s25 + $0x14] ss:$8 sps:$4 sm:$0xff]   ;;  %v6373_v12 = vld [vmem:[%s10911_s25 + $0x10] ss:$8 sps:$4 sm:$0xff]  }
 0x3d6   : > { %3521 = vmatpush2.bf16.msra.mxu0 %v2784_v25  ;;  %3874 = vmatpush2.bf16.msra.mxu1 %v2786_v33  ;;  %v2630_v23 = vmax.f32 %v2492_v49, 0.0  ;;  %v2281_v19 = vadd.f32 %v11005_v26, %v11004_v38  ;;  %v2474_v58 = vadd.f32 %v11006_v36, %v11004_v38  ;;  %v2621_v43 = vmax.f32 %v11007_v27, 0.0  ;;  %v11014_v33 = vld [vmem:[#allocation28_spill] sm:$0xff]  ;;  %v6392_v31 = vld [vmem:[%s10911_s25 + $0x80] ss:$8 sps:$4 sm:$0xff]  }
 0x3d7   : > { %3522 = vmatprep.subr.bf16.mxu0 %v2781_v41  ;;  %3875 = vmatprep.subr.bf16.mxu1 %v2783_v54  ;;  %v2623_v39 = vmax.f32 %v11008_v21, 0.0  ;;  %v2624_v52 = vmax.f32 %v2293_v59, 0.0  ;;  %v2626_v24 = vmax.f32 %v2486_v20, 0.0  ;;  %v2776_v47 = vpack.c.bf16 %v2632_v40, %v2628_v18  ;;  %v11016_v59 = vld [vmem:[#allocation57_spill] sm:$0xff]  ;;  %v6368_v20 = vld [vmem:[%s10911_s25] ss:$8 sps:$4 sm:$0xff]  }
 0x3d8   : > { %v2778_v63 = vpack.c.bf16 %v2634_v55, %v2630_v23  ;;  %v2617_v46 = vmax.f32 %v11009_v22, 0.0  ;;  %v2619_v16 = vmax.f32 %v11010_v42, 0.0  ;;  %v2773_v6 = vpack.c.bf16 %v2625_v29, %v2621_v43  ;;  %v6374_v40 = vld [vmem:[%s10911_s25 + $0x24] ss:$8 sps:$4 sm:$0xff]   ;;  %v6376_v55 = vld [vmem:[%s10911_s25 + $0x20] ss:$8 sps:$4 sm:$0xff]  }
 0x3d9   : > { %v2775_v5 = vpack.c.bf16 %v2627_v51, %v2623_v39  ;;  %v2620_v37 = vmax.f32 %v2289_v3, 0.0  ;;  %v2622_v34 = vmax.f32 %v2482_v7, 0.0  ;;  %v2271_v32 = vadd.f32 %v11012_v56, %v11011_v61  ;;  %v6380_v29 = vld [vmem:[%s10911_s25 + $0x40] ss:$8 sps:$4 sm:$0xff]   ;;  %v6385_v0 = vld [vmem:[%s10911_s25 + $0x54] ss:$8 sps:$4 sm:$0xff]  }
 0x3da   : > { %3523 = vmatpush2.bf16.msra.mxu0 %v2780_v2  ;;  %3876 = vmatpush2.bf16.msra.mxu1 %v2782_v53  ;;  %v2464_v1 = vadd.f32 %v11013_v13, %v11011_v61  ;;  %v2613_v48 = vmax.f32 %v2281_v19, 0.0  ;;  %v2615_v8 = vmax.f32 %v2474_v58, 0.0  ;;  %v2609_v9 = vmax.f32 %v11014_v33, 0.0  ;;  %v6377_v2 = vld [vmem:[%s10911_s25 + $0x34] ss:$8 sps:$4 sm:$0xff]  }
 0x3db   : > { %3524 = vmatprep.subr.bf16.mxu0 %v2777_v17  ;;  %3877 = vmatprep.subr.bf16.mxu1 %v2779_v60  ;;  %v2772_v28 = vpack.c.bf16 %v2624_v52, %v2620_v37  ;;  %v2774_v25 = vpack.c.bf16 %v2626_v24, %v2622_v34  ;;  %v2611_v41 = vmax.f32 %v11015_v4, 0.0  ;;  %v2605_v49 = vmax.f32 %v2271_v32, 0.0  ;;  %v6379_v53 = vld [vmem:[%s10911_s25 + $0x30] ss:$8 sps:$4 sm:$0xff]   ;;  %v6388_v17 = vld [vmem:[%s10911_s25 + $0x64] ss:$8 sps:$4 sm:$0xff]   ;;  %v2863_v4 = vpop.permute.xlu1 %2862 }
 0x3dc   : > { %v2769_v54 = vpack.c.bf16 %v2617_v46, %v2613_v48  ;;  %v2771_v35 = vpack.c.bf16 %v2619_v16, %v2615_v8  ;;  %v2607_v50 = vmax.f32 %v2464_v1, 0.0  ;;  %v6383_v51 = vld [vmem:[%s10911_s25 + $0x50] ss:$8 sps:$4 sm:$0xff]   ;;  %v6386_v60 = vld [vmem:[%s10911_s25 + $0x60] ss:$8 sps:$4 sm:$0xff]  }
 0x3dd   : > { %v2765_v14 = vpack.c.bf16 %v2609_v9, %v2605_v49  ;;  %v6391_v10 = vld [vmem:[%s10911_s25 + $0x74] ss:$8 sps:$4 sm:$0xff]   ;;  %v6389_v30 = vld [vmem:[%s10911_s25 + $0x70] ss:$8 sps:$4 sm:$0xff]   ;;  %v6394_v3 = vld [vmem:[%s10911_s25 + $0x84] ss:$8 sps:$4 sm:$0xff]  }
 0x3de   : > { %3525 = vmatpush2.bf16.msra.mxu0 %v2776_v47  ;;  %3878 = vmatpush2.bf16.msra.mxu1 %v2778_v63  ;;  %v2767_v45 = vpack.c.bf16 %v2611_v41, %v2607_v50  ;;  %v6397_v7 = vld [vmem:[%s10911_s25 + $0x94] ss:$8 sps:$4 sm:$0xff]   ;;  %v6395_v18 = vld [vmem:[%s10911_s25 + $0x90] ss:$8 sps:$4 sm:$0xff]   ;;  %v6400_v23 = vld [vmem:[%s10911_s25 + $0xa4] ss:$8 sps:$4 sm:$0xff]  }
 0x3df   : > { %3526 = vmatprep.subr.bf16.mxu0 %v2773_v6  ;;  %3879 = vmatprep.subr.bf16.mxu1 %v2775_v5  ;;  %v6398_v38 = vld [vmem:[%s10911_s25 + $0xa0] ss:$8 sps:$4 sm:$0xff]   ;;  %v6403_v26 = vld [vmem:[%s10911_s25 + $0xb4] ss:$8 sps:$4 sm:$0xff]   ;;  %v6401_v19 = vld [vmem:[%s10911_s25 + $0xb0] ss:$8 sps:$4 sm:$0xff]  }
 0x3e0   : > { %v6406_v36 = vld [vmem:[%s10911_s25 + $0xc4] ss:$8 sps:$4 sm:$0xff]   ;;  %v6404_v58 = vld [vmem:[%s10911_s25 + $0xc0] ss:$8 sps:$4 sm:$0xff]   ;;  %v6409_v27 = vld [vmem:[%s10911_s25 + $0xd4] ss:$8 sps:$4 sm:$0xff]  }
 0x3e1   : > { %v6407_v43 = vld [vmem:[%s10911_s25 + $0xd0] ss:$8 sps:$4 sm:$0xff]   ;;  %v6412_v21 = vld [vmem:[%s10911_s25 + $0xe4] ss:$8 sps:$4 sm:$0xff]   ;;  %v6410_v39 = vld [vmem:[%s10911_s25 + $0xe0] ss:$8 sps:$4 sm:$0xff]  }
 0x3e2   : > { %3527 = vmatpush2.bf16.msra.mxu0 %v2772_v28  ;;  %3880 = vmatpush2.bf16.msra.mxu1 %v2774_v25  ;;  %v6415_v52 = vld [vmem:[%s10911_s25 + $0xf4] ss:$8 sps:$4 sm:$0xff]   ;;  %v6413_v24 = vld [vmem:[%s10911_s25 + $0xf0] ss:$8 sps:$4 sm:$0xff]   ;;  %v6418_v47 = vld [vmem:[%s10911_s25 + $0x104] ss:$8 sps:$4 sm:$0xff]  }
 0x3e3   : > { %3528 = vmatprep.subr.bf16.mxu0 %v2769_v54  ;;  %3881 = vmatprep.subr.bf16.mxu1 %v2771_v35  ;;  %v6416_v63 = vld [vmem:[%s10911_s25 + $0x100] ss:$8 sps:$4 sm:$0xff]   ;;  %v6421_v22 = vld [vmem:[%s10911_s25 + $0x114] ss:$8 sps:$4 sm:$0xff]   ;;  %v6419_v46 = vld [vmem:[%s10911_s25 + $0x110] ss:$8 sps:$4 sm:$0xff]  }
 0x3e4   : > { %v6424_v42 = vld [vmem:[%s10911_s25 + $0x124] ss:$8 sps:$4 sm:$0xff]   ;;  %v6422_v16 = vld [vmem:[%s10911_s25 + $0x120] ss:$8 sps:$4 sm:$0xff]   ;;  %v6427_v6 = vld [vmem:[%s10911_s25 + $0x134] ss:$8 sps:$4 sm:$0xff]  }
 0x3e5   : > { %v6425_v5 = vld [vmem:[%s10911_s25 + $0x130] ss:$8 sps:$4 sm:$0xff]   ;;  %v6430_v37 = vld [vmem:[%s10911_s25 + $0x144] ss:$8 sps:$4 sm:$0xff]   ;;  %v6428_v34 = vld [vmem:[%s10911_s25 + $0x140] ss:$8 sps:$4 sm:$0xff]  }
 0x3e6   : > { %3529 = vmatpush2.bf16.msra.mxu0 %v11016_v59  ;;  %3882 = vmatpush2.bf16.msra.mxu1 %v11017_v11  ;;  %v6433_v61 = vld [vmem:[%s10911_s25 + $0x154] ss:$8 sps:$4 sm:$0xff]   ;;  %v6431_v56 = vld [vmem:[%s10911_s25 + $0x150] ss:$8 sps:$4 sm:$0xff]   ;;  %v6436_v32 = vld [vmem:[%s10911_s25 + $0x164] ss:$8 sps:$4 sm:$0xff]  }
 0x3e7   : > { %3530 = vmatprep.subr.bf16.mxu0 %v2765_v14  ;;  %3883 = vmatprep.subr.bf16.mxu1 %v2767_v45  ;;  %v6434_v13 = vld [vmem:[%s10911_s25 + $0x160] ss:$8 sps:$4 sm:$0xff]   ;;  %v6439_v1 = vld [vmem:[%s10911_s25 + $0x174] ss:$8 sps:$4 sm:$0xff]   ;;  %v6437_v48 = vld [vmem:[%s10911_s25 + $0x170] ss:$8 sps:$4 sm:$0xff]  }
 0x3e8   : > { %v6442_v8 = vld [vmem:[%s10911_s25 + $0x184] ss:$8 sps:$4 sm:$0xff]   ;;  %v6440_v28 = vld [vmem:[%s10911_s25 + $0x180] ss:$8 sps:$4 sm:$0xff]   ;;  %v6445_v25 = vld [vmem:[%s10911_s25 + $0x194] ss:$8 sps:$4 sm:$0xff]  }
 0x3e9   : > { %v6443_v11 = vld [vmem:[%s10911_s25 + $0x190] ss:$8 sps:$4 sm:$0xff]  }
 0x3ea   : > { %3531 = vmatpush2.bf16.msra.mxu0 %v11018_v62  ;;  %3884 = vmatpush2.bf16.msra.mxu1 %v11019_v44 }
 0x3ed   : > { %3533 = vmatmul.mubr.bf16.vlgmr.msra.gmra.mxu0 %v6368_v20  ;;  %3886 = vmatmul.mubr.bf16.vlgmr.msra.gmra.mxu1 %v6368_v20  ;;  %v2868_v20 = vpop.permute.xlu0 %2867 }
 0x3ee   : > { %3542 = vmatprep.mubr.bf16.mxu0 %v6371_v57  ;;  %3895 = vmatprep.mubr.bf16.mxu1 %v6371_v57  ;;  %v6448_v57 = vld [vmem:[%s10911_s25 + $0x1a4] ss:$8 sps:$4 sm:$0xff]  }
 0x3f5   : > { %3543 = vmatmul.mubr.bf16.gmra.mxu0 %v6373_v12  ;;  %3896 = vmatmul.mubr.bf16.gmra.mxu1 %v6373_v12 }
 0x3f6   : > { %3552 = vmatprep.mubr.bf16.mxu0 %v6374_v40  ;;  %3905 = vmatprep.mubr.bf16.mxu1 %v6374_v40 }
 0x3fd   : > { %3553 = vmatmul.mubr.bf16.gmra.mxu0 %v6376_v55  ;;  %3906 = vmatmul.mubr.bf16.gmra.mxu1 %v6376_v55 }
 0x3fe   : > { %3562 = vmatprep.mubr.bf16.mxu0 %v6377_v2  ;;  %3915 = vmatprep.mubr.bf16.mxu1 %v6377_v2 }
 0x405   : > { %3563 = vmatmul.mubr.bf16.gmra.mxu0 %v6379_v53  ;;  %3916 = vmatmul.mubr.bf16.gmra.mxu1 %v6379_v53 }
 0x406   : > { %3572 = vmatprep.mubr.bf16.mxu0 %v6382_v15  ;;  %3925 = vmatprep.mubr.bf16.mxu1 %v6382_v15 }
 0x40d   : > { %3573 = vmatmul.mubr.bf16.gmra.mxu0 %v6380_v29  ;;  %3926 = vmatmul.mubr.bf16.gmra.mxu1 %v6380_v29 }
 0x40e   : > { %3582 = vmatprep.mubr.bf16.mxu0 %v6385_v0  ;;  %3935 = vmatprep.mubr.bf16.mxu1 %v6385_v0 }
 0x415   : > { %3583 = vmatmul.mubr.bf16.gmra.mxu0 %v6383_v51  ;;  %3936 = vmatmul.mubr.bf16.gmra.mxu1 %v6383_v51  ;;  %v2873_v51 = vpop.permute.xlu1 %2872 }
 0x416   : > { %3592 = vmatprep.mubr.bf16.mxu0 %v6388_v17  ;;  %3945 = vmatprep.mubr.bf16.mxu1 %v6388_v17 }
 0x41d   : > { %3593 = vmatmul.mubr.bf16.gmra.mxu0 %v6386_v60  ;;  %3946 = vmatmul.mubr.bf16.gmra.mxu1 %v6386_v60 }
 0x41e   : > { %3602 = vmatprep.mubr.bf16.mxu0 %v6391_v10  ;;  %3955 = vmatprep.mubr.bf16.mxu1 %v6391_v10 }
 0x425   : > { %3603 = vmatmul.mubr.bf16.gmra.mxu0 %v6389_v30  ;;  %3956 = vmatmul.mubr.bf16.gmra.mxu1 %v6389_v30 }
 0x426   : > { %3612 = vmatprep.mubr.bf16.mxu0 %v6394_v3  ;;  %3965 = vmatprep.mubr.bf16.mxu1 %v6394_v3 }
 0x42d   : > { %3613 = vmatmul.mubr.bf16.gmra.mxu0 %v6392_v31  ;;  %3966 = vmatmul.mubr.bf16.gmra.mxu1 %v6392_v31 }
 0x42e   : > { %3622 = vmatprep.mubr.bf16.mxu0 %v6397_v7  ;;  %3975 = vmatprep.mubr.bf16.mxu1 %v6397_v7 }
 0x435   : > { %3623 = vmatmul.mubr.bf16.gmra.mxu0 %v6395_v18  ;;  %3976 = vmatmul.mubr.bf16.gmra.mxu1 %v6395_v18 }
 0x436   : > { %3632 = vmatprep.mubr.bf16.mxu0 %v6400_v23  ;;  %3985 = vmatprep.mubr.bf16.mxu1 %v6400_v23 }
 0x43d   : > { %3633 = vmatmul.mubr.bf16.gmra.mxu0 %v6398_v38  ;;  %3986 = vmatmul.mubr.bf16.gmra.mxu1 %v6398_v38 }
 0x43e   : > { %3642 = vmatprep.mubr.bf16.mxu0 %v6403_v26  ;;  %3995 = vmatprep.mubr.bf16.mxu1 %v6403_v26  ;;  %v6446_v26 = vld [vmem:[%s10911_s25 + $0x1a0] ss:$8 sps:$4 sm:$0xff]  }
 0x445   : > { %3643 = vmatmul.mubr.bf16.gmra.mxu0 %v6401_v19  ;;  %3996 = vmatmul.mubr.bf16.gmra.mxu1 %v6401_v19  ;;  %v2878_v19 = vpop.permute.xlu0 %2877 }
 0x446   : > { %3652 = vmatprep.mubr.bf16.mxu0 %v6406_v36  ;;  %4005 = vmatprep.mubr.bf16.mxu1 %v6406_v36 }
 0x44d   : > { %3653 = vmatmul.mubr.bf16.gmra.mxu0 %v6404_v58  ;;  %4006 = vmatmul.mubr.bf16.gmra.mxu1 %v6404_v58 }
 0x44e   : > { %3662 = vmatprep.mubr.bf16.mxu0 %v6409_v27  ;;  %4015 = vmatprep.mubr.bf16.mxu1 %v6409_v27  ;;  %v6451_v27 = vld [vmem:[%s10911_s25 + $0x1b4] ss:$8 sps:$4 sm:$0xff]  }
 0x455   : > { %3663 = vmatmul.mubr.bf16.gmra.mxu0 %v6407_v43  ;;  %4016 = vmatmul.mubr.bf16.gmra.mxu1 %v6407_v43 }
 0x456   : > { %3672 = vmatprep.mubr.bf16.mxu0 %v6412_v21  ;;  %4025 = vmatprep.mubr.bf16.mxu1 %v6412_v21 }
 0x45d   : > { %3673 = vmatmul.mubr.bf16.gmra.mxu0 %v6410_v39  ;;  %4026 = vmatmul.mubr.bf16.gmra.mxu1 %v6410_v39 }
 0x45e   : > { %3682 = vmatprep.mubr.bf16.mxu0 %v6415_v52  ;;  %4035 = vmatprep.mubr.bf16.mxu1 %v6415_v52 }
 0x465   : > { %3683 = vmatmul.mubr.bf16.gmra.mxu0 %v6413_v24  ;;  %4036 = vmatmul.mubr.bf16.gmra.mxu1 %v6413_v24 }
 0x466   : > { %3692 = vmatprep.mubr.bf16.mxu0 %v6418_v47  ;;  %4045 = vmatprep.mubr.bf16.mxu1 %v6418_v47 }
 0x46d   : > { %3693 = vmatmul.mubr.bf16.gmra.mxu0 %v6416_v63  ;;  %4046 = vmatmul.mubr.bf16.gmra.mxu1 %v6416_v63 }
 0x46e   : > { %3702 = vmatprep.mubr.bf16.mxu0 %v6421_v22  ;;  %4055 = vmatprep.mubr.bf16.mxu1 %v6421_v22 }
 0x475   : > { %3703 = vmatmul.mubr.bf16.gmra.mxu0 %v6419_v46  ;;  %4056 = vmatmul.mubr.bf16.gmra.mxu1 %v6419_v46  ;;  %v2883_v46 = vpop.permute.xlu1 %2882 }
 0x476   : > { %3712 = vmatprep.mubr.bf16.mxu0 %v6424_v42  ;;  %4065 = vmatprep.mubr.bf16.mxu1 %v6424_v42 }
 0x47d   : > { %3713 = vmatmul.mubr.bf16.gmra.mxu0 %v6422_v16  ;;  %4066 = vmatmul.mubr.bf16.gmra.mxu1 %v6422_v16 }
 0x47e   : > { %3722 = vmatprep.mubr.bf16.mxu0 %v6427_v6  ;;  %4075 = vmatprep.mubr.bf16.mxu1 %v6427_v6 }
 0x485   : > { %3723 = vmatmul.mubr.bf16.gmra.mxu0 %v6425_v5  ;;  %4076 = vmatmul.mubr.bf16.gmra.mxu1 %v6425_v5 }
 0x486   : > { %3732 = vmatprep.mubr.bf16.mxu0 %v6430_v37  ;;  %4085 = vmatprep.mubr.bf16.mxu1 %v6430_v37 }
 0x48d   : > { %3733 = vmatmul.mubr.bf16.gmra.mxu0 %v6428_v34  ;;  %4086 = vmatmul.mubr.bf16.gmra.mxu1 %v6428_v34 }
 0x48e   : > { %3742 = vmatprep.mubr.bf16.mxu0 %v6433_v61  ;;  %4095 = vmatprep.mubr.bf16.mxu1 %v6433_v61 }
 0x495   : > { %3743 = vmatmul.mubr.bf16.gmra.mxu0 %v6431_v56  ;;  %4096 = vmatmul.mubr.bf16.gmra.mxu1 %v6431_v56 }
 0x496   : > { %3752 = vmatprep.mubr.bf16.mxu0 %v6436_v32  ;;  %4105 = vmatprep.mubr.bf16.mxu1 %v6436_v32 }
 0x49d   : > { %3753 = vmatmul.mubr.bf16.gmra.mxu0 %v6434_v13  ;;  %4106 = vmatmul.mubr.bf16.gmra.mxu1 %v6434_v13 }
 0x49e   : > { %3762 = vmatprep.mubr.bf16.mxu0 %v6439_v1  ;;  %4115 = vmatprep.mubr.bf16.mxu1 %v6439_v1  ;;  %v6449_v1 = vld [vmem:[%s10911_s25 + $0x1b0] ss:$8 sps:$4 sm:$0xff]  }
 0x4a5   : > { %3763 = vmatmul.mubr.bf16.gmra.mxu0 %v6437_v48  ;;  %4116 = vmatmul.mubr.bf16.gmra.mxu1 %v6437_v48  ;;  %v2888_v48 = vpop.permute.xlu0 %2887 }
 0x4a6   : > { %3772 = vmatprep.mubr.bf16.mxu0 %v6442_v8  ;;  %4125 = vmatprep.mubr.bf16.mxu1 %v6442_v8 }
 0x4ad   : > { %v3534_v33 = vpop.f32.mrf.mxu0  ;;  %3773 = vmatmul.mubr.bf16.gmra.mxu0 %v6440_v28  ;;  %v3887_v9 = vpop.f32.mrf.mxu1  ;;  %4126 = vmatmul.mubr.bf16.gmra.mxu1 %v6440_v28 }
 0x4ae   : > { %3782 = vmatprep.mubr.bf16.mxu0 %v6445_v25  ;;  %4135 = vmatprep.mubr.bf16.mxu1 %v6445_v25  ;;  %v8877_v35 = vadd.f32 %v3534_v33, %v2863_v4  ;;  %v8879_v49 = vadd.f32 %v3887_v9, %v2863_v4  ;;  %v6454_v25 = vld [vmem:[%s10911_s25 + $0x1c4] ss:$8 sps:$4 sm:$0xff]  }
 0x4af   : > { %v3536_v41 = vpop.f32.mrf.mxu0  ;;  %v3889_v54 = vpop.f32.mrf.mxu1 }
 0x4b0   : > { %v8881_v50 = vadd.f32 %v3536_v41, %v2863_v4  ;;  %v8883_v14 = vadd.f32 %v3889_v54, %v2863_v4 }
 0x4b1   : > { %v3538_v45 = vpop.f32.mrf.mxu0  ;;  %v3891_v59 = vpop.f32.mrf.mxu1 }
 0x4b2   : > { %v6086_v62 = vpack.c.bf16 %v8881_v50, %v8877_v35  ;;  %v6087_v44 = vpack.c.bf16 %v8883_v14, %v8879_v49  ;;  %v8899_v55 = vadd.f32 %v3538_v45, %v2868_v20  ;;  %v8901_v2 = vadd.f32 %v3891_v59, %v2868_v20 }
 0x4b3   : > { %v3540_v12 = vpop.f32.mrf.mxu0  ;;  %v3893_v40 = vpop.f32.mrf.mxu1 }
 0x4b4   : > { %4974 = vst [vmem:[%s8895_s28] sm:$0xff] %v6086_v62  ;;  %4975 = vst [vmem:[%s8895_s28 + $0x8] sm:$0xff] %v6087_v44  ;;  %v8903_v53 = vadd.f32 %v3540_v12, %v2868_v20  ;;  %v8905_v15 = vadd.f32 %v3893_v40, %v2868_v20  ;;  %v2893_v20 = vpop.permute.xlu1 %2892 }
 0x4b5   : > { %v3544_v29 = vpop.f32.mrf.mxu0  ;;  %3783 = vmatmul.mubr.bf16.gmra.mxu0 %v6443_v11  ;;  %v3897_v0 = vpop.f32.mrf.mxu1  ;;  %4136 = vmatmul.mubr.bf16.gmra.mxu1 %v6443_v11 }
 0x4b6   : > { %v6088_v17 = vpack.c.bf16 %v8903_v53, %v8899_v55  ;;  %v6089_v60 = vpack.c.bf16 %v8905_v15, %v8901_v2  ;;  %3792 = vmatprep.mubr.bf16.mxu0 %v6448_v57  ;;  %4145 = vmatprep.mubr.bf16.mxu1 %v6448_v57  ;;  %v8913_v3 = vadd.f32 %v3544_v29, %v2873_v51 }
 0x4b7   : > { %v3546_v10 = vpop.f32.mrf.mxu0  ;;  %v3899_v30 = vpop.f32.mrf.mxu1  ;;  %v8915_v31 = vadd.f32 %v3897_v0, %v2873_v51 }
 0x4b8   : > { %4976 = vst [vmem:[%s8895_s28 + $0x10] sm:$0xff] %v6088_v17  ;;  %4977 = vst [vmem:[%s8895_s28 + $0x18] sm:$0xff] %v6089_v60  ;;  %v8917_v7 = vadd.f32 %v3546_v10, %v2873_v51  ;;  %v8919_v18 = vadd.f32 %v3899_v30, %v2873_v51  ;;  %v6452_v10 = vld [vmem:[%s10911_s25 + $0x1c0] ss:$8 sps:$4 sm:$0xff]   ;;  %v2898_v30 = vpop.permute.xlu0 %2897 }
 0x4b9   : > { %v3548_v23 = vpop.f32.mrf.mxu0  ;;  %v3901_v38 = vpop.f32.mrf.mxu1 }
 0x4ba   : > { %v6090_v36 = vpack.c.bf16 %v8917_v7, %v8913_v3  ;;  %v6091_v58 = vpack.c.bf16 %v8919_v18, %v8915_v31  ;;  %v8933_v39 = vadd.f32 %v3548_v23, %v2878_v19  ;;  %v8935_v52 = vadd.f32 %v3901_v38, %v2878_v19 }
 0x4bb   : > { %v3550_v43 = vpop.f32.mrf.mxu0  ;;  %v3903_v21 = vpop.f32.mrf.mxu1 }
 0x4bc   : > { %4978 = vst [vmem:[%s8895_s28 + $0x20] sm:$0xff] %v6090_v36  ;;  %4979 = vst [vmem:[%s8895_s28 + $0x28] sm:$0xff] %v6091_v58  ;;  %v8937_v24 = vadd.f32 %v3550_v43, %v2878_v19  ;;  %v8939_v47 = vadd.f32 %v3903_v21, %v2878_v19 }
 0x4bd   : > { %v3554_v63 = vpop.f32.mrf.mxu0  ;;  %3793 = vmatmul.mubr.bf16.gmra.mxu0 %v6446_v26  ;;  %v3907_v22 = vpop.f32.mrf.mxu1  ;;  %4146 = vmatmul.mubr.bf16.gmra.mxu1 %v6446_v26  ;;  %v6457_v26 = vld [vmem:[%s10911_s25 + $0x1d4] ss:$8 sps:$4 sm:$0xff]  }
 0x4be   : > { %v6092_v42 = vpack.c.bf16 %v8937_v24, %v8933_v39  ;;  %v6093_v16 = vpack.c.bf16 %v8939_v47, %v8935_v52  ;;  %3802 = vmatprep.mubr.bf16.mxu0 %v6451_v27  ;;  %4155 = vmatprep.mubr.bf16.mxu1 %v6451_v27  ;;  %v8947_v37 = vadd.f32 %v3554_v63, %v2883_v46 }
 0x4bf   : > { %v3556_v6 = vpop.f32.mrf.mxu0  ;;  %v3909_v5 = vpop.f32.mrf.mxu1  ;;  %v8949_v34 = vadd.f32 %v3907_v22, %v2883_v46 }
 0x4c0   : > { %4980 = vst [vmem:[%s8895_s28 + $0x30] sm:$0xff] %v6092_v42  ;;  %4981 = vst [vmem:[%s8895_s28 + $0x38] sm:$0xff] %v6093_v16  ;;  %v8951_v61 = vadd.f32 %v3556_v6, %v2883_v46  ;;  %v8953_v56 = vadd.f32 %v3909_v5, %v2883_v46  ;;  %v2903_v46 = vpop.permute.xlu1 %2902 }
 0x4c1   : > { %v3558_v32 = vpop.f32.mrf.mxu0  ;;  %v3911_v13 = vpop.f32.mrf.mxu1 }
 0x4c2   : > { %v6094_v8 = vpack.c.bf16 %v8951_v61, %v8947_v37  ;;  %v6095_v28 = vpack.c.bf16 %v8953_v56, %v8949_v34  ;;  %v8967_v4 = vadd.f32 %v3558_v32, %v2888_v48  ;;  %v8969_v41 = vadd.f32 %v3911_v13, %v2888_v48 }
 0x4c3   : > { %v3560_v33 = vpop.f32.mrf.mxu0  ;;  %v3913_v9 = vpop.f32.mrf.mxu1 }
 0x4c4   : > { %4982 = vst [vmem:[%s8895_s28 + $0x40] sm:$0xff] %v6094_v8  ;;  %4983 = vst [vmem:[%s8895_s28 + $0x48] sm:$0xff] %v6095_v28  ;;  %v8971_v54 = vadd.f32 %v3560_v33, %v2888_v48  ;;  %v8973_v45 = vadd.f32 %v3913_v9, %v2888_v48  ;;  %v2908_v33 = vpop.permute.xlu0 %2907 }
 0x4c5   : > { %v3564_v59 = vpop.f32.mrf.mxu0  ;;  %3803 = vmatmul.mubr.bf16.gmra.mxu0 %v6449_v1  ;;  %v3917_v11 = vpop.f32.mrf.mxu1  ;;  %4156 = vmatmul.mubr.bf16.gmra.mxu1 %v6449_v1 }
 0x4c6   : > { %v6096_v62 = vpack.c.bf16 %v8971_v54, %v8967_v4  ;;  %v6097_v44 = vpack.c.bf16 %v8973_v45, %v8969_v41  ;;  %3812 = vmatprep.mubr.bf16.mxu0 %v6454_v25  ;;  %4165 = vmatprep.mubr.bf16.mxu1 %v6454_v25  ;;  %v8981_v40 = vadd.f32 %v3564_v59, %v2893_v20  ;;  %v6455_v25 = vld [vmem:[%s10911_s25 + $0x1d0] ss:$8 sps:$4 sm:$0xff]  }
 0x4c7   : > { %v3566_v57 = vpop.f32.mrf.mxu0  ;;  %v3919_v12 = vpop.f32.mrf.mxu1  ;;  %v8983_v29 = vadd.f32 %v3917_v11, %v2893_v20  ;;  %v6460_v11 = vld [vmem:[%s10911_s25 + $0x1e4] ss:$8 sps:$4 sm:$0xff]  }
 0x4c8   : > { %4984 = vst [vmem:[%s8895_s28 + $0x50] sm:$0xff] %v6096_v62  ;;  %4985 = vst [vmem:[%s8895_s28 + $0x58] sm:$0xff] %v6097_v44  ;;  %v8985_v0 = vadd.f32 %v3566_v57, %v2893_v20  ;;  %v8987_v51 = vadd.f32 %v3919_v12, %v2893_v20 }
 0x4c9   : > { %v3568_v17 = vpop.f32.mrf.mxu0  ;;  %v3921_v60 = vpop.f32.mrf.mxu1 }
 0x4ca   : > { %v6098_v23 = vpack.c.bf16 %v8985_v0, %v8981_v40  ;;  %v6099_v38 = vpack.c.bf16 %v8987_v51, %v8983_v29  ;;  %v9001_v58 = vadd.f32 %v3568_v17, %v2898_v30  ;;  %v9003_v27 = vadd.f32 %v3921_v60, %v2898_v30 }
 0x4cb   : > { %v3570_v19 = vpop.f32.mrf.mxu0  ;;  %v3923_v36 = vpop.f32.mrf.mxu1 }
 0x4cc   : > { %4986 = vst [vmem:[%s8895_s28 + $0x60] sm:$0xff] %v6098_v23  ;;  %4987 = vst [vmem:[%s8895_s28 + $0x68] sm:$0xff] %v6099_v38  ;;  %v9005_v43 = vadd.f32 %v3570_v19, %v2898_v30  ;;  %v9007_v21 = vadd.f32 %v3923_v36, %v2898_v30  ;;  %v2913_v30 = vpop.permute.xlu1 %2912 }
 0x4cd   : > { %v3574_v63 = vpop.f32.mrf.mxu0  ;;  %3813 = vmatmul.mubr.bf16.gmra.mxu0 %v6452_v10  ;;  %v3927_v22 = vpop.f32.mrf.mxu1  ;;  %4166 = vmatmul.mubr.bf16.gmra.mxu1 %v6452_v10 }
 0x4ce   : > { %v6100_v42 = vpack.c.bf16 %v9005_v43, %v9001_v58  ;;  %v6101_v16 = vpack.c.bf16 %v9007_v21, %v9003_v27  ;;  %3822 = vmatprep.mubr.bf16.mxu0 %v6457_v26  ;;  %4175 = vmatprep.mubr.bf16.mxu1 %v6457_v26  ;;  %v9015_v32 = vadd.f32 %v3574_v63, %v2903_v46 }
 0x4cf   : > { %v3576_v6 = vpop.f32.mrf.mxu0  ;;  %v3929_v5 = vpop.f32.mrf.mxu1  ;;  %v9017_v13 = vadd.f32 %v3927_v22, %v2903_v46 }
 0x4d0   : > { %4988 = vst [vmem:[%s8895_s28 + $0x70] sm:$0xff] %v6100_v42  ;;  %4989 = vst [vmem:[%s8895_s28 + $0x78] sm:$0xff] %v6101_v16  ;;  %v9019_v1 = vadd.f32 %v3576_v6, %v2903_v46  ;;  %v9021_v48 = vadd.f32 %v3929_v5, %v2903_v46  ;;  %v6458_v6 = vld [vmem:[%s10911_s25 + $0x1e0] ss:$8 sps:$4 sm:$0xff]   ;;  %v2918_v5 = vpop.permute.xlu0 %2917 }
 0x4d1   : > { %v3578_v8 = vpop.f32.mrf.mxu0  ;;  %v3931_v28 = vpop.f32.mrf.mxu1 }
 0x4d2   : > { %11021 = vst [vmem:[#allocation19_spill] sm:$0xff] %v9021_v48  ;;  %v6102_v9 = vpack.c.bf16 %v9019_v1, %v9015_v32  ;;  %v6103_v59 = vpack.c.bf16 %v9021_v48, %v9017_v13  ;;  %v9035_v44 = vadd.f32 %v3578_v8, %v2908_v33  ;;  %v9037_v57 = vadd.f32 %v3931_v28, %v2908_v33 }
 0x4d3   : > { %v3580_v20 = vpop.f32.mrf.mxu0  ;;  %v3933_v62 = vpop.f32.mrf.mxu1 }
 0x4d4   : > { %4990 = vst [vmem:[%s8895_s28 + $0x80] sm:$0xff] %v6102_v9  ;;  %4991 = vst [vmem:[%s8895_s28 + $0x88] sm:$0xff] %v6103_v59  ;;  %v9039_v12 = vadd.f32 %v3580_v20, %v2908_v33  ;;  %v9041_v17 = vadd.f32 %v3933_v62, %v2908_v33 }
 0x4d5   : > { %v3584_v60 = vpop.f32.mrf.mxu0  ;;  %3823 = vmatmul.mubr.bf16.gmra.mxu0 %v6455_v25  ;;  %v3937_v10 = vpop.f32.mrf.mxu1  ;;  %4176 = vmatmul.mubr.bf16.gmra.mxu1 %v6455_v25  ;;  %v6463_v25 = vld [vmem:[%s10911_s25 + $0x1f4] ss:$8 sps:$4 sm:$0xff]  }
 0x4d6   : > { %11022 = vst [vmem:[#allocation37_spill] sm:$0xff] %v9041_v17  ;;  %v6104_v23 = vpack.c.bf16 %v9039_v12, %v9035_v44  ;;  %v6105_v38 = vpack.c.bf16 %v9041_v17, %v9037_v57  ;;  %3832 = vmatprep.mubr.bf16.mxu0 %v6460_v11  ;;  %4185 = vmatprep.mubr.bf16.mxu1 %v6460_v11 }
 0x4d7   : > { %v3586_v26 = vpop.f32.mrf.mxu0  ;;  %v3939_v19 = vpop.f32.mrf.mxu1  ;;  %v9049_v36 = vadd.f32 %v3584_v60, %v2913_v30  ;;  %v9051_v63 = vadd.f32 %v3937_v10, %v2913_v30 }
 0x4d8   : > { %4992 = vst [vmem:[%s8895_s28 + $0x90] sm:$0xff] %v6104_v23  ;;  %4993 = vst [vmem:[%s8895_s28 + $0x98] sm:$0xff] %v6105_v38  ;;  %v9053_v22 = vadd.f32 %v3586_v26, %v2913_v30  ;;  %v9055_v46 = vadd.f32 %v3939_v19, %v2913_v30  ;;  %v2923_v30 = vpop.permute.xlu1 %2922 }
 0x4d9   : > { %11023 = vst [vmem:[#allocation38_spill] sm:$0xff] %v9051_v63  ;;  %v3588_v42 = vpop.f32.mrf.mxu0  ;;  %v3941_v16 = vpop.f32.mrf.mxu1 }
 0x4da   : > { %11024 = vst [vmem:[#allocation18_spill] sm:$0xff] %v9055_v46  ;;  %v6106_v8 = vpack.c.bf16 %v9053_v22, %v9049_v36  ;;  %v6107_v28 = vpack.c.bf16 %v9055_v46, %v9051_v63  ;;  %v9069_v59 = vadd.f32 %v3588_v42, %v2918_v5  ;;  %v9071_v11 = vadd.f32 %v3941_v16, %v2918_v5 }
 0x4db   : > { %v3590_v33 = vpop.f32.mrf.mxu0  ;;  %v3943_v9 = vpop.f32.mrf.mxu1 }
 0x4dc   : > { %4994 = vst [vmem:[%s8895_s28 + $0xa0] sm:$0xff] %v6106_v8  ;;  %4995 = vst [vmem:[%s8895_s28 + $0xa8] sm:$0xff] %v6107_v28  ;;  %v9073_v20 = vadd.f32 %v3590_v33, %v2918_v5  ;;  %v9075_v62 = vadd.f32 %v3943_v9, %v2918_v5  ;;  %v6461_v33 = vld [vmem:[%s10911_s25 + $0x1f0] ss:$8 sps:$4 sm:$0xff]   ;;  %v2928_v9 = vpop.permute.xlu0 %2927  ;;  %v2933_v63 = vpop.permute.xlu1 %2932 }
 0x4dd   : > { %v3594_v60 = vpop.f32.mrf.mxu0  ;;  %3833 = vmatmul.mubr.bf16.gmra.mxu0 %v6458_v6  ;;  %v3947_v10 = vpop.f32.mrf.mxu1  ;;  %4186 = vmatmul.mubr.bf16.gmra.mxu1 %v6458_v6 }
 0x4de   : > { %11025 = vst [vmem:[#allocation24_spill] sm:$0xff] %v9075_v62  ;;  %v6108_v23 = vpack.c.bf16 %v9073_v20, %v9069_v59  ;;  %v6109_v38 = vpack.c.bf16 %v9075_v62, %v9071_v11  ;;  %3842 = vmatprep.mubr.bf16.mxu0 %v6463_v25  ;;  %4195 = vmatprep.mubr.bf16.mxu1 %v6463_v25 }
 0x4df   : > { %v3596_v26 = vpop.f32.mrf.mxu0  ;;  %v3949_v19 = vpop.f32.mrf.mxu1  ;;  %v9083_v42 = vadd.f32 %v3594_v60, %v2923_v30  ;;  %v9085_v16 = vadd.f32 %v3947_v10, %v2923_v30 }
 0x4e0   : > { %4996 = vst [vmem:[%s8895_s28 + $0xb0] sm:$0xff] %v6108_v23  ;;  %4997 = vst [vmem:[%s8895_s28 + $0xb8] sm:$0xff] %v6109_v38  ;;  %v9087_v6 = vadd.f32 %v3596_v26, %v2923_v30  ;;  %v9089_v5 = vadd.f32 %v3949_v19, %v2923_v30  ;;  %v2938_v48 = vpop.permute.xlu0 %2937 }
 0x4e1   : > { %11026 = vst [vmem:[#allocation16_spill] sm:$0xff] %v9085_v16  ;;  %v3598_v8 = vpop.f32.mrf.mxu0  ;;  %v3951_v28 = vpop.f32.mrf.mxu1 }
 0x4e2   : > { %11027 = vst [vmem:[#allocation29_spill] sm:$0xff] %v9089_v5  ;;  %v6110_v25 = vpack.c.bf16 %v9087_v6, %v9083_v42  ;;  %v6111_v60 = vpack.c.bf16 %v9089_v5, %v9085_v16  ;;  %v9100_v30 = vadd.f32 %v3598_v8, %v2928_v9  ;;  %v9102_v38 = vadd.f32 %v3951_v28, %v2928_v9 }
 0x4e3   : > { %v3600_v23 = vpop.f32.mrf.mxu0  ;;  %v3953_v10 = vpop.f32.mrf.mxu1 }
 0x4e4   : > { %4998 = vst [vmem:[%s8895_s28 + $0xc0] sm:$0xff] %v6110_v25  ;;  %4999 = vst [vmem:[%s8895_s28 + $0xc8] sm:$0xff] %v6111_v60  ;;  %v9104_v26 = vadd.f32 %v3600_v23, %v2928_v9  ;;  %v9106_v19 = vadd.f32 %v3953_v10, %v2928_v9 }
 0x4e5   : > { %11028 = vst [vmem:[#allocation35_spill] sm:$0xff] %v9102_v38  ;;  %v3604_v46 = vpop.f32.mrf.mxu0  ;;  %3843 = vmatmul.mubr.bf16.gmra.mxu0 %v6461_v33  ;;  %v3957_v62 = vpop.f32.mrf.mxu1  ;;  %4196 = vmatmul.mubr.bf16.gmra.mxu1 %v6461_v33 }
 0x4e6   : > { %11029 = vst [vmem:[#allocation36_spill] sm:$0xff] %v9106_v19  ;;  %v6112_v5 = vpack.c.bf16 %v9104_v26, %v9100_v30  ;;  %v6113_v25 = vpack.c.bf16 %v9106_v19, %v9102_v38  ;;  %v9114_v60 = vadd.f32 %v3604_v46, %v2933_v63  ;;  %v9116_v9 = vadd.f32 %v3957_v62, %v2933_v63 }
 0x4e7   : > { %v3606_v8 = vpop.f32.mrf.mxu0  ;;  %v3959_v28 = vpop.f32.mrf.mxu1 }
 0x4e8   : > { %5000 = vst [vmem:[%s8895_s28 + $0xd0] sm:$0xff] %v6112_v5  ;;  %5001 = vst [vmem:[%s8895_s28 + $0xd8] sm:$0xff] %v6113_v25  ;;  %v9118_v23 = vadd.f32 %v3606_v8, %v2933_v63  ;;  %v9120_v33 = vadd.f32 %v3959_v28, %v2933_v63 }
 0x4e9   : > { %11030 = vst [vmem:[#allocation46_spill] sm:$0xff] %v9114_v60  ;;  %11031 = vst [vmem:[#allocation21_spill] sm:$0xff] %v9116_v9  ;;  %v3608_v10 = vpop.f32.mrf.mxu0  ;;  %v3961_v16 = vpop.f32.mrf.mxu1 }
 0x4ea   : > { %11032 = vst [vmem:[#allocation25_spill] sm:$0xff] %v9118_v23  ;;  %11033 = vst [vmem:[#allocation26_spill] sm:$0xff] %v9120_v33  ;;  %v6114_v19 = vpack.c.bf16 %v9118_v23, %v9114_v60  ;;  %v6115_v38 = vpack.c.bf16 %v9120_v33, %v9116_v9  ;;  %v9128_v62 = vadd.f32 %v3608_v10, %v2938_v48  ;;  %v2943_v60 = vpop.permute.xlu1 %2942 }
 0x4eb   : > { %v3610_v5 = vpop.f32.mrf.mxu0  ;;  %v3963_v46 = vpop.f32.mrf.mxu1  ;;  %v9130_v25 = vadd.f32 %v3961_v16, %v2938_v48 }
 0x4ec   : > { %5002 = vst [vmem:[%s8895_s28 + $0xe0] sm:$0xff] %v6114_v19  ;;  %5003 = vst [vmem:[%s8895_s28 + $0xe8] sm:$0xff] %v6115_v38  ;;  %v9132_v63 = vadd.f32 %v3610_v5, %v2938_v48  ;;  %v9134_v8 = vadd.f32 %v3963_v46, %v2938_v48 }
 0x4ed   : > { %11034 = vst [vmem:[#allocation27_spill] sm:$0xff] %v9128_v62  ;;  %11035 = vst [vmem:[#allocation31_spill] sm:$0xff] %v9130_v25  ;;  %v3614_v28 = vpop.f32.mrf.mxu0  ;;  %v3967_v17 = vpop.f32.mrf.mxu1 }
 0x4ee   : > { %11036 = vst [vmem:[#allocation32_spill] sm:$0xff] %v9132_v63  ;;  %11037 = vst [vmem:[#allocation34_spill] sm:$0xff] %v9134_v8  ;;  %v6116_v33 = vpack.c.bf16 %v9132_v63, %v9128_v62  ;;  %v6117_v9 = vpack.c.bf16 %v9134_v8, %v9130_v25  ;;  %v9142_v16 = vadd.f32 %v3614_v28, %v2943_v60  ;;  %v2948_v62 = vpop.permute.xlu0 %2947 }
 0x4ef   : > { %v3616_v19 = vpop.f32.mrf.mxu0  ;;  %v3969_v38 = vpop.f32.mrf.mxu1  ;;  %v9144_v10 = vadd.f32 %v3967_v17, %v2943_v60 }
 0x4f0   : > { %5004 = vst [vmem:[%s8895_s28 + $0xf0] sm:$0xff] %v6116_v33  ;;  %5005 = vst [vmem:[%s8895_s28 + $0xf8] sm:$0xff] %v6117_v9  ;;  %v9146_v48 = vadd.f32 %v3616_v19, %v2943_v60  ;;  %v9148_v5 = vadd.f32 %v3969_v38, %v2943_v60 }
 0x4f1   : > { %11038 = vst [vmem:[#allocation23_spill] sm:$0xff] %v9142_v16  ;;  %11039 = vst [vmem:[#allocation14_spill] sm:$0xff] %v9144_v10  ;;  %v3618_v46 = vpop.f32.mrf.mxu0  ;;  %v3971_v23 = vpop.f32.mrf.mxu1 }
 0x4f2   : > { %11040 = vst [vmem:[#allocation33_spill] sm:$0xff] %v9146_v48  ;;  %11041 = vst [vmem:[#allocation45_spill] sm:$0xff] %v9148_v5  ;;  %v6118_v8 = vpack.c.bf16 %v9146_v48, %v9142_v16  ;;  %v6119_v25 = vpack.c.bf16 %v9148_v5, %v9144_v10  ;;  %v9156_v17 = vadd.f32 %v3618_v46, %v2948_v62  ;;  %v2953_v16 = vpop.permute.xlu1 %2952 }
 0x4f3   : > { %v3620_v33 = vpop.f32.mrf.mxu0  ;;  %v3973_v9 = vpop.f32.mrf.mxu1  ;;  %v9158_v28 = vadd.f32 %v3971_v23, %v2948_v62 }
 0x4f4   : > { %5006 = vst [vmem:[%s8895_s28 + $0x100] sm:$0xff] %v6118_v8  ;;  %5007 = vst [vmem:[%s8895_s28 + $0x108] sm:$0xff] %v6119_v25  ;;  %v9160_v60 = vadd.f32 %v3620_v33, %v2948_v62  ;;  %v9162_v19 = vadd.f32 %v3973_v9, %v2948_v62 }
 0x4f5   : > { %11042 = vst [vmem:[#allocation22_spill] sm:$0xff] %v9156_v17  ;;  %11043 = vst [vmem:[#allocation30_spill] sm:$0xff] %v9158_v28  ;;  %v3624_v38 = vpop.f32.mrf.mxu0  ;;  %v3977_v63 = vpop.f32.mrf.mxu1 }
 0x4f6   : > { %11044 = vst [vmem:[#allocation17_spill] sm:$0xff] %v9160_v60  ;;  %11045 = vst [vmem:[#allocation20_spill] sm:$0xff] %v9162_v19  ;;  %v6120_v5 = vpack.c.bf16 %v9160_v60, %v9156_v17  ;;  %v6121_v10 = vpack.c.bf16 %v9162_v19, %v9158_v28  ;;  %v9170_v23 = vadd.f32 %v3624_v38, %v2953_v16  ;;  %v2958_v17 = vpop.permute.xlu0 %2957 }
 0x4f7   : > { %v3626_v8 = vpop.f32.mrf.mxu0  ;;  %v3979_v25 = vpop.f32.mrf.mxu1  ;;  %v9172_v46 = vadd.f32 %v3977_v63, %v2953_v16 }
 0x4f8   : > { %5008 = vst [vmem:[%s8895_s28 + $0x110] sm:$0xff] %v6120_v5  ;;  %5009 = vst [vmem:[%s8895_s28 + $0x118] sm:$0xff] %v6121_v10  ;;  %v9174_v62 = vadd.f32 %v3626_v8, %v2953_v16  ;;  %v9176_v33 = vadd.f32 %v3979_v25, %v2953_v16 }
 0x4f9   : > { %11046 = vst [vmem:[#allocation39_spill] sm:$0xff] %v9170_v23  ;;  %11047 = vst [vmem:[#allocation44_spill] sm:$0xff] %v9172_v46  ;;  %v3628_v9 = vpop.f32.mrf.mxu0  ;;  %v3981_v48 = vpop.f32.mrf.mxu1 }
 0x4fa   : > { %11048 = vst [vmem:[#allocation55_spill] sm:$0xff] %v9174_v62  ;;  %11049 = vst [vmem:[#allocation56_spill] sm:$0xff] %v9176_v33  ;;  %v6122_v19 = vpack.c.bf16 %v9174_v62, %v9170_v23  ;;  %v6123_v28 = vpack.c.bf16 %v9176_v33, %v9172_v46  ;;  %v9184_v63 = vadd.f32 %v3628_v9, %v2958_v17  ;;  %v2963_v23 = vpop.permute.xlu1 %2962 }
 0x4fb   : > { %v3630_v5 = vpop.f32.mrf.mxu0  ;;  %v3983_v10 = vpop.f32.mrf.mxu1  ;;  %v9186_v38 = vadd.f32 %v3981_v48, %v2958_v17 }
 0x4fc   : > { %5010 = vst [vmem:[%s8895_s28 + $0x120] sm:$0xff] %v6122_v19  ;;  %5011 = vst [vmem:[%s8895_s28 + $0x128] sm:$0xff] %v6123_v28  ;;  %v9188_v16 = vadd.f32 %v3630_v5, %v2958_v17  ;;  %v9190_v8 = vadd.f32 %v3983_v10, %v2958_v17 }
 0x4fd   : > { %11050 = vst [vmem:[#allocation47_spill] sm:$0xff] %v9184_v63  ;;  %11051 = vst [vmem:[#allocation53_spill] sm:$0xff] %v9186_v38  ;;  %v3634_v25 = vpop.f32.mrf.mxu0  ;;  %v3987_v60 = vpop.f32.mrf.mxu1 }
 0x4fe   : > { %11052 = vst [vmem:[#allocation54_spill] sm:$0xff] %v9188_v16  ;;  %11053 = vst [vmem:[#allocation42_spill] sm:$0xff] %v9190_v8  ;;  %v6124_v33 = vpack.c.bf16 %v9188_v16, %v9184_v63  ;;  %v6125_v46 = vpack.c.bf16 %v9190_v8, %v9186_v38  ;;  %v9198_v48 = vadd.f32 %v3634_v25, %v2963_v23  ;;  %v2968_v63 = vpop.permute.xlu0 %2967 }
 0x4ff   : > { %v3636_v19 = vpop.f32.mrf.mxu0  ;;  %v3989_v28 = vpop.f32.mrf.mxu1  ;;  %v9200_v9 = vadd.f32 %v3987_v60, %v2963_v23 }
 0x500   : > { %5012 = vst [vmem:[%s8895_s28 + $0x130] sm:$0xff] %v6124_v33  ;;  %5013 = vst [vmem:[%s8895_s28 + $0x138] sm:$0xff] %v6125_v46  ;;  %v9202_v17 = vadd.f32 %v3636_v19, %v2963_v23  ;;  %v9204_v5 = vadd.f32 %v3989_v28, %v2963_v23 }
 0x501   : > { %11054 = vst [vmem:[#allocation43_spill] sm:$0xff] %v9198_v48  ;;  %11055 = vst [vmem:[#allocation40_spill] sm:$0xff] %v9200_v9  ;;  %v3638_v10 = vpop.f32.mrf.mxu0  ;;  %v3991_v62 = vpop.f32.mrf.mxu1 }
 0x502   : > { %11056 = vst [vmem:[#allocation41_spill] sm:$0xff] %v9202_v17  ;;  %11057 = vst [vmem:[#allocation48_spill] sm:$0xff] %v9204_v5  ;;  %v6126_v8 = vpack.c.bf16 %v9202_v17, %v9198_v48  ;;  %v6127_v38 = vpack.c.bf16 %v9204_v5, %v9200_v9  ;;  %v9212_v60 = vadd.f32 %v3638_v10, %v2968_v63  ;;  %v2973_v48 = vpop.permute.xlu1 %2972 }
 0x503   : > { %v3640_v33 = vpop.f32.mrf.mxu0  ;;  %v3993_v46 = vpop.f32.mrf.mxu1  ;;  %v9214_v25 = vadd.f32 %v3991_v62, %v2968_v63 }
 0x504   : > { %5014 = vst [vmem:[%s8895_s28 + $0x140] sm:$0xff] %v6126_v8  ;;  %5015 = vst [vmem:[%s8895_s28 + $0x148] sm:$0xff] %v6127_v38  ;;  %v9216_v23 = vadd.f32 %v3640_v33, %v2968_v63  ;;  %v9218_v19 = vadd.f32 %v3993_v46, %v2968_v63 }
 0x505   : > { %11058 = vst [vmem:[#allocation49_spill] sm:$0xff] %v9212_v60  ;;  %11059 = vst [vmem:[#allocation50_spill] sm:$0xff] %v9214_v25  ;;  %v3644_v28 = vpop.f32.mrf.mxu0  ;;  %v3997_v16 = vpop.f32.mrf.mxu1 }
 0x506   : > { %11060 = vst [vmem:[#allocation28_spill] sm:$0xff] %v9216_v23  ;;  %11061 = vst [vmem:[#allocation15_spill] sm:$0xff] %v9218_v19  ;;  %v6128_v5 = vpack.c.bf16 %v9216_v23, %v9212_v60  ;;  %v6129_v9 = vpack.c.bf16 %v9218_v19, %v9214_v25  ;;  %v9226_v62 = vadd.f32 %v3644_v28, %v2973_v48  ;;  %v2978_v60 = vpop.permute.xlu0 %2977 }
 0x507   : > { %v3646_v8 = vpop.f32.mrf.mxu0  ;;  %v3999_v38 = vpop.f32.mrf.mxu1  ;;  %v9228_v10 = vadd.f32 %v3997_v16, %v2973_v48 }
 0x508   : > { %5016 = vst [vmem:[%s8895_s28 + $0x150] sm:$0xff] %v6128_v5  ;;  %5017 = vst [vmem:[%s8895_s28 + $0x158] sm:$0xff] %v6129_v9  ;;  %v9230_v63 = vadd.f32 %v3646_v8, %v2973_v48  ;;  %v9232_v33 = vadd.f32 %v3999_v38, %v2973_v48 }
 0x509   : > { %11062 = vst [vmem:[#allocation57_spill] sm:$0xff] %v9226_v62  ;;  %11063 = vst [vmem:[#allocation58_spill] sm:$0xff] %v9228_v10  ;;  %v3648_v46 = vpop.f32.mrf.mxu0  ;;  %v4001_v17 = vpop.f32.mrf.mxu1 }
 0x50a   : > { %11064 = vst [vmem:[#allocation51_spill] sm:$0xff] %v9230_v63  ;;  %11065 = vst [vmem:[#allocation52_spill] sm:$0xff] %v9232_v33  ;;  %v6130_v19 = vpack.c.bf16 %v9230_v63, %v9226_v62  ;;  %v6131_v25 = vpack.c.bf16 %v9232_v33, %v9228_v10  ;;  %v9240_v16 = vadd.f32 %v3648_v46, %v2978_v60  ;;  %v2983_v62 = vpop.permute.xlu1 %2982 }
 0x50b   : > { %v3650_v5 = vpop.f32.mrf.mxu0  ;;  %v4003_v9 = vpop.f32.mrf.mxu1  ;;  %v9242_v28 = vadd.f32 %v4001_v17, %v2978_v60 }
 0x50c   : > { %5018 = vst [vmem:[%s8895_s28 + $0x160] sm:$0xff] %v6130_v19  ;;  %5019 = vst [vmem:[%s8895_s28 + $0x168] sm:$0xff] %v6131_v25  ;;  %v9244_v48 = vadd.f32 %v3650_v5, %v2978_v60  ;;  %v9246_v8 = vadd.f32 %v4003_v9, %v2978_v60 }
 0x50d   : > { %11066 = vst [vmem:[#allocation59_spill] sm:$0xff] %v9240_v16  ;;  %11067 = vst [vmem:[#allocation60_spill] sm:$0xff] %v9242_v28  ;;  %v3654_v38 = vpop.f32.mrf.mxu0  ;;  %v4007_v23 = vpop.f32.mrf.mxu1 }
 0x50e   : > { %11068 = vst [vmem:[#allocation61_spill] sm:$0xff] %v9244_v48  ;;  %11069 = vst [vmem:[#allocation62_spill] sm:$0xff] %v9246_v8  ;;  %v6132_v33 = vpack.c.bf16 %v9244_v48, %v9240_v16  ;;  %v6133_v10 = vpack.c.bf16 %v9246_v8, %v9242_v28  ;;  %v9254_v17 = vadd.f32 %v3654_v38, %v2983_v62  ;;  %v2988_v16 = vpop.permute.xlu0 %2987 }
 0x50f   : > { %v3656_v19 = vpop.f32.mrf.mxu0  ;;  %v4009_v25 = vpop.f32.mrf.mxu1  ;;  %v9256_v46 = vadd.f32 %v4007_v23, %v2983_v62 }
 0x510   : > { %5020 = vst [vmem:[%s8895_s28 + $0x170] sm:$0xff] %v6132_v33  ;;  %5021 = vst [vmem:[%s8895_s28 + $0x178] sm:$0xff] %v6133_v10  ;;  %v9258_v60 = vadd.f32 %v3656_v19, %v2983_v62  ;;  %v9260_v5 = vadd.f32 %v4009_v25, %v2983_v62 }
 0x511   : > { %11070 = vst [vmem:[#allocation63_spill] sm:$0xff] %v9254_v17  ;;  %11071 = vst [vmem:[#allocation64_spill] sm:$0xff] %v9256_v46  ;;  %v3658_v9 = vpop.f32.mrf.mxu0  ;;  %v4011_v63 = vpop.f32.mrf.mxu1 }
 0x512   : > { %11072 = vst [vmem:[#allocation65_spill] sm:$0xff] %v9258_v60  ;;  %11073 = vst [vmem:[#allocation66_spill] sm:$0xff] %v9260_v5  ;;  %v6134_v8 = vpack.c.bf16 %v9258_v60, %v9254_v17  ;;  %v6135_v28 = vpack.c.bf16 %v9260_v5, %v9256_v46  ;;  %v9268_v23 = vadd.f32 %v3658_v9, %v2988_v16  ;;  %v2993_v17 = vpop.permute.xlu1 %2992 }
 0x513   : > { %v3660_v33 = vpop.f32.mrf.mxu0  ;;  %v4013_v10 = vpop.f32.mrf.mxu1  ;;  %v9270_v38 = vadd.f32 %v4011_v63, %v2988_v16 }
 0x514   : > { %5022 = vst [vmem:[%s8895_s28 + $0x180] sm:$0xff] %v6134_v8  ;;  %5023 = vst [vmem:[%s8895_s28 + $0x188] sm:$0xff] %v6135_v28  ;;  %v9272_v62 = vadd.f32 %v3660_v33, %v2988_v16  ;;  %v9274_v19 = vadd.f32 %v4013_v10, %v2988_v16 }
 0x515   : > { %11074 = vst [vmem:[#allocation67_spill] sm:$0xff] %v9268_v23  ;;  %11075 = vst [vmem:[#allocation68_spill] sm:$0xff] %v9270_v38  ;;  %v3664_v25 = vpop.f32.mrf.mxu0  ;;  %v4017_v48 = vpop.f32.mrf.mxu1 }
 0x516   : > { %11076 = vst [vmem:[#allocation69_spill] sm:$0xff] %v9272_v62  ;;  %11077 = vst [vmem:[#allocation70_spill] sm:$0xff] %v9274_v19  ;;  %v6136_v5 = vpack.c.bf16 %v9272_v62, %v9268_v23  ;;  %v6137_v46 = vpack.c.bf16 %v9274_v19, %v9270_v38  ;;  %v9282_v63 = vadd.f32 %v3664_v25, %v2993_v17  ;;  %v2998_v23 = vpop.permute.xlu0 %2997 }
 0x517   : > { %v3666_v8 = vpop.f32.mrf.mxu0  ;;  %v4019_v28 = vpop.f32.mrf.mxu1  ;;  %v9284_v9 = vadd.f32 %v4017_v48, %v2993_v17 }
 0x518   : > { %5024 = vst [vmem:[%s8895_s28 + $0x190] sm:$0xff] %v6136_v5  ;;  %5025 = vst [vmem:[%s8895_s28 + $0x198] sm:$0xff] %v6137_v46  ;;  %v9286_v16 = vadd.f32 %v3666_v8, %v2993_v17  ;;  %v9288_v33 = vadd.f32 %v4019_v28, %v2993_v17 }
 0x519   : > { %11078 = vst [vmem:[#allocation71_spill] sm:$0xff] %v9282_v63  ;;  %11079 = vst [vmem:[#allocation72_spill] sm:$0xff] %v9284_v9  ;;  %v3668_v10 = vpop.f32.mrf.mxu0  ;;  %v4021_v60 = vpop.f32.mrf.mxu1 }
 0x51a   : > { %11080 = vst [vmem:[#allocation73_spill] sm:$0xff] %v9286_v16  ;;  %11081 = vst [vmem:[#allocation74_spill] sm:$0xff] %v9288_v33  ;;  %v6138_v19 = vpack.c.bf16 %v9286_v16, %v9282_v63  ;;  %v6139_v38 = vpack.c.bf16 %v9288_v33, %v9284_v9  ;;  %v9296_v48 = vadd.f32 %v3668_v10, %v2998_v23  ;;  %v3003_v63 = vpop.permute.xlu1 %3002 }
 0x51b   : > { %v3670_v5 = vpop.f32.mrf.mxu0  ;;  %v4023_v46 = vpop.f32.mrf.mxu1  ;;  %v9298_v25 = vadd.f32 %v4021_v60, %v2998_v23 }
 0x51c   : > { %5026 = vst [vmem:[%s8895_s28 + $0x1a0] sm:$0xff] %v6138_v19  ;;  %5027 = vst [vmem:[%s8895_s28 + $0x1a8] sm:$0xff] %v6139_v38  ;;  %v9300_v17 = vadd.f32 %v3670_v5, %v2998_v23  ;;  %v9302_v8 = vadd.f32 %v4023_v46, %v2998_v23 }
 0x51d   : > { %11082 = vst [vmem:[#allocation75_spill] sm:$0xff] %v9296_v48  ;;  %11083 = vst [vmem:[#allocation76_spill] sm:$0xff] %v9298_v25  ;;  %v3674_v28 = vpop.f32.mrf.mxu0  ;;  %v4027_v62 = vpop.f32.mrf.mxu1 }
 0x51e   : > { %11084 = vst [vmem:[#allocation77_spill] sm:$0xff] %v9300_v17  ;;  %11085 = vst [vmem:[#allocation78_spill] sm:$0xff] %v9302_v8  ;;  %v6140_v33 = vpack.c.bf16 %v9300_v17, %v9296_v48  ;;  %v6141_v9 = vpack.c.bf16 %v9302_v8, %v9298_v25  ;;  %v9310_v60 = vadd.f32 %v3674_v28, %v3003_v63  ;;  %v3008_v48 = vpop.permute.xlu0 %3007 }
 0x51f   : > { %v3676_v19 = vpop.f32.mrf.mxu0  ;;  %v4029_v38 = vpop.f32.mrf.mxu1  ;;  %v9312_v10 = vadd.f32 %v4027_v62, %v3003_v63 }
 0x520   : > { %5028 = vst [vmem:[%s8895_s28 + $0x1b0] sm:$0xff] %v6140_v33  ;;  %5029 = vst [vmem:[%s8895_s28 + $0x1b8] sm:$0xff] %v6141_v9  ;;  %v9314_v23 = vadd.f32 %v3676_v19, %v3003_v63  ;;  %v9316_v5 = vadd.f32 %v4029_v38, %v3003_v63 }
 0x521   : > { %11086 = vst [vmem:[#allocation79_spill] sm:$0xff] %v9310_v60  ;;  %11087 = vst [vmem:[#allocation80_spill] sm:$0xff] %v9312_v10  ;;  %v3678_v46 = vpop.f32.mrf.mxu0  ;;  %v4031_v16 = vpop.f32.mrf.mxu1 }
 0x522   : > { %11088 = vst [vmem:[#allocation81_spill] sm:$0xff] %v9314_v23  ;;  %11089 = vst [vmem:[#allocation82_spill] sm:$0xff] %v9316_v5  ;;  %v6142_v8 = vpack.c.bf16 %v9314_v23, %v9310_v60  ;;  %v6143_v25 = vpack.c.bf16 %v9316_v5, %v9312_v10  ;;  %v9324_v62 = vadd.f32 %v3678_v46, %v3008_v48  ;;  %v3013_v60 = vpop.permute.xlu1 %3012 }
 0x523   : > { %v3680_v33 = vpop.f32.mrf.mxu0  ;;  %v4033_v9 = vpop.f32.mrf.mxu1  ;;  %v9326_v28 = vadd.f32 %v4031_v16, %v3008_v48 }
 0x524   : > { %5030 = vst [vmem:[%s8895_s28 + $0x1c0] sm:$0xff] %v6142_v8  ;;  %5031 = vst [vmem:[%s8895_s28 + $0x1c8] sm:$0xff] %v6143_v25  ;;  %v9328_v63 = vadd.f32 %v3680_v33, %v3008_v48  ;;  %v9330_v19 = vadd.f32 %v4033_v9, %v3008_v48 }
 0x525   : > { %11090 = vst [vmem:[#allocation83_spill] sm:$0xff] %v9324_v62  ;;  %11091 = vst [vmem:[#allocation84_spill] sm:$0xff] %v9326_v28  ;;  %v3684_v38 = vpop.f32.mrf.mxu0  ;;  %v4037_v17 = vpop.f32.mrf.mxu1 }
 0x526   : > { %11092 = vst [vmem:[#allocation85_spill] sm:$0xff] %v9328_v63  ;;  %11093 = vst [vmem:[#allocation86_spill] sm:$0xff] %v9330_v19  ;;  %v6144_v5 = vpack.c.bf16 %v9328_v63, %v9324_v62  ;;  %v6145_v10 = vpack.c.bf16 %v9330_v19, %v9326_v28  ;;  %v9338_v16 = vadd.f32 %v3684_v38, %v3013_v60  ;;  %v3018_v62 = vpop.permute.xlu0 %3017 }
 0x527   : > { %v3686_v8 = vpop.f32.mrf.mxu0  ;;  %v4039_v25 = vpop.f32.mrf.mxu1  ;;  %v9340_v46 = vadd.f32 %v4037_v17, %v3013_v60 }
 0x528   : > { %5032 = vst [vmem:[%s8895_s28 + $0x1d0] sm:$0xff] %v6144_v5  ;;  %5033 = vst [vmem:[%s8895_s28 + $0x1d8] sm:$0xff] %v6145_v10  ;;  %v9342_v48 = vadd.f32 %v3686_v8, %v3013_v60  ;;  %v9344_v33 = vadd.f32 %v4039_v25, %v3013_v60 }
 0x529   : > { %11094 = vst [vmem:[#allocation87_spill] sm:$0xff] %v9338_v16  ;;  %11095 = vst [vmem:[#allocation88_spill] sm:$0xff] %v9340_v46  ;;  %v3688_v9 = vpop.f32.mrf.mxu0  ;;  %v4041_v23 = vpop.f32.mrf.mxu1 }
 0x52a   : > { %11096 = vst [vmem:[#allocation89_spill] sm:$0xff] %v9342_v48  ;;  %11097 = vst [vmem:[#allocation90_spill] sm:$0xff] %v9344_v33  ;;  %v6146_v19 = vpack.c.bf16 %v9342_v48, %v9338_v16  ;;  %v6147_v28 = vpack.c.bf16 %v9344_v33, %v9340_v46  ;;  %v9352_v17 = vadd.f32 %v3688_v9, %v3018_v62  ;;  %v3023_v16 = vpop.permute.xlu1 %3022 }
 0x52b   : > { %v3690_v5 = vpop.f32.mrf.mxu0  ;;  %v4043_v10 = vpop.f32.mrf.mxu1  ;;  %v9354_v38 = vadd.f32 %v4041_v23, %v3018_v62 }
 0x52c   : > { %5034 = vst [vmem:[%s8895_s28 + $0x1e0] sm:$0xff] %v6146_v19  ;;  %5035 = vst [vmem:[%s8895_s28 + $0x1e8] sm:$0xff] %v6147_v28  ;;  %v9356_v60 = vadd.f32 %v3690_v5, %v3018_v62  ;;  %v9358_v8 = vadd.f32 %v4043_v10, %v3018_v62 }
 0x52d   : > { %11098 = vst [vmem:[#allocation91_spill] sm:$0xff] %v9352_v17  ;;  %11099 = vst [vmem:[#allocation92_spill] sm:$0xff] %v9354_v38  ;;  %v3694_v25 = vpop.f32.mrf.mxu0  ;;  %v4047_v63 = vpop.f32.mrf.mxu1 }
 0x52e   : > { %11100 = vst [vmem:[#allocation93_spill] sm:$0xff] %v9356_v60  ;;  %11101 = vst [vmem:[#allocation94_spill] sm:$0xff] %v9358_v8  ;;  %v6148_v33 = vpack.c.bf16 %v9356_v60, %v9352_v17  ;;  %v6149_v46 = vpack.c.bf16 %v9358_v8, %v9354_v38  ;;  %v9366_v23 = vadd.f32 %v3694_v25, %v3023_v16  ;;  %v3028_v17 = vpop.permute.xlu0 %3027 }
 0x52f   : > { %v3696_v19 = vpop.f32.mrf.mxu0  ;;  %v4049_v28 = vpop.f32.mrf.mxu1  ;;  %v9368_v9 = vadd.f32 %v4047_v63, %v3023_v16 }
 0x530   : > { %5036 = vst [vmem:[%s8895_s28 + $0x1f0] sm:$0xff] %v6148_v33  ;;  %5037 = vst [vmem:[%s8895_s28 + $0x1f8] sm:$0xff] %v6149_v46  ;;  %v9370_v62 = vadd.f32 %v3696_v19, %v3023_v16  ;;  %v9372_v5 = vadd.f32 %v4049_v28, %v3023_v16 }
 0x531   : > { %11102 = vst [vmem:[#allocation95_spill] sm:$0xff] %v9366_v23  ;;  %11103 = vst [vmem:[#allocation96_spill] sm:$0xff] %v9368_v9  ;;  %v3698_v10 = vpop.f32.mrf.mxu0  ;;  %v4051_v48 = vpop.f32.mrf.mxu1 }
 0x532   : > { %11104 = vst [vmem:[#allocation97_spill] sm:$0xff] %v9370_v62  ;;  %11105 = vst [vmem:[#allocation98_spill] sm:$0xff] %v9372_v5  ;;  %v6150_v8 = vpack.c.bf16 %v9370_v62, %v9366_v23  ;;  %v6151_v38 = vpack.c.bf16 %v9372_v5, %v9368_v9  ;;  %v9380_v63 = vadd.f32 %v3698_v10, %v3028_v17  ;;  %v3033_v23 = vpop.permute.xlu1 %3032 }
 0x533   : > { %v3700_v33 = vpop.f32.mrf.mxu0  ;;  %v4053_v46 = vpop.f32.mrf.mxu1  ;;  %v9382_v25 = vadd.f32 %v4051_v48, %v3028_v17 }
 0x534   : > { %5038 = vst [vmem:[%s8895_s28 + $0x200] sm:$0xff] %v6150_v8  ;;  %5039 = vst [vmem:[%s8895_s28 + $0x208] sm:$0xff] %v6151_v38  ;;  %v9384_v16 = vadd.f32 %v3700_v33, %v3028_v17  ;;  %v9386_v19 = vadd.f32 %v4053_v46, %v3028_v17 }
 0x535   : > { %11106 = vst [vmem:[#allocation99_spill] sm:$0xff] %v9380_v63  ;;  %11107 = vst [vmem:[#allocation100_spill] sm:$0xff] %v9382_v25  ;;  %v3704_v28 = vpop.f32.mrf.mxu0  ;;  %v4057_v60 = vpop.f32.mrf.mxu1 }
 0x536   : > { %11108 = vst [vmem:[#allocation101_spill] sm:$0xff] %v9384_v16  ;;  %11109 = vst [vmem:[#allocation102_spill] sm:$0xff] %v9386_v19  ;;  %v6152_v5 = vpack.c.bf16 %v9384_v16, %v9380_v63  ;;  %v6153_v9 = vpack.c.bf16 %v9386_v19, %v9382_v25  ;;  %v9394_v48 = vadd.f32 %v3704_v28, %v3033_v23  ;;  %v3038_v63 = vpop.permute.xlu0 %3037 }
 0x537   : > { %v3706_v8 = vpop.f32.mrf.mxu0  ;;  %v4059_v38 = vpop.f32.mrf.mxu1  ;;  %v9396_v10 = vadd.f32 %v4057_v60, %v3033_v23 }
 0x538   : > { %5040 = vst [vmem:[%s8895_s28 + $0x210] sm:$0xff] %v6152_v5  ;;  %5041 = vst [vmem:[%s8895_s28 + $0x218] sm:$0xff] %v6153_v9  ;;  %v9398_v17 = vadd.f32 %v3706_v8, %v3033_v23  ;;  %v9400_v33 = vadd.f32 %v4059_v38, %v3033_v23 }
 0x539   : > { %11110 = vst [vmem:[#allocation103_spill] sm:$0xff] %v9394_v48  ;;  %11111 = vst [vmem:[#allocation104_spill] sm:$0xff] %v9396_v10  ;;  %v3708_v46 = vpop.f32.mrf.mxu0  ;;  %v4061_v62 = vpop.f32.mrf.mxu1 }
 0x53a   : > { %11112 = vst [vmem:[#allocation105_spill] sm:$0xff] %v9398_v17  ;;  %11113 = vst [vmem:[#allocation106_spill] sm:$0xff] %v9400_v33  ;;  %v6154_v19 = vpack.c.bf16 %v9398_v17, %v9394_v48  ;;  %v6155_v25 = vpack.c.bf16 %v9400_v33, %v9396_v10  ;;  %v9408_v60 = vadd.f32 %v3708_v46, %v3038_v63  ;;  %v3043_v48 = vpop.permute.xlu1 %3042 }
 0x53b   : > { %v3710_v5 = vpop.f32.mrf.mxu0  ;;  %v4063_v9 = vpop.f32.mrf.mxu1  ;;  %v9410_v28 = vadd.f32 %v4061_v62, %v3038_v63 }
 0x53c   : > { %5042 = vst [vmem:[%s8895_s28 + $0x220] sm:$0xff] %v6154_v19  ;;  %5043 = vst [vmem:[%s8895_s28 + $0x228] sm:$0xff] %v6155_v25  ;;  %v9412_v23 = vadd.f32 %v3710_v5, %v3038_v63  ;;  %v9414_v8 = vadd.f32 %v4063_v9, %v3038_v63 }
 0x53d   : > { %11114 = vst [vmem:[#allocation107_spill] sm:$0xff] %v9408_v60  ;;  %11115 = vst [vmem:[#allocation108_spill] sm:$0xff] %v9410_v28  ;;  %v3714_v38 = vpop.f32.mrf.mxu0  ;;  %v4067_v16 = vpop.f32.mrf.mxu1 }
 0x53e   : > { %11116 = vst [vmem:[#allocation109_spill] sm:$0xff] %v9412_v23  ;;  %11117 = vst [vmem:[#allocation110_spill] sm:$0xff] %v9414_v8  ;;  %v6156_v33 = vpack.c.bf16 %v9412_v23, %v9408_v60  ;;  %v6157_v10 = vpack.c.bf16 %v9414_v8, %v9410_v28  ;;  %v9422_v62 = vadd.f32 %v3714_v38, %v3043_v48  ;;  %v3048_v60 = vpop.permute.xlu0 %3047 }
 0x53f   : > { %v3716_v19 = vpop.f32.mrf.mxu0  ;;  %v4069_v25 = vpop.f32.mrf.mxu1  ;;  %v9424_v46 = vadd.f32 %v4067_v16, %v3043_v48 }
 0x540   : > { %5044 = vst [vmem:[%s8895_s28 + $0x230] sm:$0xff] %v6156_v33  ;;  %5045 = vst [vmem:[%s8895_s28 + $0x238] sm:$0xff] %v6157_v10  ;;  %v9426_v63 = vadd.f32 %v3716_v19, %v3043_v48  ;;  %v9428_v5 = vadd.f32 %v4069_v25, %v3043_v48 }
 0x541   : > { %11118 = vst [vmem:[#allocation111_spill] sm:$0xff] %v9422_v62  ;;  %11119 = vst [vmem:[#allocation112_spill] sm:$0xff] %v9424_v46  ;;  %v3718_v9 = vpop.f32.mrf.mxu0  ;;  %v4071_v17 = vpop.f32.mrf.mxu1 }
 0x542   : > { %11120 = vst [vmem:[#allocation113_spill] sm:$0xff] %v9426_v63  ;;  %11121 = vst [vmem:[#allocation114_spill] sm:$0xff] %v9428_v5  ;;  %v6158_v8 = vpack.c.bf16 %v9426_v63, %v9422_v62  ;;  %v6159_v28 = vpack.c.bf16 %v9428_v5, %v9424_v46  ;;  %v9436_v16 = vadd.f32 %v3718_v9, %v3048_v60  ;;  %v3053_v62 = vpop.permute.xlu1 %3052 }
 0x543   : > { %v3720_v33 = vpop.f32.mrf.mxu0  ;;  %v4073_v10 = vpop.f32.mrf.mxu1  ;;  %v9438_v38 = vadd.f32 %v4071_v17, %v3048_v60 }
 0x544   : > { %5046 = vst [vmem:[%s8895_s28 + $0x240] sm:$0xff] %v6158_v8  ;;  %5047 = vst [vmem:[%s8895_s28 + $0x248] sm:$0xff] %v6159_v28  ;;  %v9440_v48 = vadd.f32 %v3720_v33, %v3048_v60  ;;  %v9442_v19 = vadd.f32 %v4073_v10, %v3048_v60 }
 0x545   : > { %11122 = vst [vmem:[#allocation115_spill] sm:$0xff] %v9436_v16  ;;  %11123 = vst [vmem:[#allocation116_spill] sm:$0xff] %v9438_v38  ;;  %v3724_v25 = vpop.f32.mrf.mxu0  ;;  %v4077_v23 = vpop.f32.mrf.mxu1 }
 0x546   : > { %11124 = vst [vmem:[#allocation117_spill] sm:$0xff] %v9440_v48  ;;  %11125 = vst [vmem:[#allocation118_spill] sm:$0xff] %v9442_v19  ;;  %v6160_v5 = vpack.c.bf16 %v9440_v48, %v9436_v16  ;;  %v6161_v46 = vpack.c.bf16 %v9442_v19, %v9438_v38  ;;  %v9450_v17 = vadd.f32 %v3724_v25, %v3053_v62  ;;  %v3058_v16 = vpop.permute.xlu0 %3057 }
 0x547   : > { %v3726_v8 = vpop.f32.mrf.mxu0  ;;  %v4079_v28 = vpop.f32.mrf.mxu1  ;;  %v9452_v9 = vadd.f32 %v4077_v23, %v3053_v62 }
 0x548   : > { %5048 = vst [vmem:[%s8895_s28 + $0x250] sm:$0xff] %v6160_v5  ;;  %5049 = vst [vmem:[%s8895_s28 + $0x258] sm:$0xff] %v6161_v46  ;;  %v9454_v60 = vadd.f32 %v3726_v8, %v3053_v62  ;;  %v9456_v33 = vadd.f32 %v4079_v28, %v3053_v62 }
 0x549   : > { %11126 = vst [vmem:[#allocation119_spill] sm:$0xff] %v9450_v17  ;;  %11127 = vst [vmem:[#allocation120_spill] sm:$0xff] %v9452_v9  ;;  %v3728_v10 = vpop.f32.mrf.mxu0  ;;  %v4081_v63 = vpop.f32.mrf.mxu1 }
 0x54a   : > { %11128 = vst [vmem:[#allocation121_spill] sm:$0xff] %v9454_v60  ;;  %11129 = vst [vmem:[#allocation122_spill] sm:$0xff] %v9456_v33  ;;  %v6162_v19 = vpack.c.bf16 %v9454_v60, %v9450_v17  ;;  %v6163_v38 = vpack.c.bf16 %v9456_v33, %v9452_v9  ;;  %v9464_v23 = vadd.f32 %v3728_v10, %v3058_v16  ;;  %v3063_v17 = vpop.permute.xlu1 %3062 }
 0x54b   : > { %v3730_v5 = vpop.f32.mrf.mxu0  ;;  %v4083_v46 = vpop.f32.mrf.mxu1  ;;  %v9466_v25 = vadd.f32 %v4081_v63, %v3058_v16 }
 0x54c   : > { %5050 = vst [vmem:[%s8895_s28 + $0x260] sm:$0xff] %v6162_v19  ;;  %5051 = vst [vmem:[%s8895_s28 + $0x268] sm:$0xff] %v6163_v38  ;;  %v9468_v62 = vadd.f32 %v3730_v5, %v3058_v16  ;;  %v9470_v8 = vadd.f32 %v4083_v46, %v3058_v16 }
 0x54d   : > { %11130 = vst [vmem:[#allocation123_spill] sm:$0xff] %v9464_v23  ;;  %11131 = vst [vmem:[#allocation124_spill] sm:$0xff] %v9466_v25  ;;  %v3734_v28 = vpop.f32.mrf.mxu0  ;;  %v4087_v48 = vpop.f32.mrf.mxu1 }
 0x54e   : > { %11132 = vst [vmem:[#allocation125_spill] sm:$0xff] %v9468_v62  ;;  %11133 = vst [vmem:[#allocation126_spill] sm:$0xff] %v9470_v8  ;;  %v6164_v33 = vpack.c.bf16 %v9468_v62, %v9464_v23  ;;  %v6165_v9 = vpack.c.bf16 %v9470_v8, %v9466_v25  ;;  %v9478_v63 = vadd.f32 %v3734_v28, %v3063_v17  ;;  %v3068_v23 = vpop.permute.xlu0 %3067 }
 0x54f   : > { %v3736_v19 = vpop.f32.mrf.mxu0  ;;  %v4089_v38 = vpop.f32.mrf.mxu1  ;;  %v9480_v10 = vadd.f32 %v4087_v48, %v3063_v17 }
 0x550   : > { %5052 = vst [vmem:[%s8895_s28 + $0x270] sm:$0xff] %v6164_v33  ;;  %5053 = vst [vmem:[%s8895_s28 + $0x278] sm:$0xff] %v6165_v9  ;;  %v9482_v16 = vadd.f32 %v3736_v19, %v3063_v17  ;;  %v9484_v5 = vadd.f32 %v4089_v38, %v3063_v17 }
 0x551   : > { %11134 = vst [vmem:[#allocation127_spill] sm:$0xff] %v9478_v63  ;;  %11135 = vst [vmem:[#allocation128_spill] sm:$0xff] %v9480_v10  ;;  %v3738_v46 = vpop.f32.mrf.mxu0  ;;  %v4091_v60 = vpop.f32.mrf.mxu1 }
 0x552   : > { %11136 = vst [vmem:[#allocation129_spill] sm:$0xff] %v9482_v16  ;;  %11137 = vst [vmem:[#allocation130_spill] sm:$0xff] %v9484_v5  ;;  %v6166_v8 = vpack.c.bf16 %v9482_v16, %v9478_v63  ;;  %v6167_v25 = vpack.c.bf16 %v9484_v5, %v9480_v10  ;;  %v9492_v48 = vadd.f32 %v3738_v46, %v3068_v23  ;;  %v3073_v63 = vpop.permute.xlu1 %3072 }
 0x553   : > { %v3740_v33 = vpop.f32.mrf.mxu0  ;;  %v4093_v9 = vpop.f32.mrf.mxu1  ;;  %v9494_v28 = vadd.f32 %v4091_v60, %v3068_v23 }
 0x554   : > { %5054 = vst [vmem:[%s8895_s28 + $0x280] sm:$0xff] %v6166_v8  ;;  %5055 = vst [vmem:[%s8895_s28 + $0x288] sm:$0xff] %v6167_v25  ;;  %v9496_v17 = vadd.f32 %v3740_v33, %v3068_v23  ;;  %v9498_v19 = vadd.f32 %v4093_v9, %v3068_v23 }
 0x555   : > { %11138 = vst [vmem:[#allocation131_spill] sm:$0xff] %v9492_v48  ;;  %11139 = vst [vmem:[#allocation132_spill] sm:$0xff] %v9494_v28  ;;  %v3744_v38 = vpop.f32.mrf.mxu0  ;;  %v4097_v62 = vpop.f32.mrf.mxu1 }
 0x556   : > { %11140 = vst [vmem:[#allocation133_spill] sm:$0xff] %v9496_v17  ;;  %11141 = vst [vmem:[#allocation134_spill] sm:$0xff] %v9498_v19  ;;  %v6168_v5 = vpack.c.bf16 %v9496_v17, %v9492_v48  ;;  %v6169_v10 = vpack.c.bf16 %v9498_v19, %v9494_v28  ;;  %v9506_v60 = vadd.f32 %v3744_v38, %v3073_v63  ;;  %v3078_v48 = vpop.permute.xlu0 %3077 }
 0x557   : > { %v3746_v8 = vpop.f32.mrf.mxu0  ;;  %v4099_v25 = vpop.f32.mrf.mxu1  ;;  %v9508_v46 = vadd.f32 %v4097_v62, %v3073_v63 }
 0x558   : > { %5056 = vst [vmem:[%s8895_s28 + $0x290] sm:$0xff] %v6168_v5  ;;  %5057 = vst [vmem:[%s8895_s28 + $0x298] sm:$0xff] %v6169_v10  ;;  %v9510_v23 = vadd.f32 %v3746_v8, %v3073_v63  ;;  %v9512_v33 = vadd.f32 %v4099_v25, %v3073_v63 }
 0x559   : > { %11142 = vst [vmem:[#allocation135_spill] sm:$0xff] %v9506_v60  ;;  %11143 = vst [vmem:[#allocation136_spill] sm:$0xff] %v9508_v46  ;;  %v3748_v9 = vpop.f32.mrf.mxu0  ;;  %v4101_v16 = vpop.f32.mrf.mxu1 }
 0x55a   : > { %11144 = vst [vmem:[#allocation137_spill] sm:$0xff] %v9510_v23  ;;  %11145 = vst [vmem:[#allocation138_spill] sm:$0xff] %v9512_v33  ;;  %v6170_v19 = vpack.c.bf16 %v9510_v23, %v9506_v60  ;;  %v6171_v28 = vpack.c.bf16 %v9512_v33, %v9508_v46  ;;  %v9520_v62 = vadd.f32 %v3748_v9, %v3078_v48  ;;  %v3083_v60 = vpop.permute.xlu1 %3082 }
 0x55b   : > { %v3750_v5 = vpop.f32.mrf.mxu0  ;;  %v4103_v10 = vpop.f32.mrf.mxu1  ;;  %v9522_v38 = vadd.f32 %v4101_v16, %v3078_v48 }
 0x55c   : > { %5058 = vst [vmem:[%s8895_s28 + $0x2a0] sm:$0xff] %v6170_v19  ;;  %5059 = vst [vmem:[%s8895_s28 + $0x2a8] sm:$0xff] %v6171_v28  ;;  %v9524_v63 = vadd.f32 %v3750_v5, %v3078_v48  ;;  %v9526_v8 = vadd.f32 %v4103_v10, %v3078_v48 }
 0x55d   : > { %11146 = vst [vmem:[#allocation139_spill] sm:$0xff] %v9520_v62  ;;  %11147 = vst [vmem:[#allocation140_spill] sm:$0xff] %v9522_v38  ;;  %v3754_v25 = vpop.f32.mrf.mxu0  ;;  %v4107_v17 = vpop.f32.mrf.mxu1 }
 0x55e   : > { %11148 = vst [vmem:[#allocation141_spill] sm:$0xff] %v9524_v63  ;;  %11149 = vst [vmem:[#allocation142_spill] sm:$0xff] %v9526_v8  ;;  %v6172_v33 = vpack.c.bf16 %v9524_v63, %v9520_v62  ;;  %v6173_v46 = vpack.c.bf16 %v9526_v8, %v9522_v38  ;;  %v9534_v16 = vadd.f32 %v3754_v25, %v3083_v60  ;;  %v3088_v62 = vpop.permute.xlu0 %3087 }
 0x55f   : > { %v3756_v19 = vpop.f32.mrf.mxu0  ;;  %v4109_v28 = vpop.f32.mrf.mxu1  ;;  %v9536_v9 = vadd.f32 %v4107_v17, %v3083_v60 }
 0x560   : > { %5060 = vst [vmem:[%s8895_s28 + $0x2b0] sm:$0xff] %v6172_v33  ;;  %5061 = vst [vmem:[%s8895_s28 + $0x2b8] sm:$0xff] %v6173_v46  ;;  %v9538_v48 = vadd.f32 %v3756_v19, %v3083_v60  ;;  %v9540_v5 = vadd.f32 %v4109_v28, %v3083_v60 }
 0x561   : > { %11150 = vst [vmem:[#allocation143_spill] sm:$0xff] %v9534_v16  ;;  %11151 = vst [vmem:[#allocation144_spill] sm:$0xff] %v9536_v9  ;;  %v3758_v10 = vpop.f32.mrf.mxu0  ;;  %v4111_v23 = vpop.f32.mrf.mxu1 }
 0x562   : > { %11152 = vst [vmem:[#allocation145_spill] sm:$0xff] %v9538_v48  ;;  %11153 = vst [vmem:[#allocation146_spill] sm:$0xff] %v9540_v5  ;;  %v6174_v8 = vpack.c.bf16 %v9538_v48, %v9534_v16  ;;  %v6175_v38 = vpack.c.bf16 %v9540_v5, %v9536_v9  ;;  %v9548_v17 = vadd.f32 %v3758_v10, %v3088_v62  ;;  %v3093_v16 = vpop.permute.xlu1 %3092 }
 0x563   : > { %v3760_v33 = vpop.f32.mrf.mxu0  ;;  %v4113_v46 = vpop.f32.mrf.mxu1  ;;  %v9550_v25 = vadd.f32 %v4111_v23, %v3088_v62 }
 0x564   : > { %5062 = vst [vmem:[%s8895_s28 + $0x2c0] sm:$0xff] %v6174_v8  ;;  %5063 = vst [vmem:[%s8895_s28 + $0x2c8] sm:$0xff] %v6175_v38  ;;  %v9552_v60 = vadd.f32 %v3760_v33, %v3088_v62  ;;  %v9554_v19 = vadd.f32 %v4113_v46, %v3088_v62 }
 0x565   : > { %11154 = vst [vmem:[#allocation147_spill] sm:$0xff] %v9548_v17  ;;  %11155 = vst [vmem:[#allocation148_spill] sm:$0xff] %v9550_v25  ;;  %v3764_v28 = vpop.f32.mrf.mxu0  ;;  %v4117_v63 = vpop.f32.mrf.mxu1 }
 0x566   : > { %11156 = vst [vmem:[#allocation149_spill] sm:$0xff] %v9552_v60  ;;  %11157 = vst [vmem:[#allocation150_spill] sm:$0xff] %v9554_v19  ;;  %v6176_v5 = vpack.c.bf16 %v9552_v60, %v9548_v17  ;;  %v6177_v9 = vpack.c.bf16 %v9554_v19, %v9550_v25  ;;  %v9562_v23 = vadd.f32 %v3764_v28, %v3093_v16  ;;  %v3098_v17 = vpop.permute.xlu0 %3097 }
 0x567   : > { %v3766_v8 = vpop.f32.mrf.mxu0  ;;  %v4119_v38 = vpop.f32.mrf.mxu1  ;;  %v9564_v10 = vadd.f32 %v4117_v63, %v3093_v16 }
 0x568   : > { %5064 = vst [vmem:[%s8895_s28 + $0x2d0] sm:$0xff] %v6176_v5  ;;  %5065 = vst [vmem:[%s8895_s28 + $0x2d8] sm:$0xff] %v6177_v9  ;;  %v9566_v62 = vadd.f32 %v3766_v8, %v3093_v16  ;;  %v9568_v33 = vadd.f32 %v4119_v38, %v3093_v16 }
 0x569   : > { %11158 = vst [vmem:[#allocation151_spill] sm:$0xff] %v9562_v23  ;;  %11159 = vst [vmem:[#allocation152_spill] sm:$0xff] %v9564_v10  ;;  %v3768_v46 = vpop.f32.mrf.mxu0  ;;  %v4121_v48 = vpop.f32.mrf.mxu1 }
 0x56a   : > { %11160 = vst [vmem:[#allocation153_spill] sm:$0xff] %v9566_v62  ;;  %11161 = vst [vmem:[#allocation154_spill] sm:$0xff] %v9568_v33  ;;  %v6178_v19 = vpack.c.bf16 %v9566_v62, %v9562_v23  ;;  %v6179_v25 = vpack.c.bf16 %v9568_v33, %v9564_v10  ;;  %v9576_v63 = vadd.f32 %v3768_v46, %v3098_v17  ;;  %v3103_v23 = vpop.permute.xlu1 %3102 }
 0x56b   : > { %v3770_v5 = vpop.f32.mrf.mxu0  ;;  %v4123_v9 = vpop.f32.mrf.mxu1  ;;  %v9578_v28 = vadd.f32 %v4121_v48, %v3098_v17 }
 0x56c   : > { %5066 = vst [vmem:[%s8895_s28 + $0x2e0] sm:$0xff] %v6178_v19  ;;  %5067 = vst [vmem:[%s8895_s28 + $0x2e8] sm:$0xff] %v6179_v25  ;;  %v9580_v16 = vadd.f32 %v3770_v5, %v3098_v17  ;;  %v9582_v8 = vadd.f32 %v4123_v9, %v3098_v17 }
 0x56d   : > { %11162 = vst [vmem:[#allocation155_spill] sm:$0xff] %v9576_v63  ;;  %11163 = vst [vmem:[#allocation156_spill] sm:$0xff] %v9578_v28  ;;  %v3774_v38 = vpop.f32.mrf.mxu0  ;;  %v4127_v60 = vpop.f32.mrf.mxu1 }
 0x56e   : > { %11164 = vst [vmem:[#allocation157_spill] sm:$0xff] %v9580_v16  ;;  %11165 = vst [vmem:[#allocation158_spill] sm:$0xff] %v9582_v8  ;;  %v6180_v33 = vpack.c.bf16 %v9580_v16, %v9576_v63  ;;  %v6181_v10 = vpack.c.bf16 %v9582_v8, %v9578_v28  ;;  %v9590_v48 = vadd.f32 %v3774_v38, %v3103_v23  ;;  %v3108_v63 = vpop.permute.xlu0 %3107 }
 0x56f   : > { %v3776_v19 = vpop.f32.mrf.mxu0  ;;  %v4129_v25 = vpop.f32.mrf.mxu1  ;;  %v9592_v46 = vadd.f32 %v4127_v60, %v3103_v23 }
 0x570   : > { %5068 = vst [vmem:[%s8895_s28 + $0x2f0] sm:$0xff] %v6180_v33  ;;  %5069 = vst [vmem:[%s8895_s28 + $0x2f8] sm:$0xff] %v6181_v10  ;;  %v9594_v17 = vadd.f32 %v3776_v19, %v3103_v23  ;;  %v9596_v5 = vadd.f32 %v4129_v25, %v3103_v23 }
 0x571   : > { %11166 = vst [vmem:[#allocation159_spill] sm:$0xff] %v9590_v48  ;;  %11167 = vst [vmem:[#allocation160_spill] sm:$0xff] %v9592_v46  ;;  %v3778_v9 = vpop.f32.mrf.mxu0  ;;  %v4131_v62 = vpop.f32.mrf.mxu1 }
 0x572   : > { %11168 = vst [vmem:[#allocation161_spill] sm:$0xff] %v9594_v17  ;;  %11169 = vst [vmem:[#allocation162_spill] sm:$0xff] %v9596_v5  ;;  %v6182_v8 = vpack.c.bf16 %v9594_v17, %v9590_v48  ;;  %v6183_v28 = vpack.c.bf16 %v9596_v5, %v9592_v46  ;;  %v9604_v60 = vadd.f32 %v3778_v9, %v3108_v63  ;;  %v3113_v48 = vpop.permute.xlu1 %3112 }
 0x573   : > { %v3780_v33 = vpop.f32.mrf.mxu0  ;;  %v4133_v10 = vpop.f32.mrf.mxu1  ;;  %v9606_v38 = vadd.f32 %v4131_v62, %v3108_v63 }
 0x574   : > { %5070 = vst [vmem:[%s8895_s28 + $0x300] sm:$0xff] %v6182_v8  ;;  %5071 = vst [vmem:[%s8895_s28 + $0x308] sm:$0xff] %v6183_v28  ;;  %v9608_v23 = vadd.f32 %v3780_v33, %v3108_v63  ;;  %v9610_v19 = vadd.f32 %v4133_v10, %v3108_v63 }
 0x575   : > { %11170 = vst [vmem:[#allocation163_spill] sm:$0xff] %v9604_v60  ;;  %11171 = vst [vmem:[#allocation164_spill] sm:$0xff] %v9606_v38  ;;  %v3784_v25 = vpop.f32.mrf.mxu0  ;;  %v4137_v16 = vpop.f32.mrf.mxu1 }
 0x576   : > { %11172 = vst [vmem:[#allocation165_spill] sm:$0xff] %v9608_v23  ;;  %11173 = vst [vmem:[#allocation166_spill] sm:$0xff] %v9610_v19  ;;  %v6184_v5 = vpack.c.bf16 %v9608_v23, %v9604_v60  ;;  %v6185_v46 = vpack.c.bf16 %v9610_v19, %v9606_v38  ;;  %v9618_v62 = vadd.f32 %v3784_v25, %v3113_v48  ;;  %v3118_v60 = vpop.permute.xlu0 %3117 }
 0x577   : > { %v3786_v8 = vpop.f32.mrf.mxu0  ;;  %v4139_v28 = vpop.f32.mrf.mxu1  ;;  %v9620_v9 = vadd.f32 %v4137_v16, %v3113_v48 }
 0x578   : > { %5072 = vst [vmem:[%s8895_s28 + $0x310] sm:$0xff] %v6184_v5  ;;  %5073 = vst [vmem:[%s8895_s28 + $0x318] sm:$0xff] %v6185_v46  ;;  %v9622_v63 = vadd.f32 %v3786_v8, %v3113_v48  ;;  %v9624_v33 = vadd.f32 %v4139_v28, %v3113_v48 }
 0x579   : > { %11174 = vst [vmem:[#allocation167_spill] sm:$0xff] %v9618_v62  ;;  %11175 = vst [vmem:[#allocation168_spill] sm:$0xff] %v9620_v9  ;;  %v3788_v10 = vpop.f32.mrf.mxu0  ;;  %v4141_v17 = vpop.f32.mrf.mxu1 }
 0x57a   : > { %11176 = vst [vmem:[#allocation169_spill] sm:$0xff] %v9622_v63  ;;  %11177 = vst [vmem:[#allocation170_spill] sm:$0xff] %v9624_v33  ;;  %v6186_v19 = vpack.c.bf16 %v9622_v63, %v9618_v62  ;;  %v6187_v38 = vpack.c.bf16 %v9624_v33, %v9620_v9  ;;  %v9632_v16 = vadd.f32 %v3788_v10, %v3118_v60  ;;  %v3123_v62 = vpop.permute.xlu1 %3122 }
 0x57b   : > { %v3790_v5 = vpop.f32.mrf.mxu0  ;;  %v4143_v46 = vpop.f32.mrf.mxu1  ;;  %v9634_v25 = vadd.f32 %v4141_v17, %v3118_v60 }
 0x57c   : > { %5074 = vst [vmem:[%s8895_s28 + $0x320] sm:$0xff] %v6186_v19  ;;  %5075 = vst [vmem:[%s8895_s28 + $0x328] sm:$0xff] %v6187_v38  ;;  %v9636_v48 = vadd.f32 %v3790_v5, %v3118_v60  ;;  %v9638_v8 = vadd.f32 %v4143_v46, %v3118_v60 }
 0x57d   : > { %11178 = vst [vmem:[#allocation171_spill] sm:$0xff] %v9632_v16  ;;  %11179 = vst [vmem:[#allocation172_spill] sm:$0xff] %v9634_v25  ;;  %v3794_v28 = vpop.f32.mrf.mxu0  ;;  %v4147_v23 = vpop.f32.mrf.mxu1 }
 0x57e   : > { %11180 = vst [vmem:[#allocation173_spill] sm:$0xff] %v9636_v48  ;;  %11181 = vst [vmem:[#allocation174_spill] sm:$0xff] %v9638_v8  ;;  %v6188_v33 = vpack.c.bf16 %v9636_v48, %v9632_v16  ;;  %v6189_v9 = vpack.c.bf16 %v9638_v8, %v9634_v25  ;;  %v9646_v17 = vadd.f32 %v3794_v28, %v3123_v62  ;;  %v3128_v16 = vpop.permute.xlu0 %3127 }
 0x57f   : > { %v3796_v19 = vpop.f32.mrf.mxu0  ;;  %v4149_v38 = vpop.f32.mrf.mxu1  ;;  %v9648_v10 = vadd.f32 %v4147_v23, %v3123_v62 }
 0x580   : > { %5076 = vst [vmem:[%s8895_s28 + $0x330] sm:$0xff] %v6188_v33  ;;  %5077 = vst [vmem:[%s8895_s28 + $0x338] sm:$0xff] %v6189_v9  ;;  %v9650_v60 = vadd.f32 %v3796_v19, %v3123_v62  ;;  %v9652_v5 = vadd.f32 %v4149_v38, %v3123_v62 }
 0x581   : > { %11182 = vst [vmem:[#allocation175_spill] sm:$0xff] %v9646_v17  ;;  %11183 = vst [vmem:[#allocation176_spill] sm:$0xff] %v9648_v10  ;;  %v3798_v46 = vpop.f32.mrf.mxu0  ;;  %v4151_v63 = vpop.f32.mrf.mxu1 }
 0x582   : > { %11184 = vst [vmem:[#allocation177_spill] sm:$0xff] %v9650_v60  ;;  %11185 = vst [vmem:[#allocation178_spill] sm:$0xff] %v9652_v5  ;;  %v6190_v8 = vpack.c.bf16 %v9650_v60, %v9646_v17  ;;  %v6191_v25 = vpack.c.bf16 %v9652_v5, %v9648_v10  ;;  %v9660_v23 = vadd.f32 %v3798_v46, %v3128_v16  ;;  %v3133_v17 = vpop.permute.xlu1 %3132 }
 0x583   : > { %v3800_v33 = vpop.f32.mrf.mxu0  ;;  %v4153_v9 = vpop.f32.mrf.mxu1  ;;  %v9662_v28 = vadd.f32 %v4151_v63, %v3128_v16 }
 0x584   : > { %5078 = vst [vmem:[%s8895_s28 + $0x340] sm:$0xff] %v6190_v8  ;;  %5079 = vst [vmem:[%s8895_s28 + $0x348] sm:$0xff] %v6191_v25  ;;  %v9664_v62 = vadd.f32 %v3800_v33, %v3128_v16  ;;  %v9666_v19 = vadd.f32 %v4153_v9, %v3128_v16 }
 0x585   : > { %11186 = vst [vmem:[#allocation179_spill] sm:$0xff] %v9660_v23  ;;  %11187 = vst [vmem:[#allocation180_spill] sm:$0xff] %v9662_v28  ;;  %v3804_v38 = vpop.f32.mrf.mxu0  ;;  %v4157_v48 = vpop.f32.mrf.mxu1 }
 0x586   : > { %11188 = vst [vmem:[#allocation181_spill] sm:$0xff] %v9664_v62  ;;  %11189 = vst [vmem:[#allocation182_spill] sm:$0xff] %v9666_v19  ;;  %v6192_v5 = vpack.c.bf16 %v9664_v62, %v9660_v23  ;;  %v6193_v10 = vpack.c.bf16 %v9666_v19, %v9662_v28  ;;  %v9674_v63 = vadd.f32 %v3804_v38, %v3133_v17  ;;  %v3138_v23 = vpop.permute.xlu0 %3137 }
 0x587   : > { %v3806_v8 = vpop.f32.mrf.mxu0  ;;  %v4159_v25 = vpop.f32.mrf.mxu1  ;;  %v9676_v46 = vadd.f32 %v4157_v48, %v3133_v17 }
 0x588   : > { %5080 = vst [vmem:[%s8895_s28 + $0x350] sm:$0xff] %v6192_v5  ;;  %5081 = vst [vmem:[%s8895_s28 + $0x358] sm:$0xff] %v6193_v10  ;;  %v9678_v16 = vadd.f32 %v3806_v8, %v3133_v17  ;;  %v9680_v33 = vadd.f32 %v4159_v25, %v3133_v17 }
 0x589   : > { %11190 = vst [vmem:[#allocation183_spill] sm:$0xff] %v9674_v63  ;;  %11191 = vst [vmem:[#allocation184_spill] sm:$0xff] %v9676_v46  ;;  %v3808_v9 = vpop.f32.mrf.mxu0  ;;  %v4161_v60 = vpop.f32.mrf.mxu1 }
 0x58a   : > { %11192 = vst [vmem:[#allocation185_spill] sm:$0xff] %v9678_v16  ;;  %11193 = vst [vmem:[#allocation186_spill] sm:$0xff] %v9680_v33  ;;  %v6194_v19 = vpack.c.bf16 %v9678_v16, %v9674_v63  ;;  %v6195_v28 = vpack.c.bf16 %v9680_v33, %v9676_v46  ;;  %v9688_v48 = vadd.f32 %v3808_v9, %v3138_v23  ;;  %v3143_v63 = vpop.permute.xlu1 %3142 }
 0x58b   : > { %v3810_v5 = vpop.f32.mrf.mxu0  ;;  %v4163_v10 = vpop.f32.mrf.mxu1  ;;  %v9690_v38 = vadd.f32 %v4161_v60, %v3138_v23 }
 0x58c   : > { %5082 = vst [vmem:[%s8895_s28 + $0x360] sm:$0xff] %v6194_v19  ;;  %5083 = vst [vmem:[%s8895_s28 + $0x368] sm:$0xff] %v6195_v28  ;;  %v9692_v17 = vadd.f32 %v3810_v5, %v3138_v23  ;;  %v9694_v8 = vadd.f32 %v4163_v10, %v3138_v23 }
 0x58d   : > { %11194 = vst [vmem:[#allocation187_spill] sm:$0xff] %v9688_v48  ;;  %11195 = vst [vmem:[#allocation188_spill] sm:$0xff] %v9690_v38  ;;  %v3814_v25 = vpop.f32.mrf.mxu0  ;;  %v4167_v62 = vpop.f32.mrf.mxu1 }
 0x58e   : > { %11196 = vst [vmem:[#allocation189_spill] sm:$0xff] %v9692_v17  ;;  %11197 = vst [vmem:[#allocation190_spill] sm:$0xff] %v9694_v8  ;;  %v6196_v33 = vpack.c.bf16 %v9692_v17, %v9688_v48  ;;  %v6197_v46 = vpack.c.bf16 %v9694_v8, %v9690_v38  ;;  %v9702_v60 = vadd.f32 %v3814_v25, %v3143_v63  ;;  %v3148_v48 = vpop.permute.xlu0 %3147 }
 0x58f   : > { %v3816_v19 = vpop.f32.mrf.mxu0  ;;  %v4169_v28 = vpop.f32.mrf.mxu1  ;;  %v9704_v9 = vadd.f32 %v4167_v62, %v3143_v63 }
 0x590   : > { %5084 = vst [vmem:[%s8895_s28 + $0x370] sm:$0xff] %v6196_v33  ;;  %5085 = vst [vmem:[%s8895_s28 + $0x378] sm:$0xff] %v6197_v46  ;;  %v9706_v23 = vadd.f32 %v3816_v19, %v3143_v63  ;;  %v9708_v5 = vadd.f32 %v4169_v28, %v3143_v63 }
 0x591   : > { %11198 = vst [vmem:[#allocation191_spill] sm:$0xff] %v9702_v60  ;;  %11199 = vst [vmem:[#allocation192_spill] sm:$0xff] %v9704_v9  ;;  %v3818_v10 = vpop.f32.mrf.mxu0  ;;  %v4171_v16 = vpop.f32.mrf.mxu1 }
 0x592   : > { %11200 = vst [vmem:[#allocation193_spill] sm:$0xff] %v9706_v23  ;;  %11201 = vst [vmem:[#allocation194_spill] sm:$0xff] %v9708_v5  ;;  %v6198_v8 = vpack.c.bf16 %v9706_v23, %v9702_v60  ;;  %v6199_v38 = vpack.c.bf16 %v9708_v5, %v9704_v9  ;;  %v9716_v62 = vadd.f32 %v3818_v10, %v3148_v48  ;;  %v3153_v60 = vpop.permute.xlu1 %3152 }
 0x593   : > { %v3820_v33 = vpop.f32.mrf.mxu0  ;;  %v4173_v46 = vpop.f32.mrf.mxu1  ;;  %v9718_v25 = vadd.f32 %v4171_v16, %v3148_v48 }
 0x594   : > { %5086 = vst [vmem:[%s8895_s28 + $0x380] sm:$0xff] %v6198_v8  ;;  %5087 = vst [vmem:[%s8895_s28 + $0x388] sm:$0xff] %v6199_v38  ;;  %v9720_v63 = vadd.f32 %v3820_v33, %v3148_v48  ;;  %v9722_v19 = vadd.f32 %v4173_v46, %v3148_v48 }
 0x595   : > { %11202 = vst [vmem:[#allocation195_spill] sm:$0xff] %v9716_v62  ;;  %11203 = vst [vmem:[#allocation196_spill] sm:$0xff] %v9718_v25  ;;  %v3824_v28 = vpop.f32.mrf.mxu0  ;;  %v4177_v17 = vpop.f32.mrf.mxu1 }
 0x596   : > { %11204 = vst [vmem:[#allocation197_spill] sm:$0xff] %v9720_v63  ;;  %11205 = vst [vmem:[#allocation198_spill] sm:$0xff] %v9722_v19  ;;  %v6200_v5 = vpack.c.bf16 %v9720_v63, %v9716_v62  ;;  %v6201_v9 = vpack.c.bf16 %v9722_v19, %v9718_v25  ;;  %v9730_v16 = vadd.f32 %v3824_v28, %v3153_v60  ;;  %v3158_v62 = vpop.permute.xlu0 %3157 }
 0x597   : > { %v3826_v8 = vpop.f32.mrf.mxu0  ;;  %v4179_v38 = vpop.f32.mrf.mxu1  ;;  %v9732_v10 = vadd.f32 %v4177_v17, %v3153_v60 }
 0x598   : > { %5088 = vst [vmem:[%s8895_s28 + $0x390] sm:$0xff] %v6200_v5  ;;  %5089 = vst [vmem:[%s8895_s28 + $0x398] sm:$0xff] %v6201_v9  ;;  %v9734_v48 = vadd.f32 %v3826_v8, %v3153_v60  ;;  %v9736_v33 = vadd.f32 %v4179_v38, %v3153_v60 }
 0x599   : > { %11206 = vst [vmem:[#allocation199_spill] sm:$0xff] %v9730_v16  ;;  %11207 = vst [vmem:[#allocation200_spill] sm:$0xff] %v9732_v10  ;;  %v3828_v46 = vpop.f32.mrf.mxu0  ;;  %v4181_v23 = vpop.f32.mrf.mxu1 }
 0x59a   : > { %11208 = vst [vmem:[#allocation201_spill] sm:$0xff] %v9734_v48  ;;  %11209 = vst [vmem:[#allocation202_spill] sm:$0xff] %v9736_v33  ;;  %v6202_v19 = vpack.c.bf16 %v9734_v48, %v9730_v16  ;;  %v6203_v25 = vpack.c.bf16 %v9736_v33, %v9732_v10  ;;  %v9744_v17 = vadd.f32 %v3828_v46, %v3158_v62  ;;  %v3163_v16 = vpop.permute.xlu1 %3162 }
 0x59b   : > { %v3830_v5 = vpop.f32.mrf.mxu0  ;;  %v4183_v9 = vpop.f32.mrf.mxu1  ;;  %v9746_v28 = vadd.f32 %v4181_v23, %v3158_v62 }
 0x59c   : > { %5090 = vst [vmem:[%s8895_s28 + $0x3a0] sm:$0xff] %v6202_v19  ;;  %5091 = vst [vmem:[%s8895_s28 + $0x3a8] sm:$0xff] %v6203_v25  ;;  %v9748_v60 = vadd.f32 %v3830_v5, %v3158_v62  ;;  %v9750_v8 = vadd.f32 %v4183_v9, %v3158_v62 }
 0x59d   : > { %11210 = vst [vmem:[#allocation203_spill] sm:$0xff] %v9744_v17  ;;  %11211 = vst [vmem:[#allocation204_spill] sm:$0xff] %v9746_v28  ;;  %v3834_v38 = vpop.f32.mrf.mxu0  ;;  %v4187_v63 = vpop.f32.mrf.mxu1 }
 0x59e   : > { %11212 = vst [vmem:[#allocation205_spill] sm:$0xff] %v9748_v60  ;;  %11213 = vst [vmem:[#allocation206_spill] sm:$0xff] %v9750_v8  ;;  %v6204_v33 = vpack.c.bf16 %v9748_v60, %v9744_v17  ;;  %v6205_v10 = vpack.c.bf16 %v9750_v8, %v9746_v28  ;;  %v9758_v23 = vadd.f32 %v3834_v38, %v3163_v16  ;;  %v3168_v17 = vpop.permute.xlu0 %3167 }
 0x59f   : > { %v3836_v19 = vpop.f32.mrf.mxu0  ;;  %v4189_v25 = vpop.f32.mrf.mxu1  ;;  %v9760_v46 = vadd.f32 %v4187_v63, %v3163_v16 }
 0x5a0   : > { %5092 = vst [vmem:[%s8895_s28 + $0x3b0] sm:$0xff] %v6204_v33  ;;  %5093 = vst [vmem:[%s8895_s28 + $0x3b8] sm:$0xff] %v6205_v10  ;;  %v9762_v62 = vadd.f32 %v3836_v19, %v3163_v16  ;;  %v9764_v5 = vadd.f32 %v4189_v25, %v3163_v16 }
 0x5a1   : > { %11214 = vst [vmem:[#allocation207_spill] sm:$0xff] %v9758_v23  ;;  %11215 = vst [vmem:[#allocation208_spill] sm:$0xff] %v9760_v46  ;;  %v3838_v9 = vpop.f32.mrf.mxu0  ;;  %v4191_v48 = vpop.f32.mrf.mxu1 }
 0x5a2   : > { %11216 = vst [vmem:[#allocation209_spill] sm:$0xff] %v9762_v62  ;;  %11217 = vst [vmem:[#allocation210_spill] sm:$0xff] %v9764_v5  ;;  %v6206_v8 = vpack.c.bf16 %v9762_v62, %v9758_v23  ;;  %v6207_v28 = vpack.c.bf16 %v9764_v5, %v9760_v46  ;;  %v9772_v63 = vadd.f32 %v3838_v9, %v3168_v17  ;;  %v3173_v23 = vpop.permute.xlu1 %3172 }
 0x5a3   : > { %v3840_v33 = vpop.f32.mrf.mxu0  ;;  %v4193_v10 = vpop.f32.mrf.mxu1  ;;  %v9774_v38 = vadd.f32 %v4191_v48, %v3168_v17 }
 0x5a4   : > { %5094 = vst [vmem:[%s8895_s28 + $0x3c0] sm:$0xff] %v6206_v8  ;;  %5095 = vst [vmem:[%s8895_s28 + $0x3c8] sm:$0xff] %v6207_v28  ;;  %v9776_v16 = vadd.f32 %v3840_v33, %v3168_v17  ;;  %v9778_v19 = vadd.f32 %v4193_v10, %v3168_v17 }
 0x5a5   : > { %11218 = vst [vmem:[#allocation211_spill] sm:$0xff] %v9772_v63  ;;  %11219 = vst [vmem:[#allocation212_spill] sm:$0xff] %v9774_v38  ;;  %v3844_v25 = vpop.f32.mrf.mxu0  ;;  %v4197_v60 = vpop.f32.mrf.mxu1 }
 0x5a6   : > { %11220 = vst [vmem:[#allocation213_spill] sm:$0xff] %v9778_v19  ;;  %v6208_v5 = vpack.c.bf16 %v9776_v16, %v9772_v63  ;;  %v6209_v46 = vpack.c.bf16 %v9778_v19, %v9774_v38  ;;  %v9786_v48 = vadd.f32 %v3844_v25, %v3173_v23  ;;  %v9788_v9 = vadd.f32 %v4197_v60, %v3173_v23  ;;  %v3178_v63 = vpop.permute.xlu0 %3177 }
 0x5a7   : > { %v3846_v8 = vpop.f32.mrf.mxu0  ;;  %v4199_v28 = vpop.f32.mrf.mxu1 }
 0x5a8   : > { %5096 = vst [vmem:[%s8895_s28 + $0x3d0] sm:$0xff] %v6208_v5  ;;  %5097 = vst [vmem:[%s8895_s28 + $0x3d8] sm:$0xff] %v6209_v46  ;;  %v9790_v17 = vadd.f32 %v3846_v8, %v3173_v23  ;;  %v9792_v33 = vadd.f32 %v4199_v28, %v3173_v23 }
 0x5a9   : > { %11221 = vst [vmem:[#allocation214_spill] sm:$0xff] %v9786_v48  ;;  %v3848_v10 = vpop.f32.mrf.mxu0  ;;  %v4201_v62 = vpop.f32.mrf.mxu1 }
 0x5aa   : > { %v6210_v19 = vpack.c.bf16 %v9790_v17, %v9786_v48  ;;  %v6211_v5 = vpack.c.bf16 %v9792_v33, %v9788_v9  ;;  %v9800_v60 = vadd.f32 %v3848_v10, %v3178_v63  ;;  %v9802_v8 = vadd.f32 %v4201_v62, %v3178_v63 }
 0x5ab   : > { %v3850_v46 = vpop.f32.mrf.mxu0  ;;  %v4203_v25 = vpop.f32.mrf.mxu1 }
 0x5ac   : > { %5098 = vst [vmem:[%s8895_s28 + $0x3e0] sm:$0xff] %v6210_v19  ;;  %5099 = vst [vmem:[%s8895_s28 + $0x3e8] sm:$0xff] %v6211_v5  ;;  %v9804_v23 = vadd.f32 %v3850_v46, %v3178_v63  ;;  %v9806_v28 = vadd.f32 %v4203_v25, %v3178_v63  ;;  %5105 = sbr.rel (%p6078_p2) target bundleno = 1490 (0x5d2), region = 60 }
 0x5ae   : > { %v6212_v38 = vpack.c.bf16 %v9804_v23, %v9800_v60  ;;  %v6213_v48 = vpack.c.bf16 %v9806_v28, %v9802_v8 }
 0x5b0   : > { %5100 = vst [vmem:[%s8895_s28 + $0x3f0] sm:$0xff] %v6212_v38  ;;  %5101 = vst [vmem:[%s8895_s28 + $0x3f8] sm:$0xff] %v6213_v48 }
 0x5b1   : > { %vm5106_vm0 = vcmask 7168   ;;  %v6577_v62 = vmov -inf  }
 0x5b2   : > { %5107 = vst.msk [vmem:[%s6766_s20] sm:$0xff] %vm5106_vm0, %v6577_v62  ;;  %5108 = vst.msk [vmem:[%s6766_s20 + $0x8] sm:$0xff] %vm5106_vm0, %v6577_v62 }
 0x5b3   : > { %5109 = vst.msk [vmem:[%s6766_s20 + $0x10] sm:$0xff] %vm5106_vm0, %v6577_v62  ;;  %5110 = vst.msk [vmem:[%s6766_s20 + $0x18] sm:$0xff] %vm5106_vm0, %v6577_v62 }
 0x5b4   : > { %5111 = vst.msk [vmem:[%s6766_s20 + $0x20] sm:$0xff] %vm5106_vm0, %v6577_v62  ;;  %5112 = vst.msk [vmem:[%s6766_s20 + $0x28] sm:$0xff] %vm5106_vm0, %v6577_v62 }
 0x5b5   : > { %5113 = vst.msk [vmem:[%s6766_s20 + $0x30] sm:$0xff] %vm5106_vm0, %v6577_v62  ;;  %5114 = vst.msk [vmem:[%s6766_s20 + $0x38] sm:$0xff] %vm5106_vm0, %v6577_v62 }
 0x5b6   : > { %5115 = vst.msk [vmem:[%s6766_s20 + $0x40] sm:$0xff] %vm5106_vm0, %v6577_v62  ;;  %5116 = vst.msk [vmem:[%s6766_s20 + $0x48] sm:$0xff] %vm5106_vm0, %v6577_v62 }
 0x5b7   : > { %5117 = vst.msk [vmem:[%s6766_s20 + $0x50] sm:$0xff] %vm5106_vm0, %v6577_v62  ;;  %5118 = vst.msk [vmem:[%s6766_s20 + $0x58] sm:$0xff] %vm5106_vm0, %v6577_v62 }
 0x5b8   : > { %5119 = vst.msk [vmem:[%s6766_s20 + $0x60] sm:$0xff] %vm5106_vm0, %v6577_v62  ;;  %5120 = vst.msk [vmem:[%s6766_s20 + $0x68] sm:$0xff] %vm5106_vm0, %v6577_v62 }
 0x5b9   : > { %5121 = vst.msk [vmem:[%s6766_s20 + $0x70] sm:$0xff] %vm5106_vm0, %v6577_v62  ;;  %5122 = vst.msk [vmem:[%s6766_s20 + $0x78] sm:$0xff] %vm5106_vm0, %v6577_v62 }
 0x5ba   : > { %5123 = vst.msk [vmem:[%s6766_s20 + $0x80] sm:$0xff] %vm5106_vm0, %v6577_v62  ;;  %5124 = vst.msk [vmem:[%s6766_s20 + $0x88] sm:$0xff] %vm5106_vm0, %v6577_v62 }
 0x5bb   : > { %5125 = vst.msk [vmem:[%s6766_s20 + $0x90] sm:$0xff] %vm5106_vm0, %v6577_v62  ;;  %5126 = vst.msk [vmem:[%s6766_s20 + $0x98] sm:$0xff] %vm5106_vm0, %v6577_v62 }
 0x5bc   : > { %5127 = vst.msk [vmem:[%s6766_s20 + $0xa0] sm:$0xff] %vm5106_vm0, %v6577_v62  ;;  %5128 = vst.msk [vmem:[%s6766_s20 + $0xa8] sm:$0xff] %vm5106_vm0, %v6577_v62 }
 0x5bd   : > { %5129 = vst.msk [vmem:[%s6766_s20 + $0xb0] sm:$0xff] %vm5106_vm0, %v6577_v62  ;;  %5130 = vst.msk [vmem:[%s6766_s20 + $0xb8] sm:$0xff] %vm5106_vm0, %v6577_v62 }
 0x5be   : > { %5131 = vst.msk [vmem:[%s6766_s20 + $0xc0] sm:$0xff] %vm5106_vm0, %v6577_v62  ;;  %5132 = vst.msk [vmem:[%s6766_s20 + $0xc8] sm:$0xff] %vm5106_vm0, %v6577_v62 }
 0x5bf   : > { %5133 = vst.msk [vmem:[%s6766_s20 + $0xd0] sm:$0xff] %vm5106_vm0, %v6577_v62  ;;  %5134 = vst.msk [vmem:[%s6766_s20 + $0xd8] sm:$0xff] %vm5106_vm0, %v6577_v62 }
 0x5c0   : > { %5135 = vst.msk [vmem:[%s6766_s20 + $0xe0] sm:$0xff] %vm5106_vm0, %v6577_v62  ;;  %5136 = vst.msk [vmem:[%s6766_s20 + $0xe8] sm:$0xff] %vm5106_vm0, %v6577_v62 }
 0x5c1   : > { %5137 = vst.msk [vmem:[%s6766_s20 + $0xf0] sm:$0xff] %vm5106_vm0, %v6577_v62  ;;  %5138 = vst.msk [vmem:[%s6766_s20 + $0xf8] sm:$0xff] %vm5106_vm0, %v6577_v62 }
 0x5c2   : > { %5139 = vst.msk [vmem:[%s6766_s20 + $0x100] sm:$0xff] %vm5106_vm0, %v6577_v62  ;;  %5140 = vst.msk [vmem:[%s6766_s20 + $0x108] sm:$0xff] %vm5106_vm0, %v6577_v62 }
 0x5c3   : > { %5141 = vst.msk [vmem:[%s6766_s20 + $0x110] sm:$0xff] %vm5106_vm0, %v6577_v62  ;;  %5142 = vst.msk [vmem:[%s6766_s20 + $0x118] sm:$0xff] %vm5106_vm0, %v6577_v62 }
 0x5c4   : > { %5143 = vst.msk [vmem:[%s6766_s20 + $0x120] sm:$0xff] %vm5106_vm0, %v6577_v62  ;;  %5144 = vst.msk [vmem:[%s6766_s20 + $0x128] sm:$0xff] %vm5106_vm0, %v6577_v62 }
 0x5c5   : > { %5145 = vst.msk [vmem:[%s6766_s20 + $0x130] sm:$0xff] %vm5106_vm0, %v6577_v62  ;;  %5146 = vst.msk [vmem:[%s6766_s20 + $0x138] sm:$0xff] %vm5106_vm0, %v6577_v62 }
 0x5c6   : > { %5147 = vst.msk [vmem:[%s6766_s20 + $0x140] sm:$0xff] %vm5106_vm0, %v6577_v62  ;;  %5148 = vst.msk [vmem:[%s6766_s20 + $0x148] sm:$0xff] %vm5106_vm0, %v6577_v62 }
 0x5c7   : > { %5149 = vst.msk [vmem:[%s6766_s20 + $0x150] sm:$0xff] %vm5106_vm0, %v6577_v62  ;;  %5150 = vst.msk [vmem:[%s6766_s20 + $0x158] sm:$0xff] %vm5106_vm0, %v6577_v62 }
 0x5c8   : > { %5151 = vst.msk [vmem:[%s6766_s20 + $0x160] sm:$0xff] %vm5106_vm0, %v6577_v62  ;;  %5152 = vst.msk [vmem:[%s6766_s20 + $0x168] sm:$0xff] %vm5106_vm0, %v6577_v62 }
 0x5c9   : > { %5153 = vst.msk [vmem:[%s6766_s20 + $0x170] sm:$0xff] %vm5106_vm0, %v6577_v62  ;;  %5154 = vst.msk [vmem:[%s6766_s20 + $0x178] sm:$0xff] %vm5106_vm0, %v6577_v62 }
 0x5ca   : > { %5155 = vst.msk [vmem:[%s6766_s20 + $0x180] sm:$0xff] %vm5106_vm0, %v6577_v62  ;;  %5156 = vst.msk [vmem:[%s6766_s20 + $0x188] sm:$0xff] %vm5106_vm0, %v6577_v62 }
 0x5cb   : > { %5157 = vst.msk [vmem:[%s6766_s20 + $0x190] sm:$0xff] %vm5106_vm0, %v6577_v62  ;;  %5158 = vst.msk [vmem:[%s6766_s20 + $0x198] sm:$0xff] %vm5106_vm0, %v6577_v62 }
 0x5cc   : > { %5159 = vst.msk [vmem:[%s6766_s20 + $0x1a0] sm:$0xff] %vm5106_vm0, %v6577_v62  ;;  %5160 = vst.msk [vmem:[%s6766_s20 + $0x1a8] sm:$0xff] %vm5106_vm0, %v6577_v62 }
 0x5cd   : > { %5161 = vst.msk [vmem:[%s6766_s20 + $0x1b0] sm:$0xff] %vm5106_vm0, %v6577_v62  ;;  %5162 = vst.msk [vmem:[%s6766_s20 + $0x1b8] sm:$0xff] %vm5106_vm0, %v6577_v62 }
 0x5ce   : > { %5163 = vst.msk [vmem:[%s6766_s20 + $0x1c0] sm:$0xff] %vm5106_vm0, %v6577_v62  ;;  %5164 = vst.msk [vmem:[%s6766_s20 + $0x1c8] sm:$0xff] %vm5106_vm0, %v6577_v62 }
 0x5cf   : > { %5165 = vst.msk [vmem:[%s6766_s20 + $0x1d0] sm:$0xff] %vm5106_vm0, %v6577_v62  ;;  %5166 = vst.msk [vmem:[%s6766_s20 + $0x1d8] sm:$0xff] %vm5106_vm0, %v6577_v62 }
 0x5d0   : > { %5167 = vst.msk [vmem:[%s6766_s20 + $0x1e0] sm:$0xff] %vm5106_vm0, %v6577_v62  ;;  %5168 = vst.msk [vmem:[%s6766_s20 + $0x1e8] sm:$0xff] %vm5106_vm0, %v6577_v62 }
 0x5d1   : > { %5169 = vst.msk [vmem:[%s6766_s20 + $0x1f0] sm:$0xff] %vm5106_vm0, %v6577_v62  ;;  %5170 = vst.msk [vmem:[%s6766_s20 + $0x1f8] sm:$0xff] %vm5106_vm0, %v6577_v62 }
 0x5d2 PF: > { %v5245_v63 = vmax.f32 %v8913_v3, %v8917_v7  ;;  %v5235_v38 = vmax.f32 %v8877_v35, %v8881_v50  ;;  %v5250_v19 = vmax.f32 %v8933_v39, %v8937_v24  ;;  %v5240_v48 = vmax.f32 %v8899_v55, %v8903_v53  ;;  %v11234_v62 = vld [vmem:[#allocation29_spill] sm:$0xff]  ;;  %s6082_s24 = sshll.u32 %s6552_s17, 10  ;;  %s5711_s9 = sshll.u32 %s8895_s28, 4  ;;  %s10273_s9 = int_to_ptr.vmem [resolvable:$true] %s5711_s9 }
 0x5d3   : > { %v5260_v10 = vmax.f32 %v8967_v4, %v8971_v54  ;;  %v5255_v5 = vmax.f32 %v8947_v37, %v8951_v61  ;;  %v5270_v53 = vmax.f32 %v9001_v58, %v9005_v43  ;;  %v5265_v39 = vmax.f32 %v8981_v40, %v8985_v0  ;;  %s5708_s27 = sadd.s32 %s6082_s24, %s6911_s23  ;;  %s11425_s12 = sld [smem:[#allocation216_spill]] }
 0x5d4   : > { %v5246_v46 = vmax.f32 %v5245_v63, %v8915_v31  ;;  %v5236_v25 = vmax.f32 %v5235_v38, %v8879_v49  ;;  %v5251_v3 = vmax.f32 %v5250_v19, %v8935_v52  ;;  %v5241_v35 = vmax.f32 %v5240_v48, %v8901_v2  ;;  %v11235_v38 = vld [vmem:[#allocation31_spill] sm:$0xff]  ;;  %v11236_v48 = vld [vmem:[#allocation21_spill] sm:$0xff]  ;;  %s6083_s7 = sshll.u32 %s5708_s27, 6  ;;  %s10277_s17 = scalar_lea.sflag [#allocation3], %s399_s30 }
 0x5d5   : > { %v5261_v55 = vmax.f32 %v5260_v10, %v8969_v41  ;;  %v5256_v2 = vmax.f32 %v5255_v5, %v8949_v34  ;;  %v5266_v52 = vmax.f32 %v5265_v39, %v8983_v29  ;;  %v5280_v37 = vmax.f32 %v9035_v44, %v9039_v12  ;;  %v11222_v29 = vld [vmem:[#allocation37_spill] sm:$0xff]  ;;  %v11227_v44 = vld [vmem:[#allocation32_spill] sm:$0xff]  ;;  %v11243_v39 = vld [vmem:[#allocation47_spill] sm:$0xff]  ;;  %s6464_s23 = scalar_lea.vmem %s10273_s9, 16384  ;;  %s6578_s28 = smov [#allocation2]  }
 0x5d6   : > { %v5247_v50 = vmax.f32 %v5246_v46, %v8919_v18  ;;  %v5237_v7 = vmax.f32 %v5236_v25, %v8883_v14  ;;  %v5252_v49 = vmax.f32 %v5251_v3, %v8939_v47  ;;  %v5242_v31 = vmax.f32 %v5241_v35, %v8905_v15  ;;  %v11237_v5 = vld [vmem:[#allocation17_spill] sm:$0xff]  ;;  %v11238_v46 = vld [vmem:[#allocation22_spill] sm:$0xff]  ;;  %v11240_v35 = vld [vmem:[#allocation23_spill] sm:$0xff]  ;;  %p6465_p3 = scmp.ne.s32.totalorder %s10273_s9, %s6464_s23  ;;  %s6468_s14 = sshll.u32 %s6578_s28, 4  ;;  %s6469_s14 = int_to_ptr.vmem [resolvable:$false] %s6468_s14 }
 0x5d7   : > { %v5262_v18 = vmax.f32 %v5261_v55, %v8973_v45  ;;  %v5271_v14 = vmax.f32 %v5270_v53, %v9003_v27  ;;  %v5257_v24 = vmax.f32 %v5256_v2, %v8953_v56  ;;  %v5275_v47 = vmax.f32 %v9015_v32, %v9019_v1  ;;  %v11224_v27 = vld [vmem:[#allocation38_spill] sm:$0xff]  ;;  %v11239_v3 = vld [vmem:[#allocation33_spill] sm:$0xff]  ;;  %v11245_v2 = vld [vmem:[#allocation39_spill] sm:$0xff]  ;;  %s6470_s21 = scalar_lea.vmem %s6469_s14, 32768  ;;  %p6471_p7 = scmp.lt.s32.totalorder %s10273_s9, %s6469_s14 }
 0x5d8   : > { %5248 = vmax.xlane.f32.xlu1 %v5247_v50  ;;  %5238 = vmax.xlane.f32.xlu0 %v5237_v7  ;;  %v5267_v34 = vmax.f32 %v5266_v52, %v8987_v51  ;;  %v5290_v61 = vmax.f32 %v9069_v59, %v9073_v20  ;;  %v5281_v4 = vmax.f32 %v5280_v37, %v9037_v57  ;;  %v11223_v51 = vld [vmem:[#allocation19_spill] sm:$0xff]  ;;  %v11230_v59 = vld [vmem:[#allocation18_spill] sm:$0xff]  ;;  %v11231_v20 = vld [vmem:[#allocation25_spill] sm:$0xff]  ;;  %vm5619_vm1 = vcmask 7168   ;;  %p6466_p4 = pnand %p6465_p3, %p6703_p6  ;;  %p6472_p9 = scmp.lt.s32.totalorder %s6470_s21, %s6464_s23 }
 0x5d9   : > { %v5272_v15 = vmax.f32 %v5271_v14, %v9007_v21  ;;  %v5276_v41 = vmax.f32 %v5275_v47, %v9017_v13  ;;  %v5285_v56 = vmax.f32 %v9049_v36, %v9053_v22  ;;  %v5300_v45 = vmax.f32 %v9100_v30, %v9104_v26  ;;  %v11225_v21 = vld [vmem:[#allocation35_spill] sm:$0xff]  ;;  %v11226_v13 = vld [vmem:[#allocation16_spill] sm:$0xff]  ;;  %v11241_v7 = vld [vmem:[#allocation34_spill] sm:$0xff]  ;;  %s10271_s26 = scalar_lea.hbm %s11425_s12, %s6083_s7 }
 0x5da   : > { %v5291_v54 = vmax.f32 %v5290_v61, %v9071_v11  ;;  %v5295_v40 = vmax.f32 %v9083_v42, %v9087_v6  ;;  %v5282_v0 = vmax.f32 %v5281_v4, %v11222_v29  ;;  %v11228_v57 = vld [vmem:[#allocation27_spill] sm:$0xff]  ;;  %v11229_v36 = vld [vmem:[#allocation24_spill] sm:$0xff]  ;;  %v11232_v42 = vld [vmem:[#allocation46_spill] sm:$0xff]  ;;  %v5320_v25 = vmax.f32 %v11238_v46, %v11237_v5  ;;  %p6467_p5 = pneg %p6466_p4  ;;  %p6473_p10 = por %p6472_p9, %p6471_p7 }
 0x5db   : > { %v5277_v58 = vmax.f32 %v5276_v41, %v11223_v51  ;;  %v5286_v43 = vmax.f32 %v5285_v56, %v11224_v27  ;;  %v5301_v32 = vmax.f32 %v5300_v45, %v11225_v21  ;;  %v5310_v12 = vmax.f32 %v11228_v57, %v11227_v44  ;;  %v11233_v30 = vld [vmem:[#allocation36_spill] sm:$0xff]  ;;  %v11242_v53 = vld [vmem:[#allocation54_spill] sm:$0xff]  ;;  %v11251_v41 = vld [vmem:[#allocation49_spill] sm:$0xff] }
 0x5dc   : > { %5253 = vmax.xlane.f32.xlu1 %v5252_v49  ;;  %5243 = vmax.xlane.f32.xlu0 %v5242_v31  ;;  %v5296_v1 = vmax.f32 %v5295_v40, %v11226_v13  ;;  %v5292_v22 = vmax.f32 %v5291_v54, %v11229_v36  ;;  %v5305_v6 = vmax.f32 %v11232_v42, %v11231_v20  ;;  %v11244_v31 = vld [vmem:[#allocation55_spill] sm:$0xff]  ;;  %v11246_v14 = vld [vmem:[#allocation26_spill] sm:$0xff]  ;;  %v11250_v4 = vld [vmem:[#allocation28_spill] sm:$0xff]  ;;  %p6474_p11 = pnand %p6473_p10, %p6467_p5 }
 0x5dd   : > { %v5287_v11 = vmax.f32 %v5286_v43, %v11230_v59  ;;  %v5302_v26 = vmax.f32 %v5301_v32, %v11233_v30  ;;  %v5311_v19 = vmax.f32 %v5310_v12, %v11235_v38  ;;  %v5315_v50 = vmax.f32 %v11240_v35, %v11239_v3  ;;  %v11248_v47 = vld [vmem:[#allocation14_spill] sm:$0xff]  ;;  %v11252_v54 = vld [vmem:[#allocation41_spill] sm:$0xff]  ;;  %v11253_v45 = vld [vmem:[#allocation43_spill] sm:$0xff] }
 0x5de   : > { %v5297_v63 = vmax.f32 %v5296_v1, %v11234_v62  ;;  %v5306_v10 = vmax.f32 %v5305_v6, %v11236_v48  ;;  %v5330_v49 = vmax.f32 %v11243_v39, %v11242_v53  ;;  %v5340_v56 = vmax.f32 %v11251_v41, %v11250_v4  ;;  %v11254_v29 = vld [vmem:[#allocation20_spill] sm:$0xff]  ;;  %v11255_v51 = vld [vmem:[#allocation45_spill] sm:$0xff]  ;;  %v11257_v21 = vld [vmem:[#allocation50_spill] sm:$0xff] }
 0x5df   : > { %v5312_v55 = vmax.f32 %v5311_v19, %v11241_v7  ;;  %v5335_v40 = vmax.f32 %v11253_v45, %v11252_v54  ;;  %v11256_v27 = vld [vmem:[#allocation44_spill] sm:$0xff]  ;;  %v11259_v44 = vld [vmem:[#allocation61_spill] sm:$0xff]  ;;  %v11260_v57 = vld [vmem:[#allocation59_spill] sm:$0xff] }
 0x5e0   : > { %5263 = vmax.xlane.f32.xlu1 %v5262_v18  ;;  %5258 = vmax.xlane.f32.xlu0 %v5257_v24  ;;  %v5325_v18 = vmax.f32 %v11245_v2, %v11244_v31  ;;  %v5307_v52 = vmax.f32 %v5306_v10, %v11246_v14  ;;  %v11247_v24 = vld [vmem:[#allocation30_spill] sm:$0xff]  ;;  %v5341_v32 = vmax.f32 %v5340_v56, %v11257_v21  ;;  %v11258_v13 = vld [vmem:[#allocation40_spill] sm:$0xff]  ;;  %v11263_v20 = vld [vmem:[#allocation51_spill] sm:$0xff] }
 0x5e1   : > { %v5321_v37 = vmax.f32 %v5320_v25, %v11247_v24  ;;  %v5336_v1 = vmax.f32 %v5335_v40, %v11258_v13  ;;  %v5350_v12 = vmax.f32 %v11260_v57, %v11259_v44  ;;  %v11261_v36 = vld [vmem:[#allocation42_spill] sm:$0xff]  ;;  %v11262_v59 = vld [vmem:[#allocation56_spill] sm:$0xff]  ;;  %v11264_v42 = vld [vmem:[#allocation57_spill] sm:$0xff] }
 0x5e2   : > { %v5326_v43 = vmax.f32 %v5325_v18, %v11256_v27  ;;  %v5345_v6 = vmax.f32 %v11264_v42, %v11263_v20  ;;  %v11265_v30 = vld [vmem:[#allocation15_spill] sm:$0xff]  ;;  %v11266_v62 = vld [vmem:[#allocation48_spill] sm:$0xff]  ;;  %v11268_v48 = vld [vmem:[#allocation58_spill] sm:$0xff] }
 0x5e3   : > { %v11267_v38 = vld [vmem:[#allocation60_spill] sm:$0xff]  ;;  %v11269_v5 = vld [vmem:[#allocation69_spill] sm:$0xff]  ;;  %v11270_v46 = vld [vmem:[#allocation67_spill] sm:$0xff] }
 0x5e4   : > { %5273 = vmax.xlane.f32.xlu1 %v5272_v15  ;;  %5268 = vmax.xlane.f32.xlu0 %v5267_v34  ;;  %v5316_v15 = vmax.f32 %v5315_v50, %v11248_v47  ;;  %v11249_v34 = vld [vmem:[#allocation53_spill] sm:$0xff]  ;;  %v5351_v19 = vmax.f32 %v5350_v12, %v11267_v38  ;;  %v5346_v10 = vmax.f32 %v5345_v6, %v11268_v48  ;;  %v11272_v35 = vld [vmem:[#allocation63_spill] sm:$0xff]  ;;  %v11273_v7 = vld [vmem:[#allocation62_spill] sm:$0xff] }
 0x5e5   : > { %v5331_v61 = vmax.f32 %v5330_v49, %v11249_v34  ;;  %v5360_v25 = vmax.f32 %v11270_v46, %v11269_v5  ;;  %v11271_v3 = vld [vmem:[#allocation65_spill] sm:$0xff]  ;;  %v11275_v39 = vld [vmem:[#allocation75_spill] sm:$0xff]  ;;  %v11278_v14 = vld [vmem:[#allocation52_spill] sm:$0xff] }
 0x5e6   : > { %v5355_v50 = vmax.f32 %v11272_v35, %v11271_v3  ;;  %v11274_v53 = vld [vmem:[#allocation77_spill] sm:$0xff]  ;;  %v11277_v2 = vld [vmem:[#allocation71_spill] sm:$0xff]  ;;  %v11279_v24 = vld [vmem:[#allocation68_spill] sm:$0xff] }
 0x5e7   : > { %v5370_v49 = vmax.f32 %v11275_v39, %v11274_v53  ;;  %v11276_v31 = vld [vmem:[#allocation73_spill] sm:$0xff]  ;;  %v11280_v47 = vld [vmem:[#allocation64_spill] sm:$0xff]  ;;  %v11283_v41 = vld [vmem:[#allocation83_spill] sm:$0xff] }
 0x5e8   : > { %5283 = vmax.xlane.f32.xlu1 %v5282_v0  ;;  %5278 = vmax.xlane.f32.xlu0 %v5277_v58  ;;  %v5322_v0 = vmax.f32 %v5321_v37, %v11254_v29  ;;  %v5317_v58 = vmax.f32 %v5316_v15, %v11255_v51  ;;  %v5365_v18 = vmax.f32 %v11277_v2, %v11276_v31  ;;  %v11281_v34 = vld [vmem:[#allocation76_spill] sm:$0xff]  ;;  %v11282_v4 = vld [vmem:[#allocation85_spill] sm:$0xff]  ;;  %v11285_v45 = vld [vmem:[#allocation79_spill] sm:$0xff] }
 0x5e9   : > { %v5361_v37 = vmax.f32 %v5360_v25, %v11279_v24  ;;  %v5356_v15 = vmax.f32 %v5355_v50, %v11280_v47  ;;  %v5380_v56 = vmax.f32 %v11283_v41, %v11282_v4  ;;  %v11284_v54 = vld [vmem:[#allocation81_spill] sm:$0xff]  ;;  %v11286_v29 = vld [vmem:[#allocation70_spill] sm:$0xff]  ;;  %v11288_v27 = vld [vmem:[#allocation72_spill] sm:$0xff] }
 0x5ea   : > { %v5375_v40 = vmax.f32 %v11285_v45, %v11284_v54  ;;  %v11287_v51 = vld [vmem:[#allocation66_spill] sm:$0xff]  ;;  %v11289_v21 = vld [vmem:[#allocation84_spill] sm:$0xff]  ;;  %v11291_v44 = vld [vmem:[#allocation93_spill] sm:$0xff] }
 0x5eb   : > { %v11290_v13 = vld [vmem:[#allocation80_spill] sm:$0xff]  ;;  %v11292_v57 = vld [vmem:[#allocation91_spill] sm:$0xff]  ;;  %v11295_v20 = vld [vmem:[#allocation89_spill] sm:$0xff] }
 0x5ec   : > { %5293 = vmax.xlane.f32.xlu1 %v5292_v22  ;;  %5288 = vmax.xlane.f32.xlu0 %v5287_v11  ;;  %v5332_v22 = vmax.f32 %v5331_v61, %v11261_v36  ;;  %v5327_v11 = vmax.f32 %v5326_v43, %v11262_v59  ;;  %v5371_v61 = vmax.f32 %v5370_v49, %v11281_v34  ;;  %v11293_v36 = vld [vmem:[#allocation78_spill] sm:$0xff]  ;;  %v11296_v42 = vld [vmem:[#allocation87_spill] sm:$0xff]  ;;  %v11299_v38 = vld [vmem:[#allocation92_spill] sm:$0xff] }
 0x5ed   : > { %v5366_v43 = vmax.f32 %v5365_v18, %v11288_v27  ;;  %v5390_v12 = vmax.f32 %v11292_v57, %v11291_v44  ;;  %v11294_v59 = vld [vmem:[#allocation74_spill] sm:$0xff]  ;;  %v5385_v6 = vmax.f32 %v11296_v42, %v11295_v20  ;;  %v11300_v48 = vld [vmem:[#allocation88_spill] sm:$0xff]  ;;  %v11301_v5 = vld [vmem:[#allocation101_spill] sm:$0xff] }
 0x5ee   : > { %v11302_v46 = vld [vmem:[#allocation99_spill] sm:$0xff]  ;;  %v11303_v3 = vld [vmem:[#allocation97_spill] sm:$0xff]  ;;  %v11311_v24 = vld [vmem:[#allocation100_spill] sm:$0xff] }
 0x5ef   : > { %v5400_v25 = vmax.f32 %v11302_v46, %v11301_v5  ;;  %v11304_v35 = vld [vmem:[#allocation95_spill] sm:$0xff]  ;;  %v11306_v53 = vld [vmem:[#allocation109_spill] sm:$0xff]  ;;  %v11312_v47 = vld [vmem:[#allocation96_spill] sm:$0xff] }
 0x5f0   : > { %5303 = vmax.xlane.f32.xlu1 %v5302_v26  ;;  %5298 = vmax.xlane.f32.xlu0 %v5297_v63  ;;  %v5342_v26 = vmax.f32 %v5341_v32, %v11265_v30  ;;  %v5337_v63 = vmax.f32 %v5336_v1, %v11266_v62  ;;  %v5381_v32 = vmax.f32 %v5380_v56, %v11289_v21  ;;  %v11297_v30 = vld [vmem:[#allocation86_spill] sm:$0xff]  ;;  %v11307_v39 = vld [vmem:[#allocation107_spill] sm:$0xff]  ;;  %v11308_v31 = vld [vmem:[#allocation105_spill] sm:$0xff] }
 0x5f1   : > { %v5376_v1 = vmax.f32 %v5375_v40, %v11290_v13  ;;  %v11298_v62 = vld [vmem:[#allocation82_spill] sm:$0xff]  ;;  %v5395_v50 = vmax.f32 %v11304_v35, %v11303_v3  ;;  %v5410_v49 = vmax.f32 %v11307_v39, %v11306_v53  ;;  %v11309_v2 = vld [vmem:[#allocation103_spill] sm:$0xff]  ;;  %v11313_v34 = vld [vmem:[#allocation108_spill] sm:$0xff] }
 0x5f2   : > { %v5405_v18 = vmax.f32 %v11309_v2, %v11308_v31  ;;  %v11314_v4 = vld [vmem:[#allocation117_spill] sm:$0xff]  ;;  %v11315_v41 = vld [vmem:[#allocation115_spill] sm:$0xff]  ;;  %v11320_v27 = vld [vmem:[#allocation104_spill] sm:$0xff] }
 0x5f3   : > { %v5420_v56 = vmax.f32 %v11315_v41, %v11314_v4  ;;  %v11316_v54 = vld [vmem:[#allocation113_spill] sm:$0xff]  ;;  %v11317_v45 = vld [vmem:[#allocation111_spill] sm:$0xff]  ;;  %v11321_v21 = vld [vmem:[#allocation116_spill] sm:$0xff] }
 0x5f4   : > { %5313 = vmax.xlane.f32.xlu1 %v5312_v55  ;;  %5308 = vmax.xlane.f32.xlu0 %v5307_v52  ;;  %v5352_v55 = vmax.f32 %v5351_v19, %v11273_v7  ;;  %v5347_v52 = vmax.f32 %v5346_v10, %v11278_v14  ;;  %v5391_v19 = vmax.f32 %v5390_v12, %v11299_v38  ;;  %v11305_v7 = vld [vmem:[#allocation94_spill] sm:$0xff]  ;;  %v11322_v13 = vld [vmem:[#allocation112_spill] sm:$0xff]  ;;  %v11323_v44 = vld [vmem:[#allocation125_spill] sm:$0xff] }
 0x5f5   : > { %v5386_v10 = vmax.f32 %v5385_v6, %v11300_v48  ;;  %v11310_v14 = vld [vmem:[#allocation90_spill] sm:$0xff]  ;;  %v5415_v40 = vmax.f32 %v11317_v45, %v11316_v54  ;;  %v11324_v57 = vld [vmem:[#allocation123_spill] sm:$0xff]  ;;  %v11327_v20 = vld [vmem:[#allocation121_spill] sm:$0xff] }
 0x5f6   : > { %v5430_v12 = vmax.f32 %v11324_v57, %v11323_v44  ;;  %v11328_v42 = vld [vmem:[#allocation119_spill] sm:$0xff]  ;;  %v11331_v38 = vld [vmem:[#allocation124_spill] sm:$0xff]  ;;  %v11333_v5 = vld [vmem:[#allocation133_spill] sm:$0xff] }
 0x5f7   : > { %v5425_v6 = vmax.f32 %v11328_v42, %v11327_v20  ;;  %v11332_v48 = vld [vmem:[#allocation120_spill] sm:$0xff]  ;;  %v11334_v46 = vld [vmem:[#allocation131_spill] sm:$0xff]  ;;  %v11335_v3 = vld [vmem:[#allocation129_spill] sm:$0xff] }
 0x5f8   : > { %5323 = vmax.xlane.f32.xlu1 %v5322_v0  ;;  %5318 = vmax.xlane.f32.xlu0 %v5317_v58  ;;  %v5362_v0 = vmax.f32 %v5361_v37, %v11286_v29  ;;  %v5357_v58 = vmax.f32 %v5356_v15, %v11287_v51  ;;  %v5401_v37 = vmax.f32 %v5400_v25, %v11311_v24  ;;  %v11318_v29 = vld [vmem:[#allocation102_spill] sm:$0xff]  ;;  %v11336_v35 = vld [vmem:[#allocation127_spill] sm:$0xff]  ;;  %v11338_v53 = vld [vmem:[#allocation141_spill] sm:$0xff] }
 0x5f9   : > { %v5396_v15 = vmax.f32 %v5395_v50, %v11312_v47  ;;  %v11319_v51 = vld [vmem:[#allocation98_spill] sm:$0xff]  ;;  %v5440_v25 = vmax.f32 %v11334_v46, %v11333_v5  ;;  %v5435_v50 = vmax.f32 %v11336_v35, %v11335_v3  ;;  %v11339_v39 = vld [vmem:[#allocation139_spill] sm:$0xff]  ;;  %v11340_v31 = vld [vmem:[#allocation137_spill] sm:$0xff] }
 0x5fa   : > { %v11341_v2 = vld [vmem:[#allocation135_spill] sm:$0xff]  ;;  %v11343_v24 = vld [vmem:[#allocation132_spill] sm:$0xff]  ;;  %v11346_v4 = vld [vmem:[#allocation149_spill] sm:$0xff] }
 0x5fb   : > { %v11344_v47 = vld [vmem:[#allocation128_spill] sm:$0xff]  ;;  %v11347_v41 = vld [vmem:[#allocation147_spill] sm:$0xff]  ;;  %v11348_v54 = vld [vmem:[#allocation145_spill] sm:$0xff] }
 0x5fc   : > { %5333 = vmax.xlane.f32.xlu1 %v5332_v22  ;;  %5328 = vmax.xlane.f32.xlu0 %v5327_v11  ;;  %v5372_v22 = vmax.f32 %v5371_v61, %v11293_v36  ;;  %v5367_v11 = vmax.f32 %v5366_v43, %v11294_v59  ;;  %v5411_v61 = vmax.f32 %v5410_v49, %v11313_v34  ;;  %v11325_v36 = vld [vmem:[#allocation110_spill] sm:$0xff]  ;;  %v11345_v34 = vld [vmem:[#allocation140_spill] sm:$0xff]  ;;  %v11349_v45 = vld [vmem:[#allocation143_spill] sm:$0xff] }
 0x5fd   : > { %v5406_v43 = vmax.f32 %v5405_v18, %v11320_v27  ;;  %v11326_v59 = vld [vmem:[#allocation106_spill] sm:$0xff]  ;;  %v5450_v49 = vmax.f32 %v11339_v39, %v11338_v53  ;;  %v5445_v18 = vmax.f32 %v11341_v2, %v11340_v31  ;;  %v11352_v27 = vld [vmem:[#allocation136_spill] sm:$0xff]  ;;  %v11359_v20 = vld [vmem:[#allocation153_spill] sm:$0xff] }
 0x5fe   : > { %v11355_v44 = vld [vmem:[#allocation144_spill] sm:$0xff]  ;;  %v11360_v42 = vld [vmem:[#allocation151_spill] sm:$0xff]  ;;  %v11367_v3 = vld [vmem:[#allocation161_spill] sm:$0xff] }
 0x5ff   : > { %v11366_v46 = vld [vmem:[#allocation152_spill] sm:$0xff]  ;;  %v11368_v35 = vld [vmem:[#allocation159_spill] sm:$0xff]  ;;  %v11370_v53 = vld [vmem:[#allocation173_spill] sm:$0xff] }
 0x600   : > { %5343 = vmax.xlane.f32.xlu1 %v5342_v26  ;;  %5338 = vmax.xlane.f32.xlu0 %v5337_v63  ;;  %v5382_v26 = vmax.f32 %v5381_v32, %v11297_v30  ;;  %v5377_v63 = vmax.f32 %v5376_v1, %v11298_v62  ;;  %v5421_v32 = vmax.f32 %v5420_v56, %v11321_v21  ;;  %v11329_v30 = vld [vmem:[#allocation118_spill] sm:$0xff]  ;;  %v11371_v39 = vld [vmem:[#allocation171_spill] sm:$0xff]  ;;  %v11372_v31 = vld [vmem:[#allocation169_spill] sm:$0xff] }
 0x601   : > { %v5416_v1 = vmax.f32 %v5415_v40, %v11322_v13  ;;  %v11330_v62 = vld [vmem:[#allocation114_spill] sm:$0xff]  ;;  %v5460_v56 = vmax.f32 %v11347_v41, %v11346_v4  ;;  %v5455_v40 = vmax.f32 %v11349_v45, %v11348_v54  ;;  %v11354_v13 = vld [vmem:[#allocation148_spill] sm:$0xff]  ;;  %v11373_v2 = vld [vmem:[#allocation167_spill] sm:$0xff] }
 0x602   : > { %v11353_v21 = vld [vmem:[#allocation142_spill] sm:$0xff]  ;;  %v11378_v4 = vld [vmem:[#allocation168_spill] sm:$0xff]  ;;  %v11380_v54 = vld [vmem:[#allocation179_spill] sm:$0xff] }
 0x603   : > { %v5456_v57 = vmax.f32 %v5455_v40, %v11355_v44  ;;  %v11381_v40 = vld [vmem:[#allocation166_spill] sm:$0xff]  ;;  %v11387_v44 = vld [vmem:[#allocation180_spill] sm:$0xff] }
 0x604   : > { %5353 = vmax.xlane.f32.xlu1 %v5352_v55  ;;  %5348 = vmax.xlane.f32.xlu0 %v5347_v52  ;;  %v5392_v55 = vmax.f32 %v5391_v19, %v11305_v7  ;;  %v5387_v52 = vmax.f32 %v5386_v10, %v11310_v14  ;;  %v5431_v19 = vmax.f32 %v5430_v12, %v11331_v38  ;;  %v11337_v7 = vld [vmem:[#allocation126_spill] sm:$0xff]  ;;  %v11363_v38 = vld [vmem:[#allocation165_spill] sm:$0xff] }
 0x605   : > { %v5426_v10 = vmax.f32 %v5425_v6, %v11332_v48  ;;  %v11342_v14 = vld [vmem:[#allocation122_spill] sm:$0xff]  ;;  %v5465_v6 = vmax.f32 %v11360_v42, %v11359_v20  ;;  %v11391_v20 = vld [vmem:[#allocation185_spill] sm:$0xff]  ;;  %v11392_v42 = vld [vmem:[#allocation183_spill] sm:$0xff] }
 0x606   : > { %v11356_v12 = vld [vmem:[#allocation138_spill] sm:$0xff] }
 0x608   : > { %5363 = vmax.xlane.f32.xlu1 %v5362_v0  ;;  %5358 = vmax.xlane.f32.xlu0 %v5357_v58  ;;  %v5402_v0 = vmax.f32 %v5401_v37, %v11318_v29  ;;  %v5397_v58 = vmax.f32 %v5396_v15, %v11319_v51  ;;  %v5441_v37 = vmax.f32 %v5440_v25, %v11343_v24  ;;  %v11350_v29 = vld [vmem:[#allocation134_spill] sm:$0xff] }
 0x609   : > { %v5436_v15 = vmax.f32 %v5435_v50, %v11344_v47  ;;  %v11351_v51 = vld [vmem:[#allocation130_spill] sm:$0xff]  ;;  %v5466_v25 = vmax.f32 %v5465_v6, %v11366_v46  ;;  %v5475_v50 = vmax.f32 %v11368_v35, %v11367_v3  ;;  %v11376_v47 = vld [vmem:[#allocation160_spill] sm:$0xff]  ;;  %v5505_v6 = vmax.f32 %v11392_v42, %v11391_v20 }
 0x60a   : > { %v11375_v24 = vld [vmem:[#allocation154_spill] sm:$0xff]  ;;  %v11400_v35 = vld [vmem:[#allocation184_spill] sm:$0xff] }
 0x60b   : > { %v11422_v20 = vld [vmem:[#allocation210_spill] sm:$0xff] }
 0x60c   : > { %5373 = vmax.xlane.f32.xlu1 %v5372_v22  ;;  %5368 = vmax.xlane.f32.xlu0 %v5367_v11  ;;  %v5412_v22 = vmax.f32 %v5411_v61, %v11325_v36  ;;  %v5407_v11 = vmax.f32 %v5406_v43, %v11326_v59  ;;  %v5451_v61 = vmax.f32 %v5450_v49, %v11345_v34  ;;  %v11358_v59 = vld [vmem:[#allocation155_spill] sm:$0xff]  ;;  %v11377_v34 = vld [vmem:[#allocation172_spill] sm:$0xff] }
 0x60d   : > { %v5446_v43 = vmax.f32 %v5445_v18, %v11352_v27  ;;  %v5490_v49 = vmax.f32 %v11371_v39, %v11370_v53  ;;  %v5485_v18 = vmax.f32 %v11373_v2, %v11372_v31  ;;  %v11384_v27 = vld [vmem:[#allocation175_spill] sm:$0xff]  ;;  %v11402_v53 = vld [vmem:[#allocation205_spill] sm:$0xff] }
 0x60e   : > { %v11403_v39 = vld [vmem:[#allocation203_spill] sm:$0xff]  ;;  %v11404_v31 = vld [vmem:[#allocation201_spill] sm:$0xff] }
 0x60f   : > { %v5447_v36 = vmax.f32 %v5446_v43, %v11356_v12  ;;  %v5486_v41 = vmax.f32 %v5485_v18, %v11378_v4  ;;  %v11388_v12 = vld [vmem:[#allocation176_spill] sm:$0xff]  ;;  %v11405_v2 = vld [vmem:[#allocation199_spill] sm:$0xff] }
 0x610   : > { %5383 = vmax.xlane.f32.xlu1 %v5382_v26  ;;  %5378 = vmax.xlane.f32.xlu0 %v5377_v63  ;;  %v5422_v26 = vmax.f32 %v5421_v32, %v11329_v30  ;;  %v5417_v63 = vmax.f32 %v5416_v1, %v11330_v62  ;;  %v5452_v32 = vmax.f32 %v5451_v61, %v11353_v21  ;;  %v11361_v30 = vld [vmem:[#allocation150_spill] sm:$0xff]  ;;  %v11410_v4 = vld [vmem:[#allocation200_spill] sm:$0xff] }
 0x611   : > { %v5461_v1 = vmax.f32 %v5460_v56, %v11354_v13  ;;  %v11362_v62 = vld [vmem:[#allocation146_spill] sm:$0xff]  ;;  %v5491_v61 = vmax.f32 %v5490_v49, %v11377_v34  ;;  %v11379_v56 = vld [vmem:[#allocation181_spill] sm:$0xff]  ;;  %v5530_v49 = vmax.f32 %v11403_v39, %v11402_v53  ;;  %v5525_v18 = vmax.f32 %v11405_v2, %v11404_v31  ;;  %v11409_v34 = vld [vmem:[#allocation204_spill] sm:$0xff] }
 0x612   : > { %v5500_v45 = vmax.f32 %v11380_v54, %v11379_v56  ;;  %v11385_v21 = vld [vmem:[#allocation174_spill] sm:$0xff]  ;;  %v11411_v56 = vld [vmem:[#allocation211_spill] sm:$0xff] }
 0x613   : > { %v11386_v13 = vld [vmem:[#allocation170_spill] sm:$0xff]  ;;  %v5540_v54 = vmax.f32 %v11411_v56, %v9776_v16 }
 0x614   : > { %5393 = vmax.xlane.f32.xlu1 %v5392_v55  ;;  %5388 = vmax.xlane.f32.xlu0 %v5387_v52  ;;  %v5432_v55 = vmax.f32 %v5431_v19, %v11337_v7  ;;  %v5427_v52 = vmax.f32 %v5426_v10, %v11342_v14  ;;  %v11364_v19 = vld [vmem:[#allocation163_spill] sm:$0xff]  ;;  %v11365_v10 = vld [vmem:[#allocation156_spill] sm:$0xff]  ;;  %v11374_v14 = vld [vmem:[#allocation158_spill] sm:$0xff] }
 0x615   : > { %v5480_v48 = vmax.f32 %v11364_v19, %v11363_v38  ;;  %v11369_v7 = vld [vmem:[#allocation164_spill] sm:$0xff]  ;;  %v11396_v19 = vld [vmem:[#allocation193_spill] sm:$0xff] }
 0x618   : > { %5403 = vmax.xlane.f32.xlu1 %v5402_v0  ;;  %5398 = vmax.xlane.f32.xlu0 %v5397_v58  ;;  %v5442_v0 = vmax.f32 %v5441_v37, %v11350_v29  ;;  %v5437_v58 = vmax.f32 %v5436_v15, %v11351_v51  ;;  %v5467_v37 = vmax.f32 %v5466_v25, %v11375_v24  ;;  %v11399_v25 = vld [vmem:[#allocation188_spill] sm:$0xff]  ;;  %v11407_v24 = vld [vmem:[#allocation186_spill] sm:$0xff] }
 0x619   : > { %v5476_v15 = vmax.f32 %v5475_v50, %v11376_v47  ;;  %v5506_v50 = vmax.f32 %v5505_v6, %v11400_v35  ;;  %v11408_v47 = vld [vmem:[#allocation192_spill] sm:$0xff] }
 0x61c   : > { %5413 = vmax.xlane.f32.xlu1 %v5412_v22  ;;  %5408 = vmax.xlane.f32.xlu0 %v5407_v11  ;;  %v11357_v22 = vld [vmem:[#allocation157_spill] sm:$0xff] }
 0x61d   : > { %v5470_v11 = vmax.f32 %v11358_v59, %v11357_v22  ;;  %v11389_v22 = vld [vmem:[#allocation189_spill] sm:$0xff]  ;;  %v11390_v59 = vld [vmem:[#allocation187_spill] sm:$0xff] }
 0x61f   : > { %v5471_v5 = vmax.f32 %v5470_v11, %v11365_v10  ;;  %v5510_v11 = vmax.f32 %v11390_v59, %v11389_v22  ;;  %v11421_v59 = vld [vmem:[#allocation213_spill] sm:$0xff] }
 0x620   : > { %5423 = vmax.xlane.f32.xlu1 %v5422_v26  ;;  %5418 = vmax.xlane.f32.xlu0 %v5417_v63  ;;  %v5462_v26 = vmax.f32 %v5461_v1, %v11361_v30  ;;  %v5457_v63 = vmax.f32 %v5456_v57, %v11362_v62  ;;  %v5487_v1 = vmax.f32 %v5486_v41, %v11386_v13  ;;  %v11393_v30 = vld [vmem:[#allocation182_spill] sm:$0xff]  ;;  %v11394_v62 = vld [vmem:[#allocation197_spill] sm:$0xff] }
 0x621   : > { %v5501_v57 = vmax.f32 %v5500_v45, %v11387_v44  ;;  %v5511_v3 = vmax.f32 %v5510_v11, %v11399_v25  ;;  %v5526_v41 = vmax.f32 %v5525_v18, %v11410_v4  ;;  %v11412_v45 = vld [vmem:[#allocation198_spill] sm:$0xff] }
 0x624   : > { %5433 = vmax.xlane.f32.xlu1 %v5432_v55  ;;  %5428 = vmax.xlane.f32.xlu0 %v5427_v52  ;;  %v5481_v55 = vmax.f32 %v5480_v48, %v11369_v7  ;;  %v5472_v52 = vmax.f32 %v5471_v5, %v11374_v14  ;;  %v11397_v48 = vld [vmem:[#allocation191_spill] sm:$0xff]  ;;  %v11398_v5 = vld [vmem:[#allocation178_spill] sm:$0xff]  ;;  %v11401_v7 = vld [vmem:[#allocation196_spill] sm:$0xff] }
 0x625   : > { %v5515_v10 = vmax.f32 %v11397_v48, %v11396_v19  ;;  %v11406_v14 = vld [vmem:[#allocation190_spill] sm:$0xff] }
 0x626   : > { %v5482_v29 = vmax.f32 %v5481_v55, %v11381_v40 }
 0x628   : > { %5443 = vmax.xlane.f32.xlu1 %v5442_v0  ;;  %5438 = vmax.xlane.f32.xlu0 %v5437_v58  ;;  %v11382_v0 = vld [vmem:[#allocation162_spill] sm:$0xff]  ;;  %v11383_v58 = vld [vmem:[#allocation177_spill] sm:$0xff] }
 0x629   : > { %v5477_v51 = vmax.f32 %v5476_v15, %v11382_v0  ;;  %v5495_v43 = vmax.f32 %v11384_v27, %v11383_v58  ;;  %v5516_v15 = vmax.f32 %v5515_v10, %v11408_v47  ;;  %v11415_v58 = vld [vmem:[#allocation207_spill] sm:$0xff] }
 0x62c   : > { %5453 = vmax.xlane.f32.xlu1 %v5452_v32  ;;  %5448 = vmax.xlane.f32.xlu0 %v5447_v36  ;;  %v5492_v32 = vmax.f32 %v5491_v61, %v11385_v21  ;;  %v5496_v36 = vmax.f32 %v5495_v43, %v11388_v12  ;;  %v5531_v61 = vmax.f32 %v5530_v49, %v11409_v34  ;;  %v11416_v43 = vld [vmem:[#allocation206_spill] sm:$0xff] }
 0x62d   : > { %v5550_v12 = vmax.f32 %v9800_v60, %v9804_v23 }
 0x62e   : > { %v5497_v46 = vmax.f32 %v5496_v36, %v11398_v5  ;;  %v5532_v21 = vmax.f32 %v5531_v61, %v11416_v43  ;;  %v11420_v36 = vld [vmem:[#allocation214_spill] sm:$0xff] }
 0x62f   : > { %v5545_v22 = vmax.f32 %v11420_v36, %v9790_v17  ;;  %v5551_v6 = vmax.f32 %v5550_v12, %v9802_v8  ;;  %v5173_v17 = vld [vmem:[%s6766_s20 + $0x10] sm:$0xff] }
 0x630   : > { %5463 = vmax.xlane.f32.xlu1 %v5462_v26  ;;  %5458 = vmax.xlane.f32.xlu0 %v5457_v63  ;;  %v5502_v26 = vmax.f32 %v5501_v57, %v11393_v30  ;;  %v11395_v63 = vld [vmem:[#allocation195_spill] sm:$0xff]  ;;  %v11419_v57 = vld [vmem:[#allocation208_spill] sm:$0xff] }
 0x631   : > { %v5520_v38 = vmax.f32 %v11395_v63, %v11394_v62  ;;  %v5546_v30 = vmax.f32 %v5545_v22, %v9788_v9  ;;  %v5552_v60 = vmax.f32 %v5551_v6, %v9806_v28 }
 0x633   : > { %v5521_v55 = vmax.f32 %v5520_v38, %v11401_v7  ;;  %v5547_v23 = vmax.f32 %v5546_v30, %v9792_v33 }
 0x634   : > { %5473 = vmax.xlane.f32.xlu1 %v5472_v52  ;;  %5468 = vmax.xlane.f32.xlu0 %v5467_v37  ;;  %v5512_v52 = vmax.f32 %v5511_v3, %v11406_v14  ;;  %v5507_v37 = vmax.f32 %v5506_v50, %v11407_v24 }
 0x635   : > { %v5522_v40 = vmax.f32 %v5521_v55, %v11412_v45 }
 0x638   : > { %5483 = vmax.xlane.f32.xlu1 %v5482_v29  ;;  %5478 = vmax.xlane.f32.xlu0 %v5477_v51  ;;  %v11413_v29 = vld [vmem:[#allocation194_spill] sm:$0xff]  ;;  %v11414_v51 = vld [vmem:[#allocation209_spill] sm:$0xff] }
 0x639   : > { %v5517_v0 = vmax.f32 %v5516_v15, %v11413_v29  ;;  %v5535_v27 = vmax.f32 %v11415_v58, %v11414_v51 }
 0x63b   : > { %v5536_v16 = vmax.f32 %v5535_v27, %v11419_v57 }
 0x63c   : > { %5493 = vmax.xlane.f32.xlu1 %v5492_v32  ;;  %5488 = vmax.xlane.f32.xlu0 %v5487_v1  ;;  %v11417_v32 = vld [vmem:[#allocation202_spill] sm:$0xff]  ;;  %v11418_v1 = vld [vmem:[#allocation212_spill] sm:$0xff] }
 0x63d   : > { %v5527_v13 = vmax.f32 %v5526_v41, %v11417_v32  ;;  %v5541_v44 = vmax.f32 %v5540_v54, %v11418_v1  ;;  %v5537_v42 = vmax.f32 %v5536_v16, %v11422_v20 }
 0x63f   : > { %v5542_v11 = vmax.f32 %v5541_v44, %v11421_v59 }
 0x640   : > { %5503 = vmax.xlane.f32.xlu1 %v5502_v26  ;;  %5498 = vmax.xlane.f32.xlu0 %v5497_v46  ;;  %v5171_v26 = vld [vmem:[%s6766_s20] sm:$0xff] }
 0x644   : > { %5513 = vmax.xlane.f32.xlu1 %v5512_v52  ;;  %5508 = vmax.xlane.f32.xlu0 %v5507_v37 }
 0x648   : > { %5523 = vmax.xlane.f32.xlu1 %v5522_v40  ;;  %5518 = vmax.xlane.f32.xlu0 %v5517_v0 }
 0x64c   : > { %5533 = vmax.xlane.f32.xlu1 %v5532_v21  ;;  %5528 = vmax.xlane.f32.xlu0 %v5527_v13 }
 0x650   : > { %5543 = vmax.xlane.f32.xlu1 %v5542_v11  ;;  %5538 = vmax.xlane.f32.xlu0 %v5537_v42 }
 0x654   : > { %5553 = vmax.xlane.f32.xlu1 %v5552_v60  ;;  %5548 = vmax.xlane.f32.xlu0 %v5547_v23 }
 0x661   : > { %v5249_v9 = vpop.xlane.xlu1 %5248  ;;  %v5239_v33 = vpop.xlane.xlu0 %5238 }
 0x662   : > { %v5557_v8 = vmax.f32 %v5173_v17, %v5249_v9  ;;  %v5555_v28 = vmax.f32 %v5171_v26, %v5239_v33 }
 0x663   : > { %6477 = shalt.err (!%p6474_p11)
}
 0x664   : > { %s6478_s30 = scalar_lea.hbm %s10271_s26, 16384  ;;  %s6482_s27 = scalar_lea.hbm %s11425_s12, 131072 }
 0x665   : > { %p6479_p12 = scmp.ne.s32.totalorder %s10271_s26, %s6478_s30  ;;  %p6483_p1 = scmp.lt.s32.totalorder %s10271_s26, %s11425_s12 }
 0x666   : > { %p6484_p2 = scmp.lt.s32.totalorder %s6482_s27, %s6478_s30 }
 0x667   : > { %p6480_p13 = pnand %p6479_p12, %p6703_p6 }
 0x668   : > { %p6485_p3 = por %p6484_p2, %p6483_p1 }
 0x669   : > { %p6481_p0 = pneg %p6480_p13 }
 0x66b   : > { %p6486_p4 = pnand %p6485_p3, %p6481_p0 }
 0x66d   : > { %6489 = shalt.err (!%p6486_p4)
}
 0x66e   : > { %s6579_s11 = smov 256   ;;  %s6580_s23 = smov 1024   ;;  %v5174_v62 = vld [vmem:[%s6766_s20 + $0x18] sm:$0xff]  ;;  %v5172_v63 = vld [vmem:[%s6766_s20 + $0x8] sm:$0xff]  ;;  %5622 = vst.msk [vmem:[%s6766_s20 + $0x10] sm:$0xff] %vm5619_vm1, %v5557_v8  ;;  %5620 = vst.msk [vmem:[%s6766_s20] sm:$0xff] %vm5619_vm1, %v5555_v28  ;;  %v5254_v38 = vpop.xlane.xlu1 %5253  ;;  %v5244_v19 = vpop.xlane.xlu0 %5243 }
 0x66f   : > { %s6581_s28 = smov 16   ;;  %v5558_v48 = vmax.f32 %v5174_v62, %v5254_v38  ;;  %v5556_v10 = vmax.f32 %v5172_v63, %v5244_v19  ;;  %v5176_v5 = vld [vmem:[%s6766_s20 + $0x28] sm:$0xff]  ;;  %v5175_v46 = vld [vmem:[%s6766_s20 + $0x20] sm:$0xff]  ;;  %v5178_v7 = vld [vmem:[%s6766_s20 + $0x38] sm:$0xff] }
 0x670   : > { %6214 = dma.vmem_to_hbm [thread:$0]  (%p6703_p6), %s10273_s9, 16384, %s10271_s26, %s10277_s17, %s6579_s11, %s6580_s23, %s6581_s28  }
 0x671   : > { %5623 = vst.msk [vmem:[%s6766_s20 + $0x18] sm:$0xff] %vm5619_vm1, %v5558_v48  ;;  %5621 = vst.msk [vmem:[%s6766_s20 + $0x8] sm:$0xff] %vm5619_vm1, %v5556_v10  ;;  %v5177_v55 = vld [vmem:[%s6766_s20 + $0x30] sm:$0xff]  ;;  %v5180_v2 = vld [vmem:[%s6766_s20 + $0x48] sm:$0xff] }
 0x672   : > { %v5264_v25 = vpop.xlane.xlu1 %5263  ;;  %v5259_v3 = vpop.xlane.xlu0 %5258  ;;  %v5179_v18 = vld [vmem:[%s6766_s20 + $0x40] sm:$0xff]  ;;  %v5182_v47 = vld [vmem:[%s6766_s20 + $0x58] sm:$0xff]  ;;  %v5181_v15 = vld [vmem:[%s6766_s20 + $0x50] sm:$0xff] }
 0x673   : > { %v5560_v35 = vmax.f32 %v5176_v5, %v5264_v25  ;;  %v5559_v50 = vmax.f32 %v5175_v46, %v5259_v3  ;;  %v5184_v56 = vld [vmem:[%s6766_s20 + $0x68] sm:$0xff]  ;;  %v5183_v54 = vld [vmem:[%s6766_s20 + $0x60] sm:$0xff]  ;;  %v5186_v51 = vld [vmem:[%s6766_s20 + $0x78] sm:$0xff] }
 0x674   : > { %v5185_v58 = vld [vmem:[%s6766_s20 + $0x70] sm:$0xff]  ;;  %v5188_v13 = vld [vmem:[%s6766_s20 + $0x88] sm:$0xff]  ;;  %v5187_v1 = vld [vmem:[%s6766_s20 + $0x80] sm:$0xff] }
 0x675   : > { %5625 = vst.msk [vmem:[%s6766_s20 + $0x28] sm:$0xff] %vm5619_vm1, %v5560_v35  ;;  %5624 = vst.msk [vmem:[%s6766_s20 + $0x20] sm:$0xff] %vm5619_vm1, %v5559_v50  ;;  %v5190_v36 = vld [vmem:[%s6766_s20 + $0x98] sm:$0xff]  ;;  %v5189_v22 = vld [vmem:[%s6766_s20 + $0x90] sm:$0xff] }
 0x676   : > { %v5274_v53 = vpop.xlane.xlu1 %5273  ;;  %v5269_v39 = vpop.xlane.xlu0 %5268  ;;  %v5192_v6 = vld [vmem:[%s6766_s20 + $0xa8] sm:$0xff]  ;;  %v5191_v30 = vld [vmem:[%s6766_s20 + $0xa0] sm:$0xff]  ;;  %v5194_v9 = vld [vmem:[%s6766_s20 + $0xb8] sm:$0xff] }
 0x677   : > { %v5562_v49 = vmax.f32 %v5178_v7, %v5274_v53  ;;  %v5561_v31 = vmax.f32 %v5177_v55, %v5269_v39  ;;  %v5193_v33 = vld [vmem:[%s6766_s20 + $0xb0] sm:$0xff]  ;;  %v5196_v38 = vld [vmem:[%s6766_s20 + $0xc8] sm:$0xff]  ;;  %v5195_v19 = vld [vmem:[%s6766_s20 + $0xc0] sm:$0xff] }
 0x678   : > { %v5198_v25 = vld [vmem:[%s6766_s20 + $0xd8] sm:$0xff]  ;;  %v5197_v3 = vld [vmem:[%s6766_s20 + $0xd0] sm:$0xff]  ;;  %v5200_v53 = vld [vmem:[%s6766_s20 + $0xe8] sm:$0xff] }
 0x679   : > { %5627 = vst.msk [vmem:[%s6766_s20 + $0x38] sm:$0xff] %vm5619_vm1, %v5562_v49  ;;  %5626 = vst.msk [vmem:[%s6766_s20 + $0x30] sm:$0xff] %vm5619_vm1, %v5561_v31  ;;  %v5199_v39 = vld [vmem:[%s6766_s20 + $0xe0] sm:$0xff] }
 0x67a   : > { %v5284_v14 = vpop.xlane.xlu1 %5283  ;;  %v5279_v52 = vpop.xlane.xlu0 %5278 }
 0x67b   : > { %v5564_v24 = vmax.f32 %v5180_v2, %v5284_v14  ;;  %v5563_v37 = vmax.f32 %v5179_v18, %v5279_v52  ;;  %v5202_v14 = vld [vmem:[%s6766_s20 + $0xf8] sm:$0xff]  ;;  %v5201_v52 = vld [vmem:[%s6766_s20 + $0xf0] sm:$0xff] }
 0x67d   : > { %5629 = vst.msk [vmem:[%s6766_s20 + $0x48] sm:$0xff] %vm5619_vm1, %v5564_v24  ;;  %5628 = vst.msk [vmem:[%s6766_s20 + $0x40] sm:$0xff] %vm5619_vm1, %v5563_v37 }
 0x67e   : > { %v5294_v34 = vpop.xlane.xlu1 %5293  ;;  %v5289_v61 = vpop.xlane.xlu0 %5288 }
 0x67f   : > { %v5566_v4 = vmax.f32 %v5182_v47, %v5294_v34  ;;  %v5565_v41 = vmax.f32 %v5181_v15, %v5289_v61  ;;  %v5204_v34 = vld [vmem:[%s6766_s20 + $0x108] sm:$0xff]  ;;  %v5203_v61 = vld [vmem:[%s6766_s20 + $0x100] sm:$0xff] }
 0x681   : > { %5631 = vst.msk [vmem:[%s6766_s20 + $0x58] sm:$0xff] %vm5619_vm1, %v5566_v4  ;;  %5630 = vst.msk [vmem:[%s6766_s20 + $0x50] sm:$0xff] %vm5619_vm1, %v5565_v41 }
 0x682   : > { %v5304_v45 = vpop.xlane.xlu1 %5303  ;;  %v5299_v40 = vpop.xlane.xlu0 %5298 }
 0x683   : > { %v5568_v29 = vmax.f32 %v5184_v56, %v5304_v45  ;;  %v5567_v0 = vmax.f32 %v5183_v54, %v5299_v40  ;;  %v5206_v45 = vld [vmem:[%s6766_s20 + $0x118] sm:$0xff]  ;;  %v5205_v40 = vld [vmem:[%s6766_s20 + $0x110] sm:$0xff] }
 0x685   : > { %5633 = vst.msk [vmem:[%s6766_s20 + $0x68] sm:$0xff] %vm5619_vm1, %v5568_v29  ;;  %5632 = vst.msk [vmem:[%s6766_s20 + $0x60] sm:$0xff] %vm5619_vm1, %v5567_v0 }
 0x686   : > { %v5314_v27 = vpop.xlane.xlu1 %5313  ;;  %v5309_v43 = vpop.xlane.xlu0 %5308 }
 0x687   : > { %v5570_v21 = vmax.f32 %v5186_v51, %v5314_v27  ;;  %v5569_v32 = vmax.f32 %v5185_v58, %v5309_v43  ;;  %v5208_v27 = vld [vmem:[%s6766_s20 + $0x128] sm:$0xff]  ;;  %v5207_v43 = vld [vmem:[%s6766_s20 + $0x120] sm:$0xff] }
 0x689   : > { %5635 = vst.msk [vmem:[%s6766_s20 + $0x78] sm:$0xff] %vm5619_vm1, %v5570_v21  ;;  %5634 = vst.msk [vmem:[%s6766_s20 + $0x70] sm:$0xff] %vm5619_vm1, %v5569_v32 }
 0x68a   : > { %v5324_v44 = vpop.xlane.xlu1 %5323  ;;  %v5319_v57 = vpop.xlane.xlu0 %5318 }
 0x68b   : > { %v5572_v16 = vmax.f32 %v5188_v13, %v5324_v44  ;;  %v5571_v12 = vmax.f32 %v5187_v1, %v5319_v57  ;;  %v5210_v44 = vld [vmem:[%s6766_s20 + $0x138] sm:$0xff]  ;;  %v5209_v57 = vld [vmem:[%s6766_s20 + $0x130] sm:$0xff] }
 0x68d   : > { %5637 = vst.msk [vmem:[%s6766_s20 + $0x88] sm:$0xff] %vm5619_vm1, %v5572_v16  ;;  %5636 = vst.msk [vmem:[%s6766_s20 + $0x80] sm:$0xff] %vm5619_vm1, %v5571_v12 }
 0x68e   : > { %v5334_v59 = vpop.xlane.xlu1 %5333  ;;  %v5329_v11 = vpop.xlane.xlu0 %5328 }
 0x68f   : > { %v5574_v20 = vmax.f32 %v5190_v36, %v5334_v59  ;;  %v5573_v42 = vmax.f32 %v5189_v22, %v5329_v11  ;;  %v5212_v59 = vld [vmem:[%s6766_s20 + $0x148] sm:$0xff]  ;;  %v5211_v11 = vld [vmem:[%s6766_s20 + $0x140] sm:$0xff] }
 0x691   : > { %5639 = vst.msk [vmem:[%s6766_s20 + $0x98] sm:$0xff] %vm5619_vm1, %v5574_v20  ;;  %5638 = vst.msk [vmem:[%s6766_s20 + $0x90] sm:$0xff] %vm5619_vm1, %v5573_v42 }
 0x692   : > { %v5344_v60 = vpop.xlane.xlu1 %5343  ;;  %v5339_v23 = vpop.xlane.xlu0 %5338 }
 0x693   : > { %v5576_v17 = vmax.f32 %v5192_v6, %v5344_v60  ;;  %v5575_v26 = vmax.f32 %v5191_v30, %v5339_v23  ;;  %v5214_v60 = vld [vmem:[%s6766_s20 + $0x158] sm:$0xff]  ;;  %v5213_v23 = vld [vmem:[%s6766_s20 + $0x150] sm:$0xff] }
 0x695   : > { %5641 = vst.msk [vmem:[%s6766_s20 + $0xa8] sm:$0xff] %vm5619_vm1, %v5576_v17  ;;  %5640 = vst.msk [vmem:[%s6766_s20 + $0xa0] sm:$0xff] %vm5619_vm1, %v5575_v26 }
 0x696   : > { %v5354_v8 = vpop.xlane.xlu1 %5353  ;;  %v5349_v28 = vpop.xlane.xlu0 %5348 }
 0x697   : > { %v5578_v62 = vmax.f32 %v5194_v9, %v5354_v8  ;;  %v5577_v63 = vmax.f32 %v5193_v33, %v5349_v28  ;;  %v5216_v8 = vld [vmem:[%s6766_s20 + $0x168] sm:$0xff]  ;;  %v5215_v28 = vld [vmem:[%s6766_s20 + $0x160] sm:$0xff] }
 0x699   : > { %5643 = vst.msk [vmem:[%s6766_s20 + $0xb8] sm:$0xff] %vm5619_vm1, %v5578_v62  ;;  %5642 = vst.msk [vmem:[%s6766_s20 + $0xb0] sm:$0xff] %vm5619_vm1, %v5577_v63 }
 0x69a   : > { %v5364_v48 = vpop.xlane.xlu1 %5363  ;;  %v5359_v10 = vpop.xlane.xlu0 %5358 }
 0x69b   : > { %v5580_v5 = vmax.f32 %v5196_v38, %v5364_v48  ;;  %v5579_v46 = vmax.f32 %v5195_v19, %v5359_v10  ;;  %v5218_v48 = vld [vmem:[%s6766_s20 + $0x178] sm:$0xff]  ;;  %v5217_v10 = vld [vmem:[%s6766_s20 + $0x170] sm:$0xff] }
 0x69d   : > { %5645 = vst.msk [vmem:[%s6766_s20 + $0xc8] sm:$0xff] %vm5619_vm1, %v5580_v5  ;;  %5644 = vst.msk [vmem:[%s6766_s20 + $0xc0] sm:$0xff] %vm5619_vm1, %v5579_v46 }
 0x69e   : > { %v5374_v35 = vpop.xlane.xlu1 %5373  ;;  %v5369_v50 = vpop.xlane.xlu0 %5368 }
 0x69f   : > { %v5582_v7 = vmax.f32 %v5198_v25, %v5374_v35  ;;  %v5581_v55 = vmax.f32 %v5197_v3, %v5369_v50  ;;  %v5220_v35 = vld [vmem:[%s6766_s20 + $0x188] sm:$0xff]  ;;  %v5219_v50 = vld [vmem:[%s6766_s20 + $0x180] sm:$0xff] }
 0x6a1   : > { %5647 = vst.msk [vmem:[%s6766_s20 + $0xd8] sm:$0xff] %vm5619_vm1, %v5582_v7  ;;  %5646 = vst.msk [vmem:[%s6766_s20 + $0xd0] sm:$0xff] %vm5619_vm1, %v5581_v55 }
 0x6a2   : > { %v5384_v49 = vpop.xlane.xlu1 %5383  ;;  %v5379_v31 = vpop.xlane.xlu0 %5378 }
 0x6a3   : > { %v5584_v2 = vmax.f32 %v5200_v53, %v5384_v49  ;;  %v5583_v18 = vmax.f32 %v5199_v39, %v5379_v31  ;;  %v5222_v49 = vld [vmem:[%s6766_s20 + $0x198] sm:$0xff]  ;;  %v5221_v31 = vld [vmem:[%s6766_s20 + $0x190] sm:$0xff] }
 0x6a5   : > { %5649 = vst.msk [vmem:[%s6766_s20 + $0xe8] sm:$0xff] %vm5619_vm1, %v5584_v2  ;;  %5648 = vst.msk [vmem:[%s6766_s20 + $0xe0] sm:$0xff] %vm5619_vm1, %v5583_v18 }
 0x6a6   : > { %v5394_v24 = vpop.xlane.xlu1 %5393  ;;  %v5389_v37 = vpop.xlane.xlu0 %5388 }
 0x6a7   : > { %v5586_v47 = vmax.f32 %v5202_v14, %v5394_v24  ;;  %v5585_v15 = vmax.f32 %v5201_v52, %v5389_v37  ;;  %v5224_v24 = vld [vmem:[%s6766_s20 + $0x1a8] sm:$0xff]  ;;  %v5223_v37 = vld [vmem:[%s6766_s20 + $0x1a0] sm:$0xff] }
 0x6a9   : > { %5651 = vst.msk [vmem:[%s6766_s20 + $0xf8] sm:$0xff] %vm5619_vm1, %v5586_v47  ;;  %5650 = vst.msk [vmem:[%s6766_s20 + $0xf0] sm:$0xff] %vm5619_vm1, %v5585_v15 }
 0x6aa   : > { %v5404_v4 = vpop.xlane.xlu1 %5403  ;;  %v5399_v41 = vpop.xlane.xlu0 %5398 }
 0x6ab   : > { %v5588_v56 = vmax.f32 %v5204_v34, %v5404_v4  ;;  %v5587_v54 = vmax.f32 %v5203_v61, %v5399_v41  ;;  %v5226_v4 = vld [vmem:[%s6766_s20 + $0x1b8] sm:$0xff]  ;;  %v5225_v41 = vld [vmem:[%s6766_s20 + $0x1b0] sm:$0xff] }
 0x6ad   : > { %5653 = vst.msk [vmem:[%s6766_s20 + $0x108] sm:$0xff] %vm5619_vm1, %v5588_v56  ;;  %5652 = vst.msk [vmem:[%s6766_s20 + $0x100] sm:$0xff] %vm5619_vm1, %v5587_v54 }
 0x6ae   : > { %v5414_v29 = vpop.xlane.xlu1 %5413  ;;  %v5409_v0 = vpop.xlane.xlu0 %5408 }
 0x6af   : > { %v5590_v51 = vmax.f32 %v5206_v45, %v5414_v29  ;;  %v5589_v58 = vmax.f32 %v5205_v40, %v5409_v0  ;;  %v5228_v29 = vld [vmem:[%s6766_s20 + $0x1c8] sm:$0xff]  ;;  %v5227_v0 = vld [vmem:[%s6766_s20 + $0x1c0] sm:$0xff] }
 0x6b1   : > { %5655 = vst.msk [vmem:[%s6766_s20 + $0x118] sm:$0xff] %vm5619_vm1, %v5590_v51  ;;  %5654 = vst.msk [vmem:[%s6766_s20 + $0x110] sm:$0xff] %vm5619_vm1, %v5589_v58 }
 0x6b2   : > { %v5424_v21 = vpop.xlane.xlu1 %5423  ;;  %v5419_v32 = vpop.xlane.xlu0 %5418 }
 0x6b3   : > { %v5592_v13 = vmax.f32 %v5208_v27, %v5424_v21  ;;  %v5591_v1 = vmax.f32 %v5207_v43, %v5419_v32  ;;  %v5230_v21 = vld [vmem:[%s6766_s20 + $0x1d8] sm:$0xff]  ;;  %v5229_v32 = vld [vmem:[%s6766_s20 + $0x1d0] sm:$0xff] }
 0x6b5   : > { %5657 = vst.msk [vmem:[%s6766_s20 + $0x128] sm:$0xff] %vm5619_vm1, %v5592_v13  ;;  %5656 = vst.msk [vmem:[%s6766_s20 + $0x120] sm:$0xff] %vm5619_vm1, %v5591_v1 }
 0x6b6   : > { %v5434_v16 = vpop.xlane.xlu1 %5433  ;;  %v5429_v12 = vpop.xlane.xlu0 %5428 }
 0x6b7   : > { %v5594_v36 = vmax.f32 %v5210_v44, %v5434_v16  ;;  %v5593_v22 = vmax.f32 %v5209_v57, %v5429_v12  ;;  %v5232_v16 = vld [vmem:[%s6766_s20 + $0x1e8] sm:$0xff]  ;;  %v5231_v12 = vld [vmem:[%s6766_s20 + $0x1e0] sm:$0xff] }
 0x6b9   : > { %5659 = vst.msk [vmem:[%s6766_s20 + $0x138] sm:$0xff] %vm5619_vm1, %v5594_v36  ;;  %5658 = vst.msk [vmem:[%s6766_s20 + $0x130] sm:$0xff] %vm5619_vm1, %v5593_v22 }
 0x6ba   : > { %v5444_v20 = vpop.xlane.xlu1 %5443  ;;  %v5439_v42 = vpop.xlane.xlu0 %5438 }
 0x6bb   : > { %v5596_v6 = vmax.f32 %v5212_v59, %v5444_v20  ;;  %v5595_v30 = vmax.f32 %v5211_v11, %v5439_v42  ;;  %v5234_v20 = vld [vmem:[%s6766_s20 + $0x1f8] sm:$0xff]  ;;  %v5233_v42 = vld [vmem:[%s6766_s20 + $0x1f0] sm:$0xff] }
 0x6bd   : > { %5661 = vst.msk [vmem:[%s6766_s20 + $0x148] sm:$0xff] %vm5619_vm1, %v5596_v6  ;;  %5660 = vst.msk [vmem:[%s6766_s20 + $0x140] sm:$0xff] %vm5619_vm1, %v5595_v30 }
 0x6be   : > { %v5454_v17 = vpop.xlane.xlu1 %5453  ;;  %v5449_v26 = vpop.xlane.xlu0 %5448 }
 0x6bf   : > { %v5598_v9 = vmax.f32 %v5214_v60, %v5454_v17  ;;  %v5597_v33 = vmax.f32 %v5213_v23, %v5449_v26 }
 0x6c1   : > { %5663 = vst.msk [vmem:[%s6766_s20 + $0x158] sm:$0xff] %vm5619_vm1, %v5598_v9  ;;  %5662 = vst.msk [vmem:[%s6766_s20 + $0x150] sm:$0xff] %vm5619_vm1, %v5597_v33 }
 0x6c2   : > { %v5464_v62 = vpop.xlane.xlu1 %5463  ;;  %v5459_v63 = vpop.xlane.xlu0 %5458 }
 0x6c3   : > { %v5600_v38 = vmax.f32 %v5216_v8, %v5464_v62  ;;  %v5599_v19 = vmax.f32 %v5215_v28, %v5459_v63 }
 0x6c5   : > { %5665 = vst.msk [vmem:[%s6766_s20 + $0x168] sm:$0xff] %vm5619_vm1, %v5600_v38  ;;  %5664 = vst.msk [vmem:[%s6766_s20 + $0x160] sm:$0xff] %vm5619_vm1, %v5599_v19 }
 0x6c6   : > { %v5474_v5 = vpop.xlane.xlu1 %5473  ;;  %v5469_v46 = vpop.xlane.xlu0 %5468 }
 0x6c7   : > { %v5602_v25 = vmax.f32 %v5218_v48, %v5474_v5  ;;  %v5601_v3 = vmax.f32 %v5217_v10, %v5469_v46 }
 0x6c9   : > { %5667 = vst.msk [vmem:[%s6766_s20 + $0x178] sm:$0xff] %vm5619_vm1, %v5602_v25  ;;  %5666 = vst.msk [vmem:[%s6766_s20 + $0x170] sm:$0xff] %vm5619_vm1, %v5601_v3 }
 0x6ca   : > { %v5484_v7 = vpop.xlane.xlu1 %5483  ;;  %v5479_v55 = vpop.xlane.xlu0 %5478 }
 0x6cb   : > { %v5604_v53 = vmax.f32 %v5220_v35, %v5484_v7  ;;  %v5603_v39 = vmax.f32 %v5219_v50, %v5479_v55 }
 0x6cd   : > { %5669 = vst.msk [vmem:[%s6766_s20 + $0x188] sm:$0xff] %vm5619_vm1, %v5604_v53  ;;  %5668 = vst.msk [vmem:[%s6766_s20 + $0x180] sm:$0xff] %vm5619_vm1, %v5603_v39 }
 0x6ce   : > { %v5494_v2 = vpop.xlane.xlu1 %5493  ;;  %v5489_v18 = vpop.xlane.xlu0 %5488 }
 0x6cf   : > { %v5606_v14 = vmax.f32 %v5222_v49, %v5494_v2  ;;  %v5605_v52 = vmax.f32 %v5221_v31, %v5489_v18 }
 0x6d1   : > { %5671 = vst.msk [vmem:[%s6766_s20 + $0x198] sm:$0xff] %vm5619_vm1, %v5606_v14  ;;  %5670 = vst.msk [vmem:[%s6766_s20 + $0x190] sm:$0xff] %vm5619_vm1, %v5605_v52 }
 0x6d2   : > { %v5504_v47 = vpop.xlane.xlu1 %5503  ;;  %v5499_v15 = vpop.xlane.xlu0 %5498 }
 0x6d3   : > { %v5608_v34 = vmax.f32 %v5224_v24, %v5504_v47  ;;  %v5607_v61 = vmax.f32 %v5223_v37, %v5499_v15 }
 0x6d5   : > { %5673 = vst.msk [vmem:[%s6766_s20 + $0x1a8] sm:$0xff] %vm5619_vm1, %v5608_v34  ;;  %5672 = vst.msk [vmem:[%s6766_s20 + $0x1a0] sm:$0xff] %vm5619_vm1, %v5607_v61 }
 0x6d6   : > { %v5514_v56 = vpop.xlane.xlu1 %5513  ;;  %v5509_v54 = vpop.xlane.xlu0 %5508 }
 0x6d7   : > { %v5610_v45 = vmax.f32 %v5226_v4, %v5514_v56  ;;  %v5609_v40 = vmax.f32 %v5225_v41, %v5509_v54 }
 0x6d9   : > { %5675 = vst.msk [vmem:[%s6766_s20 + $0x1b8] sm:$0xff] %vm5619_vm1, %v5610_v45  ;;  %5674 = vst.msk [vmem:[%s6766_s20 + $0x1b0] sm:$0xff] %vm5619_vm1, %v5609_v40 }
 0x6da   : > { %v5524_v51 = vpop.xlane.xlu1 %5523  ;;  %v5519_v58 = vpop.xlane.xlu0 %5518 }
 0x6db   : > { %v5612_v27 = vmax.f32 %v5228_v29, %v5524_v51  ;;  %v5611_v43 = vmax.f32 %v5227_v0, %v5519_v58 }
 0x6dd   : > { %5677 = vst.msk [vmem:[%s6766_s20 + $0x1c8] sm:$0xff] %vm5619_vm1, %v5612_v27  ;;  %5676 = vst.msk [vmem:[%s6766_s20 + $0x1c0] sm:$0xff] %vm5619_vm1, %v5611_v43 }
 0x6de   : > { %v5534_v13 = vpop.xlane.xlu1 %5533  ;;  %v5529_v1 = vpop.xlane.xlu0 %5528 }
 0x6df   : > { %v5614_v44 = vmax.f32 %v5230_v21, %v5534_v13  ;;  %v5613_v57 = vmax.f32 %v5229_v32, %v5529_v1 }
 0x6e1   : > { %5679 = vst.msk [vmem:[%s6766_s20 + $0x1d8] sm:$0xff] %vm5619_vm1, %v5614_v44  ;;  %5678 = vst.msk [vmem:[%s6766_s20 + $0x1d0] sm:$0xff] %vm5619_vm1, %v5613_v57 }
 0x6e2   : > { %v5544_v36 = vpop.xlane.xlu1 %5543  ;;  %v5539_v22 = vpop.xlane.xlu0 %5538 }
 0x6e3   : > { %v5616_v59 = vmax.f32 %v5232_v16, %v5544_v36  ;;  %v5615_v11 = vmax.f32 %v5231_v12, %v5539_v22 }
 0x6e5   : > { %5681 = vst.msk [vmem:[%s6766_s20 + $0x1e8] sm:$0xff] %vm5619_vm1, %v5616_v59  ;;  %5680 = vst.msk [vmem:[%s6766_s20 + $0x1e0] sm:$0xff] %vm5619_vm1, %v5615_v11 }
 0x6e6   : > { %v5554_v6 = vpop.xlane.xlu1 %5553  ;;  %v5549_v30 = vpop.xlane.xlu0 %5548 }
 0x6e7   : > { %v5618_v60 = vmax.f32 %v5234_v20, %v5554_v6  ;;  %v5617_v23 = vmax.f32 %v5233_v42, %v5549_v30 }
 0x6e9   : > { %5683 = vst.msk [vmem:[%s6766_s20 + $0x1f8] sm:$0xff] %vm5619_vm1, %v5618_v60  ;;  %5682 = vst.msk [vmem:[%s6766_s20 + $0x1f0] sm:$0xff] %vm5619_vm1, %v5617_v23 }
 0x6ea PF: > { %s11426_s18 = sld [smem:[#allocation5_spill]]  ;;  %p6220_p6 = scmp.ge.s32.totalorder %s6572_s22, 2 }
 0x6ec   : > { %p6217_p5 = pnand %p6220_p6, %p6707_p8 }
 0x6ee   : > { %p6218_p7 = pneg %p6217_p5 }
 0x6f0   : > { %s5729_s26 = sand.u32 1, %s11426_s18  }
 0x6f1   : > { %s5730_s17 = scalar_lea.sflag [#allocation3], %s5729_s26 }
 0x6f2   : > { %6531 = dma.done.wait (%p6218_p7), %s5730_s17, 16384  }
 0x6f3   : > { %6533 = vsyncadd (%p6218_p7), %s5730_s17, 4294950912  ;;  %s24_s22 = sadd.s32 1, %s6572_s22   ;;  %s11428_s13 = sld [smem:[#allocation6_spill]] }
 0x6f4   : > { %p21_p9 = scmp.ge.s32.totalorder %s24_s22, 10   ;;  %s11429_s17 = sld [smem:[#allocation7_spill]] }
 0x6f5   : > { %s11430_s18 = sld [smem:[#allocation8_spill]]  ;;  %s11434_s14 = smov %s6544_s15 }
 0x6f6   : > { %s11431_s20 = sld [smem:[#allocation9_spill]]  ;;  %s11435_s15 = smov %s6722_s29 }
 0x6f7   : > { %s11432_s21 = sld [smem:[#allocation10_spill]]  ;;  %s11436_s16 = smov %s6560_s19 }
 0x6f8   : > { %s11433_s30 = sld [smem:[#allocation13_spill]] }
 0x6fa   :  { %23 = sbr.rel (!%p21_p9) target bundleno = 9 (0x9), region = 107 }
 0x6fc   : > { %s11437_s19 = smov %s11431_s20 }
 0x6fd   : > { %s11438_s20 = smov %s11432_s21 }
 0x6fe   : > { %s11439_s21 = smov %s11433_s30 }
 0x6ff   :  { %5747 = vsyncpa [#allocation3], 1 }
 0x700   :  { %5749 = vsyncpa [#allocation3 + $0x1], 1 }

</bundles_post_ra>
